<compile_context>
chip_gen: v5e
topology: v5e:2x2
jax: 0.10.0
libtpu: 0.0.40
codegen_flags: <defaults>
</compile_context>

<pallas_src>
import functools

import numpy as np
import jax
import jax.numpy as jnp
from jax.experimental import pallas as pl
from jax.experimental.pallas import tpu as pltpu

NEG_SLOPE = 0.2
K = 4
STRIDE = 2
PAD = 2
BN_EPS = 1e-5


def _round_up(x, m):
    return (x + m - 1) // m * m


def _conv_out(n):
    return (n + 2 * PAD - K) // STRIDE + 1


# ---------------------------------------------------------------------------
# Fused Pallas kernel: whole TurbNetD forward on VMEM-resident tiles.
# Activations are flattened (rows = N*Ho*Wo padded to 16, cols = 128).
# conv_l (l>=1):  sum_p (S_{l,p} @ act) @ W_{l,p} + b_l
# where S_{l,p} is a constant 0/1 selection matrix implementing the strided
# window gather (all-zero rows encode the conv zero padding).
# ---------------------------------------------------------------------------
def _fused_turbnetd_kernel(
        p0_ref, w0_ref, b0_ref,
        s1_ref, w1_ref, b1_ref, g1_ref, be1_ref,
        s2_ref, w2_ref, b2_ref, g2_ref, be2_ref,
        s3_ref, w3_ref, b3_ref, g3_ref, be3_ref,
        s4_ref, w4_ref, b4_ref,
        o_ref, *, m_real):

    def leaky(x):
        return jnp.where(x > 0, x, NEG_SLOPE * x)      # F.leaky_relu(., 0.2)

    def conv(act_bf16, s_ref, w_ref, b_ref):
        acc = jnp.zeros((s_ref.shape[1], w_ref.shape[2]), jnp.float32)
        for p in range(K * K):
            # (m_out, m_in) @ (m_in, C): exact 0/1 row gather on the MXU.
            patches = jnp.dot(s_ref[p], act_bf16,
                              preferred_element_type=jnp.float32)
            acc = acc + jnp.dot(patches.astype(jnp.bfloat16), w_ref[p],
                                preferred_element_type=jnp.float32)
        return acc + b_ref[...]                         # conv bias (f32)

    def bn_leaky(x, g_ref, be_ref, bias_ref, m):
        # Training-mode BatchNorm2d batch stats over the m real rows.  The
        # (rows - m) alignment-padding rows of x are exactly `bias` (zero
        # patches @ W + bias); subtract their contribution analytically.
        n_pad = x.shape[0] - m
        s = jnp.sum(x, axis=0, keepdims=True)
        sq = jnp.sum(x * x, axis=0, keepdims=True)
        if n_pad:
            bias = bias_ref[...]
            s = s - float(n_pad) * bias
            sq = sq - float(n_pad) * bias * bias
        mean = s * (1.0 / m)
        var = jnp.maximum(sq * (1.0 / m) - mean * mean, 0.0)  # biased variance
        a = g_ref[...] * jax.lax.rsqrt(var + BN_EPS)
        b = be_ref[...] - mean * a
        return leaky(x * a + b)

    m1, m2, m3 = m_real

    # c0 + leaky (no BN on layer 0); p0 is the host-side im2col of the input.
    h0 = jnp.dot(p0_ref[...], w0_ref[...],
                 preferred_element_type=jnp.float32) + b0_ref[...]
    a0 = leaky(h0).astype(jnp.bfloat16)

    a1 = bn_leaky(conv(a0, s1_ref, w1_ref, b1_ref),
                  g1_ref, be1_ref, b1_ref, m1).astype(jnp.bfloat16)
    a2 = bn_leaky(conv(a1, s2_ref, w2_ref, b2_ref),
                  g2_ref, be2_ref, b2_ref, m2).astype(jnp.bfloat16)
    a3 = bn_leaky(conv(a2, s3_ref, w3_ref, b3_ref),
                  g3_ref, be3_ref, b3_ref, m3).astype(jnp.bfloat16)

    h4 = conv(a3, s4_ref, w4_ref, b4_ref)
    o_ref[...] = 1.0 / (1.0 + jnp.exp(-h4))             # F.sigmoid (f32)


# ---------------------------------------------------------------------------
# Host-side helpers (one-time prep + tiny per-call input im2col)
# ---------------------------------------------------------------------------
def _im2col(x):
    """x: (N,H,W,C) -> (N*Ho*Wo, K*K*C); zero border from the conv padding."""
    n, h, w, c = x.shape
    ho, wo = _conv_out(h), _conv_out(w)
    xp = jnp.pad(x, ((0, 0), (PAD, PAD), (PAD, PAD), (0, 0)))
    cols = []
    for di in range(K):
        for dj in range(K):
            cols.append(xp[:,
                           di:di + STRIDE * (ho - 1) + 1:STRIDE,
                           dj:dj + STRIDE * (wo - 1) + 1:STRIDE, :])
    patches = jnp.stack(cols, axis=3)                    # (N,Ho,Wo,K*K,C)
    return patches.reshape(n * ho * wo, K * K * c), (n, ho, wo)


def _make_selection(n, h_in, w_in, m_in_pad, m_out_pad):
    """Constant 0/1 selection matrices S[p]: (m_out_pad, m_in_pad) per kernel
    position; all-zero rows/cols encode conv zero padding and row alignment."""
    h_out, w_out = _conv_out(h_in), _conv_out(w_in)
    s = np.zeros((K * K, m_out_pad, m_in_pad), np.float32)
    for p in range(K * K):
        di, dj = p // K, p % K
        for b in range(n):
            for oh in range(h_out):
                ih = oh * STRIDE + di - PAD
                if ih < 0 or ih >= h_in:
                    continue
                for ow in range(w_out):
                    iw = ow * STRIDE + dj - PAD
                    if iw < 0 or iw >= w_in:
                        continue
                    s[p,
                      b * h_out * w_out + oh * w_out + ow,
                      b * h_in * w_in + ih * w_in + iw] = 1.0
    return jnp.asarray(s, jnp.bfloat16)


def prepare_params(params, n, h, w):
    """One-time prep: pad/transpose/bf16-cast weights, pad BN params, build
    the constant selection matrices for the fused kernel."""
    P = {"n": n}
    hs, ws = [h], [w]
    for _ in range(5):
        hs.append(_conv_out(hs[-1]))
        ws.append(_conv_out(ws[-1]))
    m_real = [n * hs[i + 1] * ws[i + 1] for i in range(5)]
    m_pad = [_round_up(m, 16) for m in m_real]           # bf16 sublane packing
    P["m_real"], P["m_pad"] = tuple(m_real), tuple(m_pad)
    P["out_hw"] = (hs[5], ws[5])

    # Layer 0: weights in im2col layout (K*K*cin_pad, 128).
    w0, b0 = params["w0"], params["b0"]
    cout0, cin0 = w0.shape[0], w0.shape[1]
    cpad0 = _round_up(cin0, 8)
    np0 = _round_up(cout0, 128)
    wt = jnp.transpose(w0, (2, 3, 1, 0))                 # (kh, kw, cin, cout)
    wt = jnp.pad(wt, ((0, 0), (0, 0), (0, cpad0 - cin0), (0, np0 - cout0)))
    P["cpad0"] = cpad0
    P["w0"] = wt.reshape(K * K * cpad0, np0).astype(jnp.bfloat16)
    P["b0"] = jnp.pad(b0, (0, np0 - cout0)).reshape(1, np0).astype(jnp.float32)

    # Layers 1..4: per-position weights (K*K, prev lane width, np) + selection.
    for i in range(1, 5):
        wi, bi = params[f"w{i}"], params[f"b{i}"]
        cout, cin = wi.shape[0], wi.shape[1]
        cin_pad = _round_up(cin, 128)                    # prev layer lane width
        npi = _round_up(cout, 128)
        wt = jnp.transpose(wi, (2, 3, 1, 0))
        wt = jnp.pad(wt, ((0, 0), (0, 0), (0, cin_pad - cin), (0, npi - cout)))
        P[f"w{i}"] = wt.reshape(K * K, cin_pad, npi).astype(jnp.bfloat16)
        P[f"b{i}"] = jnp.pad(bi, (0, npi - cout)).reshape(1, npi).astype(jnp.float32)
        P[f"s{i}"] = _make_selection(n, hs[i], ws[i], m_pad[i - 1], m_pad[i])

    # BN affine params, zero-padded so padded channels stay exactly 0.
    for j in (1, 2, 3):
        c = params[f"g{j}"].shape[0]
        npj = _round_up(c, 128)
        P[f"g{j}"] = jnp.pad(params[f"g{j}"], (0, npj - c)).reshape(1, npj).astype(jnp.float32)
        P[f"be{j}"] = jnp.pad(params[f"be{j}"], (0, npj - c)).reshape(1, npj).astype(jnp.float32)
    return P


def _full_block_spec(arr):
    nd = arr.ndim
    return pl.BlockSpec(arr.shape, lambda i, _nd=nd: (0,) * _nd)


# ---------------------------------------------------------------------------
# TurbNetD forward
# ---------------------------------------------------------------------------
def turbnet_d_forward(P, x1, x2):
    x = jnp.concatenate([x1, x2], axis=1)                     # NCHW concat
    h = jnp.transpose(x, (0, 2, 3, 1)).astype(jnp.float32)    # -> NHWC

    cin = h.shape[-1]
    if P["cpad0"] != cin:
        h = jnp.pad(h, ((0, 0), (0, 0), (0, 0), (0, P["cpad0"] - cin)))
    patches0, _ = _im2col(h.astype(jnp.bfloat16))              # tiny, once/call
    m0, mp0 = P["m_real"][0], P["m_pad"][0]
    if mp0 != m0:
        patches0 = jnp.pad(patches0, ((0, mp0 - m0), (0, 0)))

    args = [patches0, P["w0"], P["b0"]]
    for l in (1, 2, 3):
        args += [P[f"s{l}"], P[f"w{l}"], P[f"b{l}"], P[f"g{l}"], P[f"be{l}"]]
    args += [P["s4"], P["w4"], P["b4"]]

    mp4, np4 = P["m_pad"][4], P["b4"].shape[1]
    kernel = functools.partial(
        _fused_turbnetd_kernel,
        m_real=(P["m_real"][1], P["m_real"][2], P["m_real"][3]))

    out_flat = pl.pallas_call(
        kernel,
        out_shape=jax.ShapeDtypeStruct((mp4, np4), jnp.float32),
        grid=(1,),
        in_specs=[_full_block_spec(a) for a in args],
        out_specs=pl.BlockSpec((mp4, np4), lambda i: (0, 0)),
        compiler_params=pltpu.CompilerParams(
            dimension_semantics=("arbitrary",),
            vmem_limit_bytes=32 * 1024 * 1024),
    )(*args)

    ho, wo = P["out_hw"]
    out = out_flat[:P["m_real"][4], :1].reshape(P["n"], ho, wo, 1)
    return jnp.transpose(out, (0, 3, 1, 2))                   # back to NCHW


# ---------------------------------------------------------------------------
# Deterministic synthetic parameters
# ---------------------------------------------------------------------------
def init_params(key, in1, in2, ch):
    keys = jax.random.split(key, 16)
    cins = [in1 + in2, ch, ch * 2, ch * 4, ch * 8]
    couts = [ch, ch * 2, ch * 4, ch * 8, 1]
    p = {}
    for i, (ci, co) in enumerate(zip(cins, couts)):
        p[f"w{i}"] = 0.1 * jax.random.normal(keys[2 * i], (co, ci, K, K), jnp.float32)
        p[f"b{i}"] = 0.01 * jax.random.normal(keys[2 * i + 1], (co,), jnp.float32)
    bkeys = jax.random.split(keys[-1], 6)
    for j, c in enumerate([ch * 2, ch * 4, ch * 8], start=1):
        p[f"g{j}"] = 1.0 + 0.05 * jax.random.normal(bkeys[2 * (j - 1)], (c,), jnp.float32)
        p[f"be{j}"] = 0.05 * jax.random.normal(bkeys[2 * (j - 1) + 1], (c,), jnp.float32)
    return p


if __name__ == "__main__":
    key = jax.random.PRNGKey(0)
    k_p, k_x1, k_x2 = jax.random.split(key, 3)

    in_channels1, in_channels2, ch = 2, 2, 16    # small ch instead of 64
    n, hgt, wid = 2, 16, 16

    params = init_params(k_p, in_channels1, in_channels2, ch)
    prepped = prepare_params(params, n, hgt, wid)    # one-time, outside forward

    x1 = jax.random.normal(k_x1, (n, in_channels1, hgt, wid), jnp.float32)
    x2 = jax.random.normal(k_x2, (n, in_channels2, hgt, wid), jnp.float32)

    fwd = jax.jit(functools.partial(turbnet_d_forward, prepped))
    out = jax.block_until_ready(fwd(x1, x2))

    # H: 16 -> 9 -> 5 -> 3 -> 2 -> 2
    assert out.shape == (n, 1, 2, 2), out.shape
    assert bool(jnp.all(jnp.isfinite(out)))
    assert bool(jnp.all((out >= 0.0) & (out <= 1.0)))   # sigmoid range
    print("KERNEL_OK")
</pallas_src>

<mosaic_0001>
module attributes {stable_mosaic.version = 11 : i64} {
  func.func @_fused_turbnetd_kernel(%arg0: i32, %arg1: memref<176x128xbf16, #tpu.memory_space<vmem>>, %arg2: memref<128x128xbf16, #tpu.memory_space<vmem>>, %arg3: memref<1x128xf32, #tpu.memory_space<vmem>>, %arg4: memref<16x64x176xbf16, #tpu.memory_space<vmem>>, %arg5: memref<16x128x128xbf16, #tpu.memory_space<vmem>>, %arg6: memref<1x128xf32, #tpu.memory_space<vmem>>, %arg7: memref<1x128xf32, #tpu.memory_space<vmem>>, %arg8: memref<1x128xf32, #tpu.memory_space<vmem>>, %arg9: memref<16x32x64xbf16, #tpu.memory_space<vmem>>, %arg10: memref<16x128x128xbf16, #tpu.memory_space<vmem>>, %arg11: memref<1x128xf32, #tpu.memory_space<vmem>>, %arg12: memref<1x128xf32, #tpu.memory_space<vmem>>, %arg13: memref<1x128xf32, #tpu.memory_space<vmem>>, %arg14: memref<16x16x32xbf16, #tpu.memory_space<vmem>>, %arg15: memref<16x128x128xbf16, #tpu.memory_space<vmem>>, %arg16: memref<1x128xf32, #tpu.memory_space<vmem>>, %arg17: memref<1x128xf32, #tpu.memory_space<vmem>>, %arg18: memref<1x128xf32, #tpu.memory_space<vmem>>, %arg19: memref<16x16x16xbf16, #tpu.memory_space<vmem>>, %arg20: memref<16x128x128xbf16, #tpu.memory_space<vmem>>, %arg21: memref<1x128xf32, #tpu.memory_space<vmem>>, %arg22: memref<16x128xf32, #tpu.memory_space<vmem>>) attributes {dimension_semantics = [#tpu.dimension_semantics<arbitrary>], iteration_bounds = array<i64: 1>, scalar_prefetch = 0 : i64, scratch_operands = 0 : i64, tpu.core_type = #tpu.core_type<tc>, window_params = [{pipeline_mode = #tpu.pipeline_mode<synchronous>, transform_indices = @transform_0, window_bounds = array<i64: 176, 128>}, {pipeline_mode = #tpu.pipeline_mode<synchronous>, transform_indices = @transform_1, window_bounds = array<i64: 128, 128>}, {pipeline_mode = #tpu.pipeline_mode<synchronous>, transform_indices = @transform_2, window_bounds = array<i64: 1, 128>}, {pipeline_mode = #tpu.pipeline_mode<synchronous>, transform_indices = @transform_3, window_bounds = array<i64: 16, 64, 176>}, {pipeline_mode = #tpu.pipeline_mode<synchronous>, transform_indices = @transform_4, window_bounds = array<i64: 16, 128, 128>}, {pipeline_mode = #tpu.pipeline_mode<synchronous>, transform_indices = @transform_5, window_bounds = array<i64: 1, 128>}, {pipeline_mode = #tpu.pipeline_mode<synchronous>, transform_indices = @transform_6, window_bounds = array<i64: 1, 128>}, {pipeline_mode = #tpu.pipeline_mode<synchronous>, transform_indices = @transform_7, window_bounds = array<i64: 1, 128>}, {pipeline_mode = #tpu.pipeline_mode<synchronous>, transform_indices = @transform_8, window_bounds = array<i64: 16, 32, 64>}, {pipeline_mode = #tpu.pipeline_mode<synchronous>, transform_indices = @transform_9, window_bounds = array<i64: 16, 128, 128>}, {pipeline_mode = #tpu.pipeline_mode<synchronous>, transform_indices = @transform_10, window_bounds = array<i64: 1, 128>}, {pipeline_mode = #tpu.pipeline_mode<synchronous>, transform_indices = @transform_11, window_bounds = array<i64: 1, 128>}, {pipeline_mode = #tpu.pipeline_mode<synchronous>, transform_indices = @transform_12, window_bounds = array<i64: 1, 128>}, {pipeline_mode = #tpu.pipeline_mode<synchronous>, transform_indices = @transform_13, window_bounds = array<i64: 16, 16, 32>}, {pipeline_mode = #tpu.pipeline_mode<synchronous>, transform_indices = @transform_14, window_bounds = array<i64: 16, 128, 128>}, {pipeline_mode = #tpu.pipeline_mode<synchronous>, transform_indices = @transform_15, window_bounds = array<i64: 1, 128>}, {pipeline_mode = #tpu.pipeline_mode<synchronous>, transform_indices = @transform_16, window_bounds = array<i64: 1, 128>}, {pipeline_mode = #tpu.pipeline_mode<synchronous>, transform_indices = @transform_17, window_bounds = array<i64: 1, 128>}, {pipeline_mode = #tpu.pipeline_mode<synchronous>, transform_indices = @transform_18, window_bounds = array<i64: 16, 16, 16>}, {pipeline_mode = #tpu.pipeline_mode<synchronous>, transform_indices = @transform_19, window_bounds = array<i64: 16, 128, 128>}, {pipeline_mode = #tpu.pipeline_mode<synchronous>, transform_indices = @transform_20, window_bounds = array<i64: 1, 128>}, {pipeline_mode = #tpu.pipeline_mode<synchronous>, transform_indices = @transform_21, window_bounds = array<i64: 16, 128>}]} {
    %c0 = arith.constant 0 : index
    %c0_0 = arith.constant 0 : index
    %0 = vector.load %arg1[%c0, %c0_0] : memref<176x128xbf16, #tpu.memory_space<vmem>>, vector<176x128xbf16>
    %c0_1 = arith.constant 0 : index
    %c0_2 = arith.constant 0 : index
    %1 = vector.load %arg2[%c0_1, %c0_2] : memref<128x128xbf16, #tpu.memory_space<vmem>>, vector<128x128xbf16>
    %cst = arith.constant dense<0.000000e+00> : vector<176x128xf32>
    %2 = tpu.matmul %0, %1, %cst {dimension_numbers = #tpu.dot_dimension_numbers<[1], [0], [0], [1], [0, 0, 1, 1], [], []>} : vector<176x128xbf16>, vector<128x128xbf16>, vector<176x128xf32> -> vector<176x128xf32>
    %c0_3 = arith.constant 0 : index
    %c0_4 = arith.constant 0 : index
    %3 = vector.load %arg3[%c0_3, %c0_4] : memref<1x128xf32, #tpu.memory_space<vmem>>, vector<1x128xf32>
    %4 = vector.broadcast %3 : vector<1x128xf32> to vector<176x128xf32>
    %5 = arith.addf %2, %4 : vector<176x128xf32>
    %cst_5 = arith.constant 0.000000e+00 : f32
    %6 = vector.broadcast %cst_5 : f32 to vector<176x128xf32>
    %7 = arith.cmpf ogt, %5, %6 : vector<176x128xf32>
    %cst_6 = arith.constant 2.000000e-01 : f32
    %8 = vector.broadcast %cst_6 : f32 to vector<176x128xf32>
    %9 = arith.mulf %8, %5 : vector<176x128xf32>
    %10 = arith.select %7, %5, %9 : vector<176x128xi1>, vector<176x128xf32>
    %11 = arith.truncf %10 : vector<176x128xf32> to vector<176x128xbf16>
    %cst_7 = arith.constant 0.000000e+00 : f32
    %12 = vector.broadcast %cst_7 : f32 to vector<64x128xf32>
    %c0_8 = arith.constant 0 : index
    %c0_9 = arith.constant 0 : index
    %c0_10 = arith.constant 0 : index
    %13 = vector.load %arg4[%c0_8, %c0_9, %c0_10] : memref<16x64x176xbf16, #tpu.memory_space<vmem>>, vector<1x64x176xbf16>
    %14 = vector.shape_cast %13 : vector<1x64x176xbf16> to vector<64x176xbf16>
    %cst_11 = arith.constant dense<0.000000e+00> : vector<64x128xf32>
    %15 = tpu.matmul %14, %11, %cst_11 {dimension_numbers = #tpu.dot_dimension_numbers<[1], [0], [0], [1], [0, 0, 1, 1], [], []>} : vector<64x176xbf16>, vector<176x128xbf16>, vector<64x128xf32> -> vector<64x128xf32>
    %16 = arith.truncf %15 : vector<64x128xf32> to vector<64x128xbf16>
    %c0_12 = arith.constant 0 : index
    %c0_13 = arith.constant 0 : index
    %c0_14 = arith.constant 0 : index
    %17 = vector.load %arg5[%c0_12, %c0_13, %c0_14] : memref<16x128x128xbf16, #tpu.memory_space<vmem>>, vector<1x128x128xbf16>
    %18 = vector.shape_cast %17 : vector<1x128x128xbf16> to vector<128x128xbf16>
    %cst_15 = arith.constant dense<0.000000e+00> : vector<64x128xf32>
    %19 = tpu.matmul %16, %18, %cst_15 {dimension_numbers = #tpu.dot_dimension_numbers<[1], [0], [0], [1], [0, 0, 1, 1], [], []>} : vector<64x128xbf16>, vector<128x128xbf16>, vector<64x128xf32> -> vector<64x128xf32>
    %20 = arith.addf %12, %19 : vector<64x128xf32>
    %c1 = arith.constant 1 : index
    %c0_16 = arith.constant 0 : index
    %c0_17 = arith.constant 0 : index
    %21 = vector.load %arg4[%c1, %c0_16, %c0_17] : memref<16x64x176xbf16, #tpu.memory_space<vmem>>, vector<1x64x176xbf16>
    %22 = vector.shape_cast %21 : vector<1x64x176xbf16> to vector<64x176xbf16>
    %cst_18 = arith.constant dense<0.000000e+00> : vector<64x128xf32>
    %23 = tpu.matmul %22, %11, %cst_18 {dimension_numbers = #tpu.dot_dimension_numbers<[1], [0], [0], [1], [0, 0, 1, 1], [], []>} : vector<64x176xbf16>, vector<176x128xbf16>, vector<64x128xf32> -> vector<64x128xf32>
    %24 = arith.truncf %23 : vector<64x128xf32> to vector<64x128xbf16>
    %c1_19 = arith.constant 1 : index
    %c0_20 = arith.constant 0 : index
    %c0_21 = arith.constant 0 : index
    %25 = vector.load %arg5[%c1_19, %c0_20, %c0_21] : memref<16x128x128xbf16, #tpu.memory_space<vmem>>, vector<1x128x128xbf16>
    %26 = vector.shape_cast %25 : vector<1x128x128xbf16> to vector<128x128xbf16>
    %cst_22 = arith.constant dense<0.000000e+00> : vector<64x128xf32>
    %27 = tpu.matmul %24, %26, %cst_22 {dimension_numbers = #tpu.dot_dimension_numbers<[1], [0], [0], [1], [0, 0, 1, 1], [], []>} : vector<64x128xbf16>, vector<128x128xbf16>, vector<64x128xf32> -> vector<64x128xf32>
    %28 = arith.addf %20, %27 : vector<64x128xf32>
    %c2 = arith.constant 2 : index
    %c0_23 = arith.constant 0 : index
    %c0_24 = arith.constant 0 : index
    %29 = vector.load %arg4[%c2, %c0_23, %c0_24] : memref<16x64x176xbf16, #tpu.memory_space<vmem>>, vector<1x64x176xbf16>
    %30 = vector.shape_cast %29 : vector<1x64x176xbf16> to vector<64x176xbf16>
    %cst_25 = arith.constant dense<0.000000e+00> : vector<64x128xf32>
    %31 = tpu.matmul %30, %11, %cst_25 {dimension_numbers = #tpu.dot_dimension_numbers<[1], [0], [0], [1], [0, 0, 1, 1], [], []>} : vector<64x176xbf16>, vector<176x128xbf16>, vector<64x128xf32> -> vector<64x128xf32>
    %32 = arith.truncf %31 : vector<64x128xf32> to vector<64x128xbf16>
    %c2_26 = arith.constant 2 : index
    %c0_27 = arith.constant 0 : index
    %c0_28 = arith.constant 0 : index
    %33 = vector.load %arg5[%c2_26, %c0_27, %c0_28] : memref<16x128x128xbf16, #tpu.memory_space<vmem>>, vector<1x128x128xbf16>
    %34 = vector.shape_cast %33 : vector<1x128x128xbf16> to vector<128x128xbf16>
    %cst_29 = arith.constant dense<0.000000e+00> : vector<64x128xf32>
    %35 = tpu.matmul %32, %34, %cst_29 {dimension_numbers = #tpu.dot_dimension_numbers<[1], [0], [0], [1], [0, 0, 1, 1], [], []>} : vector<64x128xbf16>, vector<128x128xbf16>, vector<64x128xf32> -> vector<64x128xf32>
    %36 = arith.addf %28, %35 : vector<64x128xf32>
    %c3 = arith.constant 3 : index
    %c0_30 = arith.constant 0 : index
    %c0_31 = arith.constant 0 : index
    %37 = vector.load %arg4[%c3, %c0_30, %c0_31] : memref<16x64x176xbf16, #tpu.memory_space<vmem>>, vector<1x64x176xbf16>
    %38 = vector.shape_cast %37 : vector<1x64x176xbf16> to vector<64x176xbf16>
    %cst_32 = arith.constant dense<0.000000e+00> : vector<64x128xf32>
    %39 = tpu.matmul %38, %11, %cst_32 {dimension_numbers = #tpu.dot_dimension_numbers<[1], [0], [0], [1], [0, 0, 1, 1], [], []>} : vector<64x176xbf16>, vector<176x128xbf16>, vector<64x128xf32> -> vector<64x128xf32>
    %40 = arith.truncf %39 : vector<64x128xf32> to vector<64x128xbf16>
    %c3_33 = arith.constant 3 : index
    %c0_34 = arith.constant 0 : index
    %c0_35 = arith.constant 0 : index
    %41 = vector.load %arg5[%c3_33, %c0_34, %c0_35] : memref<16x128x128xbf16, #tpu.memory_space<vmem>>, vector<1x128x128xbf16>
    %42 = vector.shape_cast %41 : vector<1x128x128xbf16> to vector<128x128xbf16>
    %cst_36 = arith.constant dense<0.000000e+00> : vector<64x128xf32>
    %43 = tpu.matmul %40, %42, %cst_36 {dimension_numbers = #tpu.dot_dimension_numbers<[1], [0], [0], [1], [0, 0, 1, 1], [], []>} : vector<64x128xbf16>, vector<128x128xbf16>, vector<64x128xf32> -> vector<64x128xf32>
    %44 = arith.addf %36, %43 : vector<64x128xf32>
    %c4 = arith.constant 4 : index
    %c0_37 = arith.constant 0 : index
    %c0_38 = arith.constant 0 : index
    %45 = vector.load %arg4[%c4, %c0_37, %c0_38] : memref<16x64x176xbf16, #tpu.memory_space<vmem>>, vector<1x64x176xbf16>
    %46 = vector.shape_cast %45 : vector<1x64x176xbf16> to vector<64x176xbf16>
    %cst_39 = arith.constant dense<0.000000e+00> : vector<64x128xf32>
    %47 = tpu.matmul %46, %11, %cst_39 {dimension_numbers = #tpu.dot_dimension_numbers<[1], [0], [0], [1], [0, 0, 1, 1], [], []>} : vector<64x176xbf16>, vector<176x128xbf16>, vector<64x128xf32> -> vector<64x128xf32>
    %48 = arith.truncf %47 : vector<64x128xf32> to vector<64x128xbf16>
    %c4_40 = arith.constant 4 : index
    %c0_41 = arith.constant 0 : index
    %c0_42 = arith.constant 0 : index
    %49 = vector.load %arg5[%c4_40, %c0_41, %c0_42] : memref<16x128x128xbf16, #tpu.memory_space<vmem>>, vector<1x128x128xbf16>
    %50 = vector.shape_cast %49 : vector<1x128x128xbf16> to vector<128x128xbf16>
    %cst_43 = arith.constant dense<0.000000e+00> : vector<64x128xf32>
    %51 = tpu.matmul %48, %50, %cst_43 {dimension_numbers = #tpu.dot_dimension_numbers<[1], [0], [0], [1], [0, 0, 1, 1], [], []>} : vector<64x128xbf16>, vector<128x128xbf16>, vector<64x128xf32> -> vector<64x128xf32>
    %52 = arith.addf %44, %51 : vector<64x128xf32>
    %c5 = arith.constant 5 : index
    %c0_44 = arith.constant 0 : index
    %c0_45 = arith.constant 0 : index
    %53 = vector.load %arg4[%c5, %c0_44, %c0_45] : memref<16x64x176xbf16, #tpu.memory_space<vmem>>, vector<1x64x176xbf16>
    %54 = vector.shape_cast %53 : vector<1x64x176xbf16> to vector<64x176xbf16>
    %cst_46 = arith.constant dense<0.000000e+00> : vector<64x128xf32>
    %55 = tpu.matmul %54, %11, %cst_46 {dimension_numbers = #tpu.dot_dimension_numbers<[1], [0], [0], [1], [0, 0, 1, 1], [], []>} : vector<64x176xbf16>, vector<176x128xbf16>, vector<64x128xf32> -> vector<64x128xf32>
    %56 = arith.truncf %55 : vector<64x128xf32> to vector<64x128xbf16>
    %c5_47 = arith.constant 5 : index
    %c0_48 = arith.constant 0 : index
    %c0_49 = arith.constant 0 : index
    %57 = vector.load %arg5[%c5_47, %c0_48, %c0_49] : memref<16x128x128xbf16, #tpu.memory_space<vmem>>, vector<1x128x128xbf16>
    %58 = vector.shape_cast %57 : vector<1x128x128xbf16> to vector<128x128xbf16>
    %cst_50 = arith.constant dense<0.000000e+00> : vector<64x128xf32>
    %59 = tpu.matmul %56, %58, %cst_50 {dimension_numbers = #tpu.dot_dimension_numbers<[1], [0], [0], [1], [0, 0, 1, 1], [], []>} : vector<64x128xbf16>, vector<128x128xbf16>, vector<64x128xf32> -> vector<64x128xf32>
    %60 = arith.addf %52, %59 : vector<64x128xf32>
    %c6 = arith.constant 6 : index
    %c0_51 = arith.constant 0 : index
    %c0_52 = arith.constant 0 : index
    %61 = vector.load %arg4[%c6, %c0_51, %c0_52] : memref<16x64x176xbf16, #tpu.memory_space<vmem>>, vector<1x64x176xbf16>
    %62 = vector.shape_cast %61 : vector<1x64x176xbf16> to vector<64x176xbf16>
    %cst_53 = arith.constant dense<0.000000e+00> : vector<64x128xf32>
    %63 = tpu.matmul %62, %11, %cst_53 {dimension_numbers = #tpu.dot_dimension_numbers<[1], [0], [0], [1], [0, 0, 1, 1], [], []>} : vector<64x176xbf16>, vector<176x128xbf16>, vector<64x128xf32> -> vector<64x128xf32>
    %64 = arith.truncf %63 : vector<64x128xf32> to vector<64x128xbf16>
    %c6_54 = arith.constant 6 : index
    %c0_55 = arith.constant 0 : index
    %c0_56 = arith.constant 0 : index
    %65 = vector.load %arg5[%c6_54, %c0_55, %c0_56] : memref<16x128x128xbf16, #tpu.memory_space<vmem>>, vector<1x128x128xbf16>
    %66 = vector.shape_cast %65 : vector<1x128x128xbf16> to vector<128x128xbf16>
    %cst_57 = arith.constant dense<0.000000e+00> : vector<64x128xf32>
    %67 = tpu.matmul %64, %66, %cst_57 {dimension_numbers = #tpu.dot_dimension_numbers<[1], [0], [0], [1], [0, 0, 1, 1], [], []>} : vector<64x128xbf16>, vector<128x128xbf16>, vector<64x128xf32> -> vector<64x128xf32>
    %68 = arith.addf %60, %67 : vector<64x128xf32>
    %c7 = arith.constant 7 : index
    %c0_58 = arith.constant 0 : index
    %c0_59 = arith.constant 0 : index
    %69 = vector.load %arg4[%c7, %c0_58, %c0_59] : memref<16x64x176xbf16, #tpu.memory_space<vmem>>, vector<1x64x176xbf16>
    %70 = vector.shape_cast %69 : vector<1x64x176xbf16> to vector<64x176xbf16>
    %cst_60 = arith.constant dense<0.000000e+00> : vector<64x128xf32>
    %71 = tpu.matmul %70, %11, %cst_60 {dimension_numbers = #tpu.dot_dimension_numbers<[1], [0], [0], [1], [0, 0, 1, 1], [], []>} : vector<64x176xbf16>, vector<176x128xbf16>, vector<64x128xf32> -> vector<64x128xf32>
    %72 = arith.truncf %71 : vector<64x128xf32> to vector<64x128xbf16>
    %c7_61 = arith.constant 7 : index
    %c0_62 = arith.constant 0 : index
    %c0_63 = arith.constant 0 : index
    %73 = vector.load %arg5[%c7_61, %c0_62, %c0_63] : memref<16x128x128xbf16, #tpu.memory_space<vmem>>, vector<1x128x128xbf16>
    %74 = vector.shape_cast %73 : vector<1x128x128xbf16> to vector<128x128xbf16>
    %cst_64 = arith.constant dense<0.000000e+00> : vector<64x128xf32>
    %75 = tpu.matmul %72, %74, %cst_64 {dimension_numbers = #tpu.dot_dimension_numbers<[1], [0], [0], [1], [0, 0, 1, 1], [], []>} : vector<64x128xbf16>, vector<128x128xbf16>, vector<64x128xf32> -> vector<64x128xf32>
    %76 = arith.addf %68, %75 : vector<64x128xf32>
    %c8 = arith.constant 8 : index
    %c0_65 = arith.constant 0 : index
    %c0_66 = arith.constant 0 : index
    %77 = vector.load %arg4[%c8, %c0_65, %c0_66] : memref<16x64x176xbf16, #tpu.memory_space<vmem>>, vector<1x64x176xbf16>
    %78 = vector.shape_cast %77 : vector<1x64x176xbf16> to vector<64x176xbf16>
    %cst_67 = arith.constant dense<0.000000e+00> : vector<64x128xf32>
    %79 = tpu.matmul %78, %11, %cst_67 {dimension_numbers = #tpu.dot_dimension_numbers<[1], [0], [0], [1], [0, 0, 1, 1], [], []>} : vector<64x176xbf16>, vector<176x128xbf16>, vector<64x128xf32> -> vector<64x128xf32>
    %80 = arith.truncf %79 : vector<64x128xf32> to vector<64x128xbf16>
    %c8_68 = arith.constant 8 : index
    %c0_69 = arith.constant 0 : index
    %c0_70 = arith.constant 0 : index
    %81 = vector.load %arg5[%c8_68, %c0_69, %c0_70] : memref<16x128x128xbf16, #tpu.memory_space<vmem>>, vector<1x128x128xbf16>
    %82 = vector.shape_cast %81 : vector<1x128x128xbf16> to vector<128x128xbf16>
    %cst_71 = arith.constant dense<0.000000e+00> : vector<64x128xf32>
    %83 = tpu.matmul %80, %82, %cst_71 {dimension_numbers = #tpu.dot_dimension_numbers<[1], [0], [0], [1], [0, 0, 1, 1], [], []>} : vector<64x128xbf16>, vector<128x128xbf16>, vector<64x128xf32> -> vector<64x128xf32>
    %84 = arith.addf %76, %83 : vector<64x128xf32>
    %c9 = arith.constant 9 : index
    %c0_72 = arith.constant 0 : index
    %c0_73 = arith.constant 0 : index
    %85 = vector.load %arg4[%c9, %c0_72, %c0_73] : memref<16x64x176xbf16, #tpu.memory_space<vmem>>, vector<1x64x176xbf16>
    %86 = vector.shape_cast %85 : vector<1x64x176xbf16> to vector<64x176xbf16>
    %cst_74 = arith.constant dense<0.000000e+00> : vector<64x128xf32>
    %87 = tpu.matmul %86, %11, %cst_74 {dimension_numbers = #tpu.dot_dimension_numbers<[1], [0], [0], [1], [0, 0, 1, 1], [], []>} : vector<64x176xbf16>, vector<176x128xbf16>, vector<64x128xf32> -> vector<64x128xf32>
    %88 = arith.truncf %87 : vector<64x128xf32> to vector<64x128xbf16>
    %c9_75 = arith.constant 9 : index
    %c0_76 = arith.constant 0 : index
    %c0_77 = arith.constant 0 : index
    %89 = vector.load %arg5[%c9_75, %c0_76, %c0_77] : memref<16x128x128xbf16, #tpu.memory_space<vmem>>, vector<1x128x128xbf16>
    %90 = vector.shape_cast %89 : vector<1x128x128xbf16> to vector<128x128xbf16>
    %cst_78 = arith.constant dense<0.000000e+00> : vector<64x128xf32>
    %91 = tpu.matmul %88, %90, %cst_78 {dimension_numbers = #tpu.dot_dimension_numbers<[1], [0], [0], [1], [0, 0, 1, 1], [], []>} : vector<64x128xbf16>, vector<128x128xbf16>, vector<64x128xf32> -> vector<64x128xf32>
    %92 = arith.addf %84, %91 : vector<64x128xf32>
    %c10 = arith.constant 10 : index
    %c0_79 = arith.constant 0 : index
    %c0_80 = arith.constant 0 : index
    %93 = vector.load %arg4[%c10, %c0_79, %c0_80] : memref<16x64x176xbf16, #tpu.memory_space<vmem>>, vector<1x64x176xbf16>
    %94 = vector.shape_cast %93 : vector<1x64x176xbf16> to vector<64x176xbf16>
    %cst_81 = arith.constant dense<0.000000e+00> : vector<64x128xf32>
    %95 = tpu.matmul %94, %11, %cst_81 {dimension_numbers = #tpu.dot_dimension_numbers<[1], [0], [0], [1], [0, 0, 1, 1], [], []>} : vector<64x176xbf16>, vector<176x128xbf16>, vector<64x128xf32> -> vector<64x128xf32>
    %96 = arith.truncf %95 : vector<64x128xf32> to vector<64x128xbf16>
    %c10_82 = arith.constant 10 : index
    %c0_83 = arith.constant 0 : index
    %c0_84 = arith.constant 0 : index
    %97 = vector.load %arg5[%c10_82, %c0_83, %c0_84] : memref<16x128x128xbf16, #tpu.memory_space<vmem>>, vector<1x128x128xbf16>
    %98 = vector.shape_cast %97 : vector<1x128x128xbf16> to vector<128x128xbf16>
    %cst_85 = arith.constant dense<0.000000e+00> : vector<64x128xf32>
    %99 = tpu.matmul %96, %98, %cst_85 {dimension_numbers = #tpu.dot_dimension_numbers<[1], [0], [0], [1], [0, 0, 1, 1], [], []>} : vector<64x128xbf16>, vector<128x128xbf16>, vector<64x128xf32> -> vector<64x128xf32>
    %100 = arith.addf %92, %99 : vector<64x128xf32>
    %c11 = arith.constant 11 : index
    %c0_86 = arith.constant 0 : index
    %c0_87 = arith.constant 0 : index
    %101 = vector.load %arg4[%c11, %c0_86, %c0_87] : memref<16x64x176xbf16, #tpu.memory_space<vmem>>, vector<1x64x176xbf16>
    %102 = vector.shape_cast %101 : vector<1x64x176xbf16> to vector<64x176xbf16>
    %cst_88 = arith.constant dense<0.000000e+00> : vector<64x128xf32>
    %103 = tpu.matmul %102, %11, %cst_88 {dimension_numbers = #tpu.dot_dimension_numbers<[1], [0], [0], [1], [0, 0, 1, 1], [], []>} : vector<64x176xbf16>, vector<176x128xbf16>, vector<64x128xf32> -> vector<64x128xf32>
    %104 = arith.truncf %103 : vector<64x128xf32> to vector<64x128xbf16>
    %c11_89 = arith.constant 11 : index
    %c0_90 = arith.constant 0 : index
    %c0_91 = arith.constant 0 : index
    %105 = vector.load %arg5[%c11_89, %c0_90, %c0_91] : memref<16x128x128xbf16, #tpu.memory_space<vmem>>, vector<1x128x128xbf16>
    %106 = vector.shape_cast %105 : vector<1x128x128xbf16> to vector<128x128xbf16>
    %cst_92 = arith.constant dense<0.000000e+00> : vector<64x128xf32>
    %107 = tpu.matmul %104, %106, %cst_92 {dimension_numbers = #tpu.dot_dimension_numbers<[1], [0], [0], [1], [0, 0, 1, 1], [], []>} : vector<64x128xbf16>, vector<128x128xbf16>, vector<64x128xf32> -> vector<64x128xf32>
    %108 = arith.addf %100, %107 : vector<64x128xf32>
    %c12 = arith.constant 12 : index
    %c0_93 = arith.constant 0 : index
    %c0_94 = arith.constant 0 : index
    %109 = vector.load %arg4[%c12, %c0_93, %c0_94] : memref<16x64x176xbf16, #tpu.memory_space<vmem>>, vector<1x64x176xbf16>
    %110 = vector.shape_cast %109 : vector<1x64x176xbf16> to vector<64x176xbf16>
    %cst_95 = arith.constant dense<0.000000e+00> : vector<64x128xf32>
    %111 = tpu.matmul %110, %11, %cst_95 {dimension_numbers = #tpu.dot_dimension_numbers<[1], [0], [0], [1], [0, 0, 1, 1], [], []>} : vector<64x176xbf16>, vector<176x128xbf16>, vector<64x128xf32> -> vector<64x128xf32>
    %112 = arith.truncf %111 : vector<64x128xf32> to vector<64x128xbf16>
    %c12_96 = arith.constant 12 : index
    %c0_97 = arith.constant 0 : index
    %c0_98 = arith.constant 0 : index
    %113 = vector.load %arg5[%c12_96, %c0_97, %c0_98] : memref<16x128x128xbf16, #tpu.memory_space<vmem>>, vector<1x128x128xbf16>
    %114 = vector.shape_cast %113 : vector<1x128x128xbf16> to vector<128x128xbf16>
    %cst_99 = arith.constant dense<0.000000e+00> : vector<64x128xf32>
    %115 = tpu.matmul %112, %114, %cst_99 {dimension_numbers = #tpu.dot_dimension_numbers<[1], [0], [0], [1], [0, 0, 1, 1], [], []>} : vector<64x128xbf16>, vector<128x128xbf16>, vector<64x128xf32> -> vector<64x128xf32>
    %116 = arith.addf %108, %115 : vector<64x128xf32>
    %c13 = arith.constant 13 : index
    %c0_100 = arith.constant 0 : index
    %c0_101 = arith.constant 0 : index
    %117 = vector.load %arg4[%c13, %c0_100, %c0_101] : memref<16x64x176xbf16, #tpu.memory_space<vmem>>, vector<1x64x176xbf16>
    %118 = vector.shape_cast %117 : vector<1x64x176xbf16> to vector<64x176xbf16>
    %cst_102 = arith.constant dense<0.000000e+00> : vector<64x128xf32>
    %119 = tpu.matmul %118, %11, %cst_102 {dimension_numbers = #tpu.dot_dimension_numbers<[1], [0], [0], [1], [0, 0, 1, 1], [], []>} : vector<64x176xbf16>, vector<176x128xbf16>, vector<64x128xf32> -> vector<64x128xf32>
    %120 = arith.truncf %119 : vector<64x128xf32> to vector<64x128xbf16>
    %c13_103 = arith.constant 13 : index
    %c0_104 = arith.constant 0 : index
    %c0_105 = arith.constant 0 : index
    %121 = vector.load %arg5[%c13_103, %c0_104, %c0_105] : memref<16x128x128xbf16, #tpu.memory_space<vmem>>, vector<1x128x128xbf16>
    %122 = vector.shape_cast %121 : vector<1x128x128xbf16> to vector<128x128xbf16>
    %cst_106 = arith.constant dense<0.000000e+00> : vector<64x128xf32>
    %123 = tpu.matmul %120, %122, %cst_106 {dimension_numbers = #tpu.dot_dimension_numbers<[1], [0], [0], [1], [0, 0, 1, 1], [], []>} : vector<64x128xbf16>, vector<128x128xbf16>, vector<64x128xf32> -> vector<64x128xf32>
    %124 = arith.addf %116, %123 : vector<64x128xf32>
    %c14 = arith.constant 14 : index
    %c0_107 = arith.constant 0 : index
    %c0_108 = arith.constant 0 : index
    %125 = vector.load %arg4[%c14, %c0_107, %c0_108] : memref<16x64x176xbf16, #tpu.memory_space<vmem>>, vector<1x64x176xbf16>
    %126 = vector.shape_cast %125 : vector<1x64x176xbf16> to vector<64x176xbf16>
    %cst_109 = arith.constant dense<0.000000e+00> : vector<64x128xf32>
    %127 = tpu.matmul %126, %11, %cst_109 {dimension_numbers = #tpu.dot_dimension_numbers<[1], [0], [0], [1], [0, 0, 1, 1], [], []>} : vector<64x176xbf16>, vector<176x128xbf16>, vector<64x128xf32> -> vector<64x128xf32>
    %128 = arith.truncf %127 : vector<64x128xf32> to vector<64x128xbf16>
    %c14_110 = arith.constant 14 : index
    %c0_111 = arith.constant 0 : index
    %c0_112 = arith.constant 0 : index
    %129 = vector.load %arg5[%c14_110, %c0_111, %c0_112] : memref<16x128x128xbf16, #tpu.memory_space<vmem>>, vector<1x128x128xbf16>
    %130 = vector.shape_cast %129 : vector<1x128x128xbf16> to vector<128x128xbf16>
    %cst_113 = arith.constant dense<0.000000e+00> : vector<64x128xf32>
    %131 = tpu.matmul %128, %130, %cst_113 {dimension_numbers = #tpu.dot_dimension_numbers<[1], [0], [0], [1], [0, 0, 1, 1], [], []>} : vector<64x128xbf16>, vector<128x128xbf16>, vector<64x128xf32> -> vector<64x128xf32>
    %132 = arith.addf %124, %131 : vector<64x128xf32>
    %c15 = arith.constant 15 : index
    %c0_114 = arith.constant 0 : index
    %c0_115 = arith.constant 0 : index
    %133 = vector.load %arg4[%c15, %c0_114, %c0_115] : memref<16x64x176xbf16, #tpu.memory_space<vmem>>, vector<1x64x176xbf16>
    %134 = vector.shape_cast %133 : vector<1x64x176xbf16> to vector<64x176xbf16>
    %cst_116 = arith.constant dense<0.000000e+00> : vector<64x128xf32>
    %135 = tpu.matmul %134, %11, %cst_116 {dimension_numbers = #tpu.dot_dimension_numbers<[1], [0], [0], [1], [0, 0, 1, 1], [], []>} : vector<64x176xbf16>, vector<176x128xbf16>, vector<64x128xf32> -> vector<64x128xf32>
    %136 = arith.truncf %135 : vector<64x128xf32> to vector<64x128xbf16>
    %c15_117 = arith.constant 15 : index
    %c0_118 = arith.constant 0 : index
    %c0_119 = arith.constant 0 : index
    %137 = vector.load %arg5[%c15_117, %c0_118, %c0_119] : memref<16x128x128xbf16, #tpu.memory_space<vmem>>, vector<1x128x128xbf16>
    %138 = vector.shape_cast %137 : vector<1x128x128xbf16> to vector<128x128xbf16>
    %cst_120 = arith.constant dense<0.000000e+00> : vector<64x128xf32>
    %139 = tpu.matmul %136, %138, %cst_120 {dimension_numbers = #tpu.dot_dimension_numbers<[1], [0], [0], [1], [0, 0, 1, 1], [], []>} : vector<64x128xbf16>, vector<128x128xbf16>, vector<64x128xf32> -> vector<64x128xf32>
    %140 = arith.addf %132, %139 : vector<64x128xf32>
    %c0_121 = arith.constant 0 : index
    %c0_122 = arith.constant 0 : index
    %141 = vector.load %arg6[%c0_121, %c0_122] : memref<1x128xf32, #tpu.memory_space<vmem>>, vector<1x128xf32>
    %142 = vector.broadcast %141 : vector<1x128xf32> to vector<64x128xf32>
    %143 = arith.addf %140, %142 : vector<64x128xf32>
    %cst_123 = arith.constant dense<0.000000e+00> : vector<128xf32>
    %144 = vector.multi_reduction <add>, %143, %cst_123 [0] : vector<64x128xf32> to vector<128xf32>
    %145 = vector.shape_cast %144 : vector<128xf32> to vector<1x128xf32>
    %146 = arith.mulf %143, %143 : vector<64x128xf32>
    %cst_124 = arith.constant dense<0.000000e+00> : vector<128xf32>
    %147 = vector.multi_reduction <add>, %146, %cst_124 [0] : vector<64x128xf32> to vector<128xf32>
    %148 = vector.shape_cast %147 : vector<128xf32> to vector<1x128xf32>
    %c0_125 = arith.constant 0 : index
    %c0_126 = arith.constant 0 : index
    %149 = vector.load %arg6[%c0_125, %c0_126] : memref<1x128xf32, #tpu.memory_space<vmem>>, vector<1x128xf32>
    %cst_127 = arith.constant 1.400000e+01 : f32
    %150 = vector.broadcast %cst_127 : f32 to vector<1x128xf32>
    %151 = arith.mulf %150, %149 : vector<1x128xf32>
    %152 = arith.subf %145, %151 : vector<1x128xf32>
    %cst_128 = arith.constant 1.400000e+01 : f32
    %153 = vector.broadcast %cst_128 : f32 to vector<1x128xf32>
    %154 = arith.mulf %153, %149 : vector<1x128xf32>
    %155 = arith.mulf %154, %149 : vector<1x128xf32>
    %156 = arith.subf %148, %155 : vector<1x128xf32>
    %cst_129 = arith.constant 2.000000e-02 : f32
    %157 = vector.broadcast %cst_129 : f32 to vector<1x128xf32>
    %158 = arith.mulf %152, %157 : vector<1x128xf32>
    %cst_130 = arith.constant 2.000000e-02 : f32
    %159 = vector.broadcast %cst_130 : f32 to vector<1x128xf32>
    %160 = arith.mulf %156, %159 : vector<1x128xf32>
    %161 = arith.mulf %158, %158 : vector<1x128xf32>
    %162 = arith.subf %160, %161 : vector<1x128xf32>
    %cst_131 = arith.constant 0.000000e+00 : f32
    %163 = vector.broadcast %cst_131 : f32 to vector<1x128xf32>
    %164 = arith.maximumf %162, %163 : vector<1x128xf32>
    %c0_132 = arith.constant 0 : index
    %c0_133 = arith.constant 0 : index
    %165 = vector.load %arg7[%c0_132, %c0_133] : memref<1x128xf32, #tpu.memory_space<vmem>>, vector<1x128xf32>
    %cst_134 = arith.constant 9.99999974E-6 : f32
    %166 = vector.broadcast %cst_134 : f32 to vector<1x128xf32>
    %167 = arith.addf %164, %166 : vector<1x128xf32>
    %168 = math.rsqrt %167 : vector<1x128xf32>
    %169 = arith.mulf %165, %168 : vector<1x128xf32>
    %c0_135 = arith.constant 0 : index
    %c0_136 = arith.constant 0 : index
    %170 = vector.load %arg8[%c0_135, %c0_136] : memref<1x128xf32, #tpu.memory_space<vmem>>, vector<1x128xf32>
    %171 = arith.mulf %158, %169 : vector<1x128xf32>
    %172 = arith.subf %170, %171 : vector<1x128xf32>
    %173 = vector.broadcast %169 : vector<1x128xf32> to vector<64x128xf32>
    %174 = arith.mulf %143, %173 : vector<64x128xf32>
    %175 = vector.broadcast %172 : vector<1x128xf32> to vector<64x128xf32>
    %176 = arith.addf %174, %175 : vector<64x128xf32>
    %cst_137 = arith.constant 0.000000e+00 : f32
    %177 = vector.broadcast %cst_137 : f32 to vector<64x128xf32>
    %178 = arith.cmpf ogt, %176, %177 : vector<64x128xf32>
    %cst_138 = arith.constant 2.000000e-01 : f32
    %179 = vector.broadcast %cst_138 : f32 to vector<64x128xf32>
    %180 = arith.mulf %179, %176 : vector<64x128xf32>
    %181 = arith.select %178, %176, %180 : vector<64x128xi1>, vector<64x128xf32>
    %182 = arith.truncf %181 : vector<64x128xf32> to vector<64x128xbf16>
    %cst_139 = arith.constant 0.000000e+00 : f32
    %183 = vector.broadcast %cst_139 : f32 to vector<32x128xf32>
    %c0_140 = arith.constant 0 : index
    %c0_141 = arith.constant 0 : index
    %c0_142 = arith.constant 0 : index
    %184 = vector.load %arg9[%c0_140, %c0_141, %c0_142] : memref<16x32x64xbf16, #tpu.memory_space<vmem>>, vector<1x32x64xbf16>
    %185 = vector.shape_cast %184 : vector<1x32x64xbf16> to vector<32x64xbf16>
    %cst_143 = arith.constant dense<0.000000e+00> : vector<32x128xf32>
    %186 = tpu.matmul %185, %182, %cst_143 {dimension_numbers = #tpu.dot_dimension_numbers<[1], [0], [0], [1], [0, 0, 1, 1], [], []>} : vector<32x64xbf16>, vector<64x128xbf16>, vector<32x128xf32> -> vector<32x128xf32>
    %187 = arith.truncf %186 : vector<32x128xf32> to vector<32x128xbf16>
    %c0_144 = arith.constant 0 : index
    %c0_145 = arith.constant 0 : index
    %c0_146 = arith.constant 0 : index
    %188 = vector.load %arg10[%c0_144, %c0_145, %c0_146] : memref<16x128x128xbf16, #tpu.memory_space<vmem>>, vector<1x128x128xbf16>
    %189 = vector.shape_cast %188 : vector<1x128x128xbf16> to vector<128x128xbf16>
    %cst_147 = arith.constant dense<0.000000e+00> : vector<32x128xf32>
    %190 = tpu.matmul %187, %189, %cst_147 {dimension_numbers = #tpu.dot_dimension_numbers<[1], [0], [0], [1], [0, 0, 1, 1], [], []>} : vector<32x128xbf16>, vector<128x128xbf16>, vector<32x128xf32> -> vector<32x128xf32>
    %191 = arith.addf %183, %190 : vector<32x128xf32>
    %c1_148 = arith.constant 1 : index
    %c0_149 = arith.constant 0 : index
    %c0_150 = arith.constant 0 : index
    %192 = vector.load %arg9[%c1_148, %c0_149, %c0_150] : memref<16x32x64xbf16, #tpu.memory_space<vmem>>, vector<1x32x64xbf16>
    %193 = vector.shape_cast %192 : vector<1x32x64xbf16> to vector<32x64xbf16>
    %cst_151 = arith.constant dense<0.000000e+00> : vector<32x128xf32>
    %194 = tpu.matmul %193, %182, %cst_151 {dimension_numbers = #tpu.dot_dimension_numbers<[1], [0], [0], [1], [0, 0, 1, 1], [], []>} : vector<32x64xbf16>, vector<64x128xbf16>, vector<32x128xf32> -> vector<32x128xf32>
    %195 = arith.truncf %194 : vector<32x128xf32> to vector<32x128xbf16>
    %c1_152 = arith.constant 1 : index
    %c0_153 = arith.constant 0 : index
    %c0_154 = arith.constant 0 : index
    %196 = vector.load %arg10[%c1_152, %c0_153, %c0_154] : memref<16x128x128xbf16, #tpu.memory_space<vmem>>, vector<1x128x128xbf16>
    %197 = vector.shape_cast %196 : vector<1x128x128xbf16> to vector<128x128xbf16>
    %cst_155 = arith.constant dense<0.000000e+00> : vector<32x128xf32>
    %198 = tpu.matmul %195, %197, %cst_155 {dimension_numbers = #tpu.dot_dimension_numbers<[1], [0], [0], [1], [0, 0, 1, 1], [], []>} : vector<32x128xbf16>, vector<128x128xbf16>, vector<32x128xf32> -> vector<32x128xf32>
    %199 = arith.addf %191, %198 : vector<32x128xf32>
    %c2_156 = arith.constant 2 : index
    %c0_157 = arith.constant 0 : index
    %c0_158 = arith.constant 0 : index
    %200 = vector.load %arg9[%c2_156, %c0_157, %c0_158] : memref<16x32x64xbf16, #tpu.memory_space<vmem>>, vector<1x32x64xbf16>
    %201 = vector.shape_cast %200 : vector<1x32x64xbf16> to vector<32x64xbf16>
    %cst_159 = arith.constant dense<0.000000e+00> : vector<32x128xf32>
    %202 = tpu.matmul %201, %182, %cst_159 {dimension_numbers = #tpu.dot_dimension_numbers<[1], [0], [0], [1], [0, 0, 1, 1], [], []>} : vector<32x64xbf16>, vector<64x128xbf16>, vector<32x128xf32> -> vector<32x128xf32>
    %203 = arith.truncf %202 : vector<32x128xf32> to vector<32x128xbf16>
    %c2_160 = arith.constant 2 : index
    %c0_161 = arith.constant 0 : index
    %c0_162 = arith.constant 0 : index
    %204 = vector.load %arg10[%c2_160, %c0_161, %c0_162] : memref<16x128x128xbf16, #tpu.memory_space<vmem>>, vector<1x128x128xbf16>
    %205 = vector.shape_cast %204 : vector<1x128x128xbf16> to vector<128x128xbf16>
    %cst_163 = arith.constant dense<0.000000e+00> : vector<32x128xf32>
    %206 = tpu.matmul %203, %205, %cst_163 {dimension_numbers = #tpu.dot_dimension_numbers<[1], [0], [0], [1], [0, 0, 1, 1], [], []>} : vector<32x128xbf16>, vector<128x128xbf16>, vector<32x128xf32> -> vector<32x128xf32>
    %207 = arith.addf %199, %206 : vector<32x128xf32>
    %c3_164 = arith.constant 3 : index
    %c0_165 = arith.constant 0 : index
    %c0_166 = arith.constant 0 : index
    %208 = vector.load %arg9[%c3_164, %c0_165, %c0_166] : memref<16x32x64xbf16, #tpu.memory_space<vmem>>, vector<1x32x64xbf16>
    %209 = vector.shape_cast %208 : vector<1x32x64xbf16> to vector<32x64xbf16>
    %cst_167 = arith.constant dense<0.000000e+00> : vector<32x128xf32>
    %210 = tpu.matmul %209, %182, %cst_167 {dimension_numbers = #tpu.dot_dimension_numbers<[1], [0], [0], [1], [0, 0, 1, 1], [], []>} : vector<32x64xbf16>, vector<64x128xbf16>, vector<32x128xf32> -> vector<32x128xf32>
    %211 = arith.truncf %210 : vector<32x128xf32> to vector<32x128xbf16>
    %c3_168 = arith.constant 3 : index
    %c0_169 = arith.constant 0 : index
    %c0_170 = arith.constant 0 : index
    %212 = vector.load %arg10[%c3_168, %c0_169, %c0_170] : memref<16x128x128xbf16, #tpu.memory_space<vmem>>, vector<1x128x128xbf16>
    %213 = vector.shape_cast %212 : vector<1x128x128xbf16> to vector<128x128xbf16>
    %cst_171 = arith.constant dense<0.000000e+00> : vector<32x128xf32>
    %214 = tpu.matmul %211, %213, %cst_171 {dimension_numbers = #tpu.dot_dimension_numbers<[1], [0], [0], [1], [0, 0, 1, 1], [], []>} : vector<32x128xbf16>, vector<128x128xbf16>, vector<32x128xf32> -> vector<32x128xf32>
    %215 = arith.addf %207, %214 : vector<32x128xf32>
    %c4_172 = arith.constant 4 : index
    %c0_173 = arith.constant 0 : index
    %c0_174 = arith.constant 0 : index
    %216 = vector.load %arg9[%c4_172, %c0_173, %c0_174] : memref<16x32x64xbf16, #tpu.memory_space<vmem>>, vector<1x32x64xbf16>
    %217 = vector.shape_cast %216 : vector<1x32x64xbf16> to vector<32x64xbf16>
    %cst_175 = arith.constant dense<0.000000e+00> : vector<32x128xf32>
    %218 = tpu.matmul %217, %182, %cst_175 {dimension_numbers = #tpu.dot_dimension_numbers<[1], [0], [0], [1], [0, 0, 1, 1], [], []>} : vector<32x64xbf16>, vector<64x128xbf16>, vector<32x128xf32> -> vector<32x128xf32>
    %219 = arith.truncf %218 : vector<32x128xf32> to vector<32x128xbf16>
    %c4_176 = arith.constant 4 : index
    %c0_177 = arith.constant 0 : index
    %c0_178 = arith.constant 0 : index
    %220 = vector.load %arg10[%c4_176, %c0_177, %c0_178] : memref<16x128x128xbf16, #tpu.memory_space<vmem>>, vector<1x128x128xbf16>
    %221 = vector.shape_cast %220 : vector<1x128x128xbf16> to vector<128x128xbf16>
    %cst_179 = arith.constant dense<0.000000e+00> : vector<32x128xf32>
    %222 = tpu.matmul %219, %221, %cst_179 {dimension_numbers = #tpu.dot_dimension_numbers<[1], [0], [0], [1], [0, 0, 1, 1], [], []>} : vector<32x128xbf16>, vector<128x128xbf16>, vector<32x128xf32> -> vector<32x128xf32>
    %223 = arith.addf %215, %222 : vector<32x128xf32>
    %c5_180 = arith.constant 5 : index
    %c0_181 = arith.constant 0 : index
    %c0_182 = arith.constant 0 : index
    %224 = vector.load %arg9[%c5_180, %c0_181, %c0_182] : memref<16x32x64xbf16, #tpu.memory_space<vmem>>, vector<1x32x64xbf16>
    %225 = vector.shape_cast %224 : vector<1x32x64xbf16> to vector<32x64xbf16>
    %cst_183 = arith.constant dense<0.000000e+00> : vector<32x128xf32>
    %226 = tpu.matmul %225, %182, %cst_183 {dimension_numbers = #tpu.dot_dimension_numbers<[1], [0], [0], [1], [0, 0, 1, 1], [], []>} : vector<32x64xbf16>, vector<64x128xbf16>, vector<32x128xf32> -> vector<32x128xf32>
    %227 = arith.truncf %226 : vector<32x128xf32> to vector<32x128xbf16>
    %c5_184 = arith.constant 5 : index
    %c0_185 = arith.constant 0 : index
    %c0_186 = arith.constant 0 : index
    %228 = vector.load %arg10[%c5_184, %c0_185, %c0_186] : memref<16x128x128xbf16, #tpu.memory_space<vmem>>, vector<1x128x128xbf16>
    %229 = vector.shape_cast %228 : vector<1x128x128xbf16> to vector<128x128xbf16>
    %cst_187 = arith.constant dense<0.000000e+00> : vector<32x128xf32>
    %230 = tpu.matmul %227, %229, %cst_187 {dimension_numbers = #tpu.dot_dimension_numbers<[1], [0], [0], [1], [0, 0, 1, 1], [], []>} : vector<32x128xbf16>, vector<128x128xbf16>, vector<32x128xf32> -> vector<32x128xf32>
    %231 = arith.addf %223, %230 : vector<32x128xf32>
    %c6_188 = arith.constant 6 : index
    %c0_189 = arith.constant 0 : index
    %c0_190 = arith.constant 0 : index
    %232 = vector.load %arg9[%c6_188, %c0_189, %c0_190] : memref<16x32x64xbf16, #tpu.memory_space<vmem>>, vector<1x32x64xbf16>
    %233 = vector.shape_cast %232 : vector<1x32x64xbf16> to vector<32x64xbf16>
    %cst_191 = arith.constant dense<0.000000e+00> : vector<32x128xf32>
    %234 = tpu.matmul %233, %182, %cst_191 {dimension_numbers = #tpu.dot_dimension_numbers<[1], [0], [0], [1], [0, 0, 1, 1], [], []>} : vector<32x64xbf16>, vector<64x128xbf16>, vector<32x128xf32> -> vector<32x128xf32>
    %235 = arith.truncf %234 : vector<32x128xf32> to vector<32x128xbf16>
    %c6_192 = arith.constant 6 : index
    %c0_193 = arith.constant 0 : index
    %c0_194 = arith.constant 0 : index
    %236 = vector.load %arg10[%c6_192, %c0_193, %c0_194] : memref<16x128x128xbf16, #tpu.memory_space<vmem>>, vector<1x128x128xbf16>
    %237 = vector.shape_cast %236 : vector<1x128x128xbf16> to vector<128x128xbf16>
    %cst_195 = arith.constant dense<0.000000e+00> : vector<32x128xf32>
    %238 = tpu.matmul %235, %237, %cst_195 {dimension_numbers = #tpu.dot_dimension_numbers<[1], [0], [0], [1], [0, 0, 1, 1], [], []>} : vector<32x128xbf16>, vector<128x128xbf16>, vector<32x128xf32> -> vector<32x128xf32>
    %239 = arith.addf %231, %238 : vector<32x128xf32>
    %c7_196 = arith.constant 7 : index
    %c0_197 = arith.constant 0 : index
    %c0_198 = arith.constant 0 : index
    %240 = vector.load %arg9[%c7_196, %c0_197, %c0_198] : memref<16x32x64xbf16, #tpu.memory_space<vmem>>, vector<1x32x64xbf16>
    %241 = vector.shape_cast %240 : vector<1x32x64xbf16> to vector<32x64xbf16>
    %cst_199 = arith.constant dense<0.000000e+00> : vector<32x128xf32>
    %242 = tpu.matmul %241, %182, %cst_199 {dimension_numbers = #tpu.dot_dimension_numbers<[1], [0], [0], [1], [0, 0, 1, 1], [], []>} : vector<32x64xbf16>, vector<64x128xbf16>, vector<32x128xf32> -> vector<32x128xf32>
    %243 = arith.truncf %242 : vector<32x128xf32> to vector<32x128xbf16>
    %c7_200 = arith.constant 7 : index
    %c0_201 = arith.constant 0 : index
    %c0_202 = arith.constant 0 : index
    %244 = vector.load %arg10[%c7_200, %c0_201, %c0_202] : memref<16x128x128xbf16, #tpu.memory_space<vmem>>, vector<1x128x128xbf16>
    %245 = vector.shape_cast %244 : vector<1x128x128xbf16> to vector<128x128xbf16>
    %cst_203 = arith.constant dense<0.000000e+00> : vector<32x128xf32>
    %246 = tpu.matmul %243, %245, %cst_203 {dimension_numbers = #tpu.dot_dimension_numbers<[1], [0], [0], [1], [0, 0, 1, 1], [], []>} : vector<32x128xbf16>, vector<128x128xbf16>, vector<32x128xf32> -> vector<32x128xf32>
    %247 = arith.addf %239, %246 : vector<32x128xf32>
    %c8_204 = arith.constant 8 : index
    %c0_205 = arith.constant 0 : index
    %c0_206 = arith.constant 0 : index
    %248 = vector.load %arg9[%c8_204, %c0_205, %c0_206] : memref<16x32x64xbf16, #tpu.memory_space<vmem>>, vector<1x32x64xbf16>
    %249 = vector.shape_cast %248 : vector<1x32x64xbf16> to vector<32x64xbf16>
    %cst_207 = arith.constant dense<0.000000e+00> : vector<32x128xf32>
    %250 = tpu.matmul %249, %182, %cst_207 {dimension_numbers = #tpu.dot_dimension_numbers<[1], [0], [0], [1], [0, 0, 1, 1], [], []>} : vector<32x64xbf16>, vector<64x128xbf16>, vector<32x128xf32> -> vector<32x128xf32>
    %251 = arith.truncf %250 : vector<32x128xf32> to vector<32x128xbf16>
    %c8_208 = arith.constant 8 : index
    %c0_209 = arith.constant 0 : index
    %c0_210 = arith.constant 0 : index
    %252 = vector.load %arg10[%c8_208, %c0_209, %c0_210] : memref<16x128x128xbf16, #tpu.memory_space<vmem>>, vector<1x128x128xbf16>
    %253 = vector.shape_cast %252 : vector<1x128x128xbf16> to vector<128x128xbf16>
    %cst_211 = arith.constant dense<0.000000e+00> : vector<32x128xf32>
    %254 = tpu.matmul %251, %253, %cst_211 {dimension_numbers = #tpu.dot_dimension_numbers<[1], [0], [0], [1], [0, 0, 1, 1], [], []>} : vector<32x128xbf16>, vector<128x128xbf16>, vector<32x128xf32> -> vector<32x128xf32>
    %255 = arith.addf %247, %254 : vector<32x128xf32>
    %c9_212 = arith.constant 9 : index
    %c0_213 = arith.constant 0 : index
    %c0_214 = arith.constant 0 : index
    %256 = vector.load %arg9[%c9_212, %c0_213, %c0_214] : memref<16x32x64xbf16, #tpu.memory_space<vmem>>, vector<1x32x64xbf16>
    %257 = vector.shape_cast %256 : vector<1x32x64xbf16> to vector<32x64xbf16>
    %cst_215 = arith.constant dense<0.000000e+00> : vector<32x128xf32>
    %258 = tpu.matmul %257, %182, %cst_215 {dimension_numbers = #tpu.dot_dimension_numbers<[1], [0], [0], [1], [0, 0, 1, 1], [], []>} : vector<32x64xbf16>, vector<64x128xbf16>, vector<32x128xf32> -> vector<32x128xf32>
    %259 = arith.truncf %258 : vector<32x128xf32> to vector<32x128xbf16>
    %c9_216 = arith.constant 9 : index
    %c0_217 = arith.constant 0 : index
    %c0_218 = arith.constant 0 : index
    %260 = vector.load %arg10[%c9_216, %c0_217, %c0_218] : memref<16x128x128xbf16, #tpu.memory_space<vmem>>, vector<1x128x128xbf16>
    %261 = vector.shape_cast %260 : vector<1x128x128xbf16> to vector<128x128xbf16>
    %cst_219 = arith.constant dense<0.000000e+00> : vector<32x128xf32>
    %262 = tpu.matmul %259, %261, %cst_219 {dimension_numbers = #tpu.dot_dimension_numbers<[1], [0], [0], [1], [0, 0, 1, 1], [], []>} : vector<32x128xbf16>, vector<128x128xbf16>, vector<32x128xf32> -> vector<32x128xf32>
    %263 = arith.addf %255, %262 : vector<32x128xf32>
    %c10_220 = arith.constant 10 : index
    %c0_221 = arith.constant 0 : index
    %c0_222 = arith.constant 0 : index
    %264 = vector.load %arg9[%c10_220, %c0_221, %c0_222] : memref<16x32x64xbf16, #tpu.memory_space<vmem>>, vector<1x32x64xbf16>
    %265 = vector.shape_cast %264 : vector<1x32x64xbf16> to vector<32x64xbf16>
    %cst_223 = arith.constant dense<0.000000e+00> : vector<32x128xf32>
    %266 = tpu.matmul %265, %182, %cst_223 {dimension_numbers = #tpu.dot_dimension_numbers<[1], [0], [0], [1], [0, 0, 1, 1], [], []>} : vector<32x64xbf16>, vector<64x128xbf16>, vector<32x128xf32> -> vector<32x128xf32>
    %267 = arith.truncf %266 : vector<32x128xf32> to vector<32x128xbf16>
    %c10_224 = arith.constant 10 : index
    %c0_225 = arith.constant 0 : index
    %c0_226 = arith.constant 0 : index
    %268 = vector.load %arg10[%c10_224, %c0_225, %c0_226] : memref<16x128x128xbf16, #tpu.memory_space<vmem>>, vector<1x128x128xbf16>
    %269 = vector.shape_cast %268 : vector<1x128x128xbf16> to vector<128x128xbf16>
    %cst_227 = arith.constant dense<0.000000e+00> : vector<32x128xf32>
    %270 = tpu.matmul %267, %269, %cst_227 {dimension_numbers = #tpu.dot_dimension_numbers<[1], [0], [0], [1], [0, 0, 1, 1], [], []>} : vector<32x128xbf16>, vector<128x128xbf16>, vector<32x128xf32> -> vector<32x128xf32>
    %271 = arith.addf %263, %270 : vector<32x128xf32>
    %c11_228 = arith.constant 11 : index
    %c0_229 = arith.constant 0 : index
    %c0_230 = arith.constant 0 : index
    %272 = vector.load %arg9[%c11_228, %c0_229, %c0_230] : memref<16x32x64xbf16, #tpu.memory_space<vmem>>, vector<1x32x64xbf16>
    %273 = vector.shape_cast %272 : vector<1x32x64xbf16> to vector<32x64xbf16>
    %cst_231 = arith.constant dense<0.000000e+00> : vector<32x128xf32>
    %274 = tpu.matmul %273, %182, %cst_231 {dimension_numbers = #tpu.dot_dimension_numbers<[1], [0], [0], [1], [0, 0, 1, 1], [], []>} : vector<32x64xbf16>, vector<64x128xbf16>, vector<32x128xf32> -> vector<32x128xf32>
    %275 = arith.truncf %274 : vector<32x128xf32> to vector<32x128xbf16>
    %c11_232 = arith.constant 11 : index
    %c0_233 = arith.constant 0 : index
    %c0_234 = arith.constant 0 : index
    %276 = vector.load %arg10[%c11_232, %c0_233, %c0_234] : memref<16x128x128xbf16, #tpu.memory_space<vmem>>, vector<1x128x128xbf16>
    %277 = vector.shape_cast %276 : vector<1x128x128xbf16> to vector<128x128xbf16>
    %cst_235 = arith.constant dense<0.000000e+00> : vector<32x128xf32>
    %278 = tpu.matmul %275, %277, %cst_235 {dimension_numbers = #tpu.dot_dimension_numbers<[1], [0], [0], [1], [0, 0, 1, 1], [], []>} : vector<32x128xbf16>, vector<128x128xbf16>, vector<32x128xf32> -> vector<32x128xf32>
    %279 = arith.addf %271, %278 : vector<32x128xf32>
    %c12_236 = arith.constant 12 : index
    %c0_237 = arith.constant 0 : index
    %c0_238 = arith.constant 0 : index
    %280 = vector.load %arg9[%c12_236, %c0_237, %c0_238] : memref<16x32x64xbf16, #tpu.memory_space<vmem>>, vector<1x32x64xbf16>
    %281 = vector.shape_cast %280 : vector<1x32x64xbf16> to vector<32x64xbf16>
    %cst_239 = arith.constant dense<0.000000e+00> : vector<32x128xf32>
    %282 = tpu.matmul %281, %182, %cst_239 {dimension_numbers = #tpu.dot_dimension_numbers<[1], [0], [0], [1], [0, 0, 1, 1], [], []>} : vector<32x64xbf16>, vector<64x128xbf16>, vector<32x128xf32> -> vector<32x128xf32>
    %283 = arith.truncf %282 : vector<32x128xf32> to vector<32x128xbf16>
    %c12_240 = arith.constant 12 : index
    %c0_241 = arith.constant 0 : index
    %c0_242 = arith.constant 0 : index
    %284 = vector.load %arg10[%c12_240, %c0_241, %c0_242] : memref<16x128x128xbf16, #tpu.memory_space<vmem>>, vector<1x128x128xbf16>
    %285 = vector.shape_cast %284 : vector<1x128x128xbf16> to vector<128x128xbf16>
    %cst_243 = arith.constant dense<0.000000e+00> : vector<32x128xf32>
    %286 = tpu.matmul %283, %285, %cst_243 {dimension_numbers = #tpu.dot_dimension_numbers<[1], [0], [0], [1], [0, 0, 1, 1], [], []>} : vector<32x128xbf16>, vector<128x128xbf16>, vector<32x128xf32> -> vector<32x128xf32>
    %287 = arith.addf %279, %286 : vector<32x128xf32>
    %c13_244 = arith.constant 13 : index
    %c0_245 = arith.constant 0 : index
    %c0_246 = arith.constant 0 : index
    %288 = vector.load %arg9[%c13_244, %c0_245, %c0_246] : memref<16x32x64xbf16, #tpu.memory_space<vmem>>, vector<1x32x64xbf16>
    %289 = vector.shape_cast %288 : vector<1x32x64xbf16> to vector<32x64xbf16>
    %cst_247 = arith.constant dense<0.000000e+00> : vector<32x128xf32>
    %290 = tpu.matmul %289, %182, %cst_247 {dimension_numbers = #tpu.dot_dimension_numbers<[1], [0], [0], [1], [0, 0, 1, 1], [], []>} : vector<32x64xbf16>, vector<64x128xbf16>, vector<32x128xf32> -> vector<32x128xf32>
    %291 = arith.truncf %290 : vector<32x128xf32> to vector<32x128xbf16>
    %c13_248 = arith.constant 13 : index
    %c0_249 = arith.constant 0 : index
    %c0_250 = arith.constant 0 : index
    %292 = vector.load %arg10[%c13_248, %c0_249, %c0_250] : memref<16x128x128xbf16, #tpu.memory_space<vmem>>, vector<1x128x128xbf16>
    %293 = vector.shape_cast %292 : vector<1x128x128xbf16> to vector<128x128xbf16>
    %cst_251 = arith.constant dense<0.000000e+00> : vector<32x128xf32>
    %294 = tpu.matmul %291, %293, %cst_251 {dimension_numbers = #tpu.dot_dimension_numbers<[1], [0], [0], [1], [0, 0, 1, 1], [], []>} : vector<32x128xbf16>, vector<128x128xbf16>, vector<32x128xf32> -> vector<32x128xf32>
    %295 = arith.addf %287, %294 : vector<32x128xf32>
    %c14_252 = arith.constant 14 : index
    %c0_253 = arith.constant 0 : index
    %c0_254 = arith.constant 0 : index
    %296 = vector.load %arg9[%c14_252, %c0_253, %c0_254] : memref<16x32x64xbf16, #tpu.memory_space<vmem>>, vector<1x32x64xbf16>
    %297 = vector.shape_cast %296 : vector<1x32x64xbf16> to vector<32x64xbf16>
    %cst_255 = arith.constant dense<0.000000e+00> : vector<32x128xf32>
    %298 = tpu.matmul %297, %182, %cst_255 {dimension_numbers = #tpu.dot_dimension_numbers<[1], [0], [0], [1], [0, 0, 1, 1], [], []>} : vector<32x64xbf16>, vector<64x128xbf16>, vector<32x128xf32> -> vector<32x128xf32>
    %299 = arith.truncf %298 : vector<32x128xf32> to vector<32x128xbf16>
    %c14_256 = arith.constant 14 : index
    %c0_257 = arith.constant 0 : index
    %c0_258 = arith.constant 0 : index
    %300 = vector.load %arg10[%c14_256, %c0_257, %c0_258] : memref<16x128x128xbf16, #tpu.memory_space<vmem>>, vector<1x128x128xbf16>
    %301 = vector.shape_cast %300 : vector<1x128x128xbf16> to vector<128x128xbf16>
    %cst_259 = arith.constant dense<0.000000e+00> : vector<32x128xf32>
    %302 = tpu.matmul %299, %301, %cst_259 {dimension_numbers = #tpu.dot_dimension_numbers<[1], [0], [0], [1], [0, 0, 1, 1], [], []>} : vector<32x128xbf16>, vector<128x128xbf16>, vector<32x128xf32> -> vector<32x128xf32>
    %303 = arith.addf %295, %302 : vector<32x128xf32>
    %c15_260 = arith.constant 15 : index
    %c0_261 = arith.constant 0 : index
    %c0_262 = arith.constant 0 : index
    %304 = vector.load %arg9[%c15_260, %c0_261, %c0_262] : memref<16x32x64xbf16, #tpu.memory_space<vmem>>, vector<1x32x64xbf16>
    %305 = vector.shape_cast %304 : vector<1x32x64xbf16> to vector<32x64xbf16>
    %cst_263 = arith.constant dense<0.000000e+00> : vector<32x128xf32>
    %306 = tpu.matmul %305, %182, %cst_263 {dimension_numbers = #tpu.dot_dimension_numbers<[1], [0], [0], [1], [0, 0, 1, 1], [], []>} : vector<32x64xbf16>, vector<64x128xbf16>, vector<32x128xf32> -> vector<32x128xf32>
    %307 = arith.truncf %306 : vector<32x128xf32> to vector<32x128xbf16>
    %c15_264 = arith.constant 15 : index
    %c0_265 = arith.constant 0 : index
    %c0_266 = arith.constant 0 : index
    %308 = vector.load %arg10[%c15_264, %c0_265, %c0_266] : memref<16x128x128xbf16, #tpu.memory_space<vmem>>, vector<1x128x128xbf16>
    %309 = vector.shape_cast %308 : vector<1x128x128xbf16> to vector<128x128xbf16>
    %cst_267 = arith.constant dense<0.000000e+00> : vector<32x128xf32>
    %310 = tpu.matmul %307, %309, %cst_267 {dimension_numbers = #tpu.dot_dimension_numbers<[1], [0], [0], [1], [0, 0, 1, 1], [], []>} : vector<32x128xbf16>, vector<128x128xbf16>, vector<32x128xf32> -> vector<32x128xf32>
    %311 = arith.addf %303, %310 : vector<32x128xf32>
    %c0_268 = arith.constant 0 : index
    %c0_269 = arith.constant 0 : index
    %312 = vector.load %arg11[%c0_268, %c0_269] : memref<1x128xf32, #tpu.memory_space<vmem>>, vector<1x128xf32>
    %313 = vector.broadcast %312 : vector<1x128xf32> to vector<32x128xf32>
    %314 = arith.addf %311, %313 : vector<32x128xf32>
    %cst_270 = arith.constant dense<0.000000e+00> : vector<128xf32>
    %315 = vector.multi_reduction <add>, %314, %cst_270 [0] : vector<32x128xf32> to vector<128xf32>
    %316 = vector.shape_cast %315 : vector<128xf32> to vector<1x128xf32>
    %317 = arith.mulf %314, %314 : vector<32x128xf32>
    %cst_271 = arith.constant dense<0.000000e+00> : vector<128xf32>
    %318 = vector.multi_reduction <add>, %317, %cst_271 [0] : vector<32x128xf32> to vector<128xf32>
    %319 = vector.shape_cast %318 : vector<128xf32> to vector<1x128xf32>
    %c0_272 = arith.constant 0 : index
    %c0_273 = arith.constant 0 : index
    %320 = vector.load %arg11[%c0_272, %c0_273] : memref<1x128xf32, #tpu.memory_space<vmem>>, vector<1x128xf32>
    %cst_274 = arith.constant 1.400000e+01 : f32
    %321 = vector.broadcast %cst_274 : f32 to vector<1x128xf32>
    %322 = arith.mulf %321, %320 : vector<1x128xf32>
    %323 = arith.subf %316, %322 : vector<1x128xf32>
    %cst_275 = arith.constant 1.400000e+01 : f32
    %324 = vector.broadcast %cst_275 : f32 to vector<1x128xf32>
    %325 = arith.mulf %324, %320 : vector<1x128xf32>
    %326 = arith.mulf %325, %320 : vector<1x128xf32>
    %327 = arith.subf %319, %326 : vector<1x128xf32>
    %cst_276 = arith.constant 0.055555556 : f32
    %328 = vector.broadcast %cst_276 : f32 to vector<1x128xf32>
    %329 = arith.mulf %323, %328 : vector<1x128xf32>
    %cst_277 = arith.constant 0.055555556 : f32
    %330 = vector.broadcast %cst_277 : f32 to vector<1x128xf32>
    %331 = arith.mulf %327, %330 : vector<1x128xf32>
    %332 = arith.mulf %329, %329 : vector<1x128xf32>
    %333 = arith.subf %331, %332 : vector<1x128xf32>
    %cst_278 = arith.constant 0.000000e+00 : f32
    %334 = vector.broadcast %cst_278 : f32 to vector<1x128xf32>
    %335 = arith.maximumf %333, %334 : vector<1x128xf32>
    %c0_279 = arith.constant 0 : index
    %c0_280 = arith.constant 0 : index
    %336 = vector.load %arg12[%c0_279, %c0_280] : memref<1x128xf32, #tpu.memory_space<vmem>>, vector<1x128xf32>
    %cst_281 = arith.constant 9.99999974E-6 : f32
    %337 = vector.broadcast %cst_281 : f32 to vector<1x128xf32>
    %338 = arith.addf %335, %337 : vector<1x128xf32>
    %339 = math.rsqrt %338 : vector<1x128xf32>
    %340 = arith.mulf %336, %339 : vector<1x128xf32>
    %c0_282 = arith.constant 0 : index
    %c0_283 = arith.constant 0 : index
    %341 = vector.load %arg13[%c0_282, %c0_283] : memref<1x128xf32, #tpu.memory_space<vmem>>, vector<1x128xf32>
    %342 = arith.mulf %329, %340 : vector<1x128xf32>
    %343 = arith.subf %341, %342 : vector<1x128xf32>
    %344 = vector.broadcast %340 : vector<1x128xf32> to vector<32x128xf32>
    %345 = arith.mulf %314, %344 : vector<32x128xf32>
    %346 = vector.broadcast %343 : vector<1x128xf32> to vector<32x128xf32>
    %347 = arith.addf %345, %346 : vector<32x128xf32>
    %cst_284 = arith.constant 0.000000e+00 : f32
    %348 = vector.broadcast %cst_284 : f32 to vector<32x128xf32>
    %349 = arith.cmpf ogt, %347, %348 : vector<32x128xf32>
    %cst_285 = arith.constant 2.000000e-01 : f32
    %350 = vector.broadcast %cst_285 : f32 to vector<32x128xf32>
    %351 = arith.mulf %350, %347 : vector<32x128xf32>
    %352 = arith.select %349, %347, %351 : vector<32x128xi1>, vector<32x128xf32>
    %353 = arith.truncf %352 : vector<32x128xf32> to vector<32x128xbf16>
    %cst_286 = arith.constant 0.000000e+00 : f32
    %354 = vector.broadcast %cst_286 : f32 to vector<16x128xf32>
    %c0_287 = arith.constant 0 : index
    %c0_288 = arith.constant 0 : index
    %c0_289 = arith.constant 0 : index
    %355 = vector.load %arg14[%c0_287, %c0_288, %c0_289] : memref<16x16x32xbf16, #tpu.memory_space<vmem>>, vector<1x16x32xbf16>
    %356 = vector.shape_cast %355 : vector<1x16x32xbf16> to vector<16x32xbf16>
    %cst_290 = arith.constant dense<0.000000e+00> : vector<16x128xf32>
    %357 = tpu.matmul %356, %353, %cst_290 {dimension_numbers = #tpu.dot_dimension_numbers<[1], [0], [0], [1], [0, 0, 1, 1], [], []>} : vector<16x32xbf16>, vector<32x128xbf16>, vector<16x128xf32> -> vector<16x128xf32>
    %358 = arith.truncf %357 : vector<16x128xf32> to vector<16x128xbf16>
    %c0_291 = arith.constant 0 : index
    %c0_292 = arith.constant 0 : index
    %c0_293 = arith.constant 0 : index
    %359 = vector.load %arg15[%c0_291, %c0_292, %c0_293] : memref<16x128x128xbf16, #tpu.memory_space<vmem>>, vector<1x128x128xbf16>
    %360 = vector.shape_cast %359 : vector<1x128x128xbf16> to vector<128x128xbf16>
    %cst_294 = arith.constant dense<0.000000e+00> : vector<16x128xf32>
    %361 = tpu.matmul %358, %360, %cst_294 {dimension_numbers = #tpu.dot_dimension_numbers<[1], [0], [0], [1], [0, 0, 1, 1], [], []>} : vector<16x128xbf16>, vector<128x128xbf16>, vector<16x128xf32> -> vector<16x128xf32>
    %362 = arith.addf %354, %361 : vector<16x128xf32>
    %c1_295 = arith.constant 1 : index
    %c0_296 = arith.constant 0 : index
    %c0_297 = arith.constant 0 : index
    %363 = vector.load %arg14[%c1_295, %c0_296, %c0_297] : memref<16x16x32xbf16, #tpu.memory_space<vmem>>, vector<1x16x32xbf16>
    %364 = vector.shape_cast %363 : vector<1x16x32xbf16> to vector<16x32xbf16>
    %cst_298 = arith.constant dense<0.000000e+00> : vector<16x128xf32>
    %365 = tpu.matmul %364, %353, %cst_298 {dimension_numbers = #tpu.dot_dimension_numbers<[1], [0], [0], [1], [0, 0, 1, 1], [], []>} : vector<16x32xbf16>, vector<32x128xbf16>, vector<16x128xf32> -> vector<16x128xf32>
    %366 = arith.truncf %365 : vector<16x128xf32> to vector<16x128xbf16>
    %c1_299 = arith.constant 1 : index
    %c0_300 = arith.constant 0 : index
    %c0_301 = arith.constant 0 : index
    %367 = vector.load %arg15[%c1_299, %c0_300, %c0_301] : memref<16x128x128xbf16, #tpu.memory_space<vmem>>, vector<1x128x128xbf16>
    %368 = vector.shape_cast %367 : vector<1x128x128xbf16> to vector<128x128xbf16>
    %cst_302 = arith.constant dense<0.000000e+00> : vector<16x128xf32>
    %369 = tpu.matmul %366, %368, %cst_302 {dimension_numbers = #tpu.dot_dimension_numbers<[1], [0], [0], [1], [0, 0, 1, 1], [], []>} : vector<16x128xbf16>, vector<128x128xbf16>, vector<16x128xf32> -> vector<16x128xf32>
    %370 = arith.addf %362, %369 : vector<16x128xf32>
    %c2_303 = arith.constant 2 : index
    %c0_304 = arith.constant 0 : index
    %c0_305 = arith.constant 0 : index
    %371 = vector.load %arg14[%c2_303, %c0_304, %c0_305] : memref<16x16x32xbf16, #tpu.memory_space<vmem>>, vector<1x16x32xbf16>
    %372 = vector.shape_cast %371 : vector<1x16x32xbf16> to vector<16x32xbf16>
    %cst_306 = arith.constant dense<0.000000e+00> : vector<16x128xf32>
    %373 = tpu.matmul %372, %353, %cst_306 {dimension_numbers = #tpu.dot_dimension_numbers<[1], [0], [0], [1], [0, 0, 1, 1], [], []>} : vector<16x32xbf16>, vector<32x128xbf16>, vector<16x128xf32> -> vector<16x128xf32>
    %374 = arith.truncf %373 : vector<16x128xf32> to vector<16x128xbf16>
    %c2_307 = arith.constant 2 : index
    %c0_308 = arith.constant 0 : index
    %c0_309 = arith.constant 0 : index
    %375 = vector.load %arg15[%c2_307, %c0_308, %c0_309] : memref<16x128x128xbf16, #tpu.memory_space<vmem>>, vector<1x128x128xbf16>
    %376 = vector.shape_cast %375 : vector<1x128x128xbf16> to vector<128x128xbf16>
    %cst_310 = arith.constant dense<0.000000e+00> : vector<16x128xf32>
    %377 = tpu.matmul %374, %376, %cst_310 {dimension_numbers = #tpu.dot_dimension_numbers<[1], [0], [0], [1], [0, 0, 1, 1], [], []>} : vector<16x128xbf16>, vector<128x128xbf16>, vector<16x128xf32> -> vector<16x128xf32>
    %378 = arith.addf %370, %377 : vector<16x128xf32>
    %c3_311 = arith.constant 3 : index
    %c0_312 = arith.constant 0 : index
    %c0_313 = arith.constant 0 : index
    %379 = vector.load %arg14[%c3_311, %c0_312, %c0_313] : memref<16x16x32xbf16, #tpu.memory_space<vmem>>, vector<1x16x32xbf16>
    %380 = vector.shape_cast %379 : vector<1x16x32xbf16> to vector<16x32xbf16>
    %cst_314 = arith.constant dense<0.000000e+00> : vector<16x128xf32>
    %381 = tpu.matmul %380, %353, %cst_314 {dimension_numbers = #tpu.dot_dimension_numbers<[1], [0], [0], [1], [0, 0, 1, 1], [], []>} : vector<16x32xbf16>, vector<32x128xbf16>, vector<16x128xf32> -> vector<16x128xf32>
    %382 = arith.truncf %381 : vector<16x128xf32> to vector<16x128xbf16>
    %c3_315 = arith.constant 3 : index
    %c0_316 = arith.constant 0 : index
    %c0_317 = arith.constant 0 : index
    %383 = vector.load %arg15[%c3_315, %c0_316, %c0_317] : memref<16x128x128xbf16, #tpu.memory_space<vmem>>, vector<1x128x128xbf16>
    %384 = vector.shape_cast %383 : vector<1x128x128xbf16> to vector<128x128xbf16>
    %cst_318 = arith.constant dense<0.000000e+00> : vector<16x128xf32>
    %385 = tpu.matmul %382, %384, %cst_318 {dimension_numbers = #tpu.dot_dimension_numbers<[1], [0], [0], [1], [0, 0, 1, 1], [], []>} : vector<16x128xbf16>, vector<128x128xbf16>, vector<16x128xf32> -> vector<16x128xf32>
    %386 = arith.addf %378, %385 : vector<16x128xf32>
    %c4_319 = arith.constant 4 : index
    %c0_320 = arith.constant 0 : index
    %c0_321 = arith.constant 0 : index
    %387 = vector.load %arg14[%c4_319, %c0_320, %c0_321] : memref<16x16x32xbf16, #tpu.memory_space<vmem>>, vector<1x16x32xbf16>
    %388 = vector.shape_cast %387 : vector<1x16x32xbf16> to vector<16x32xbf16>
    %cst_322 = arith.constant dense<0.000000e+00> : vector<16x128xf32>
    %389 = tpu.matmul %388, %353, %cst_322 {dimension_numbers = #tpu.dot_dimension_numbers<[1], [0], [0], [1], [0, 0, 1, 1], [], []>} : vector<16x32xbf16>, vector<32x128xbf16>, vector<16x128xf32> -> vector<16x128xf32>
    %390 = arith.truncf %389 : vector<16x128xf32> to vector<16x128xbf16>
    %c4_323 = arith.constant 4 : index
    %c0_324 = arith.constant 0 : index
    %c0_325 = arith.constant 0 : index
    %391 = vector.load %arg15[%c4_323, %c0_324, %c0_325] : memref<16x128x128xbf16, #tpu.memory_space<vmem>>, vector<1x128x128xbf16>
    %392 = vector.shape_cast %391 : vector<1x128x128xbf16> to vector<128x128xbf16>
    %cst_326 = arith.constant dense<0.000000e+00> : vector<16x128xf32>
    %393 = tpu.matmul %390, %392, %cst_326 {dimension_numbers = #tpu.dot_dimension_numbers<[1], [0], [0], [1], [0, 0, 1, 1], [], []>} : vector<16x128xbf16>, vector<128x128xbf16>, vector<16x128xf32> -> vector<16x128xf32>
    %394 = arith.addf %386, %393 : vector<16x128xf32>
    %c5_327 = arith.constant 5 : index
    %c0_328 = arith.constant 0 : index
    %c0_329 = arith.constant 0 : index
    %395 = vector.load %arg14[%c5_327, %c0_328, %c0_329] : memref<16x16x32xbf16, #tpu.memory_space<vmem>>, vector<1x16x32xbf16>
    %396 = vector.shape_cast %395 : vector<1x16x32xbf16> to vector<16x32xbf16>
    %cst_330 = arith.constant dense<0.000000e+00> : vector<16x128xf32>
    %397 = tpu.matmul %396, %353, %cst_330 {dimension_numbers = #tpu.dot_dimension_numbers<[1], [0], [0], [1], [0, 0, 1, 1], [], []>} : vector<16x32xbf16>, vector<32x128xbf16>, vector<16x128xf32> -> vector<16x128xf32>
    %398 = arith.truncf %397 : vector<16x128xf32> to vector<16x128xbf16>
    %c5_331 = arith.constant 5 : index
    %c0_332 = arith.constant 0 : index
    %c0_333 = arith.constant 0 : index
    %399 = vector.load %arg15[%c5_331, %c0_332, %c0_333] : memref<16x128x128xbf16, #tpu.memory_space<vmem>>, vector<1x128x128xbf16>
    %400 = vector.shape_cast %399 : vector<1x128x128xbf16> to vector<128x128xbf16>
    %cst_334 = arith.constant dense<0.000000e+00> : vector<16x128xf32>
    %401 = tpu.matmul %398, %400, %cst_334 {dimension_numbers = #tpu.dot_dimension_numbers<[1], [0], [0], [1], [0, 0, 1, 1], [], []>} : vector<16x128xbf16>, vector<128x128xbf16>, vector<16x128xf32> -> vector<16x128xf32>
    %402 = arith.addf %394, %401 : vector<16x128xf32>
    %c6_335 = arith.constant 6 : index
    %c0_336 = arith.constant 0 : index
    %c0_337 = arith.constant 0 : index
    %403 = vector.load %arg14[%c6_335, %c0_336, %c0_337] : memref<16x16x32xbf16, #tpu.memory_space<vmem>>, vector<1x16x32xbf16>
    %404 = vector.shape_cast %403 : vector<1x16x32xbf16> to vector<16x32xbf16>
    %cst_338 = arith.constant dense<0.000000e+00> : vector<16x128xf32>
    %405 = tpu.matmul %404, %353, %cst_338 {dimension_numbers = #tpu.dot_dimension_numbers<[1], [0], [0], [1], [0, 0, 1, 1], [], []>} : vector<16x32xbf16>, vector<32x128xbf16>, vector<16x128xf32> -> vector<16x128xf32>
    %406 = arith.truncf %405 : vector<16x128xf32> to vector<16x128xbf16>
    %c6_339 = arith.constant 6 : index
    %c0_340 = arith.constant 0 : index
    %c0_341 = arith.constant 0 : index
    %407 = vector.load %arg15[%c6_339, %c0_340, %c0_341] : memref<16x128x128xbf16, #tpu.memory_space<vmem>>, vector<1x128x128xbf16>
    %408 = vector.shape_cast %407 : vector<1x128x128xbf16> to vector<128x128xbf16>
    %cst_342 = arith.constant dense<0.000000e+00> : vector<16x128xf32>
    %409 = tpu.matmul %406, %408, %cst_342 {dimension_numbers = #tpu.dot_dimension_numbers<[1], [0], [0], [1], [0, 0, 1, 1], [], []>} : vector<16x128xbf16>, vector<128x128xbf16>, vector<16x128xf32> -> vector<16x128xf32>
    %410 = arith.addf %402, %409 : vector<16x128xf32>
    %c7_343 = arith.constant 7 : index
    %c0_344 = arith.constant 0 : index
    %c0_345 = arith.constant 0 : index
    %411 = vector.load %arg14[%c7_343, %c0_344, %c0_345] : memref<16x16x32xbf16, #tpu.memory_space<vmem>>, vector<1x16x32xbf16>
    %412 = vector.shape_cast %411 : vector<1x16x32xbf16> to vector<16x32xbf16>
    %cst_346 = arith.constant dense<0.000000e+00> : vector<16x128xf32>
    %413 = tpu.matmul %412, %353, %cst_346 {dimension_numbers = #tpu.dot_dimension_numbers<[1], [0], [0], [1], [0, 0, 1, 1], [], []>} : vector<16x32xbf16>, vector<32x128xbf16>, vector<16x128xf32> -> vector<16x128xf32>
    %414 = arith.truncf %413 : vector<16x128xf32> to vector<16x128xbf16>
    %c7_347 = arith.constant 7 : index
    %c0_348 = arith.constant 0 : index
    %c0_349 = arith.constant 0 : index
    %415 = vector.load %arg15[%c7_347, %c0_348, %c0_349] : memref<16x128x128xbf16, #tpu.memory_space<vmem>>, vector<1x128x128xbf16>
    %416 = vector.shape_cast %415 : vector<1x128x128xbf16> to vector<128x128xbf16>
    %cst_350 = arith.constant dense<0.000000e+00> : vector<16x128xf32>
    %417 = tpu.matmul %414, %416, %cst_350 {dimension_numbers = #tpu.dot_dimension_numbers<[1], [0], [0], [1], [0, 0, 1, 1], [], []>} : vector<16x128xbf16>, vector<128x128xbf16>, vector<16x128xf32> -> vector<16x128xf32>
    %418 = arith.addf %410, %417 : vector<16x128xf32>
    %c8_351 = arith.constant 8 : index
    %c0_352 = arith.constant 0 : index
    %c0_353 = arith.constant 0 : index
    %419 = vector.load %arg14[%c8_351, %c0_352, %c0_353] : memref<16x16x32xbf16, #tpu.memory_space<vmem>>, vector<1x16x32xbf16>
    %420 = vector.shape_cast %419 : vector<1x16x32xbf16> to vector<16x32xbf16>
    %cst_354 = arith.constant dense<0.000000e+00> : vector<16x128xf32>
    %421 = tpu.matmul %420, %353, %cst_354 {dimension_numbers = #tpu.dot_dimension_numbers<[1], [0], [0], [1], [0, 0, 1, 1], [], []>} : vector<16x32xbf16>, vector<32x128xbf16>, vector<16x128xf32> -> vector<16x128xf32>
    %422 = arith.truncf %421 : vector<16x128xf32> to vector<16x128xbf16>
    %c8_355 = arith.constant 8 : index
    %c0_356 = arith.constant 0 : index
    %c0_357 = arith.constant 0 : index
    %423 = vector.load %arg15[%c8_355, %c0_356, %c0_357] : memref<16x128x128xbf16, #tpu.memory_space<vmem>>, vector<1x128x128xbf16>
    %424 = vector.shape_cast %423 : vector<1x128x128xbf16> to vector<128x128xbf16>
    %cst_358 = arith.constant dense<0.000000e+00> : vector<16x128xf32>
    %425 = tpu.matmul %422, %424, %cst_358 {dimension_numbers = #tpu.dot_dimension_numbers<[1], [0], [0], [1], [0, 0, 1, 1], [], []>} : vector<16x128xbf16>, vector<128x128xbf16>, vector<16x128xf32> -> vector<16x128xf32>
    %426 = arith.addf %418, %425 : vector<16x128xf32>
    %c9_359 = arith.constant 9 : index
    %c0_360 = arith.constant 0 : index
    %c0_361 = arith.constant 0 : index
    %427 = vector.load %arg14[%c9_359, %c0_360, %c0_361] : memref<16x16x32xbf16, #tpu.memory_space<vmem>>, vector<1x16x32xbf16>
    %428 = vector.shape_cast %427 : vector<1x16x32xbf16> to vector<16x32xbf16>
    %cst_362 = arith.constant dense<0.000000e+00> : vector<16x128xf32>
    %429 = tpu.matmul %428, %353, %cst_362 {dimension_numbers = #tpu.dot_dimension_numbers<[1], [0], [0], [1], [0, 0, 1, 1], [], []>} : vector<16x32xbf16>, vector<32x128xbf16>, vector<16x128xf32> -> vector<16x128xf32>
    %430 = arith.truncf %429 : vector<16x128xf32> to vector<16x128xbf16>
    %c9_363 = arith.constant 9 : index
    %c0_364 = arith.constant 0 : index
    %c0_365 = arith.constant 0 : index
    %431 = vector.load %arg15[%c9_363, %c0_364, %c0_365] : memref<16x128x128xbf16, #tpu.memory_space<vmem>>, vector<1x128x128xbf16>
    %432 = vector.shape_cast %431 : vector<1x128x128xbf16> to vector<128x128xbf16>
    %cst_366 = arith.constant dense<0.000000e+00> : vector<16x128xf32>
    %433 = tpu.matmul %430, %432, %cst_366 {dimension_numbers = #tpu.dot_dimension_numbers<[1], [0], [0], [1], [0, 0, 1, 1], [], []>} : vector<16x128xbf16>, vector<128x128xbf16>, vector<16x128xf32> -> vector<16x128xf32>
    %434 = arith.addf %426, %433 : vector<16x128xf32>
    %c10_367 = arith.constant 10 : index
    %c0_368 = arith.constant 0 : index
    %c0_369 = arith.constant 0 : index
    %435 = vector.load %arg14[%c10_367, %c0_368, %c0_369] : memref<16x16x32xbf16, #tpu.memory_space<vmem>>, vector<1x16x32xbf16>
    %436 = vector.shape_cast %435 : vector<1x16x32xbf16> to vector<16x32xbf16>
    %cst_370 = arith.constant dense<0.000000e+00> : vector<16x128xf32>
    %437 = tpu.matmul %436, %353, %cst_370 {dimension_numbers = #tpu.dot_dimension_numbers<[1], [0], [0], [1], [0, 0, 1, 1], [], []>} : vector<16x32xbf16>, vector<32x128xbf16>, vector<16x128xf32> -> vector<16x128xf32>
    %438 = arith.truncf %437 : vector<16x128xf32> to vector<16x128xbf16>
    %c10_371 = arith.constant 10 : index
    %c0_372 = arith.constant 0 : index
    %c0_373 = arith.constant 0 : index
    %439 = vector.load %arg15[%c10_371, %c0_372, %c0_373] : memref<16x128x128xbf16, #tpu.memory_space<vmem>>, vector<1x128x128xbf16>
    %440 = vector.shape_cast %439 : vector<1x128x128xbf16> to vector<128x128xbf16>
    %cst_374 = arith.constant dense<0.000000e+00> : vector<16x128xf32>
    %441 = tpu.matmul %438, %440, %cst_374 {dimension_numbers = #tpu.dot_dimension_numbers<[1], [0], [0], [1], [0, 0, 1, 1], [], []>} : vector<16x128xbf16>, vector<128x128xbf16>, vector<16x128xf32> -> vector<16x128xf32>
    %442 = arith.addf %434, %441 : vector<16x128xf32>
    %c11_375 = arith.constant 11 : index
    %c0_376 = arith.constant 0 : index
    %c0_377 = arith.constant 0 : index
    %443 = vector.load %arg14[%c11_375, %c0_376, %c0_377] : memref<16x16x32xbf16, #tpu.memory_space<vmem>>, vector<1x16x32xbf16>
    %444 = vector.shape_cast %443 : vector<1x16x32xbf16> to vector<16x32xbf16>
    %cst_378 = arith.constant dense<0.000000e+00> : vector<16x128xf32>
    %445 = tpu.matmul %444, %353, %cst_378 {dimension_numbers = #tpu.dot_dimension_numbers<[1], [0], [0], [1], [0, 0, 1, 1], [], []>} : vector<16x32xbf16>, vector<32x128xbf16>, vector<16x128xf32> -> vector<16x128xf32>
    %446 = arith.truncf %445 : vector<16x128xf32> to vector<16x128xbf16>
    %c11_379 = arith.constant 11 : index
    %c0_380 = arith.constant 0 : index
    %c0_381 = arith.constant 0 : index
    %447 = vector.load %arg15[%c11_379, %c0_380, %c0_381] : memref<16x128x128xbf16, #tpu.memory_space<vmem>>, vector<1x128x128xbf16>
    %448 = vector.shape_cast %447 : vector<1x128x128xbf16> to vector<128x128xbf16>
    %cst_382 = arith.constant dense<0.000000e+00> : vector<16x128xf32>
    %449 = tpu.matmul %446, %448, %cst_382 {dimension_numbers = #tpu.dot_dimension_numbers<[1], [0], [0], [1], [0, 0, 1, 1], [], []>} : vector<16x128xbf16>, vector<128x128xbf16>, vector<16x128xf32> -> vector<16x128xf32>
    %450 = arith.addf %442, %449 : vector<16x128xf32>
    %c12_383 = arith.constant 12 : index
    %c0_384 = arith.constant 0 : index
    %c0_385 = arith.constant 0 : index
    %451 = vector.load %arg14[%c12_383, %c0_384, %c0_385] : memref<16x16x32xbf16, #tpu.memory_space<vmem>>, vector<1x16x32xbf16>
    %452 = vector.shape_cast %451 : vector<1x16x32xbf16> to vector<16x32xbf16>
    %cst_386 = arith.constant dense<0.000000e+00> : vector<16x128xf32>
    %453 = tpu.matmul %452, %353, %cst_386 {dimension_numbers = #tpu.dot_dimension_numbers<[1], [0], [0], [1], [0, 0, 1, 1], [], []>} : vector<16x32xbf16>, vector<32x128xbf16>, vector<16x128xf32> -> vector<16x128xf32>
    %454 = arith.truncf %453 : vector<16x128xf32> to vector<16x128xbf16>
    %c12_387 = arith.constant 12 : index
    %c0_388 = arith.constant 0 : index
    %c0_389 = arith.constant 0 : index
    %455 = vector.load %arg15[%c12_387, %c0_388, %c0_389] : memref<16x128x128xbf16, #tpu.memory_space<vmem>>, vector<1x128x128xbf16>
    %456 = vector.shape_cast %455 : vector<1x128x128xbf16> to vector<128x128xbf16>
    %cst_390 = arith.constant dense<0.000000e+00> : vector<16x128xf32>
    %457 = tpu.matmul %454, %456, %cst_390 {dimension_numbers = #tpu.dot_dimension_numbers<[1], [0], [0], [1], [0, 0, 1, 1], [], []>} : vector<16x128xbf16>, vector<128x128xbf16>, vector<16x128xf32> -> vector<16x128xf32>
    %458 = arith.addf %450, %457 : vector<16x128xf32>
    %c13_391 = arith.constant 13 : index
    %c0_392 = arith.constant 0 : index
    %c0_393 = arith.constant 0 : index
    %459 = vector.load %arg14[%c13_391, %c0_392, %c0_393] : memref<16x16x32xbf16, #tpu.memory_space<vmem>>, vector<1x16x32xbf16>
    %460 = vector.shape_cast %459 : vector<1x16x32xbf16> to vector<16x32xbf16>
    %cst_394 = arith.constant dense<0.000000e+00> : vector<16x128xf32>
    %461 = tpu.matmul %460, %353, %cst_394 {dimension_numbers = #tpu.dot_dimension_numbers<[1], [0], [0], [1], [0, 0, 1, 1], [], []>} : vector<16x32xbf16>, vector<32x128xbf16>, vector<16x128xf32> -> vector<16x128xf32>
    %462 = arith.truncf %461 : vector<16x128xf32> to vector<16x128xbf16>
    %c13_395 = arith.constant 13 : index
    %c0_396 = arith.constant 0 : index
    %c0_397 = arith.constant 0 : index
    %463 = vector.load %arg15[%c13_395, %c0_396, %c0_397] : memref<16x128x128xbf16, #tpu.memory_space<vmem>>, vector<1x128x128xbf16>
    %464 = vector.shape_cast %463 : vector<1x128x128xbf16> to vector<128x128xbf16>
    %cst_398 = arith.constant dense<0.000000e+00> : vector<16x128xf32>
    %465 = tpu.matmul %462, %464, %cst_398 {dimension_numbers = #tpu.dot_dimension_numbers<[1], [0], [0], [1], [0, 0, 1, 1], [], []>} : vector<16x128xbf16>, vector<128x128xbf16>, vector<16x128xf32> -> vector<16x128xf32>
    %466 = arith.addf %458, %465 : vector<16x128xf32>
    %c14_399 = arith.constant 14 : index
    %c0_400 = arith.constant 0 : index
    %c0_401 = arith.constant 0 : index
    %467 = vector.load %arg14[%c14_399, %c0_400, %c0_401] : memref<16x16x32xbf16, #tpu.memory_space<vmem>>, vector<1x16x32xbf16>
    %468 = vector.shape_cast %467 : vector<1x16x32xbf16> to vector<16x32xbf16>
    %cst_402 = arith.constant dense<0.000000e+00> : vector<16x128xf32>
    %469 = tpu.matmul %468, %353, %cst_402 {dimension_numbers = #tpu.dot_dimension_numbers<[1], [0], [0], [1], [0, 0, 1, 1], [], []>} : vector<16x32xbf16>, vector<32x128xbf16>, vector<16x128xf32> -> vector<16x128xf32>
    %470 = arith.truncf %469 : vector<16x128xf32> to vector<16x128xbf16>
    %c14_403 = arith.constant 14 : index
    %c0_404 = arith.constant 0 : index
    %c0_405 = arith.constant 0 : index
    %471 = vector.load %arg15[%c14_403, %c0_404, %c0_405] : memref<16x128x128xbf16, #tpu.memory_space<vmem>>, vector<1x128x128xbf16>
    %472 = vector.shape_cast %471 : vector<1x128x128xbf16> to vector<128x128xbf16>
    %cst_406 = arith.constant dense<0.000000e+00> : vector<16x128xf32>
    %473 = tpu.matmul %470, %472, %cst_406 {dimension_numbers = #tpu.dot_dimension_numbers<[1], [0], [0], [1], [0, 0, 1, 1], [], []>} : vector<16x128xbf16>, vector<128x128xbf16>, vector<16x128xf32> -> vector<16x128xf32>
    %474 = arith.addf %466, %473 : vector<16x128xf32>
    %c15_407 = arith.constant 15 : index
    %c0_408 = arith.constant 0 : index
    %c0_409 = arith.constant 0 : index
    %475 = vector.load %arg14[%c15_407, %c0_408, %c0_409] : memref<16x16x32xbf16, #tpu.memory_space<vmem>>, vector<1x16x32xbf16>
    %476 = vector.shape_cast %475 : vector<1x16x32xbf16> to vector<16x32xbf16>
    %cst_410 = arith.constant dense<0.000000e+00> : vector<16x128xf32>
    %477 = tpu.matmul %476, %353, %cst_410 {dimension_numbers = #tpu.dot_dimension_numbers<[1], [0], [0], [1], [0, 0, 1, 1], [], []>} : vector<16x32xbf16>, vector<32x128xbf16>, vector<16x128xf32> -> vector<16x128xf32>
    %478 = arith.truncf %477 : vector<16x128xf32> to vector<16x128xbf16>
    %c15_411 = arith.constant 15 : index
    %c0_412 = arith.constant 0 : index
    %c0_413 = arith.constant 0 : index
    %479 = vector.load %arg15[%c15_411, %c0_412, %c0_413] : memref<16x128x128xbf16, #tpu.memory_space<vmem>>, vector<1x128x128xbf16>
    %480 = vector.shape_cast %479 : vector<1x128x128xbf16> to vector<128x128xbf16>
    %cst_414 = arith.constant dense<0.000000e+00> : vector<16x128xf32>
    %481 = tpu.matmul %478, %480, %cst_414 {dimension_numbers = #tpu.dot_dimension_numbers<[1], [0], [0], [1], [0, 0, 1, 1], [], []>} : vector<16x128xbf16>, vector<128x128xbf16>, vector<16x128xf32> -> vector<16x128xf32>
    %482 = arith.addf %474, %481 : vector<16x128xf32>
    %c0_415 = arith.constant 0 : index
    %c0_416 = arith.constant 0 : index
    %483 = vector.load %arg16[%c0_415, %c0_416] : memref<1x128xf32, #tpu.memory_space<vmem>>, vector<1x128xf32>
    %484 = vector.broadcast %483 : vector<1x128xf32> to vector<16x128xf32>
    %485 = arith.addf %482, %484 : vector<16x128xf32>
    %cst_417 = arith.constant dense<0.000000e+00> : vector<128xf32>
    %486 = vector.multi_reduction <add>, %485, %cst_417 [0] : vector<16x128xf32> to vector<128xf32>
    %487 = vector.shape_cast %486 : vector<128xf32> to vector<1x128xf32>
    %488 = arith.mulf %485, %485 : vector<16x128xf32>
    %cst_418 = arith.constant dense<0.000000e+00> : vector<128xf32>
    %489 = vector.multi_reduction <add>, %488, %cst_418 [0] : vector<16x128xf32> to vector<128xf32>
    %490 = vector.shape_cast %489 : vector<128xf32> to vector<1x128xf32>
    %c0_419 = arith.constant 0 : index
    %c0_420 = arith.constant 0 : index
    %491 = vector.load %arg16[%c0_419, %c0_420] : memref<1x128xf32, #tpu.memory_space<vmem>>, vector<1x128xf32>
    %cst_421 = arith.constant 8.000000e+00 : f32
    %492 = vector.broadcast %cst_421 : f32 to vector<1x128xf32>
    %493 = arith.mulf %492, %491 : vector<1x128xf32>
    %494 = arith.subf %487, %493 : vector<1x128xf32>
    %cst_422 = arith.constant 8.000000e+00 : f32
    %495 = vector.broadcast %cst_422 : f32 to vector<1x128xf32>
    %496 = arith.mulf %495, %491 : vector<1x128xf32>
    %497 = arith.mulf %496, %491 : vector<1x128xf32>
    %498 = arith.subf %490, %497 : vector<1x128xf32>
    %cst_423 = arith.constant 1.250000e-01 : f32
    %499 = vector.broadcast %cst_423 : f32 to vector<1x128xf32>
    %500 = arith.mulf %494, %499 : vector<1x128xf32>
    %cst_424 = arith.constant 1.250000e-01 : f32
    %501 = vector.broadcast %cst_424 : f32 to vector<1x128xf32>
    %502 = arith.mulf %498, %501 : vector<1x128xf32>
    %503 = arith.mulf %500, %500 : vector<1x128xf32>
    %504 = arith.subf %502, %503 : vector<1x128xf32>
    %cst_425 = arith.constant 0.000000e+00 : f32
    %505 = vector.broadcast %cst_425 : f32 to vector<1x128xf32>
    %506 = arith.maximumf %504, %505 : vector<1x128xf32>
    %c0_426 = arith.constant 0 : index
    %c0_427 = arith.constant 0 : index
    %507 = vector.load %arg17[%c0_426, %c0_427] : memref<1x128xf32, #tpu.memory_space<vmem>>, vector<1x128xf32>
    %cst_428 = arith.constant 9.99999974E-6 : f32
    %508 = vector.broadcast %cst_428 : f32 to vector<1x128xf32>
    %509 = arith.addf %506, %508 : vector<1x128xf32>
    %510 = math.rsqrt %509 : vector<1x128xf32>
    %511 = arith.mulf %507, %510 : vector<1x128xf32>
    %c0_429 = arith.constant 0 : index
    %c0_430 = arith.constant 0 : index
    %512 = vector.load %arg18[%c0_429, %c0_430] : memref<1x128xf32, #tpu.memory_space<vmem>>, vector<1x128xf32>
    %513 = arith.mulf %500, %511 : vector<1x128xf32>
    %514 = arith.subf %512, %513 : vector<1x128xf32>
    %515 = vector.broadcast %511 : vector<1x128xf32> to vector<16x128xf32>
    %516 = arith.mulf %485, %515 : vector<16x128xf32>
    %517 = vector.broadcast %514 : vector<1x128xf32> to vector<16x128xf32>
    %518 = arith.addf %516, %517 : vector<16x128xf32>
    %cst_431 = arith.constant 0.000000e+00 : f32
    %519 = vector.broadcast %cst_431 : f32 to vector<16x128xf32>
    %520 = arith.cmpf ogt, %518, %519 : vector<16x128xf32>
    %cst_432 = arith.constant 2.000000e-01 : f32
    %521 = vector.broadcast %cst_432 : f32 to vector<16x128xf32>
    %522 = arith.mulf %521, %518 : vector<16x128xf32>
    %523 = arith.select %520, %518, %522 : vector<16x128xi1>, vector<16x128xf32>
    %524 = arith.truncf %523 : vector<16x128xf32> to vector<16x128xbf16>
    %cst_433 = arith.constant 0.000000e+00 : f32
    %525 = vector.broadcast %cst_433 : f32 to vector<16x128xf32>
    %c0_434 = arith.constant 0 : index
    %c0_435 = arith.constant 0 : index
    %c0_436 = arith.constant 0 : index
    %526 = vector.load %arg19[%c0_434, %c0_435, %c0_436] : memref<16x16x16xbf16, #tpu.memory_space<vmem>>, vector<1x16x16xbf16>
    %527 = vector.shape_cast %526 : vector<1x16x16xbf16> to vector<16x16xbf16>
    %cst_437 = arith.constant dense<0.000000e+00> : vector<16x128xf32>
    %528 = tpu.matmul %527, %524, %cst_437 {dimension_numbers = #tpu.dot_dimension_numbers<[1], [0], [0], [1], [0, 0, 1, 1], [], []>} : vector<16x16xbf16>, vector<16x128xbf16>, vector<16x128xf32> -> vector<16x128xf32>
    %529 = arith.truncf %528 : vector<16x128xf32> to vector<16x128xbf16>
    %c0_438 = arith.constant 0 : index
    %c0_439 = arith.constant 0 : index
    %c0_440 = arith.constant 0 : index
    %530 = vector.load %arg20[%c0_438, %c0_439, %c0_440] : memref<16x128x128xbf16, #tpu.memory_space<vmem>>, vector<1x128x128xbf16>
    %531 = vector.shape_cast %530 : vector<1x128x128xbf16> to vector<128x128xbf16>
    %cst_441 = arith.constant dense<0.000000e+00> : vector<16x128xf32>
    %532 = tpu.matmul %529, %531, %cst_441 {dimension_numbers = #tpu.dot_dimension_numbers<[1], [0], [0], [1], [0, 0, 1, 1], [], []>} : vector<16x128xbf16>, vector<128x128xbf16>, vector<16x128xf32> -> vector<16x128xf32>
    %533 = arith.addf %525, %532 : vector<16x128xf32>
    %c1_442 = arith.constant 1 : index
    %c0_443 = arith.constant 0 : index
    %c0_444 = arith.constant 0 : index
    %534 = vector.load %arg19[%c1_442, %c0_443, %c0_444] : memref<16x16x16xbf16, #tpu.memory_space<vmem>>, vector<1x16x16xbf16>
    %535 = vector.shape_cast %534 : vector<1x16x16xbf16> to vector<16x16xbf16>
    %cst_445 = arith.constant dense<0.000000e+00> : vector<16x128xf32>
    %536 = tpu.matmul %535, %524, %cst_445 {dimension_numbers = #tpu.dot_dimension_numbers<[1], [0], [0], [1], [0, 0, 1, 1], [], []>} : vector<16x16xbf16>, vector<16x128xbf16>, vector<16x128xf32> -> vector<16x128xf32>
    %537 = arith.truncf %536 : vector<16x128xf32> to vector<16x128xbf16>
    %c1_446 = arith.constant 1 : index
    %c0_447 = arith.constant 0 : index
    %c0_448 = arith.constant 0 : index
    %538 = vector.load %arg20[%c1_446, %c0_447, %c0_448] : memref<16x128x128xbf16, #tpu.memory_space<vmem>>, vector<1x128x128xbf16>
    %539 = vector.shape_cast %538 : vector<1x128x128xbf16> to vector<128x128xbf16>
    %cst_449 = arith.constant dense<0.000000e+00> : vector<16x128xf32>
    %540 = tpu.matmul %537, %539, %cst_449 {dimension_numbers = #tpu.dot_dimension_numbers<[1], [0], [0], [1], [0, 0, 1, 1], [], []>} : vector<16x128xbf16>, vector<128x128xbf16>, vector<16x128xf32> -> vector<16x128xf32>
    %541 = arith.addf %533, %540 : vector<16x128xf32>
    %c2_450 = arith.constant 2 : index
    %c0_451 = arith.constant 0 : index
    %c0_452 = arith.constant 0 : index
    %542 = vector.load %arg19[%c2_450, %c0_451, %c0_452] : memref<16x16x16xbf16, #tpu.memory_space<vmem>>, vector<1x16x16xbf16>
    %543 = vector.shape_cast %542 : vector<1x16x16xbf16> to vector<16x16xbf16>
    %cst_453 = arith.constant dense<0.000000e+00> : vector<16x128xf32>
    %544 = tpu.matmul %543, %524, %cst_453 {dimension_numbers = #tpu.dot_dimension_numbers<[1], [0], [0], [1], [0, 0, 1, 1], [], []>} : vector<16x16xbf16>, vector<16x128xbf16>, vector<16x128xf32> -> vector<16x128xf32>
    %545 = arith.truncf %544 : vector<16x128xf32> to vector<16x128xbf16>
    %c2_454 = arith.constant 2 : index
    %c0_455 = arith.constant 0 : index
    %c0_456 = arith.constant 0 : index
    %546 = vector.load %arg20[%c2_454, %c0_455, %c0_456] : memref<16x128x128xbf16, #tpu.memory_space<vmem>>, vector<1x128x128xbf16>
    %547 = vector.shape_cast %546 : vector<1x128x128xbf16> to vector<128x128xbf16>
    %cst_457 = arith.constant dense<0.000000e+00> : vector<16x128xf32>
    %548 = tpu.matmul %545, %547, %cst_457 {dimension_numbers = #tpu.dot_dimension_numbers<[1], [0], [0], [1], [0, 0, 1, 1], [], []>} : vector<16x128xbf16>, vector<128x128xbf16>, vector<16x128xf32> -> vector<16x128xf32>
    %549 = arith.addf %541, %548 : vector<16x128xf32>
    %c3_458 = arith.constant 3 : index
    %c0_459 = arith.constant 0 : index
    %c0_460 = arith.constant 0 : index
    %550 = vector.load %arg19[%c3_458, %c0_459, %c0_460] : memref<16x16x16xbf16, #tpu.memory_space<vmem>>, vector<1x16x16xbf16>
    %551 = vector.shape_cast %550 : vector<1x16x16xbf16> to vector<16x16xbf16>
    %cst_461 = arith.constant dense<0.000000e+00> : vector<16x128xf32>
    %552 = tpu.matmul %551, %524, %cst_461 {dimension_numbers = #tpu.dot_dimension_numbers<[1], [0], [0], [1], [0, 0, 1, 1], [], []>} : vector<16x16xbf16>, vector<16x128xbf16>, vector<16x128xf32> -> vector<16x128xf32>
    %553 = arith.truncf %552 : vector<16x128xf32> to vector<16x128xbf16>
    %c3_462 = arith.constant 3 : index
    %c0_463 = arith.constant 0 : index
    %c0_464 = arith.constant 0 : index
    %554 = vector.load %arg20[%c3_462, %c0_463, %c0_464] : memref<16x128x128xbf16, #tpu.memory_space<vmem>>, vector<1x128x128xbf16>
    %555 = vector.shape_cast %554 : vector<1x128x128xbf16> to vector<128x128xbf16>
    %cst_465 = arith.constant dense<0.000000e+00> : vector<16x128xf32>
    %556 = tpu.matmul %553, %555, %cst_465 {dimension_numbers = #tpu.dot_dimension_numbers<[1], [0], [0], [1], [0, 0, 1, 1], [], []>} : vector<16x128xbf16>, vector<128x128xbf16>, vector<16x128xf32> -> vector<16x128xf32>
    %557 = arith.addf %549, %556 : vector<16x128xf32>
    %c4_466 = arith.constant 4 : index
    %c0_467 = arith.constant 0 : index
    %c0_468 = arith.constant 0 : index
    %558 = vector.load %arg19[%c4_466, %c0_467, %c0_468] : memref<16x16x16xbf16, #tpu.memory_space<vmem>>, vector<1x16x16xbf16>
    %559 = vector.shape_cast %558 : vector<1x16x16xbf16> to vector<16x16xbf16>
    %cst_469 = arith.constant dense<0.000000e+00> : vector<16x128xf32>
    %560 = tpu.matmul %559, %524, %cst_469 {dimension_numbers = #tpu.dot_dimension_numbers<[1], [0], [0], [1], [0, 0, 1, 1], [], []>} : vector<16x16xbf16>, vector<16x128xbf16>, vector<16x128xf32> -> vector<16x128xf32>
    %561 = arith.truncf %560 : vector<16x128xf32> to vector<16x128xbf16>
    %c4_470 = arith.constant 4 : index
    %c0_471 = arith.constant 0 : index
    %c0_472 = arith.constant 0 : index
    %562 = vector.load %arg20[%c4_470, %c0_471, %c0_472] : memref<16x128x128xbf16, #tpu.memory_space<vmem>>, vector<1x128x128xbf16>
    %563 = vector.shape_cast %562 : vector<1x128x128xbf16> to vector<128x128xbf16>
    %cst_473 = arith.constant dense<0.000000e+00> : vector<16x128xf32>
    %564 = tpu.matmul %561, %563, %cst_473 {dimension_numbers = #tpu.dot_dimension_numbers<[1], [0], [0], [1], [0, 0, 1, 1], [], []>} : vector<16x128xbf16>, vector<128x128xbf16>, vector<16x128xf32> -> vector<16x128xf32>
    %565 = arith.addf %557, %564 : vector<16x128xf32>
    %c5_474 = arith.constant 5 : index
    %c0_475 = arith.constant 0 : index
    %c0_476 = arith.constant 0 : index
    %566 = vector.load %arg19[%c5_474, %c0_475, %c0_476] : memref<16x16x16xbf16, #tpu.memory_space<vmem>>, vector<1x16x16xbf16>
    %567 = vector.shape_cast %566 : vector<1x16x16xbf16> to vector<16x16xbf16>
    %cst_477 = arith.constant dense<0.000000e+00> : vector<16x128xf32>
    %568 = tpu.matmul %567, %524, %cst_477 {dimension_numbers = #tpu.dot_dimension_numbers<[1], [0], [0], [1], [0, 0, 1, 1], [], []>} : vector<16x16xbf16>, vector<16x128xbf16>, vector<16x128xf32> -> vector<16x128xf32>
    %569 = arith.truncf %568 : vector<16x128xf32> to vector<16x128xbf16>
    %c5_478 = arith.constant 5 : index
    %c0_479 = arith.constant 0 : index
    %c0_480 = arith.constant 0 : index
    %570 = vector.load %arg20[%c5_478, %c0_479, %c0_480] : memref<16x128x128xbf16, #tpu.memory_space<vmem>>, vector<1x128x128xbf16>
    %571 = vector.shape_cast %570 : vector<1x128x128xbf16> to vector<128x128xbf16>
    %cst_481 = arith.constant dense<0.000000e+00> : vector<16x128xf32>
    %572 = tpu.matmul %569, %571, %cst_481 {dimension_numbers = #tpu.dot_dimension_numbers<[1], [0], [0], [1], [0, 0, 1, 1], [], []>} : vector<16x128xbf16>, vector<128x128xbf16>, vector<16x128xf32> -> vector<16x128xf32>
    %573 = arith.addf %565, %572 : vector<16x128xf32>
    %c6_482 = arith.constant 6 : index
    %c0_483 = arith.constant 0 : index
    %c0_484 = arith.constant 0 : index
    %574 = vector.load %arg19[%c6_482, %c0_483, %c0_484] : memref<16x16x16xbf16, #tpu.memory_space<vmem>>, vector<1x16x16xbf16>
    %575 = vector.shape_cast %574 : vector<1x16x16xbf16> to vector<16x16xbf16>
    %cst_485 = arith.constant dense<0.000000e+00> : vector<16x128xf32>
    %576 = tpu.matmul %575, %524, %cst_485 {dimension_numbers = #tpu.dot_dimension_numbers<[1], [0], [0], [1], [0, 0, 1, 1], [], []>} : vector<16x16xbf16>, vector<16x128xbf16>, vector<16x128xf32> -> vector<16x128xf32>
    %577 = arith.truncf %576 : vector<16x128xf32> to vector<16x128xbf16>
    %c6_486 = arith.constant 6 : index
    %c0_487 = arith.constant 0 : index
    %c0_488 = arith.constant 0 : index
    %578 = vector.load %arg20[%c6_486, %c0_487, %c0_488] : memref<16x128x128xbf16, #tpu.memory_space<vmem>>, vector<1x128x128xbf16>
    %579 = vector.shape_cast %578 : vector<1x128x128xbf16> to vector<128x128xbf16>
    %cst_489 = arith.constant dense<0.000000e+00> : vector<16x128xf32>
    %580 = tpu.matmul %577, %579, %cst_489 {dimension_numbers = #tpu.dot_dimension_numbers<[1], [0], [0], [1], [0, 0, 1, 1], [], []>} : vector<16x128xbf16>, vector<128x128xbf16>, vector<16x128xf32> -> vector<16x128xf32>
    %581 = arith.addf %573, %580 : vector<16x128xf32>
    %c7_490 = arith.constant 7 : index
    %c0_491 = arith.constant 0 : index
    %c0_492 = arith.constant 0 : index
    %582 = vector.load %arg19[%c7_490, %c0_491, %c0_492] : memref<16x16x16xbf16, #tpu.memory_space<vmem>>, vector<1x16x16xbf16>
    %583 = vector.shape_cast %582 : vector<1x16x16xbf16> to vector<16x16xbf16>
    %cst_493 = arith.constant dense<0.000000e+00> : vector<16x128xf32>
    %584 = tpu.matmul %583, %524, %cst_493 {dimension_numbers = #tpu.dot_dimension_numbers<[1], [0], [0], [1], [0, 0, 1, 1], [], []>} : vector<16x16xbf16>, vector<16x128xbf16>, vector<16x128xf32> -> vector<16x128xf32>
    %585 = arith.truncf %584 : vector<16x128xf32> to vector<16x128xbf16>
    %c7_494 = arith.constant 7 : index
    %c0_495 = arith.constant 0 : index
    %c0_496 = arith.constant 0 : index
    %586 = vector.load %arg20[%c7_494, %c0_495, %c0_496] : memref<16x128x128xbf16, #tpu.memory_space<vmem>>, vector<1x128x128xbf16>
    %587 = vector.shape_cast %586 : vector<1x128x128xbf16> to vector<128x128xbf16>
    %cst_497 = arith.constant dense<0.000000e+00> : vector<16x128xf32>
    %588 = tpu.matmul %585, %587, %cst_497 {dimension_numbers = #tpu.dot_dimension_numbers<[1], [0], [0], [1], [0, 0, 1, 1], [], []>} : vector<16x128xbf16>, vector<128x128xbf16>, vector<16x128xf32> -> vector<16x128xf32>
    %589 = arith.addf %581, %588 : vector<16x128xf32>
    %c8_498 = arith.constant 8 : index
    %c0_499 = arith.constant 0 : index
    %c0_500 = arith.constant 0 : index
    %590 = vector.load %arg19[%c8_498, %c0_499, %c0_500] : memref<16x16x16xbf16, #tpu.memory_space<vmem>>, vector<1x16x16xbf16>
    %591 = vector.shape_cast %590 : vector<1x16x16xbf16> to vector<16x16xbf16>
    %cst_501 = arith.constant dense<0.000000e+00> : vector<16x128xf32>
    %592 = tpu.matmul %591, %524, %cst_501 {dimension_numbers = #tpu.dot_dimension_numbers<[1], [0], [0], [1], [0, 0, 1, 1], [], []>} : vector<16x16xbf16>, vector<16x128xbf16>, vector<16x128xf32> -> vector<16x128xf32>
    %593 = arith.truncf %592 : vector<16x128xf32> to vector<16x128xbf16>
    %c8_502 = arith.constant 8 : index
    %c0_503 = arith.constant 0 : index
    %c0_504 = arith.constant 0 : index
    %594 = vector.load %arg20[%c8_502, %c0_503, %c0_504] : memref<16x128x128xbf16, #tpu.memory_space<vmem>>, vector<1x128x128xbf16>
    %595 = vector.shape_cast %594 : vector<1x128x128xbf16> to vector<128x128xbf16>
    %cst_505 = arith.constant dense<0.000000e+00> : vector<16x128xf32>
    %596 = tpu.matmul %593, %595, %cst_505 {dimension_numbers = #tpu.dot_dimension_numbers<[1], [0], [0], [1], [0, 0, 1, 1], [], []>} : vector<16x128xbf16>, vector<128x128xbf16>, vector<16x128xf32> -> vector<16x128xf32>
    %597 = arith.addf %589, %596 : vector<16x128xf32>
    %c9_506 = arith.constant 9 : index
    %c0_507 = arith.constant 0 : index
    %c0_508 = arith.constant 0 : index
    %598 = vector.load %arg19[%c9_506, %c0_507, %c0_508] : memref<16x16x16xbf16, #tpu.memory_space<vmem>>, vector<1x16x16xbf16>
    %599 = vector.shape_cast %598 : vector<1x16x16xbf16> to vector<16x16xbf16>
    %cst_509 = arith.constant dense<0.000000e+00> : vector<16x128xf32>
    %600 = tpu.matmul %599, %524, %cst_509 {dimension_numbers = #tpu.dot_dimension_numbers<[1], [0], [0], [1], [0, 0, 1, 1], [], []>} : vector<16x16xbf16>, vector<16x128xbf16>, vector<16x128xf32> -> vector<16x128xf32>
    %601 = arith.truncf %600 : vector<16x128xf32> to vector<16x128xbf16>
    %c9_510 = arith.constant 9 : index
    %c0_511 = arith.constant 0 : index
    %c0_512 = arith.constant 0 : index
    %602 = vector.load %arg20[%c9_510, %c0_511, %c0_512] : memref<16x128x128xbf16, #tpu.memory_space<vmem>>, vector<1x128x128xbf16>
    %603 = vector.shape_cast %602 : vector<1x128x128xbf16> to vector<128x128xbf16>
    %cst_513 = arith.constant dense<0.000000e+00> : vector<16x128xf32>
    %604 = tpu.matmul %601, %603, %cst_513 {dimension_numbers = #tpu.dot_dimension_numbers<[1], [0], [0], [1], [0, 0, 1, 1], [], []>} : vector<16x128xbf16>, vector<128x128xbf16>, vector<16x128xf32> -> vector<16x128xf32>
    %605 = arith.addf %597, %604 : vector<16x128xf32>
    %c10_514 = arith.constant 10 : index
    %c0_515 = arith.constant 0 : index
    %c0_516 = arith.constant 0 : index
    %606 = vector.load %arg19[%c10_514, %c0_515, %c0_516] : memref<16x16x16xbf16, #tpu.memory_space<vmem>>, vector<1x16x16xbf16>
    %607 = vector.shape_cast %606 : vector<1x16x16xbf16> to vector<16x16xbf16>
    %cst_517 = arith.constant dense<0.000000e+00> : vector<16x128xf32>
    %608 = tpu.matmul %607, %524, %cst_517 {dimension_numbers = #tpu.dot_dimension_numbers<[1], [0], [0], [1], [0, 0, 1, 1], [], []>} : vector<16x16xbf16>, vector<16x128xbf16>, vector<16x128xf32> -> vector<16x128xf32>
    %609 = arith.truncf %608 : vector<16x128xf32> to vector<16x128xbf16>
    %c10_518 = arith.constant 10 : index
    %c0_519 = arith.constant 0 : index
    %c0_520 = arith.constant 0 : index
    %610 = vector.load %arg20[%c10_518, %c0_519, %c0_520] : memref<16x128x128xbf16, #tpu.memory_space<vmem>>, vector<1x128x128xbf16>
    %611 = vector.shape_cast %610 : vector<1x128x128xbf16> to vector<128x128xbf16>
    %cst_521 = arith.constant dense<0.000000e+00> : vector<16x128xf32>
    %612 = tpu.matmul %609, %611, %cst_521 {dimension_numbers = #tpu.dot_dimension_numbers<[1], [0], [0], [1], [0, 0, 1, 1], [], []>} : vector<16x128xbf16>, vector<128x128xbf16>, vector<16x128xf32> -> vector<16x128xf32>
    %613 = arith.addf %605, %612 : vector<16x128xf32>
    %c11_522 = arith.constant 11 : index
    %c0_523 = arith.constant 0 : index
    %c0_524 = arith.constant 0 : index
    %614 = vector.load %arg19[%c11_522, %c0_523, %c0_524] : memref<16x16x16xbf16, #tpu.memory_space<vmem>>, vector<1x16x16xbf16>
    %615 = vector.shape_cast %614 : vector<1x16x16xbf16> to vector<16x16xbf16>
    %cst_525 = arith.constant dense<0.000000e+00> : vector<16x128xf32>
    %616 = tpu.matmul %615, %524, %cst_525 {dimension_numbers = #tpu.dot_dimension_numbers<[1], [0], [0], [1], [0, 0, 1, 1], [], []>} : vector<16x16xbf16>, vector<16x128xbf16>, vector<16x128xf32> -> vector<16x128xf32>
    %617 = arith.truncf %616 : vector<16x128xf32> to vector<16x128xbf16>
    %c11_526 = arith.constant 11 : index
    %c0_527 = arith.constant 0 : index
    %c0_528 = arith.constant 0 : index
    %618 = vector.load %arg20[%c11_526, %c0_527, %c0_528] : memref<16x128x128xbf16, #tpu.memory_space<vmem>>, vector<1x128x128xbf16>
    %619 = vector.shape_cast %618 : vector<1x128x128xbf16> to vector<128x128xbf16>
    %cst_529 = arith.constant dense<0.000000e+00> : vector<16x128xf32>
    %620 = tpu.matmul %617, %619, %cst_529 {dimension_numbers = #tpu.dot_dimension_numbers<[1], [0], [0], [1], [0, 0, 1, 1], [], []>} : vector<16x128xbf16>, vector<128x128xbf16>, vector<16x128xf32> -> vector<16x128xf32>
    %621 = arith.addf %613, %620 : vector<16x128xf32>
    %c12_530 = arith.constant 12 : index
    %c0_531 = arith.constant 0 : index
    %c0_532 = arith.constant 0 : index
    %622 = vector.load %arg19[%c12_530, %c0_531, %c0_532] : memref<16x16x16xbf16, #tpu.memory_space<vmem>>, vector<1x16x16xbf16>
    %623 = vector.shape_cast %622 : vector<1x16x16xbf16> to vector<16x16xbf16>
    %cst_533 = arith.constant dense<0.000000e+00> : vector<16x128xf32>
    %624 = tpu.matmul %623, %524, %cst_533 {dimension_numbers = #tpu.dot_dimension_numbers<[1], [0], [0], [1], [0, 0, 1, 1], [], []>} : vector<16x16xbf16>, vector<16x128xbf16>, vector<16x128xf32> -> vector<16x128xf32>
    %625 = arith.truncf %624 : vector<16x128xf32> to vector<16x128xbf16>
    %c12_534 = arith.constant 12 : index
    %c0_535 = arith.constant 0 : index
    %c0_536 = arith.constant 0 : index
    %626 = vector.load %arg20[%c12_534, %c0_535, %c0_536] : memref<16x128x128xbf16, #tpu.memory_space<vmem>>, vector<1x128x128xbf16>
    %627 = vector.shape_cast %626 : vector<1x128x128xbf16> to vector<128x128xbf16>
    %cst_537 = arith.constant dense<0.000000e+00> : vector<16x128xf32>
    %628 = tpu.matmul %625, %627, %cst_537 {dimension_numbers = #tpu.dot_dimension_numbers<[1], [0], [0], [1], [0, 0, 1, 1], [], []>} : vector<16x128xbf16>, vector<128x128xbf16>, vector<16x128xf32> -> vector<16x128xf32>
    %629 = arith.addf %621, %628 : vector<16x128xf32>
    %c13_538 = arith.constant 13 : index
    %c0_539 = arith.constant 0 : index
    %c0_540 = arith.constant 0 : index
    %630 = vector.load %arg19[%c13_538, %c0_539, %c0_540] : memref<16x16x16xbf16, #tpu.memory_space<vmem>>, vector<1x16x16xbf16>
    %631 = vector.shape_cast %630 : vector<1x16x16xbf16> to vector<16x16xbf16>
    %cst_541 = arith.constant dense<0.000000e+00> : vector<16x128xf32>
    %632 = tpu.matmul %631, %524, %cst_541 {dimension_numbers = #tpu.dot_dimension_numbers<[1], [0], [0], [1], [0, 0, 1, 1], [], []>} : vector<16x16xbf16>, vector<16x128xbf16>, vector<16x128xf32> -> vector<16x128xf32>
    %633 = arith.truncf %632 : vector<16x128xf32> to vector<16x128xbf16>
    %c13_542 = arith.constant 13 : index
    %c0_543 = arith.constant 0 : index
    %c0_544 = arith.constant 0 : index
    %634 = vector.load %arg20[%c13_542, %c0_543, %c0_544] : memref<16x128x128xbf16, #tpu.memory_space<vmem>>, vector<1x128x128xbf16>
    %635 = vector.shape_cast %634 : vector<1x128x128xbf16> to vector<128x128xbf16>
    %cst_545 = arith.constant dense<0.000000e+00> : vector<16x128xf32>
    %636 = tpu.matmul %633, %635, %cst_545 {dimension_numbers = #tpu.dot_dimension_numbers<[1], [0], [0], [1], [0, 0, 1, 1], [], []>} : vector<16x128xbf16>, vector<128x128xbf16>, vector<16x128xf32> -> vector<16x128xf32>
    %637 = arith.addf %629, %636 : vector<16x128xf32>
    %c14_546 = arith.constant 14 : index
    %c0_547 = arith.constant 0 : index
    %c0_548 = arith.constant 0 : index
    %638 = vector.load %arg19[%c14_546, %c0_547, %c0_548] : memref<16x16x16xbf16, #tpu.memory_space<vmem>>, vector<1x16x16xbf16>
    %639 = vector.shape_cast %638 : vector<1x16x16xbf16> to vector<16x16xbf16>
    %cst_549 = arith.constant dense<0.000000e+00> : vector<16x128xf32>
    %640 = tpu.matmul %639, %524, %cst_549 {dimension_numbers = #tpu.dot_dimension_numbers<[1], [0], [0], [1], [0, 0, 1, 1], [], []>} : vector<16x16xbf16>, vector<16x128xbf16>, vector<16x128xf32> -> vector<16x128xf32>
    %641 = arith.truncf %640 : vector<16x128xf32> to vector<16x128xbf16>
    %c14_550 = arith.constant 14 : index
    %c0_551 = arith.constant 0 : index
    %c0_552 = arith.constant 0 : index
    %642 = vector.load %arg20[%c14_550, %c0_551, %c0_552] : memref<16x128x128xbf16, #tpu.memory_space<vmem>>, vector<1x128x128xbf16>
    %643 = vector.shape_cast %642 : vector<1x128x128xbf16> to vector<128x128xbf16>
    %cst_553 = arith.constant dense<0.000000e+00> : vector<16x128xf32>
    %644 = tpu.matmul %641, %643, %cst_553 {dimension_numbers = #tpu.dot_dimension_numbers<[1], [0], [0], [1], [0, 0, 1, 1], [], []>} : vector<16x128xbf16>, vector<128x128xbf16>, vector<16x128xf32> -> vector<16x128xf32>
    %645 = arith.addf %637, %644 : vector<16x128xf32>
    %c15_554 = arith.constant 15 : index
    %c0_555 = arith.constant 0 : index
    %c0_556 = arith.constant 0 : index
    %646 = vector.load %arg19[%c15_554, %c0_555, %c0_556] : memref<16x16x16xbf16, #tpu.memory_space<vmem>>, vector<1x16x16xbf16>
    %647 = vector.shape_cast %646 : vector<1x16x16xbf16> to vector<16x16xbf16>
    %cst_557 = arith.constant dense<0.000000e+00> : vector<16x128xf32>
    %648 = tpu.matmul %647, %524, %cst_557 {dimension_numbers = #tpu.dot_dimension_numbers<[1], [0], [0], [1], [0, 0, 1, 1], [], []>} : vector<16x16xbf16>, vector<16x128xbf16>, vector<16x128xf32> -> vector<16x128xf32>
    %649 = arith.truncf %648 : vector<16x128xf32> to vector<16x128xbf16>
    %c15_558 = arith.constant 15 : index
    %c0_559 = arith.constant 0 : index
    %c0_560 = arith.constant 0 : index
    %650 = vector.load %arg20[%c15_558, %c0_559, %c0_560] : memref<16x128x128xbf16, #tpu.memory_space<vmem>>, vector<1x128x128xbf16>
    %651 = vector.shape_cast %650 : vector<1x128x128xbf16> to vector<128x128xbf16>
    %cst_561 = arith.constant dense<0.000000e+00> : vector<16x128xf32>
    %652 = tpu.matmul %649, %651, %cst_561 {dimension_numbers = #tpu.dot_dimension_numbers<[1], [0], [0], [1], [0, 0, 1, 1], [], []>} : vector<16x128xbf16>, vector<128x128xbf16>, vector<16x128xf32> -> vector<16x128xf32>
    %653 = arith.addf %645, %652 : vector<16x128xf32>
    %c0_562 = arith.constant 0 : index
    %c0_563 = arith.constant 0 : index
    %654 = vector.load %arg21[%c0_562, %c0_563] : memref<1x128xf32, #tpu.memory_space<vmem>>, vector<1x128xf32>
    %655 = vector.broadcast %654 : vector<1x128xf32> to vector<16x128xf32>
    %656 = arith.addf %653, %655 : vector<16x128xf32>
    %cst_564 = arith.constant 0.000000e+00 : f32
    %657 = vector.broadcast %cst_564 : f32 to vector<16x128xf32>
    %658 = arith.subf %657, %656 : vector<16x128xf32>
    %659 = math.exp %658 : vector<16x128xf32>
    %cst_565 = arith.constant 1.000000e+00 : f32
    %660 = vector.broadcast %cst_565 : f32 to vector<16x128xf32>
    %661 = arith.addf %660, %659 : vector<16x128xf32>
    %cst_566 = arith.constant 1.000000e+00 : f32
    %662 = vector.broadcast %cst_566 : f32 to vector<16x128xf32>
    %663 = arith.divf %662, %661 : vector<16x128xf32>
    %c0_567 = arith.constant 0 : index
    %c0_568 = arith.constant 0 : index
    %664 = vector.load %arg22[%c0_567, %c0_568] : memref<16x128xf32, #tpu.memory_space<vmem>>, vector<16x128xf32>
    tpu.vector_store %arg22[%c0_567, %c0_568], %663 {strides = array<i32>} : memref<16x128xf32, #tpu.memory_space<vmem>>, vector<16x128xf32>,
    return
  }
  func.func @transform_0(%arg0: i32) -> (i32, i32) {
    %c0_i32 = arith.constant 0 : i32
    %c0_i32_0 = arith.constant 0 : i32
    %c0_i32_1 = arith.constant 0 : i32
    return %c0_i32, %c0_i32_0 : i32, i32
  }
  func.func @transform_1(%arg0: i32) -> (i32, i32) {
    %c0_i32 = arith.constant 0 : i32
    %c0_i32_0 = arith.constant 0 : i32
    %c0_i32_1 = arith.constant 0 : i32
    return %c0_i32, %c0_i32_0 : i32, i32
  }
  func.func @transform_2(%arg0: i32) -> (i32, i32) {
    %c0_i32 = arith.constant 0 : i32
    %c0_i32_0 = arith.constant 0 : i32
    %c0_i32_1 = arith.constant 0 : i32
    return %c0_i32, %c0_i32_0 : i32, i32
  }
  func.func @transform_3(%arg0: i32) -> (i32, i32, i32) {
    %c0_i32 = arith.constant 0 : i32
    %c0_i32_0 = arith.constant 0 : i32
    %c0_i32_1 = arith.constant 0 : i32
    %c0_i32_2 = arith.constant 0 : i32
    return %c0_i32, %c0_i32_0, %c0_i32_1 : i32, i32, i32
  }
  func.func @transform_4(%arg0: i32) -> (i32, i32, i32) {
    %c0_i32 = arith.constant 0 : i32
    %c0_i32_0 = arith.constant 0 : i32
    %c0_i32_1 = arith.constant 0 : i32
    %c0_i32_2 = arith.constant 0 : i32
    return %c0_i32, %c0_i32_0, %c0_i32_1 : i32, i32, i32
  }
  func.func @transform_5(%arg0: i32) -> (i32, i32) {
    %c0_i32 = arith.constant 0 : i32
    %c0_i32_0 = arith.constant 0 : i32
    %c0_i32_1 = arith.constant 0 : i32
    return %c0_i32, %c0_i32_0 : i32, i32
  }
  func.func @transform_6(%arg0: i32) -> (i32, i32) {
    %c0_i32 = arith.constant 0 : i32
    %c0_i32_0 = arith.constant 0 : i32
    %c0_i32_1 = arith.constant 0 : i32
    return %c0_i32, %c0_i32_0 : i32, i32
  }
  func.func @transform_7(%arg0: i32) -> (i32, i32) {
    %c0_i32 = arith.constant 0 : i32
    %c0_i32_0 = arith.constant 0 : i32
    %c0_i32_1 = arith.constant 0 : i32
    return %c0_i32, %c0_i32_0 : i32, i32
  }
  func.func @transform_8(%arg0: i32) -> (i32, i32, i32) {
    %c0_i32 = arith.constant 0 : i32
    %c0_i32_0 = arith.constant 0 : i32
    %c0_i32_1 = arith.constant 0 : i32
    %c0_i32_2 = arith.constant 0 : i32
    return %c0_i32, %c0_i32_0, %c0_i32_1 : i32, i32, i32
  }
  func.func @transform_9(%arg0: i32) -> (i32, i32, i32) {
    %c0_i32 = arith.constant 0 : i32
    %c0_i32_0 = arith.constant 0 : i32
    %c0_i32_1 = arith.constant 0 : i32
    %c0_i32_2 = arith.constant 0 : i32
    return %c0_i32, %c0_i32_0, %c0_i32_1 : i32, i32, i32
  }
  func.func @transform_10(%arg0: i32) -> (i32, i32) {
    %c0_i32 = arith.constant 0 : i32
    %c0_i32_0 = arith.constant 0 : i32
    %c0_i32_1 = arith.constant 0 : i32
    return %c0_i32, %c0_i32_0 : i32, i32
  }
  func.func @transform_11(%arg0: i32) -> (i32, i32) {
    %c0_i32 = arith.constant 0 : i32
    %c0_i32_0 = arith.constant 0 : i32
    %c0_i32_1 = arith.constant 0 : i32
    return %c0_i32, %c0_i32_0 : i32, i32
  }
  func.func @transform_12(%arg0: i32) -> (i32, i32) {
    %c0_i32 = arith.constant 0 : i32
    %c0_i32_0 = arith.constant 0 : i32
    %c0_i32_1 = arith.constant 0 : i32
    return %c0_i32, %c0_i32_0 : i32, i32
  }
  func.func @transform_13(%arg0: i32) -> (i32, i32, i32) {
    %c0_i32 = arith.constant 0 : i32
    %c0_i32_0 = arith.constant 0 : i32
    %c0_i32_1 = arith.constant 0 : i32
    %c0_i32_2 = arith.constant 0 : i32
    return %c0_i32, %c0_i32_0, %c0_i32_1 : i32, i32, i32
  }
  func.func @transform_14(%arg0: i32) -> (i32, i32, i32) {
    %c0_i32 = arith.constant 0 : i32
    %c0_i32_0 = arith.constant 0 : i32
    %c0_i32_1 = arith.constant 0 : i32
    %c0_i32_2 = arith.constant 0 : i32
    return %c0_i32, %c0_i32_0, %c0_i32_1 : i32, i32, i32
  }
  func.func @transform_15(%arg0: i32) -> (i32, i32) {
    %c0_i32 = arith.constant 0 : i32
    %c0_i32_0 = arith.constant 0 : i32
    %c0_i32_1 = arith.constant 0 : i32
    return %c0_i32, %c0_i32_0 : i32, i32
  }
  func.func @transform_16(%arg0: i32) -> (i32, i32) {
    %c0_i32 = arith.constant 0 : i32
    %c0_i32_0 = arith.constant 0 : i32
    %c0_i32_1 = arith.constant 0 : i32
    return %c0_i32, %c0_i32_0 : i32, i32
  }
  func.func @transform_17(%arg0: i32) -> (i32, i32) {
    %c0_i32 = arith.constant 0 : i32
    %c0_i32_0 = arith.constant 0 : i32
    %c0_i32_1 = arith.constant 0 : i32
    return %c0_i32, %c0_i32_0 : i32, i32
  }
  func.func @transform_18(%arg0: i32) -> (i32, i32, i32) {
    %c0_i32 = arith.constant 0 : i32
    %c0_i32_0 = arith.constant 0 : i32
    %c0_i32_1 = arith.constant 0 : i32
    %c0_i32_2 = arith.constant 0 : i32
    return %c0_i32, %c0_i32_0, %c0_i32_1 : i32, i32, i32
  }
  func.func @transform_19(%arg0: i32) -> (i32, i32, i32) {
    %c0_i32 = arith.constant 0 : i32
    %c0_i32_0 = arith.constant 0 : i32
    %c0_i32_1 = arith.constant 0 : i32
    %c0_i32_2 = arith.constant 0 : i32
    return %c0_i32, %c0_i32_0, %c0_i32_1 : i32, i32, i32
  }
  func.func @transform_20(%arg0: i32) -> (i32, i32) {
    %c0_i32 = arith.constant 0 : i32
    %c0_i32_0 = arith.constant 0 : i32
    %c0_i32_1 = arith.constant 0 : i32
    return %c0_i32, %c0_i32_0 : i32, i32
  }
  func.func @transform_21(%arg0: i32) -> (i32, i32) {
    %c0_i32 = arith.constant 0 : i32
    %c0_i32_0 = arith.constant 0 : i32
    %c0_i32_1 = arith.constant 0 : i32
    return %c0_i32, %c0_i32_0 : i32, i32
  }
}

</mosaic_0001>

<bundles_post_ra>
// kernel: turbnet_d_forward.1
= control target key start
LH: loop header
LB: loop body
LE: loop exit
PB: predicated region body
PF: predicated region fallthrough
CT: control target
= control target key end

     0   :  { %s18383_s1 = inlined_call_operand.vmem [shape: bf16[128,128], index: 1, kind: input, shape index: {}]   ;;  %s18384_s2 = inlined_call_operand.vmem [shape: f32[1,128], index: 2, kind: input, shape index: {}]   ;;  %s18385_s0 = inlined_call_operand.vmem [shape: bf16[176,128], index: 0, kind: input, shape index: {}]   ;;  %s18386_s3 = inlined_call_operand.vmem [shape: bf16[16,64,176], index: 3, kind: input, shape index: {}]   ;;  %s18387_s4 = inlined_call_operand.vmem [shape: bf16[16,128,128], index: 4, kind: input, shape index: {}]   ;;  %s18388_s5 = inlined_call_operand.vmem [shape: f32[1,128], index: 5, kind: input, shape index: {}]   ;;  %s18389_s9 = inlined_call_operand.vmem [shape: bf16[16,128,128], index: 9, kind: input, shape index: {}]   ;;  %s18390_s6 = inlined_call_operand.vmem [shape: f32[1,128], index: 6, kind: input, shape index: {}]   ;;  %s18391_s7 = inlined_call_operand.vmem [shape: f32[1,128], index: 7, kind: input, shape index: {}]   ;;  %s18392_s8 = inlined_call_operand.vmem [shape: bf16[16,32,64], index: 8, kind: input, shape index: {}]   ;;  %s18393_s10 = inlined_call_operand.vmem [shape: f32[1,128], index: 10, kind: input, shape index: {}]   ;;  %s18394_s14 = inlined_call_operand.vmem [shape: bf16[16,128,128], index: 14, kind: input, shape index: {}]   ;;  %s18395_s11 = inlined_call_operand.vmem [shape: f32[1,128], index: 11, kind: input, shape index: {}]   ;;  %s18396_s12 = inlined_call_operand.vmem [shape: f32[1,128], index: 12, kind: input, shape index: {}]   ;;  %s18397_s13 = inlined_call_operand.vmem [shape: bf16[16,16,32], index: 13, kind: input, shape index: {}]   ;;  %s18398_s15 = inlined_call_operand.vmem [shape: f32[1,128], index: 15, kind: input, shape index: {}]   ;;  %s18399_s19 = inlined_call_operand.vmem [shape: bf16[16,128,128], index: 19, kind: input, shape index: {}]   ;;  %s18400_s16 = inlined_call_operand.vmem [shape: f32[1,128], index: 16, kind: input, shape index: {}]   ;;  %s18401_s17 = inlined_call_operand.vmem [shape: f32[1,128], index: 17, kind: input, shape index: {}]   ;;  %s18402_s18 = inlined_call_operand.vmem [shape: bf16[16,16,16], index: 18, kind: input, shape index: {}]   ;;  %s18403_s20 = inlined_call_operand.vmem [shape: f32[1,128], index: 20, kind: input, shape index: {}]   ;;  %s18404_s21 = inlined_call_operand.vmem [shape: f32[16,128], index: 21, kind: output, shape index: {}]  }
   0x1   :  { %18410 = sst [smem:[#allocation20_spill]] %s18383_s1 }
   0x2   :  { %18411 = sst [smem:[#allocation21_spill]] %s18384_s2 }
   0x3   :  { %18412 = sst [smem:[#allocation22_spill]] %s18385_s0 }
   0x4   :  { %18413 = sst [smem:[#allocation23_spill]] %s18386_s3 }
   0x5   :  { %18414 = sst [smem:[#allocation24_spill]] %s18387_s4 }
   0x6   :  { %18415 = sst [smem:[#allocation25_spill]] %s18388_s5 }
   0x7   :  { %s18416_s26 = sld [smem:[#allocation20_spill]] }
   0x8   :  { %s18417_s28 = sld [smem:[#allocation22_spill]] }
   0x9   :  { %s18418_s2 = sld [smem:[#allocation21_spill]] }
   0xa   :  { %s18419_s0 = sld [smem:[#allocation23_spill]] }
   0xb   :  { %s18420_s1 = sld [smem:[#allocation24_spill]] }
   0xd   :  { %v13926_v0 = vld [vmem:[%s18416_s26 + $0x38] sm:$0xff]  ;;  %v13925_v1 = vld [vmem:[%s18416_s26 + $0x30] sm:$0xff]  ;;  %v13924_v2 = vld [vmem:[%s18416_s26 + $0x28] sm:$0xff] }
   0xe   :  { %225 = vmatpush.bf16.msra.mxu0 %v13926_v0  ;;  %v13923_v3 = vld [vmem:[%s18416_s26 + $0x20] sm:$0xff]  ;;  %v13922_v4 = vld [vmem:[%s18416_s26 + $0x18] sm:$0xff]  ;;  %v13921_v5 = vld [vmem:[%s18416_s26 + $0x10] sm:$0xff] }
   0xf   :  { %v13920_v6 = vld [vmem:[%s18416_s26 + $0x8] sm:$0xff]  ;;  %v13919_v7 = vld [vmem:[%s18416_s26] sm:$0xff]  ;;  %v13910_v10 = vld [vmem:[%s18417_s28 + $0x10] sm:$0xff] }
  0x10   :  { %v13908_v8 = vld [vmem:[%s18417_s28] sm:$0xff]  ;;  %v13909_v9 = vld [vmem:[%s18417_s28 + $0x8] sm:$0xff]  ;;  %v13911_v11 = vld [vmem:[%s18417_s28 + $0x18] sm:$0xff] }
  0x11   :  { %v13912_v12 = vld [vmem:[%s18417_s28 + $0x20] sm:$0xff]  ;;  %v13913_v13 = vld [vmem:[%s18417_s28 + $0x28] sm:$0xff]  ;;  %v13914_v14 = vld [vmem:[%s18417_s28 + $0x30] sm:$0xff] }
  0x12   :  { %226 = vmatpush.bf16.msra.mxu0 %v13925_v1  ;;  %v13915_v15 = vld [vmem:[%s18417_s28 + $0x38] sm:$0xff]  ;;  %v13916_v16 = vld [vmem:[%s18417_s28 + $0x40] sm:$0xff]  ;;  %v13917_v19 = vld [vmem:[%s18417_s28 + $0x48] sm:$0xff] }
  0x13   :  { %v13918_v22 = vld [vmem:[%s18417_s28 + $0x50] sm:$0xff]  ;;  %v14836_v34 = vld [vmem:[%s18418_s2] ss:$0 sm:$0xff]  ;;  %s18440_s28 = sld [smem:[#allocation25_spill]] }
  0x16   :  { %227 = vmatpush.bf16.msra.mxu0 %v13924_v2 }
  0x1a   :  { %228 = vmatpush.bf16.msra.mxu0 %v13923_v3 }
  0x1e   :  { %229 = vmatpush.bf16.msra.mxu0 %v13922_v4 }
  0x22   :  { %230 = vmatpush.bf16.msra.mxu0 %v13921_v5 }
  0x26   :  { %231 = vmatpush.bf16.msra.mxu0 %v13920_v6 }
  0x2a   :  { %232 = vmatpush.bf16.msra.mxu0 %v13919_v7 }
  0x2d   :  { %233 = vmatmul.bf16.vlgmr.msra.gmra.mxu0 %v13908_v8 }
  0x3d   :  { %238 = vmatmul.bf16.gmra.mxu0 %v13909_v9 }
  0x4d   :  { %243 = vmatmul.bf16.gmra.mxu0 %v13910_v10 }
  0x5d   :  { %248 = vmatmul.bf16.gmra.mxu0 %v13911_v11 }
  0x6d   :  { %253 = vmatmul.bf16.gmra.mxu0 %v13912_v12 }
  0x7d   :  { %258 = vmatmul.bf16.gmra.mxu0 %v13913_v13 }
  0x8d   :  { %263 = vmatmul.bf16.gmra.mxu0 %v13914_v14 }
  0x9d   :  { %268 = vmatmul.bf16.gmra.mxu0 %v13915_v15 }
  0xaa   :  { %v14819_v17 = vpop.f32.mrf.mxu0 }
  0xad   :  { %273 = vmatmul.bf16.gmra.mxu0 %v13916_v16 }
  0xb2   :  { %v14821_v18 = vpop.f32.mrf.mxu0 }
  0xb3   :  { %v237_v15 = vadd.f32 %v14836_v34, %v14821_v18 }
  0xb5   :  { %vm290_vm14 = vcmp.gt.f32.partialorder %v237_v15, 0.0 }
  0xba   :  { %v14826_v20 = vpop.f32.mrf.mxu0 }
  0xbb   :  { %v240_v11 = vadd.f32 %v14836_v34, %v14826_v20 }
  0xbd   :  { %278 = vmatmul.bf16.gmra.mxu0 %v13917_v19  ;;  %v313_v20 = vmul.f32 0.2, %v240_v11  ;;  %vm291_vm13 = vcmp.gt.f32.partialorder %v240_v11, 0.0 }
  0xc2   :  { %v14828_v21 = vpop.f32.mrf.mxu0 }
  0xc3   :  { %v242_v8 = vadd.f32 %v14836_v34, %v14828_v21 }
  0xc5   :  { %v314_v16 = vmul.f32 0.2, %v242_v8  ;;  %vm292_vm12 = vcmp.gt.f32.partialorder %v242_v8, 0.0 }
  0xca   :  { %v244_v23 = vpop.f32.mrf.mxu0 }
  0xcb   :  { %v245_v4 = vadd.f32 %v14836_v34, %v244_v23 }
  0xcd   :  { %283 = vmatmul.bf16.gmra.mxu0 %v13918_v22  ;;  %v315_v12 = vmul.f32 0.2, %v245_v4  ;;  %vm293_vm11 = vcmp.gt.f32.partialorder %v245_v4, 0.0  ;;  %v235_v22 = vadd.f32 %v14836_v34, %v14819_v17  ;;  %v9766_v17 = vld [vmem:[%s18419_s0] sm:$0xf] }
  0xcf   :  { %v337_v23 = vsel %vm293_vm11, %v245_v4, %v315_v12  ;;  %v311_v18 = vmul.f32 0.2, %v235_v22  ;;  %vm289_vm15 = vcmp.gt.f32.partialorder %v235_v22, 0.0 }
  0xd2   :  { %v246_v24 = vpop.f32.mrf.mxu0 }
  0xd3   :  { %v247_v0 = vadd.f32 %v14836_v34, %v246_v24 }
  0xd5   :  { %v316_v9 = vmul.f32 0.2, %v247_v0  ;;  %vm294_vm10 = vcmp.gt.f32.partialorder %v247_v0, 0.0 }
  0xd7   :  { %v338_v19 = vsel %vm294_vm10, %v247_v0, %v316_v9  ;;  %v10028_v9 = vld [vmem:[%s18419_s0 + $0xc8] sm:$0xf0] }
  0xd8   :  { %v14882_v24 = vpack.c.bf16 %v338_v19, %v337_v23  ;;  %v14973_v19 = vld [vmem:[%s18420_s1 + $0x130] sm:$0xff] }
  0xda   :  { %v249_v25 = vpop.f32.mrf.mxu0 }
  0xdb   :  { %v250_v60 = vadd.f32 %v14836_v34, %v249_v25  ;;  %v312_v25 = vmul.f32 0.2, %v237_v15 }
  0xdd   :  { %v317_v5 = vmul.f32 0.2, %v250_v60  ;;  %vm295_vm9 = vcmp.gt.f32.partialorder %v250_v60, 0.0 }
  0xdf   :  { %v339_v13 = vsel %vm295_vm9, %v250_v60, %v317_v5  ;;  %v9774_v60 = vld [vmem:[%s18419_s0 + $0x10] sm:$0xf]  ;;  %v13927_v5 = vld [vmem:[%s18419_s0 + $0x4] sm:$0xf] }
  0xe2   :  { %v251_v26 = vpop.f32.mrf.mxu0 }
  0xe3   :  { %v252_v57 = vadd.f32 %v14836_v34, %v251_v26  ;;  %v336_v26 = vsel %vm292_vm12, %v242_v8, %v314_v16  ;;  %v13975_v8 = vld [vmem:[%s18419_s0 + $0xc4] sm:$0xf] }
  0xe4   :  { %v10031_v16 = vor.u32 %v13975_v8, %v10028_v9  ;;  %v13935_v9 = vld [vmem:[%s18420_s1] sm:$0xff] }
  0xe5   :  { %v318_v1 = vmul.f32 0.2, %v252_v57  ;;  %vm296_vm8 = vcmp.gt.f32.partialorder %v252_v57, 0.0 }
  0xe7   :  { %v340_v10 = vsel %vm296_vm8, %v252_v57, %v318_v1 }
  0xe8   :  { %v14874_v14 = vpack.c.bf16 %v340_v10, %v339_v13  ;;  %v14963_v13 = vld [vmem:[%s18420_s1 + $0x138] sm:$0xff] }
  0xea   :  { %v254_v27 = vpop.f32.mrf.mxu0 }
  0xeb   :  { %v255_v53 = vadd.f32 %v14836_v34, %v254_v27  ;;  %v335_v27 = vsel %vm291_vm13, %v240_v11, %v313_v20  ;;  %v13951_v11 = vld [vmem:[%s18420_s1 + $0x40] sm:$0xff]  ;;  %v13932_v20 = vld [vmem:[%s18419_s0 + $0x24] sm:$0xf0] }
  0xed   :  { %v319_v61 = vmul.f32 0.2, %v255_v53  ;;  %vm297_vm7 = vcmp.gt.f32.partialorder %v255_v53, 0.0 }
  0xef   :  { %v341_v6 = vsel %vm297_vm7, %v255_v53, %v319_v61  ;;  %v13930_v61 = vld [vmem:[%s18419_s0 + $0x14] sm:$0xf0] }
  0xf2   :  { %v256_v28 = vpop.f32.mrf.mxu0 }
  0xf3   :  { %v257_v49 = vadd.f32 %v14836_v34, %v256_v28  ;;  %v14886_v28 = vpack.c.bf16 %v336_v26, %v335_v27  ;;  %v13929_v26 = vld [vmem:[%s18419_s0 + $0x14] sm:$0xf]  ;;  %v15011_v27 = vld [vmem:[%s18420_s1 + $0x118] sm:$0xff] }
  0xf5   :  { %v320_v58 = vmul.f32 0.2, %v257_v49  ;;  %vm298_vm6 = vcmp.gt.f32.partialorder %v257_v49, 0.0 }
  0xf7   :  { %v342_v2 = vsel %vm298_vm6, %v257_v49, %v320_v58  ;;  %v13953_v58 = vld [vmem:[%s18420_s1 + $0x50] sm:$0xff]  ;;  %vm410_vm6 = vcmask 392192  }
  0xf8   :  { %v14866_v7 = vpack.c.bf16 %v342_v2, %v341_v6  ;;  %v13952_v2 = vld [vmem:[%s18420_s1 + $0x48] sm:$0xff] }
  0xf9   :  { %v9768_v6 = vld [vmem:[%s18419_s0 + $0x8] sm:$0xf0] }
  0xfa   :  { %v259_v29 = vpop.f32.mrf.mxu0 }
  0xfb   :  { %v260_v44 = vadd.f32 %v14836_v34, %v259_v29  ;;  %v334_v29 = vsel %vm290_vm14, %v237_v15, %v312_v25  ;;  %v9771_v15 = vor.u32 %v13927_v5, %v9768_v6  ;;  %v14997_v25 = vld [vmem:[%s18420_s1 + $0x120] sm:$0xff]  ;;  %v9820_v5 = vld [vmem:[%s18419_s0 + $0x58] sm:$0xf0]  ;;  %v13936_v6 = vld [vmem:[%s18420_s1 + $0x8] sm:$0xff] }
  0xfd   :  { %v321_v54 = vmul.f32 0.2, %v260_v44  ;;  %vm299_vm5 = vcmp.gt.f32.partialorder %v260_v44, 0.0 }
  0xff   :  { %v343_v62 = vsel %vm299_vm5, %v260_v44, %v321_v54 }
 0x102   :  { %v261_v30 = vpop.f32.mrf.mxu0 }
 0x103   :  { %v262_v41 = vadd.f32 %v14836_v34, %v261_v30 }
 0x105   :  { %v322_v50 = vmul.f32 0.2, %v262_v41  ;;  %vm300_vm4 = vcmp.gt.f32.partialorder %v262_v41, 0.0 }
 0x107   :  { %v344_v59 = vsel %vm300_vm4, %v262_v41, %v322_v50  ;;  %v13955_v41 = vld [vmem:[%s18420_s1 + $0x60] sm:$0xff] }
 0x108   :  { %v14858_v63 = vpack.c.bf16 %v344_v59, %v343_v62  ;;  %v9775_v62 = vor.u32 %v13930_v61, %v9774_v60  ;;  %v13940_v61 = vld [vmem:[%s18420_s1 + $0x28] sm:$0xff] }
 0x10a   :  { %v264_v31 = vpop.f32.mrf.mxu0 }
 0x10b   :  { %v265_v38 = vadd.f32 %v14836_v34, %v264_v31  ;;  %v13928_v31 = vld [vmem:[%s18419_s0 + $0x4] sm:$0xf0] }
 0x10d   :  { %v323_v45 = vmul.f32 0.2, %v265_v38  ;;  %vm301_vm3 = vcmp.gt.f32.partialorder %v265_v38, 0.0 }
 0x10f   :  { %v345_v55 = vsel %vm301_vm3, %v265_v38, %v323_v45 }
 0x112   :  { %v266_v32 = vpop.f32.mrf.mxu0 }
 0x113   :  { %v267_v36 = vadd.f32 %v14836_v34, %v266_v32  ;;  %v333_v32 = vsel %vm289_vm15, %v235_v22, %v311_v18  ;;  %v9782_v22 = vld [vmem:[%s18419_s0 + $0x20] sm:$0xf]  ;;  %v9776_v18 = vld [vmem:[%s18419_s0 + $0x18] sm:$0xf0] }
 0x114   :  { %v9783_v23 = vor.u32 %v13932_v20, %v9782_v22  ;;  %v9828_v22 = vld [vmem:[%s18419_s0 + $0x68] sm:$0xf0] }
 0x115   :  { %v324_v42 = vmul.f32 0.2, %v267_v36  ;;  %vm302_vm2 = vcmp.gt.f32.partialorder %v267_v36, 0.0 }
 0x117   :  { %v346_v51 = vsel %vm302_vm2, %v267_v36, %v324_v42  ;;  %v9767_v36 = vor.u32 %v13928_v31, %v9766_v17  ;;  %v15026_v17 = vld [vmem:[%s18420_s1 + $0x108] sm:$0xff]  ;;  %v9790_v31 = vld [vmem:[%s18419_s0 + $0x30] sm:$0xf] }
 0x118   :  { %v14852_v56 = vpack.c.bf16 %v346_v51, %v345_v55 }
 0x11a   :  { %v269_v33 = vpop.f32.mrf.mxu0 }
 0x11b   :  { %v270_v35 = vadd.f32 %v14836_v34, %v269_v33  ;;  %v13958_v33 = vld [vmem:[%s18420_s1 + $0x78] sm:$0xff] }
 0x11d   :  { %v325_v39 = vmul.f32 0.2, %v270_v35  ;;  %vm303_vm0 = vcmp.gt.f32.partialorder %v270_v35, 0.0 }
 0x11f   :  { %v347_v46 = vsel %vm303_vm0, %v270_v35, %v325_v39  ;;  %v14899_v35 = vpack.c.bf16 %v334_v29, %v333_v32  ;;  %v13956_v39 = vld [vmem:[%s18420_s1 + $0x68] sm:$0xff]  ;;  %v9779_v29 = vor.u32 %v13929_v26, %v9776_v18  ;;  %v13934_v32 = vld [vmem:[%s18419_s0 + $0x34] sm:$0xf0]  ;;  %v13969_v18 = vld [vmem:[%s18420_s1 + $0x90] sm:$0xff] }
 0x120   :  { %v13970_v26 = vld [vmem:[%s18420_s1 + $0x98] sm:$0xff] }
 0x122   :  { %v271_v37 = vpop.f32.mrf.mxu0 }
 0x123   :  { %v272_v40 = vadd.f32 %v14836_v34, %v271_v37  ;;  %v13957_v37 = vld [vmem:[%s18420_s1 + $0x70] sm:$0xff] }
 0x125   :  { %vm304_vm1 = vcmp.gt.f32.partialorder %v272_v40, 0.0  ;;  %v326_v43 = vmul.f32 0.2, %v272_v40 }
 0x127   :  { %v348_v47 = vsel %vm304_vm1, %v272_v40, %v326_v43 }
 0x128   :  { %v14844_v48 = vpack.c.bf16 %v348_v47, %v347_v46  ;;  %v13954_v47 = vld [vmem:[%s18420_s1 + $0x58] sm:$0xff] }
 0x12a   :  { %v14847_v52 = vpop.f32.mrf.mxu0  ;;  %423 = vmatpush.bf16.msra.mxu1 %v14844_v48  ;;  %558 = vmatpush.bf16.msra.mxu3 %v14844_v48 }
 0x12b   :  { %v275_v53 = vadd.f32 %v14836_v34, %v14847_v52 }
 0x12d   :  { %v327_v0 = vmul.f32 0.2, %v275_v53  ;;  %vm305_vm5 = vcmp.gt.f32.partialorder %v275_v53, 0.0 }
 0x12e   :  { %424 = vmatpush.bf16.msra.mxu1 %v14852_v56  ;;  %559 = vmatpush.bf16.msra.mxu3 %v14852_v56 }
 0x12f   :  { %v349_v10 = vsel %vm305_vm5, %v275_v53, %v327_v0  ;;  %v13948_v53 = vld [vmem:[%s18419_s0 + $0x64] sm:$0xf0]  ;;  %v13938_v0 = vld [vmem:[%s18420_s1 + $0x18] sm:$0xff] }
 0x132   :  { %v14861_v3 = vpop.f32.mrf.mxu0  ;;  %425 = vmatpush.bf16.msra.mxu1 %v14858_v63  ;;  %560 = vmatpush.bf16.msra.mxu3 %v14858_v63 }
 0x133   :  { %v277_v49 = vadd.f32 %v14836_v34, %v14861_v3 }
 0x135   :  { %vm306_vm4 = vcmp.gt.f32.partialorder %v277_v49, 0.0 }
 0x136   :  { %426 = vmatpush.bf16.msra.mxu1 %v14866_v7  ;;  %561 = vmatpush.bf16.msra.mxu3 %v14866_v7 }
 0x13a   :  { %v279_v21 = vpop.f32.mrf.mxu0  ;;  %427 = vmatpush.bf16.msra.mxu1 %v14874_v14  ;;  %562 = vmatpush.bf16.msra.mxu3 %v14874_v14 }
 0x13b   :  { %v280_v44 = vadd.f32 %v14836_v34, %v279_v21  ;;  %v14983_v21 = vld [vmem:[%s18420_s1 + $0x128] sm:$0xff] }
 0x13d   :  { %v329_v54 = vmul.f32 0.2, %v280_v44  ;;  %vm307_vm3 = vcmp.gt.f32.partialorder %v280_v44, 0.0 }
 0x13e   :  { %428 = vmatpush.bf16.msra.mxu1 %v14882_v24  ;;  %563 = vmatpush.bf16.msra.mxu3 %v14882_v24 }
 0x13f   :  { %v351_v1 = vsel %vm307_vm3, %v280_v44, %v329_v54  ;;  %v13946_v44 = vld [vmem:[%s18419_s0 + $0x54] sm:$0xf0] }
 0x142   :  { %v281_v30 = vpop.f32.mrf.mxu0  ;;  %429 = vmatpush.bf16.msra.mxu1 %v14886_v28  ;;  %564 = vmatpush.bf16.msra.mxu3 %v14886_v28 }
 0x143   :  { %v282_v42 = vadd.f32 %v14836_v34, %v281_v30  ;;  %v15018_v30 = vld [vmem:[%s18420_s1 + $0x110] sm:$0xff] }
 0x145   :  { %v330_v50 = vmul.f32 0.2, %v282_v42  ;;  %vm308_vm2 = vcmp.gt.f32.partialorder %v282_v42, 0.0 }
 0x146   :  { %430 = vmatpush.bf16.msra.mxu1 %v14899_v35  ;;  %565 = vmatpush.bf16.msra.mxu3 %v14899_v35 }
 0x147   :  { %v352_v52 = vsel %vm308_vm2, %v282_v42, %v330_v50  ;;  %v13942_v50 = vld [vmem:[%s18420_s1 + $0x38] sm:$0xff]  ;;  %vm4020_vm2 = vcmask 523264  }
 0x148   :  { %v14939_v3 = vpack.c.bf16 %v352_v52, %v351_v1  ;;  %v9834_v52 = vld [vmem:[%s18419_s0 + $0x70] sm:$0xf] }
 0x149   :  { %431 = vmatmul.bf16.vlgmr.msra.gmra.mxu1 %v9767_v36  ;;  %v9810_v36 = vld [vmem:[%s18419_s0 + $0x40] sm:$0xf] }
 0x14a   :  { %685 = vmatpush.bf16.msrb.mxu1 %v13958_v33  ;;  %v284_v38 = vpop.f32.mrf.mxu0  ;;  %v9791_v33 = vor.u32 %v13934_v32, %v9790_v31  ;;  %762 = vmatpush.bf16.msrb.mxu3 %v13942_v50  ;;  %v9836_v31 = vld [vmem:[%s18419_s0 + $0x78] sm:$0xf0]  ;;  %v13968_v32 = vld [vmem:[%s18420_s1 + $0x88] sm:$0xff] }
 0x14b   :  { %v285_v40 = vadd.f32 %v14836_v34, %v284_v38  ;;  %v15045_v38 = vld [vmem:[%s18420_s1 + $0x100] sm:$0xff] }
 0x14d   :  { %v331_v45 = vmul.f32 0.2, %v285_v40  ;;  %vm309_vm0 = vcmp.gt.f32.partialorder %v285_v40, 0.0 }
 0x14e   :  { %686 = vmatpush.bf16.msrb.mxu1 %v13957_v37  ;;  %v13944_v37 = vld [vmem:[%s18419_s0 + $0x44] sm:$0xf0] }
 0x14f   :  { %v353_v55 = vsel %vm309_vm0, %v285_v40, %v331_v45  ;;  %v13931_v40 = vld [vmem:[%s18419_s0 + $0x24] sm:$0xf] }
 0x152   :  { %687 = vmatpush.bf16.msrb.mxu1 %v13956_v39  ;;  %v286_v43 = vpop.f32.mrf.mxu0  ;;  %v9811_v39 = vor.u32 %v13944_v37, %v9810_v36  ;;  %v13967_v36 = vld [vmem:[%s18420_s1 + $0x80] sm:$0xff] }
 0x153   :  { %v287_v46 = vadd.f32 %v14836_v34, %v286_v43  ;;  %v328_v34 = vmul.f32 0.2, %v277_v49  ;;  %v9818_v43 = vld [vmem:[%s18419_s0 + $0x50] sm:$0xf] }
 0x154   :  { %566 = vmatmul.bf16.vlgmr.msra.gmra.mxu3 %v9811_v39  ;;  %v9819_v45 = vor.u32 %v13946_v44, %v9818_v43  ;;  %v9934_v39 = vld [vmem:[%s18419_s0 + $0x80] sm:$0xf] }
 0x155   :  { %vm310_vm1 = vcmp.gt.f32.partialorder %v287_v46, 0.0  ;;  %v332_v51 = vmul.f32 0.2, %v287_v46  ;;  %v350_v4 = vsel %vm306_vm4, %v277_v49, %v328_v34  ;;  %v13939_v34 = vld [vmem:[%s18420_s1 + $0x20] sm:$0xff] }
 0x156   :  { %688 = vmatpush.bf16.msrb.mxu1 %v13955_v41  ;;  %v14958_v12 = vpack.c.bf16 %v350_v4, %v349_v10  ;;  %v9784_v41 = vld [vmem:[%s18419_s0 + $0x28] sm:$0xf0]  ;;  %v13945_v4 = vld [vmem:[%s18419_s0 + $0x54] sm:$0xf]  ;;  %v13974_v10 = vld [vmem:[%s18420_s1 + $0xb8] sm:$0xff] }
 0x157   :  { %v354_v57 = vsel %vm310_vm1, %v287_v46, %v332_v51  ;;  %v9787_v42 = vor.u32 %v13931_v40, %v9784_v41  ;;  %v13933_v46 = vld [vmem:[%s18419_s0 + $0x34] sm:$0xf]  ;;  %v9826_v51 = vld [vmem:[%s18419_s0 + $0x60] sm:$0xf]  ;;  %v9823_v8 = vor.u32 %v13945_v4, %v9820_v5  ;;  %v13960_v40 = vld [vmem:[%s18419_s0 + $0x84] sm:$0xf0] }
 0x158   :  { %v14926_v59 = vpack.c.bf16 %v354_v57, %v353_v55  ;;  %v9827_v54 = vor.u32 %v13948_v53, %v9826_v51  ;;  %v13943_v55 = vld [vmem:[%s18419_s0 + $0x44] sm:$0xf]  ;;  %v9812_v57 = vld [vmem:[%s18419_s0 + $0x48] sm:$0xf0]  ;;  %v9935_v41 = vor.u32 %v13960_v40, %v9934_v39  ;;  %v9958_v4 = vld [vmem:[%s18419_s0 + $0xb0] sm:$0xf] }
 0x159   :  { %436 = vmatmul.bf16.gmra.mxu1 %v9775_v62  ;;  %v9815_v60 = vor.u32 %v13943_v55, %v9812_v57  ;;  %v13950_v62 = vld [vmem:[%s18419_s0 + $0x74] sm:$0xf0]  ;;  %v9950_v57 = vld [vmem:[%s18419_s0 + $0xa0] sm:$0xf] }
 0x15a   :  { %689 = vmatpush.bf16.msrb.mxu1 %v13954_v47  ;;  %457 = vmatpush.bf16.msra.mxu2 %v14926_v59  ;;  %v9792_v47 = vld [vmem:[%s18419_s0 + $0x38] sm:$0xf0]  ;;  %v9835_v1 = vor.u32 %v13950_v62, %v9834_v52  ;;  %v13966_v5 = vld [vmem:[%s18419_s0 + $0xb4] sm:$0xf0] }
 0x15b   :  { %1103 = vmatpush.bf16.msrb.mxu0 %v14926_v59  ;;  %v9795_v49 = vor.u32 %v13933_v46, %v9792_v47  ;;  %v13962_v46 = vld [vmem:[%s18419_s0 + $0x94] sm:$0xf0] }
 0x15e   :  { %690 = vmatpush.bf16.msrb.mxu1 %v13953_v58  ;;  %458 = vmatpush.bf16.msra.mxu2 %v14939_v3  ;;  %v13941_v58 = vld [vmem:[%s18420_s1 + $0x30] sm:$0xff] }
 0x15f   :  { %1104 = vmatpush.bf16.msrb.mxu0 %v14939_v3  ;;  %763 = vmatpush.bf16.msrb.mxu3 %v13941_v58  ;;  %v13964_v58 = vld [vmem:[%s18419_s0 + $0xa4] sm:$0xf0] }
 0x160   :  { %v9951_v62 = vor.u32 %v13964_v58, %v9950_v57  ;;  %v14019_v58 = vld [vmem:[%s18420_s1 + $0x160] sm:$0xff] }
 0x162   :  { %691 = vmatpush.bf16.msrb.mxu1 %v13952_v2  ;;  %459 = vmatpush.bf16.msra.mxu2 %v14958_v12  ;;  %v13937_v2 = vld [vmem:[%s18420_s1 + $0x10] sm:$0xff] }
 0x163   :  { %1105 = vmatpush.bf16.msrb.mxu0 %v14958_v12  ;;  %764 = vmatpush.bf16.msrb.mxu3 %v13940_v61 }
 0x164   :  { %571 = vmatmul.bf16.gmra.mxu3 %v9819_v45  ;;  %v9942_v45 = vld [vmem:[%s18419_s0 + $0x90] sm:$0xf] }
 0x165   :  { %9796 = vmatmul.msk.bf16.vlgmr.msra.gmra.mxu2 %vm410_vm6, %v9771_v15  ;;  %v13972_v15 = vld [vmem:[%s18420_s1 + $0xa8] sm:$0xff]  ;;  %v9943_v51 = vor.u32 %v13962_v46, %v9942_v45  ;;  %v14021_v45 = vld [vmem:[%s18420_s1 + $0x170] sm:$0xff] }
 0x166   :  { %592 = vmatpush.bf16.msrb.mxu2 %v14926_v59  ;;  %692 = vmatpush.bf16.msrb.mxu1 %v13951_v11  ;;  %v13973_v11 = vld [vmem:[%s18420_s1 + $0xb0] sm:$0xff] }
 0x167   :  { %1417 = vmatpush.bf16.msra.mxu0 %v14963_v13  ;;  %765 = vmatpush.bf16.msrb.mxu3 %v13939_v34 }
 0x168   :  { %10056 = vmatmul.msk.bf16.vlgmr.msrb.gmra.mxu0 %vm410_vm6, %v10031_v16  ;;  %v13947_v16 = vld [vmem:[%s18419_s0 + $0x64] sm:$0xf] }
 0x169   :  { %441 = vmatmul.bf16.gmra.mxu1 %v9783_v23  ;;  %v9831_v20 = vor.u32 %v13947_v16, %v9828_v22  ;;  %v13971_v23 = vld [vmem:[%s18420_s1 + $0xa0] sm:$0xff]  ;;  %v13977_v22 = vld [vmem:[%s18419_s0 + $0xd4] sm:$0xf] }
 0x16a   :  { %882 = vmatpush.bf16.msra.mxu1 %v14926_v59  ;;  %593 = vmatpush.bf16.msrb.mxu2 %v14939_v3 }
 0x16b   :  { %1418 = vmatpush.bf16.msra.mxu0 %v14973_v19  ;;  %766 = vmatpush.bf16.msrb.mxu3 %v13938_v0 }
 0x16e   :  { %883 = vmatpush.bf16.msra.mxu1 %v14939_v3  ;;  %594 = vmatpush.bf16.msrb.mxu2 %v14958_v12 }
 0x16f   :  { %1419 = vmatpush.bf16.msra.mxu0 %v14983_v21  ;;  %767 = vmatpush.bf16.msrb.mxu3 %v13937_v2 }
 0x172   :  { %848 = vmatpush.bf16.msra.mxu2 %v14844_v48  ;;  %884 = vmatpush.bf16.msra.mxu1 %v14958_v12 }
 0x173   :  { %1420 = vmatpush.bf16.msra.mxu0 %v14997_v25  ;;  %768 = vmatpush.bf16.msrb.mxu3 %v13936_v6 }
 0x174   :  { %576 = vmatmul.bf16.gmra.mxu3 %v9827_v54 }
 0x175   :  { %9797 = vmatmul.msk.bf16.gmra.mxu2 %vm410_vm6, %v9779_v29  ;;  %v13949_v29 = vld [vmem:[%s18419_s0 + $0x74] sm:$0xf] }
 0x176   :  { %849 = vmatpush.bf16.msra.mxu2 %v14852_v56 }
 0x177   :  { %1421 = vmatpush.bf16.msra.mxu0 %v15011_v27  ;;  %769 = vmatpush.bf16.msrb.mxu3 %v13935_v9 }
 0x179   :  { %446 = vmatmul.bf16.gmra.mxu1 %v9791_v33  ;;  %v9839_v33 = vor.u32 %v13949_v29, %v9836_v31  ;;  %v10026_v29 = vld [vmem:[%s18419_s0 + $0xc0] sm:$0xf]  ;;  %v13976_v31 = vld [vmem:[%s18419_s0 + $0xc4] sm:$0xf0] }
 0x17a   :  { %850 = vmatpush.bf16.msra.mxu2 %v14858_v63 }
 0x17b   :  { %1422 = vmatpush.bf16.msra.mxu0 %v15018_v30  ;;  %975 = vmatpush.bf16.msra.mxu3 %v13974_v10  ;;  %v9959_v10 = vor.u32 %v13966_v5, %v9958_v4  ;;  %v14017_v5 = vld [vmem:[%s18420_s1 + $0x150] sm:$0xff] }
 0x17e   :  { %851 = vmatpush.bf16.msra.mxu2 %v14866_v7 }
 0x17f   :  { %1423 = vmatpush.bf16.msra.mxu0 %v15026_v17  ;;  %976 = vmatpush.bf16.msra.mxu3 %v13973_v11 }
 0x182   :  { %852 = vmatpush.bf16.msra.mxu2 %v14874_v14 }
 0x183   :  { %1424 = vmatpush.bf16.msra.mxu0 %v15045_v38  ;;  %977 = vmatpush.bf16.msra.mxu3 %v13972_v15 }
 0x184   :  { %581 = vmatmul.bf16.gmra.mxu3 %v9835_v1 }
 0x185   :  { %9798 = vmatmul.msk.bf16.gmra.mxu2 %vm410_vm6, %v9787_v42 }
 0x186   :  { %853 = vmatpush.bf16.msra.mxu2 %v14882_v24 }
 0x187   :  { %1732 = vmatpush.bf16.msrb.mxu0 %v14844_v48  ;;  %978 = vmatpush.bf16.msra.mxu3 %v13971_v23 }
 0x18a   :  { %854 = vmatpush.bf16.msra.mxu2 %v14886_v28 }
 0x18b   :  { %1733 = vmatpush.bf16.msrb.mxu0 %v14852_v56  ;;  %979 = vmatpush.bf16.msra.mxu3 %v13970_v26 }
 0x18e   :  { %855 = vmatpush.bf16.msra.mxu2 %v14899_v35 }
 0x18f   :  { %1734 = vmatpush.bf16.msrb.mxu0 %v14858_v63  ;;  %980 = vmatpush.bf16.msra.mxu3 %v13969_v18 }
 0x193   :  { %1735 = vmatpush.bf16.msrb.mxu0 %v14866_v7  ;;  %981 = vmatpush.bf16.msra.mxu3 %v13968_v32 }
 0x195   :  { %9799 = vmatmul.msk.bf16.gmra.mxu2 %vm410_vm6, %v9795_v49 }
 0x197   :  { %1736 = vmatpush.bf16.msrb.mxu0 %v14874_v14  ;;  %982 = vmatpush.bf16.msra.mxu3 %v13967_v36 }
 0x19b   :  { %1737 = vmatpush.bf16.msrb.mxu0 %v14882_v24 }
 0x19f   :  { %1738 = vmatpush.bf16.msrb.mxu0 %v14886_v28 }
 0x1a3   :  { %1739 = vmatpush.bf16.msrb.mxu0 %v14899_v35 }
 0x1a5   :  { %9840 = vmatmul.msk.bf16.vlgmr.msrb.gmra.mxu2 %vm410_vm6, %v9815_v60 }
 0x1a6   :  { %1069 = vmatpush.bf16.msrb.mxu2 %v14844_v48 }
 0x1aa   :  { %1070 = vmatpush.bf16.msrb.mxu2 %v14852_v56 }
 0x1ae   :  { %1071 = vmatpush.bf16.msrb.mxu2 %v14858_v63 }
 0x1b2   :  { %1072 = vmatpush.bf16.msrb.mxu2 %v14866_v7 }
 0x1b5   :  { %9841 = vmatmul.msk.bf16.gmra.mxu2 %vm410_vm6, %v9823_v8 }
 0x1b6   :  { %1073 = vmatpush.bf16.msrb.mxu2 %v14874_v14 }
 0x1ba   :  { %1074 = vmatpush.bf16.msrb.mxu2 %v14882_v24 }
 0x1be   :  { %1075 = vmatpush.bf16.msrb.mxu2 %v14886_v28 }
 0x1c2   :  { %1076 = vmatpush.bf16.msrb.mxu2 %v14899_v35 }
 0x1c5   :  { %9842 = vmatmul.msk.bf16.gmra.mxu2 %vm410_vm6, %v9831_v20  ;;  %v10036_v20 = vld [vmem:[%s18419_s0 + $0xd8] sm:$0xf0] }
 0x1c6   :  { %v432_v37 = vpop.f32.mrf.mxu1  ;;  %v10039_v26 = vor.u32 %v13977_v22, %v10036_v20 }
 0x1c8   :  { %10057 = vmatmul.msk.bf16.gmra.mxu0 %vm410_vm6, %v10039_v26  ;;  %v14015_v26 = vld [vmem:[%s18420_s1 + $0x140] sm:$0xff] }
 0x1ce   :  { %v434_v42 = vpop.f32.mrf.mxu1 }
 0x1d5   :  { %9843 = vmatmul.msk.bf16.gmra.mxu2 %vm410_vm6, %v9839_v33 }
 0x1d6   :  { %v437_v44 = vpop.f32.mrf.mxu1 }
 0x1d7   :  { %v567_v23 = vpop.f32.mrf.mxu3 }
 0x1de   :  { %v439_v54 = vpop.f32.mrf.mxu1 }
 0x1df   :  { %v569_v40 = vpop.f32.mrf.mxu3 }
 0x1e5   :  { %856 = vmatmul.bf16.vlgmr.msra.gmra.mxu2 %v9935_v41  ;;  %v14022_v41 = vld [vmem:[%s18420_s1 + $0x178] sm:$0xff] }
 0x1e6   :  { %1324 = vmatpush.bf16.msra.mxu2 %v14926_v59  ;;  %v442_v61 = vpop.f32.mrf.mxu1 }
 0x1e8   :  { %v461_v43 = vpop.f32.mrf.mxu2 }
 0x1e9   :  { %v462_v49 = vadd.f32 %v461_v43, %v432_v37  ;;  %v10027_v37 = vor.u32 %v13976_v31, %v10026_v29  ;;  %v13979_v43 = vld [vmem:[%s18419_s0 + $0xe4] sm:$0xf]  ;;  %v13986_v29 = vld [vmem:[%s18420_s1 + $0xd8] sm:$0xff] }
 0x1ea   :  { %1325 = vmatpush.bf16.msra.mxu2 %v14939_v3 }
 0x1ee   :  { %1326 = vmatpush.bf16.msra.mxu2 %v14958_v12  ;;  %v444_v2 = vpop.f32.mrf.mxu1 }
 0x1f0   :  { %v463_v47 = vpop.f32.mrf.mxu2 }
 0x1f1   :  { %v464_v50 = vadd.f32 %v463_v47, %v434_v42  ;;  %v572_v47 = vpop.f32.mrf.mxu3 }
 0x1f3   :  { %v481_v53 = vpack.c.bf16 %v464_v50, %v462_v49  ;;  %v10034_v49 = vld [vmem:[%s18419_s0 + $0xd0] sm:$0xf]  ;;  %v13978_v50 = vld [vmem:[%s18419_s0 + $0xd4] sm:$0xf0] }
 0x1f4   :  { %v10035_v57 = vor.u32 %v13978_v50, %v10034_v49  ;;  %v13991_v49 = vld [vmem:[%s18419_s0 + $0x104] sm:$0xf]  ;;  %v10120_v50 = vld [vmem:[%s18419_s0 + $0x108] sm:$0xf0] }
 0x1f5   :  { %770 = vmatmul.bf16.vlgmr.msrb.gmra.mxu3 %v481_v53  ;;  %861 = vmatmul.bf16.gmra.mxu2 %v9943_v51  ;;  %v14020_v51 = vld [vmem:[%s18420_s1 + $0x168] sm:$0xff] }
 0x1f6   :  { %1290 = vmatpush.bf16.msrb.mxu3 %v14844_v48  ;;  %v447_v15 = vpop.f32.mrf.mxu1 }
 0x1f8   :  { %v466_v55 = vpop.f32.mrf.mxu2 }
 0x1f9   :  { %v467_v34 = vadd.f32 %v466_v55, %v437_v44  ;;  %v10044_v44 = vld [vmem:[%s18419_s0 + $0xe8] sm:$0xf0] }
 0x1fa   :  { %1291 = vmatpush.bf16.msrb.mxu3 %v14852_v56  ;;  %v10047_v46 = vor.u32 %v13979_v43, %v10044_v44  ;;  %v13983_v44 = vld [vmem:[%s18420_s1 + $0xc0] sm:$0xff] }
 0x1fc   :  { %10058 = vmatmul.msk.bf16.gmra.mxu0 %vm410_vm6, %v10047_v46 }
 0x1fe   :  { %1292 = vmatpush.bf16.msrb.mxu3 %v14858_v63  ;;  %v449_v18 = vpop.f32.mrf.mxu1 }
 0x200   :  { %v468_v60 = vpop.f32.mrf.mxu2 }
 0x201   :  { %v469_v52 = vadd.f32 %v468_v60, %v439_v54 }
 0x202   :  { %1293 = vmatpush.bf16.msrb.mxu3 %v14866_v7 }
 0x203   :  { %v482_v0 = vpack.c.bf16 %v469_v52, %v467_v34  ;;  %v14018_v34 = vld [vmem:[%s18420_s1 + $0x158] sm:$0xff]  ;;  %v574_v52 = vpop.f32.mrf.mxu3 }
 0x205   :  { %775 = vmatmul.bf16.gmra.mxu3 %v482_v0  ;;  %866 = vmatmul.bf16.gmra.mxu2 %v9951_v62  ;;  %v13981_v0 = vld [vmem:[%s18419_s0 + $0xf4] sm:$0xf] }
 0x206   :  { %1294 = vmatpush.bf16.msrb.mxu3 %v14874_v14 }
 0x208   :  { %v471_v1 = vpop.f32.mrf.mxu2 }
 0x209   :  { %v472_v8 = vadd.f32 %v471_v1, %v442_v61  ;;  %v13990_v61 = vld [vmem:[%s18420_s1 + $0xf8] sm:$0xff] }
 0x20a   :  { %1295 = vmatpush.bf16.msrb.mxu3 %v14882_v24  ;;  %v10052_v1 = vld [vmem:[%s18419_s0 + $0xf8] sm:$0xf0] }
 0x20b   :  { %v10055_v4 = vor.u32 %v13981_v0, %v10052_v1  ;;  %v577_v20 = vpop.f32.mrf.mxu3  ;;  %v13961_v1 = vld [vmem:[%s18419_s0 + $0x94] sm:$0xf] }
 0x20d   :  { %10059 = vmatmul.msk.bf16.gmra.mxu0 %vm410_vm6, %v10055_v4 }
 0x20e   :  { %1296 = vmatpush.bf16.msrb.mxu3 %v14886_v28 }
 0x210   :  { %v473_v6 = vpop.f32.mrf.mxu2 }
 0x211   :  { %v474_v9 = vadd.f32 %v473_v6, %v444_v2  ;;  %v13989_v2 = vld [vmem:[%s18420_s1 + $0xf0] sm:$0xff]  ;;  %v10042_v6 = vld [vmem:[%s18419_s0 + $0xe0] sm:$0xf] }
 0x212   :  { %1297 = vmatpush.bf16.msrb.mxu3 %v14899_v35 }
 0x213   :  { %v483_v11 = vpack.c.bf16 %v474_v9, %v472_v8  ;;  %v13980_v8 = vld [vmem:[%s18419_s0 + $0xe4] sm:$0xf0] }
 0x214   :  { %v13988_v9 = vld [vmem:[%s18420_s1 + $0xe8] sm:$0xff]  ;;  %v10043_v22 = vor.u32 %v13980_v8, %v10042_v6  ;;  %v13963_v8 = vld [vmem:[%s18419_s0 + $0xa4] sm:$0xf] }
 0x215   :  { %780 = vmatmul.bf16.gmra.mxu3 %v483_v11  ;;  %871 = vmatmul.bf16.gmra.mxu2 %v9959_v10  ;;  %v14016_v10 = vld [vmem:[%s18420_s1 + $0x148] sm:$0xff] }
 0x218   :  { %v476_v16 = vpop.f32.mrf.mxu2 }
 0x219   :  { %v477_v33 = vadd.f32 %v476_v16, %v447_v15 }
 0x220   :  { %v478_v32 = vpop.f32.mrf.mxu2 }
 0x221   :  { %v479_v36 = vadd.f32 %v478_v32, %v449_v18  ;;  %v13985_v32 = vld [vmem:[%s18420_s1 + $0xd0] sm:$0xff] }
 0x223   :  { %v484_v39 = vpack.c.bf16 %v479_v36, %v477_v33  ;;  %v579_v33 = vpop.f32.mrf.mxu3  ;;  %v10050_v36 = vld [vmem:[%s18419_s0 + $0xf0] sm:$0xf] }
 0x225   :  { %785 = vmatmul.bf16.gmra.mxu3 %v484_v39  ;;  %1077 = vmatmul.bf16.vlgmr.msrb.gmra.mxu2 %v10027_v37  ;;  %v13982_v37 = vld [vmem:[%s18419_s0 + $0xf4] sm:$0xf0]  ;;  %v13984_v39 = vld [vmem:[%s18420_s1 + $0xc8] sm:$0xff] }
 0x226   :  { %1638 = vmatpush.bf16.msrb.mxu2 %v14022_v41  ;;  %v10051_v43 = vor.u32 %v13982_v37, %v10050_v36 }
 0x228   :  { %v596_v42 = vpop.f32.mrf.mxu2 }
 0x229   :  { %v597_v54 = vadd.f32 %v596_v42, %v567_v23  ;;  %v13987_v23 = vld [vmem:[%s18420_s1 + $0xe0] sm:$0xff] }
 0x22a   :  { %1639 = vmatpush.bf16.msrb.mxu2 %v14021_v45 }
 0x22b   :  { %v582_v46 = vpop.f32.mrf.mxu3 }
 0x22e   :  { %1640 = vmatpush.bf16.msrb.mxu2 %v14020_v51 }
 0x230   :  { %v598_v53 = vpop.f32.mrf.mxu2 }
 0x231   :  { %v599_v55 = vadd.f32 %v598_v53, %v569_v40 }
 0x232   :  { %1641 = vmatpush.bf16.msrb.mxu2 %v14019_v58 }
 0x233   :  { %v616_v60 = vpack.c.bf16 %v599_v55, %v597_v54  ;;  %v584_v51 = vpop.f32.mrf.mxu3 }
 0x235   :  { %693 = vmatmul.bf16.vlgmr.msrb.gmra.mxu1 %v616_v60  ;;  %1082 = vmatmul.bf16.gmra.mxu2 %v10035_v57  ;;  %v10123_v57 = vor.u32 %v13991_v49, %v10120_v50 }
 0x236   :  { %1196 = vmatpush.bf16.msrb.mxu1 %v13990_v61  ;;  %1642 = vmatpush.bf16.msrb.mxu2 %v14018_v34  ;;  %v13959_v61 = vld [vmem:[%s18419_s0 + $0x84] sm:$0xf]  ;;  %v9936_v34 = vld [vmem:[%s18419_s0 + $0x88] sm:$0xf0] }
 0x238   :  { %v601_v62 = vpop.f32.mrf.mxu2 }
 0x239   :  { %v602_v15 = vadd.f32 %v601_v62, %v572_v47  ;;  %v9939_v62 = vor.u32 %v13959_v61, %v9936_v34 }
 0x23a   :  { %1197 = vmatpush.bf16.msrb.mxu1 %v13989_v2  ;;  %1643 = vmatpush.bf16.msrb.mxu2 %v14017_v5  ;;  %v9944_v2 = vld [vmem:[%s18419_s0 + $0x98] sm:$0xf0] }
 0x23b   :  { %v9947_v5 = vor.u32 %v13961_v1, %v9944_v2 }
 0x23e   :  { %1198 = vmatpush.bf16.msrb.mxu1 %v13988_v9  ;;  %1644 = vmatpush.bf16.msrb.mxu2 %v14016_v10  ;;  %v9952_v9 = vld [vmem:[%s18419_s0 + $0xa8] sm:$0xf0] }
 0x240   :  { %v603_v11 = vpop.f32.mrf.mxu2 }
 0x241   :  { %v604_v16 = vadd.f32 %v603_v11, %v574_v52  ;;  %v9955_v11 = vor.u32 %v13963_v8, %v9952_v9 }
 0x242   :  { %1199 = vmatpush.bf16.msrb.mxu1 %v13987_v23  ;;  %1645 = vmatpush.bf16.msrb.mxu2 %v14015_v26 }
 0x243   :  { %v617_v18 = vpack.c.bf16 %v604_v16, %v602_v15  ;;  %v1107_v16 = vpop.f32.mrf.mxu0 }
 0x245   :  { %698 = vmatmul.bf16.gmra.mxu1 %v617_v18  ;;  %1087 = vmatmul.bf16.gmra.mxu2 %v10043_v22  ;;  %v13965_v22 = vld [vmem:[%s18419_s0 + $0xb4] sm:$0xf] }
 0x246   :  { %1200 = vmatpush.bf16.msrb.mxu1 %v13986_v29 }
 0x248   :  { %v606_v31 = vpop.f32.mrf.mxu2 }
 0x249   :  { %v607_v41 = vadd.f32 %v606_v31, %v577_v20  ;;  %v9960_v20 = vld [vmem:[%s18419_s0 + $0xb8] sm:$0xf0] }
 0x24a   :  { %1201 = vmatpush.bf16.msrb.mxu1 %v13985_v32  ;;  %v9963_v26 = vor.u32 %v13965_v22, %v9960_v20 }
 0x24b   :  { %v1109_v18 = vpop.f32.mrf.mxu0 }
 0x24e   :  { %1202 = vmatpush.bf16.msrb.mxu1 %v13984_v39 }
 0x250   :  { %v608_v40 = vpop.f32.mrf.mxu2 }
 0x251   :  { %v609_v42 = vadd.f32 %v608_v40, %v579_v33 }
 0x252   :  { %1203 = vmatpush.bf16.msrb.mxu1 %v13983_v44 }
 0x253   :  { %v618_v45 = vpack.c.bf16 %v609_v42, %v607_v41  ;;  %v1112_v32 = vpop.f32.mrf.mxu0 }
 0x255   :  { %703 = vmatmul.bf16.gmra.mxu1 %v618_v45  ;;  %1092 = vmatmul.bf16.gmra.mxu2 %v10051_v43 }
 0x258   :  { %v611_v47 = vpop.f32.mrf.mxu2 }
 0x259   :  { %v612_v54 = vadd.f32 %v611_v47, %v582_v46 }
 0x25b   :  { %v1114_v43 = vpop.f32.mrf.mxu0 }
 0x260   :  { %v613_v53 = vpop.f32.mrf.mxu2 }
 0x261   :  { %v614_v55 = vadd.f32 %v613_v53, %v584_v51 }
 0x263   :  { %v619_v58 = vpack.c.bf16 %v614_v55, %v612_v54 }
 0x265   :  { %708 = vmatmul.bf16.gmra.mxu1 %v619_v58  ;;  %10148 = vmatmul.msk.bf16.vlgmr.msra.gmra.mxu2 %vm410_vm6, %v10123_v57 }
 0x266   :  { %1953 = vmatpush.bf16.msra.mxu2 %v14844_v48 }
 0x268   :  { %v15311_v60 = vpop.f32.mrf.mxu2 }
 0x26a   :  { %1954 = vmatpush.bf16.msra.mxu2 %v14852_v56 }
 0x26e   :  { %1955 = vmatpush.bf16.msra.mxu2 %v14858_v63 }
 0x270   :  { %v15321_v52 = vpop.f32.mrf.mxu2 }
 0x272   :  { %1956 = vmatpush.bf16.msra.mxu2 %v14866_v7 }
 0x275   :  { %9964 = vmatmul.msk.bf16.vlgmr.msra.gmra.mxu1 %vm410_vm6, %v9939_v62 }
 0x276   :  { %1511 = vmatpush.bf16.msra.mxu1 %v14844_v48  ;;  %1957 = vmatpush.bf16.msra.mxu2 %v14874_v14 }
 0x278   :  { %v15327_v0 = vpop.f32.mrf.mxu2  ;;  %v771_v29 = vpop.f32.mrf.mxu3 }
 0x279   :  { %v1117_v50 = vpop.f32.mrf.mxu0 }
 0x27a   :  { %1512 = vmatpush.bf16.msra.mxu1 %v14852_v56  ;;  %1958 = vmatpush.bf16.msra.mxu2 %v14882_v24 }
 0x27e   :  { %1513 = vmatpush.bf16.msra.mxu1 %v14858_v63  ;;  %1959 = vmatpush.bf16.msra.mxu2 %v14886_v28 }
 0x280   :  { %v15339_v4 = vpop.f32.mrf.mxu2  ;;  %v15370_v36 = vpop.f32.mrf.mxu3 }
 0x281   :  { %v1119_v34 = vpop.f32.mrf.mxu0 }
 0x282   :  { %1514 = vmatpush.bf16.msra.mxu1 %v14866_v7  ;;  %1960 = vmatpush.bf16.msra.mxu2 %v14899_v35 }
 0x285   :  { %9965 = vmatmul.msk.bf16.gmra.mxu1 %vm410_vm6, %v9947_v5 }
 0x286   :  { %1515 = vmatpush.bf16.msra.mxu1 %v14874_v14 }
 0x288   :  { %v15345_v6 = vpop.f32.mrf.mxu2  ;;  %v776_v45 = vpop.f32.mrf.mxu3 }
 0x28a   :  { %1516 = vmatpush.bf16.msra.mxu1 %v14882_v24 }
 0x28e   :  { %1517 = vmatpush.bf16.msra.mxu1 %v14886_v28 }
 0x290   :  { %v15355_v10 = vpop.f32.mrf.mxu2  ;;  %v15381_v57 = vpop.f32.mrf.mxu3 }
 0x292   :  { %1518 = vmatpush.bf16.msra.mxu1 %v14899_v35 }
 0x295   :  { %9966 = vmatmul.msk.bf16.gmra.mxu1 %vm410_vm6, %v9955_v11 }
 0x298   :  { %v15359_v15 = vpop.f32.mrf.mxu2  ;;  %v781_v62 = vpop.f32.mrf.mxu3 }
 0x2a0   :  { %v15367_v23 = vpop.f32.mrf.mxu2  ;;  %v15387_v22 = vpop.f32.mrf.mxu3 }
 0x2a5   :  { %9967 = vmatmul.msk.bf16.gmra.mxu1 %vm410_vm6, %v9963_v26 }
 0x2a8   :  { %v1078_v31 = vpop.f32.mrf.mxu2 }
 0x2a9   :  { %v1108_v33 = vadd.f32 %v1107_v16, %v1078_v31  ;;  %v1122_v16 = vpop.f32.mrf.mxu0 }
 0x2b0   :  { %v1080_v37 = vpop.f32.mrf.mxu2 }
 0x2b1   :  { %v1110_v39 = vadd.f32 %v1109_v18, %v1080_v37  ;;  %v1124_v18 = vpop.f32.mrf.mxu0 }
 0x2b2   :  { %v694_v40 = vpop.f32.mrf.mxu1 }
 0x2b3   :  { %v1127_v41 = vpack.c.bf16 %v1110_v39, %v1108_v33  ;;  %v15372_v42 = vadd.f32 %v771_v29, %v694_v40  ;;  %v786_v33 = vpop.f32.mrf.mxu3 }
 0x2b5   :  { %1204 = vmatmul.bf16.vlgmr.msrb.gmra.mxu1 %v1127_v41 }
 0x2b6   :  { %1766 = vmatpush.bf16.msrb.mxu1 %v14926_v59 }
 0x2b8   :  { %v1083_v44 = vpop.f32.mrf.mxu2 }
 0x2b9   :  { %v1113_v47 = vadd.f32 %v1112_v32, %v1083_v44  ;;  %v14008_v44 = vld [vmem:[%s18419_s0 + $0x144] sm:$0xf0] }
 0x2ba   :  { %1767 = vmatpush.bf16.msrb.mxu1 %v14939_v3  ;;  %v15376_v46 = vpop.f32.mrf.mxu1 }
 0x2be   :  { %1768 = vmatpush.bf16.msrb.mxu1 %v14958_v12 }
 0x2c0   :  { %v1085_v49 = vpop.f32.mrf.mxu2 }
 0x2c1   :  { %v1115_v51 = vadd.f32 %v1114_v43, %v1085_v49  ;;  %v10210_v43 = vld [vmem:[%s18419_s0 + $0x140] sm:$0xf]  ;;  %v14054_v49 = vld [vmem:[%s18420_s1 + $0x1f8] sm:$0xff] }
 0x2c2   :  { %v699_v53 = vpop.f32.mrf.mxu1 }
 0x2c3   :  { %v1128_v54 = vpack.c.bf16 %v1115_v51, %v1113_v47  ;;  %v15379_v55 = vadd.f32 %v776_v45, %v699_v53  ;;  %v10211_v45 = vor.u32 %v14008_v44, %v10210_v43 }
 0x2c5   :  { %1209 = vmatmul.bf16.gmra.mxu1 %v1128_v54  ;;  %v14053_v54 = vld [vmem:[%s18420_s1 + $0x1f0] sm:$0xff] }
 0x2c8   :  { %v1088_v58 = vpop.f32.mrf.mxu2 }
 0x2c9   :  { %v1118_v1 = vadd.f32 %v1117_v50, %v1088_v58 }
 0x2ca   :  { %v15383_v61 = vpop.f32.mrf.mxu1 }
 0x2d0   :  { %v1090_v2 = vpop.f32.mrf.mxu2 }
 0x2d1   :  { %v1120_v5 = vadd.f32 %v1119_v34, %v1090_v2  ;;  %v10218_v34 = vld [vmem:[%s18419_s0 + $0x150] sm:$0xf]  ;;  %v14051_v2 = vld [vmem:[%s18420_s1 + $0x1e0] sm:$0xff] }
 0x2d2   :  { %v704_v8 = vpop.f32.mrf.mxu1 }
 0x2d3   :  { %v1129_v9 = vpack.c.bf16 %v1120_v5, %v1118_v1  ;;  %v15385_v11 = vadd.f32 %v781_v62, %v704_v8  ;;  %v14010_v62 = vld [vmem:[%s18419_s0 + $0x154] sm:$0xf0] }
 0x2d4   :  { %v14050_v5 = vld [vmem:[%s18420_s1 + $0x1d8] sm:$0xff] }
 0x2d5   :  { %1214 = vmatmul.bf16.gmra.mxu1 %v1129_v9 }
 0x2d8   :  { %v1093_v20 = vpop.f32.mrf.mxu2 }
 0x2d9   :  { %v1123_v29 = vadd.f32 %v1122_v16, %v1093_v20  ;;  %v14049_v16 = vld [vmem:[%s18420_s1 + $0x1d0] sm:$0xff]  ;;  %v10226_v20 = vld [vmem:[%s18419_s0 + $0x160] sm:$0xf] }
 0x2da   :  { %v15389_v26 = vpop.f32.mrf.mxu1 }
 0x2e0   :  { %v1095_v31 = vpop.f32.mrf.mxu2 }
 0x2e1   :  { %v1125_v32 = vadd.f32 %v1124_v18, %v1095_v31 }
 0x2e2   :  { %v709_v37 = vpop.f32.mrf.mxu1 }
 0x2e3   :  { %v1130_v39 = vpack.c.bf16 %v1125_v32, %v1123_v29  ;;  %v15391_v40 = vadd.f32 %v786_v33, %v709_v37  ;;  %v10234_v33 = vld [vmem:[%s18419_s0 + $0x170] sm:$0xf] }
 0x2e5   :  { %1219 = vmatmul.bf16.gmra.mxu1 %v1130_v39 }
 0x2ea   :  { %v15393_v41 = vpop.f32.mrf.mxu1 }
 0x2f2   :  { %v886_v47 = vpop.f32.mrf.mxu1 }
 0x2f3   :  { %v887_v51 = vadd.f32 %v886_v47, %v15311_v60  ;;  %v14052_v60 = vld [vmem:[%s18420_s1 + $0x1e8] sm:$0xff]  ;;  %v14023_v47 = vld [vmem:[%s18419_s0 + $0x184] sm:$0xf] }
 0x2f5   :  { %1519 = vmatmul.bf16.vlgmr.msra.gmra.mxu1 %v10211_v45 }
 0x2f6   :  { %2080 = vmatpush.bf16.msra.mxu1 %v14054_v49  ;;  %v10304_v49 = vld [vmem:[%s18419_s0 + $0x188] sm:$0xf0] }
 0x2fa   :  { %v888_v50 = vpop.f32.mrf.mxu1  ;;  %2081 = vmatpush.bf16.msra.mxu1 %v14053_v54  ;;  %v13992_v54 = vld [vmem:[%s18419_s0 + $0x104] sm:$0xf0] }
 0x2fb   :  { %v889_v53 = vadd.f32 %v888_v50, %v15321_v52  ;;  %v10219_v52 = vor.u32 %v14010_v62, %v10218_v34  ;;  %v10307_v50 = vor.u32 %v14023_v47, %v10304_v49  ;;  %v13997_v34 = vld [vmem:[%s18419_s0 + $0x134] sm:$0xf]  ;;  %v10144_v62 = vld [vmem:[%s18419_s0 + $0x138] sm:$0xf0] }
 0x2fd   :  { %v906_v58 = vpack.c.bf16 %v889_v53, %v887_v51  ;;  %v13995_v51 = vld [vmem:[%s18419_s0 + $0x124] sm:$0xf]  ;;  %v10118_v53 = vld [vmem:[%s18419_s0 + $0x100] sm:$0xf] }
 0x2fe   :  { %2082 = vmatpush.bf16.msra.mxu1 %v14052_v60  ;;  %v10147_v60 = vor.u32 %v13997_v34, %v10144_v62 }
 0x2ff   :  { %983 = vmatmul.bf16.vlgmr.msra.gmra.mxu3 %v906_v58  ;;  %v10119_v58 = vor.u32 %v13992_v54, %v10118_v53 }
 0x300   :  { %14631 = vmatpush.bf16.msra.mxu3 %v14963_v13 }
 0x302   :  { %v891_v1 = vpop.f32.mrf.mxu1  ;;  %2083 = vmatpush.bf16.msra.mxu1 %v14051_v2 }
 0x303   :  { %v892_v13 = vadd.f32 %v891_v1, %v15327_v0  ;;  %v14048_v0 = vld [vmem:[%s18420_s1 + $0x1c8] sm:$0xff]  ;;  %v13994_v1 = vld [vmem:[%s18419_s0 + $0x114] sm:$0xf0] }
 0x304   :  { %14632 = vmatpush.bf16.msra.mxu3 %v14973_v19 }
 0x305   :  { %1524 = vmatmul.bf16.gmra.mxu1 %v10219_v52  ;;  %v10126_v52 = vld [vmem:[%s18419_s0 + $0x110] sm:$0xf] }
 0x306   :  { %2084 = vmatpush.bf16.msra.mxu1 %v14050_v5  ;;  %v10127_v2 = vor.u32 %v13994_v1, %v10126_v52  ;;  %v10134_v5 = vld [vmem:[%s18419_s0 + $0x120] sm:$0xf] }
 0x308   :  { %14633 = vmatpush.bf16.msra.mxu3 %v14983_v21  ;;  %v14012_v21 = vld [vmem:[%s18419_s0 + $0x164] sm:$0xf0] }
 0x30a   :  { %v893_v8 = vpop.f32.mrf.mxu1  ;;  %2085 = vmatpush.bf16.msra.mxu1 %v14049_v16  ;;  %v13998_v16 = vld [vmem:[%s18419_s0 + $0x134] sm:$0xf0] }
 0x30b   :  { %v894_v9 = vadd.f32 %v893_v8, %v15339_v4  ;;  %v10227_v4 = vor.u32 %v14012_v21, %v10226_v20  ;;  %v13996_v8 = vld [vmem:[%s18419_s0 + $0x124] sm:$0xf0]  ;;  %v15522_v21 = vpop.f32.mrf.mxu3 }
 0x30c   :  { %14634 = vmatpush.bf16.msra.mxu3 %v14997_v25  ;;  %v14047_v25 = vld [vmem:[%s18420_s1 + $0x1c0] sm:$0xff] }
 0x30d   :  { %v907_v19 = vpack.c.bf16 %v894_v9, %v892_v13  ;;  %v10135_v13 = vor.u32 %v13996_v8, %v10134_v5  ;;  %v10142_v9 = vld [vmem:[%s18419_s0 + $0x130] sm:$0xf] }
 0x30e   :  { %2086 = vmatpush.bf16.msra.mxu1 %v14048_v0 }
 0x30f   :  { %988 = vmatmul.bf16.gmra.mxu3 %v907_v19  ;;  %v10143_v19 = vor.u32 %v13998_v16, %v10142_v9 }
 0x310   :  { %14635 = vmatpush.bf16.msra.mxu3 %v15011_v27 }
 0x312   :  { %v896_v18 = vpop.f32.mrf.mxu1  ;;  %2087 = vmatpush.bf16.msra.mxu1 %v14047_v25 }
 0x313   :  { %v897_v31 = vadd.f32 %v896_v18, %v15345_v6 }
 0x314   :  { %14636 = vmatpush.bf16.msra.mxu3 %v15018_v30  ;;  %v14014_v30 = vld [vmem:[%s18419_s0 + $0x174] sm:$0xf0] }
 0x315   :  { %1529 = vmatmul.bf16.gmra.mxu1 %v10227_v4  ;;  %v10235_v37 = vor.u32 %v14014_v30, %v10234_v33 }
 0x318   :  { %14637 = vmatpush.bf16.msra.mxu3 %v15026_v17  ;;  %v13993_v17 = vld [vmem:[%s18419_s0 + $0x114] sm:$0xf] }
 0x31a   :  { %v898_v29 = vpop.f32.mrf.mxu1 }
 0x31b   :  { %v899_v32 = vadd.f32 %v898_v29, %v15355_v10 }
 0x31c   :  { %14638 = vmatpush.bf16.msra.mxu3 %v15045_v38  ;;  %v10128_v38 = vld [vmem:[%s18419_s0 + $0x118] sm:$0xf0] }
 0x31d   :  { %v908_v27 = vpack.c.bf16 %v899_v32, %v897_v31  ;;  %v10131_v6 = vor.u32 %v13993_v17, %v10128_v38 }
 0x31f   :  { %993 = vmatmul.bf16.gmra.mxu3 %v908_v27  ;;  %10149 = vmatmul.msk.bf16.gmra.mxu2 %vm410_vm6, %v10131_v6 }
 0x322   :  { %v901_v39 = vpop.f32.mrf.mxu1 }
 0x323   :  { %v902_v43 = vadd.f32 %v901_v39, %v15359_v15  ;;  %v10136_v15 = vld [vmem:[%s18419_s0 + $0x128] sm:$0xf0] }
 0x325   :  { %1534 = vmatmul.bf16.gmra.mxu1 %v10235_v37 }
 0x32a   :  { %v903_v10 = vpop.f32.mrf.mxu1 }
 0x32b   :  { %v904_v44 = vadd.f32 %v903_v10, %v15367_v23  ;;  %v10139_v23 = vor.u32 %v13995_v51, %v10136_v15 }
 0x32d   :  { %v909_v45 = vpack.c.bf16 %v904_v44, %v902_v43 }
 0x32f   :  { %998 = vmatmul.bf16.gmra.mxu3 %v909_v45  ;;  %10150 = vmatmul.msk.bf16.gmra.mxu2 %vm410_vm6, %v10139_v23  ;;  %v1328_v45 = vpop.f32.mrf.mxu2 }
 0x332   :  { %v1205_v20 = vpop.f32.mrf.mxu1 }
 0x335   :  { %10332 = vmatmul.msk.bf16.vlgmr.msrb.gmra.mxu1 %vm410_vm6, %v10307_v50 }
 0x336   :  { %2395 = vmatpush.bf16.msrb.mxu1 %v14844_v48 }
 0x337   :  { %v1330_v50 = vpop.f32.mrf.mxu2 }
 0x33a   :  { %2396 = vmatpush.bf16.msrb.mxu1 %v14852_v56  ;;  %v15524_v0 = vpop.f32.mrf.mxu1 }
 0x33e   :  { %2397 = vmatpush.bf16.msrb.mxu1 %v14858_v63 }
 0x33f   :  { %1298 = vmatmul.bf16.vlgmr.msrb.gmra.mxu3 %v10119_v58  ;;  %10151 = vmatmul.msk.bf16.gmra.mxu2 %vm410_vm6, %v10147_v60 }
 0x340   :  { %1545 = vmatpush.bf16.msrb.mxu3 %v14926_v59 }
 0x342   :  { %2398 = vmatpush.bf16.msrb.mxu1 %v14866_v7  ;;  %v1210_v31 = vpop.f32.mrf.mxu1 }
 0x344   :  { %1546 = vmatpush.bf16.msrb.mxu3 %v14939_v3 }
 0x346   :  { %2399 = vmatpush.bf16.msrb.mxu1 %v14874_v14 }
 0x348   :  { %1547 = vmatpush.bf16.msrb.mxu3 %v14958_v12 }
 0x34a   :  { %2400 = vmatpush.bf16.msrb.mxu1 %v14882_v24  ;;  %v15532_v33 = vpop.f32.mrf.mxu1 }
 0x34e   :  { %2401 = vmatpush.bf16.msrb.mxu1 %v14886_v28 }
 0x34f   :  { %1303 = vmatmul.bf16.gmra.mxu3 %v10127_v2 }
 0x352   :  { %2402 = vmatpush.bf16.msrb.mxu1 %v14899_v35  ;;  %v1215_v39 = vpop.f32.mrf.mxu1 }
 0x35f   :  { %1308 = vmatmul.bf16.gmra.mxu3 %v10135_v13 }
 0x36f   :  { %1313 = vmatmul.bf16.gmra.mxu3 %v10143_v19  ;;  %v14025_v19 = vld [vmem:[%s18419_s0 + $0x194] sm:$0xf] }
 0x382   :  { %v984_v4 = vpop.f32.mrf.mxu3 }
 0x383   :  { %v1004_v18 = vadd.f32 %v984_v4, %v15372_v42  ;;  %v15541_v42 = vpop.f32.mrf.mxu1 }
 0x385   :  { %v15527_v25 = vadd.f32 %v1205_v20, %v1004_v18  ;;  %v10312_v20 = vld [vmem:[%s18419_s0 + $0x198] sm:$0xf0] }
 0x386   :  { %v10315_v4 = vor.u32 %v14025_v19, %v10312_v20  ;;  %v14066_v20 = vld [vmem:[%s18420_s1 + $0x218] sm:$0xff] }
 0x388   :  { %10333 = vmatmul.msk.bf16.gmra.mxu1 %vm410_vm6, %v10315_v4 }
 0x38a   :  { %v15529_v29 = vpop.f32.mrf.mxu3 }
 0x38b   :  { %v1220_v44 = vpop.f32.mrf.mxu1 }
 0x392   :  { %v989_v32 = vpop.f32.mrf.mxu3 }
 0x393   :  { %v1006_v27 = vadd.f32 %v989_v32, %v15379_v55  ;;  %v10302_v32 = vld [vmem:[%s18419_s0 + $0x180] sm:$0xf]  ;;  %v15626_v4 = vpop.f32.mrf.mxu1 }
 0x394   :  { %18421 = vst [vmem:[#allocation2_spill] sm:$0xff] %v15626_v4 }
 0x395   :  { %v15534_v30 = vadd.f32 %v1210_v31, %v1006_v27  ;;  %v14024_v27 = vld [vmem:[%s18419_s0 + $0x184] sm:$0xf0] }
 0x39a   :  { %v15536_v37 = vpop.f32.mrf.mxu3 }
 0x3a2   :  { %v994_v17 = vpop.f32.mrf.mxu3  ;;  %v1333_v15 = vpop.f32.mrf.mxu2 }
 0x3a3   :  { %v1008_v38 = vadd.f32 %v994_v17, %v15385_v11 }
 0x3a5   :  { %v15539_v6 = vadd.f32 %v1215_v39, %v1008_v38 }
 0x3aa   :  { %v15543_v10 = vpop.f32.mrf.mxu3  ;;  %v1335_v34 = vpop.f32.mrf.mxu2 }
 0x3b2   :  { %v999_v43 = vpop.f32.mrf.mxu3  ;;  %v1338_v52 = vpop.f32.mrf.mxu2 }
 0x3b3   :  { %v1010_v55 = vadd.f32 %v999_v43, %v15391_v40 }
 0x3b5   :  { %v15546_v47 = vadd.f32 %v1220_v44, %v1010_v55  ;;  %v10303_v44 = vor.u32 %v14024_v27, %v10302_v32  ;;  %v14038_v55 = vld [vmem:[%s18420_s1 + $0x1b8] sm:$0xff]  ;;  %v14031_v32 = vld [vmem:[%s18420_s1 + $0x180] sm:$0xff]  ;;  %v14009_v27 = vld [vmem:[%s18419_s0 + $0x154] sm:$0xf] }
 0x3ba   :  { %v15548_v49 = vpop.f32.mrf.mxu3  ;;  %v1340_v5 = vpop.f32.mrf.mxu2 }
 0x3c2   :  { %v1299_v51 = vpop.f32.mrf.mxu3  ;;  %v1343_v18 = vpop.f32.mrf.mxu2 }
 0x3c3   :  { %v1329_v11 = vadd.f32 %v1328_v45, %v1299_v51  ;;  %v10320_v51 = vld [vmem:[%s18419_s0 + $0x1a8] sm:$0xf0] }
 0x3ca   :  { %v1301_v23 = vpop.f32.mrf.mxu3  ;;  %v1345_v39 = vpop.f32.mrf.mxu2 }
 0x3cb   :  { %v1331_v53 = vadd.f32 %v1330_v50, %v1301_v23  ;;  %v14027_v50 = vld [vmem:[%s18419_s0 + $0x1a4] sm:$0xf]  ;;  %v14037_v23 = vld [vmem:[%s18420_s1 + $0x1b0] sm:$0xff] }
 0x3cd   :  { %v1348_v54 = vpack.c.bf16 %v1331_v53, %v1329_v11  ;;  %v14070_v11 = vld [vmem:[%s18420_s1 + $0x238] sm:$0xff]  ;;  %v14036_v53 = vld [vmem:[%s18420_s1 + $0x1a8] sm:$0xff] }
 0x3cf   :  { %1425 = vmatmul.bf16.vlgmr.msra.gmra.mxu0 %v1348_v54  ;;  %v14069_v54 = vld [vmem:[%s18420_s1 + $0x230] sm:$0xff] }
 0x3d0   :  { %1987 = vmatpush.bf16.msra.mxu0 %v14926_v59 }
 0x3d2   :  { %v1304_v58 = vpop.f32.mrf.mxu3 }
 0x3d3   :  { %v1334_v62 = vadd.f32 %v1333_v15, %v1304_v58  ;;  %v10323_v15 = vor.u32 %v14027_v50, %v10320_v51  ;;  %v14035_v58 = vld [vmem:[%s18420_s1 + $0x1a0] sm:$0xff] }
 0x3d4   :  { %1988 = vmatpush.bf16.msra.mxu0 %v14939_v3  ;;  %v14063_v50 = vld [vmem:[%s18420_s1 + $0x200] sm:$0xff] }
 0x3d5   :  { %10334 = vmatmul.msk.bf16.gmra.mxu1 %vm410_vm6, %v10323_v15  ;;  %v14011_v15 = vld [vmem:[%s18419_s0 + $0x164] sm:$0xf] }
 0x3d8   :  { %1989 = vmatpush.bf16.msra.mxu0 %v14958_v12 }
 0x3da   :  { %v1306_v40 = vpop.f32.mrf.mxu3 }
 0x3db   :  { %v1336_v60 = vadd.f32 %v1335_v34, %v1306_v40  ;;  %v14007_v34 = vld [vmem:[%s18419_s0 + $0x144] sm:$0xf]  ;;  %v10212_v40 = vld [vmem:[%s18419_s0 + $0x148] sm:$0xf0] }
 0x3dd   :  { %v1349_v1 = vpack.c.bf16 %v1336_v60, %v1334_v62  ;;  %v10310_v62 = vld [vmem:[%s18419_s0 + $0x190] sm:$0xf]  ;;  %v14026_v60 = vld [vmem:[%s18419_s0 + $0x194] sm:$0xf0] }
 0x3df   :  { %1430 = vmatmul.bf16.gmra.mxu0 %v1349_v1  ;;  %v10215_v1 = vor.u32 %v14007_v34, %v10212_v40  ;;  %v14013_v40 = vld [vmem:[%s18419_s0 + $0x174] sm:$0xf] }
 0x3e2   :  { %v1309_v2 = vpop.f32.mrf.mxu3 }
 0x3e3   :  { %v1339_v13 = vadd.f32 %v1338_v52, %v1309_v2  ;;  %v14068_v52 = vld [vmem:[%s18420_s1 + $0x228] sm:$0xff]  ;;  %v10311_v2 = vor.u32 %v14026_v60, %v10310_v62  ;;  %v10236_v62 = vld [vmem:[%s18419_s0 + $0x178] sm:$0xf0]  ;;  %v14039_v60 = vld [vmem:[%s18419_s0 + $0x1c4] sm:$0xf] }
 0x3ea   :  { %v1311_v8 = vpop.f32.mrf.mxu3 }
 0x3eb   :  { %v1341_v9 = vadd.f32 %v1340_v5, %v1311_v8  ;;  %v14034_v5 = vld [vmem:[%s18420_s1 + $0x198] sm:$0xff]  ;;  %v14067_v8 = vld [vmem:[%s18420_s1 + $0x220] sm:$0xff] }
 0x3ed   :  { %v1350_v16 = vpack.c.bf16 %v1341_v9, %v1339_v13  ;;  %v14029_v13 = vld [vmem:[%s18419_s0 + $0x1b4] sm:$0xf]  ;;  %v10328_v9 = vld [vmem:[%s18419_s0 + $0x1b8] sm:$0xf0] }
 0x3ee   :  { %v10331_v19 = vor.u32 %v14029_v13, %v10328_v9 }
 0x3ef   :  { %1435 = vmatmul.bf16.gmra.mxu0 %v1350_v16  ;;  %v14033_v16 = vld [vmem:[%s18420_s1 + $0x190] sm:$0xff] }
 0x3f0   :  { %10335 = vmatmul.msk.bf16.gmra.mxu1 %vm410_vm6, %v10331_v19 }
 0x3f2   :  { %v1314_v31 = vpop.f32.mrf.mxu3 }
 0x3f3   :  { %v1344_v38 = vadd.f32 %v1343_v18, %v1314_v31  ;;  %v14032_v18 = vld [vmem:[%s18420_s1 + $0x188] sm:$0xff]  ;;  %v14065_v31 = vld [vmem:[%s18420_s1 + $0x210] sm:$0xff] }
 0x3fa   :  { %v1316_v17 = vpop.f32.mrf.mxu3 }
 0x3fb   :  { %v1346_v43 = vadd.f32 %v1345_v39, %v1316_v17  ;;  %v10220_v39 = vld [vmem:[%s18419_s0 + $0x158] sm:$0xf0]  ;;  %v10318_v17 = vld [vmem:[%s18419_s0 + $0x1a0] sm:$0xf] }
 0x3fd   :  { %v1351_v45 = vpack.c.bf16 %v1346_v43, %v1344_v38  ;;  %v14028_v38 = vld [vmem:[%s18419_s0 + $0x1a4] sm:$0xf0] }
 0x3fe   :  { %v14064_v43 = vld [vmem:[%s18420_s1 + $0x208] sm:$0xff] }
 0x3ff   :  { %1440 = vmatmul.bf16.vlgmr.msra.gmra.mxu3 %v1351_v45  ;;  %1740 = vmatmul.bf16.vlgmr.msrb.gmra.mxu0 %v10303_v44  ;;  %v10223_v44 = vor.u32 %v14009_v27, %v10220_v39  ;;  %v15652_v45 = vpop.f32.mrf.mxu1 }
 0x400   :  { %1859 = vmatpush.bf16.msra.mxu3 %v14038_v55  ;;  %2301 = vmatpush.bf16.msrb.mxu0 %v14070_v11  ;;  %v10319_v55 = vor.u32 %v14028_v38, %v10318_v17  ;;  %v10326_v11 = vld [vmem:[%s18419_s0 + $0x1b0] sm:$0xf] }
 0x404   :  { %1860 = vmatpush.bf16.msra.mxu3 %v14037_v23  ;;  %2302 = vmatpush.bf16.msrb.mxu0 %v14069_v54  ;;  %v10228_v23 = vld [vmem:[%s18419_s0 + $0x168] sm:$0xf0] }
 0x405   :  { %v10231_v54 = vor.u32 %v14011_v15, %v10228_v23 }
 0x407   :  { %v15661_v51 = vpop.f32.mrf.mxu1 }
 0x408   :  { %1861 = vmatpush.bf16.msra.mxu3 %v14036_v53  ;;  %2303 = vmatpush.bf16.msrb.mxu0 %v14068_v52  ;;  %v14030_v53 = vld [vmem:[%s18419_s0 + $0x1b4] sm:$0xf0]  ;;  %v10396_v52 = vld [vmem:[%s18419_s0 + $0x1c8] sm:$0xf0] }
 0x40c   :  { %1862 = vmatpush.bf16.msra.mxu3 %v14035_v58  ;;  %2304 = vmatpush.bf16.msrb.mxu0 %v14067_v8  ;;  %v10327_v58 = vor.u32 %v14030_v53, %v10326_v11 }
 0x40f   :  { %10240 = vmatmul.msk.bf16.vlgmr.msrb.gmra.mxu3 %vm410_vm6, %v10215_v1  ;;  %1745 = vmatmul.bf16.gmra.mxu0 %v10311_v2  ;;  %v15678_v34 = vpop.f32.mrf.mxu1  ;;  %v10239_v2 = vor.u32 %v14013_v40, %v10236_v62 }
 0x410   :  { %1863 = vmatpush.bf16.msra.mxu3 %v14034_v5  ;;  %2305 = vmatpush.bf16.msrb.mxu0 %v14066_v20  ;;  %v10399_v5 = vor.u32 %v14039_v60, %v10396_v52 }
 0x414   :  { %1864 = vmatpush.bf16.msra.mxu3 %v14033_v16  ;;  %2306 = vmatpush.bf16.msrb.mxu0 %v14065_v31 }
 0x417   :  { %v15695_v1 = vpop.f32.mrf.mxu1 }
 0x418   :  { %1865 = vmatpush.bf16.msra.mxu3 %v14032_v18  ;;  %2307 = vmatpush.bf16.msrb.mxu0 %v14064_v43 }
 0x41c   :  { %1866 = vmatpush.bf16.msra.mxu3 %v14031_v32  ;;  %2308 = vmatpush.bf16.msrb.mxu0 %v14063_v50 }
 0x41f   :  { %10241 = vmatmul.msk.bf16.gmra.mxu3 %vm410_vm6, %v10223_v44  ;;  %1750 = vmatmul.bf16.gmra.mxu0 %v10319_v55  ;;  %v15701_v8 = vpop.f32.mrf.mxu1 }
 0x420   :  { %2174 = vmatpush.bf16.msrb.mxu3 %v14844_v48 }
 0x424   :  { %2175 = vmatpush.bf16.msrb.mxu3 %v14852_v56 }
 0x427   :  { %v15708_v16 = vpop.f32.mrf.mxu1 }
 0x428   :  { %2176 = vmatpush.bf16.msrb.mxu3 %v14858_v63 }
 0x42c   :  { %2177 = vmatpush.bf16.msrb.mxu3 %v14866_v7 }
 0x42f   :  { %10242 = vmatmul.msk.bf16.gmra.mxu3 %vm410_vm6, %v10231_v54  ;;  %1755 = vmatmul.bf16.gmra.mxu0 %v10327_v58  ;;  %v15715_v20 = vpop.f32.mrf.mxu1 }
 0x430   :  { %2178 = vmatpush.bf16.msrb.mxu3 %v14874_v14 }
 0x434   :  { %2179 = vmatpush.bf16.msrb.mxu3 %v14882_v24 }
 0x438   :  { %2180 = vmatpush.bf16.msrb.mxu3 %v14886_v28 }
 0x43c   :  { %2181 = vmatpush.bf16.msrb.mxu3 %v14899_v35 }
 0x43f   :  { %10243 = vmatmul.msk.bf16.gmra.mxu3 %vm410_vm6, %v10239_v2  ;;  %10424 = vmatmul.msk.bf16.vlgmr.msra.gmra.mxu0 %vm410_vm6, %v10399_v5 }
 0x440   :  { %2616 = vmatpush.bf16.msra.mxu0 %v14844_v48 }
 0x444   :  { %2617 = vmatpush.bf16.msra.mxu0 %v14852_v56 }
 0x448   :  { %2618 = vmatpush.bf16.msra.mxu0 %v14858_v63 }
 0x44c   :  { %2619 = vmatpush.bf16.msra.mxu0 %v14866_v7  ;;  %v1426_v13 = vpop.f32.mrf.mxu0 }
 0x44d   :  { %v15706_v9 = vadd.f32 %v1426_v13, %v15527_v25  ;;  %v15721_v25 = vpop.f32.mrf.mxu1 }
 0x450   :  { %2620 = vmatpush.bf16.msra.mxu0 %v14874_v14 }
 0x454   :  { %2621 = vmatpush.bf16.msra.mxu0 %v14882_v24  ;;  %v15712_v19 = vpop.f32.mrf.mxu0 }
 0x455   :  { %v1770_v39 = vpop.f32.mrf.mxu1 }
 0x458   :  { %2622 = vmatpush.bf16.msra.mxu0 %v14886_v28 }
 0x45c   :  { %2623 = vmatpush.bf16.msra.mxu0 %v14899_v35  ;;  %v1431_v18 = vpop.f32.mrf.mxu0 }
 0x45d   :  { %v15719_v31 = vadd.f32 %v1431_v18, %v15534_v30  ;;  %v1772_v43 = vpop.f32.mrf.mxu1 }
 0x464   :  { %v15723_v32 = vpop.f32.mrf.mxu0 }
 0x465   :  { %v1775_v55 = vpop.f32.mrf.mxu1 }
 0x46c   :  { %v1436_v27 = vpop.f32.mrf.mxu0 }
 0x46d   :  { %v15726_v17 = vadd.f32 %v1436_v27, %v15539_v6  ;;  %v1777_v6 = vpop.f32.mrf.mxu1 }
 0x474   :  { %v15728_v38 = vpop.f32.mrf.mxu0 }
 0x475   :  { %v1780_v52 = vpop.f32.mrf.mxu1 }
 0x47c   :  { %v1741_v44 = vpop.f32.mrf.mxu0 }
 0x47d   :  { %v1771_v15 = vadd.f32 %v1770_v39, %v1741_v44 }
 0x482   :  { %v1441_v50 = vpop.f32.mrf.mxu3 }
 0x483   :  { %v15731_v23 = vadd.f32 %v1441_v50, %v15546_v47 }
 0x484   :  { %v1743_v30 = vpop.f32.mrf.mxu0 }
 0x485   :  { %v1773_v11 = vadd.f32 %v1772_v43, %v1743_v30  ;;  %v1782_v43 = vpop.f32.mrf.mxu1 }
 0x487   :  { %v1790_v53 = vpack.c.bf16 %v1773_v11, %v1771_v15 }
 0x489   :  { %1867 = vmatmul.bf16.vlgmr.msra.gmra.mxu3 %v1790_v53 }
 0x48a   :  { %2429 = vmatpush.bf16.msra.mxu3 %v14926_v59  ;;  %v15734_v54 = vpop.f32.mrf.mxu3 }
 0x48b   :  { %18422 = vst [vmem:[#allocation3_spill] sm:$0xff] %v15734_v54 }
 0x48c   :  { %v1746_v58 = vpop.f32.mrf.mxu0 }
 0x48d   :  { %v1776_v62 = vadd.f32 %v1775_v55, %v1746_v58  ;;  %v1785_v11 = vpop.f32.mrf.mxu1 }
 0x48e   :  { %2430 = vmatpush.bf16.msra.mxu3 %v14939_v3 }
 0x492   :  { %2431 = vmatpush.bf16.msra.mxu3 %v14958_v12  ;;  %v1549_v40 = vpop.f32.mrf.mxu3 }
 0x493   :  { %v1550_v13 = vadd.f32 %v1549_v40, %v15652_v45 }
 0x494   :  { %v1748_v60 = vpop.f32.mrf.mxu0 }
 0x495   :  { %v1778_v47 = vadd.f32 %v1777_v6, %v1748_v60 }
 0x497   :  { %v1791_v2 = vpack.c.bf16 %v1778_v47, %v1776_v62  ;;  %v1787_v62 = vpop.f32.mrf.mxu1 }
 0x499   :  { %1872 = vmatmul.bf16.gmra.mxu3 %v1791_v2 }
 0x49a   :  { %v1551_v5 = vpop.f32.mrf.mxu3 }
 0x49b   :  { %v1552_v18 = vadd.f32 %v1551_v5, %v15661_v51 }
 0x49c   :  { %v1751_v27 = vpop.f32.mrf.mxu0 }
 0x49d   :  { %v1569_v39 = vpack.c.bf16 %v1552_v18, %v1550_v13  ;;  %v1781_v50 = vadd.f32 %v1780_v52, %v1751_v27 }
 0x49f   :  { %1646 = vmatmul.bf16.vlgmr.msrb.gmra.mxu2 %v1569_v39  ;;  %v14056_v39 = vld [vmem:[%s18419_s0 + $0x204] sm:$0xf0] }
 0x4a0   :  { %2208 = vmatpush.bf16.msrb.mxu2 %v14926_v59 }
 0x4a2   :  { %v1554_v44 = vpop.f32.mrf.mxu3 }
 0x4a3   :  { %v1555_v51 = vadd.f32 %v1554_v44, %v15678_v34  ;;  %v14102_v44 = vld [vmem:[%s18420_s1 + $0x2b8] sm:$0xff] }
 0x4a4   :  { %2209 = vmatpush.bf16.msrb.mxu2 %v14939_v3  ;;  %v1753_v55 = vpop.f32.mrf.mxu0 }
 0x4a5   :  { %v1783_v15 = vadd.f32 %v1782_v43, %v1753_v55 }
 0x4a7   :  { %v1792_v30 = vpack.c.bf16 %v1783_v15, %v1781_v50 }
 0x4a8   :  { %2210 = vmatpush.bf16.msrb.mxu2 %v14958_v12 }
 0x4a9   :  { %1877 = vmatmul.bf16.gmra.mxu3 %v1792_v30 }
 0x4aa   :  { %v1556_v45 = vpop.f32.mrf.mxu3 }
 0x4ab   :  { %v1557_v53 = vadd.f32 %v1556_v45, %v15695_v1  ;;  %v10486_v1 = vld [vmem:[%s18419_s0 + $0x200] sm:$0xf]  ;;  %v14101_v45 = vld [vmem:[%s18420_s1 + $0x2b0] sm:$0xff] }
 0x4ac   :  { %v1756_v6 = vpop.f32.mrf.mxu0  ;;  %v10487_v43 = vor.u32 %v14056_v39, %v10486_v1  ;;  %v14096_v1 = vld [vmem:[%s18420_s1 + $0x288] sm:$0xff] }
 0x4ad   :  { %v1570_v58 = vpack.c.bf16 %v1557_v53, %v1555_v51  ;;  %v1786_v60 = vadd.f32 %v1785_v11, %v1756_v6  ;;  %v14100_v51 = vld [vmem:[%s18420_s1 + $0x2a8] sm:$0xff]  ;;  %v14099_v6 = vld [vmem:[%s18420_s1 + $0x2a0] sm:$0xff] }
 0x4af   :  { %1651 = vmatmul.bf16.gmra.mxu2 %v1570_v58  ;;  %v10394_v58 = vld [vmem:[%s18419_s0 + $0x1c0] sm:$0xf] }
 0x4b2   :  { %v1559_v40 = vpop.f32.mrf.mxu3 }
 0x4b3   :  { %v1560_v13 = vadd.f32 %v1559_v40, %v15701_v8  ;;  %v14041_v8 = vld [vmem:[%s18419_s0 + $0x1d4] sm:$0xf]  ;;  %v14040_v40 = vld [vmem:[%s18419_s0 + $0x1c4] sm:$0xf0] }
 0x4b4   :  { %v1758_v52 = vpop.f32.mrf.mxu0 }
 0x4b5   :  { %v1788_v47 = vadd.f32 %v1787_v62, %v1758_v52  ;;  %v14043_v62 = vld [vmem:[%s18419_s0 + $0x1e4] sm:$0xf]  ;;  %v14098_v52 = vld [vmem:[%s18420_s1 + $0x298] sm:$0xff] }
 0x4b7   :  { %v1793_v2 = vpack.c.bf16 %v1788_v47, %v1786_v60  ;;  %v10412_v60 = vld [vmem:[%s18419_s0 + $0x1e8] sm:$0xf0] }
 0x4b8   :  { %v10415_v47 = vor.u32 %v14043_v62, %v10412_v60  ;;  %v14079_v60 = vld [vmem:[%s18420_s1 + $0x240] sm:$0xff] }
 0x4b9   :  { %1882 = vmatmul.bf16.gmra.mxu3 %v1793_v2  ;;  %v10395_v2 = vor.u32 %v14040_v40, %v10394_v58  ;;  %v14044_v58 = vld [vmem:[%s18419_s0 + $0x1e4] sm:$0xf0] }
 0x4ba   :  { %v1561_v5 = vpop.f32.mrf.mxu3  ;;  %v14080_v40 = vld [vmem:[%s18420_s1 + $0x248] sm:$0xff] }
 0x4bb   :  { %v1562_v18 = vadd.f32 %v1561_v5, %v15708_v16  ;;  %v10404_v16 = vld [vmem:[%s18419_s0 + $0x1d8] sm:$0xf0]  ;;  %v14097_v5 = vld [vmem:[%s18420_s1 + $0x290] sm:$0xff] }
 0x4bc   :  { %v10407_v55 = vor.u32 %v14041_v8, %v10404_v16  ;;  %v14042_v8 = vld [vmem:[%s18419_s0 + $0x1d4] sm:$0xf0]  ;;  %v14084_v16 = vld [vmem:[%s18420_s1 + $0x268] sm:$0xff] }
 0x4bd   :  { %v1571_v27 = vpack.c.bf16 %v1562_v18, %v1560_v13  ;;  %v14086_v13 = vld [vmem:[%s18420_s1 + $0x278] sm:$0xff]  ;;  %v14085_v18 = vld [vmem:[%s18420_s1 + $0x270] sm:$0xff] }
 0x4be   :  { %10425 = vmatmul.msk.bf16.gmra.mxu0 %vm410_vm6, %v10407_v55  ;;  %v10420_v55 = vld [vmem:[%s18419_s0 + $0x1f8] sm:$0xf0] }
 0x4bf   :  { %1656 = vmatmul.bf16.gmra.mxu2 %v1571_v27  ;;  %v10502_v27 = vld [vmem:[%s18419_s0 + $0x220] sm:$0xf] }
 0x4c2   :  { %v1564_v34 = vpop.f32.mrf.mxu3 }
 0x4c3   :  { %v1565_v15 = vadd.f32 %v1564_v34, %v15715_v20  ;;  %v10494_v20 = vld [vmem:[%s18419_s0 + $0x210] sm:$0xf]  ;;  %v14060_v34 = vld [vmem:[%s18419_s0 + $0x224] sm:$0xf0] }
 0x4c4   :  { %v10503_v39 = vor.u32 %v14060_v34, %v10502_v27  ;;  %v14055_v34 = vld [vmem:[%s18419_s0 + $0x204] sm:$0xf] }
 0x4c9   :  { %2182 = vmatmul.bf16.vlgmr.msrb.gmra.mxu3 %v10487_v43  ;;  %v14095_v43 = vld [vmem:[%s18420_s1 + $0x280] sm:$0xff] }
 0x4ca   :  { %v1566_v50 = vpop.f32.mrf.mxu3  ;;  %2743 = vmatpush.bf16.msrb.mxu3 %v14102_v44  ;;  %v10402_v44 = vld [vmem:[%s18419_s0 + $0x1d0] sm:$0xf] }
 0x4cb   :  { %v1567_v30 = vadd.f32 %v1566_v50, %v15721_v25  ;;  %v14058_v25 = vld [vmem:[%s18419_s0 + $0x214] sm:$0xf0]  ;;  %v14045_v50 = vld [vmem:[%s18419_s0 + $0x1f4] sm:$0xf] }
 0x4cc   :  { %v10495_v53 = vor.u32 %v14058_v25, %v10494_v20  ;;  %v14062_v20 = vld [vmem:[%s18419_s0 + $0x234] sm:$0xf0] }
 0x4cd   :  { %v1572_v11 = vpack.c.bf16 %v1567_v30, %v1565_v15  ;;  %v10403_v15 = vor.u32 %v14042_v8, %v10402_v44  ;;  %v10423_v30 = vor.u32 %v14045_v50, %v10420_v55  ;;  %v14057_v50 = vld [vmem:[%s18419_s0 + $0x214] sm:$0xf]  ;;  %v10496_v55 = vld [vmem:[%s18419_s0 + $0x218] sm:$0xf0] }
 0x4ce   :  { %2744 = vmatpush.bf16.msrb.mxu3 %v14101_v45  ;;  %10426 = vmatmul.msk.bf16.gmra.mxu0 %vm410_vm6, %v10415_v47  ;;  %v14082_v45 = vld [vmem:[%s18420_s1 + $0x258] sm:$0xff]  ;;  %v10580_v47 = vld [vmem:[%s18419_s0 + $0x248] sm:$0xf0] }
 0x4cf   :  { %1661 = vmatmul.bf16.gmra.mxu2 %v1572_v11  ;;  %v14083_v11 = vld [vmem:[%s18420_s1 + $0x260] sm:$0xff] }
 0x4d2   :  { %2745 = vmatpush.bf16.msrb.mxu3 %v14100_v51  ;;  %v10510_v51 = vld [vmem:[%s18419_s0 + $0x230] sm:$0xf] }
 0x4d3   :  { %v10511_v25 = vor.u32 %v14062_v20, %v10510_v51 }
 0x4d6   :  { %2746 = vmatpush.bf16.msrb.mxu3 %v14099_v6  ;;  %v10410_v6 = vld [vmem:[%s18419_s0 + $0x1e0] sm:$0xf] }
 0x4d7   :  { %v10411_v62 = vor.u32 %v14044_v58, %v10410_v6 }
 0x4d9   :  { %2187 = vmatmul.bf16.gmra.mxu3 %v10495_v53  ;;  %v14081_v53 = vld [vmem:[%s18420_s1 + $0x250] sm:$0xff] }
 0x4da   :  { %2747 = vmatpush.bf16.msrb.mxu3 %v14098_v52  ;;  %v14071_v52 = vld [vmem:[%s18419_s0 + $0x244] sm:$0xf] }
 0x4de   :  { %2748 = vmatpush.bf16.msrb.mxu3 %v14097_v5  ;;  %10427 = vmatmul.msk.bf16.gmra.mxu0 %vm410_vm6, %v10423_v30  ;;  %v10418_v5 = vld [vmem:[%s18419_s0 + $0x1f0] sm:$0xf] }
 0x4df   :  { %1961 = vmatmul.bf16.vlgmr.msra.gmra.mxu2 %v10395_v2  ;;  %v10583_v2 = vor.u32 %v14071_v52, %v10580_v47  ;;  %v14061_v47 = vld [vmem:[%s18419_s0 + $0x234] sm:$0xf] }
 0x4e0   :  { %2522 = vmatpush.bf16.msra.mxu2 %v14086_v13  ;;  %v14046_v13 = vld [vmem:[%s18419_s0 + $0x1f4] sm:$0xf0] }
 0x4e2   :  { %2749 = vmatpush.bf16.msrb.mxu3 %v14096_v1  ;;  %v10488_v1 = vld [vmem:[%s18419_s0 + $0x208] sm:$0xf0] }
 0x4e4   :  { %2523 = vmatpush.bf16.msra.mxu2 %v14085_v18  ;;  %v10419_v18 = vor.u32 %v14046_v13, %v10418_v5 }
 0x4e6   :  { %2750 = vmatpush.bf16.msrb.mxu3 %v14095_v43 }
 0x4e8   :  { %2524 = vmatpush.bf16.msra.mxu2 %v14084_v16 }
 0x4e9   :  { %2192 = vmatmul.bf16.gmra.mxu3 %v10503_v39  ;;  %v10491_v39 = vor.u32 %v14055_v34, %v10488_v1  ;;  %v1991_v34 = vpop.f32.mrf.mxu0 }
 0x4ec   :  { %2525 = vmatpush.bf16.msra.mxu2 %v14083_v11 }
 0x4ef   :  { %1966 = vmatmul.bf16.gmra.mxu2 %v10403_v15 }
 0x4f0   :  { %2526 = vmatpush.bf16.msra.mxu2 %v14082_v45 }
 0x4f4   :  { %2527 = vmatpush.bf16.msra.mxu2 %v14081_v53  ;;  %v10504_v53 = vld [vmem:[%s18419_s0 + $0x228] sm:$0xf0] }
 0x4f8   :  { %2528 = vmatpush.bf16.msra.mxu2 %v14080_v40 }
 0x4f9   :  { %2197 = vmatmul.bf16.gmra.mxu3 %v10511_v25  ;;  %v14059_v25 = vld [vmem:[%s18419_s0 + $0x224] sm:$0xf] }
 0x4fa   :  { %v10507_v58 = vor.u32 %v14059_v25, %v10504_v53 }
 0x4fc   :  { %2529 = vmatpush.bf16.msra.mxu2 %v14079_v60 }
 0x4ff   :  { %1971 = vmatmul.bf16.gmra.mxu2 %v10411_v62 }
 0x509   :  { %10608 = vmatmul.msk.bf16.vlgmr.msra.gmra.mxu3 %vm410_vm6, %v10583_v2  ;;  %v10512_v2 = vld [vmem:[%s18419_s0 + $0x238] sm:$0xf0] }
 0x50a   :  { %3058 = vmatpush.bf16.msra.mxu3 %v14844_v48  ;;  %v10515_v13 = vor.u32 %v14061_v47, %v10512_v2 }
 0x50c   :  { %v1868_v27 = vpop.f32.mrf.mxu3 }
 0x50e   :  { %3059 = vmatpush.bf16.msra.mxu3 %v14852_v56 }
 0x50f   :  { %1976 = vmatmul.bf16.gmra.mxu2 %v10419_v18 }
 0x512   :  { %3060 = vmatpush.bf16.msra.mxu3 %v14858_v63 }
 0x514   :  { %v15887_v43 = vpop.f32.mrf.mxu3 }
 0x516   :  { %3061 = vmatpush.bf16.msra.mxu3 %v14866_v7 }
 0x51a   :  { %3062 = vmatpush.bf16.msra.mxu3 %v14874_v14 }
 0x51c   :  { %v1873_v30 = vpop.f32.mrf.mxu3 }
 0x51e   :  { %3063 = vmatpush.bf16.msra.mxu3 %v14882_v24 }
 0x51f   :  { %10516 = vmatmul.msk.bf16.vlgmr.msrb.gmra.mxu2 %vm410_vm6, %v10491_v39 }
 0x520   :  { %2837 = vmatpush.bf16.msrb.mxu2 %v14844_v48 }
 0x522   :  { %3064 = vmatpush.bf16.msra.mxu3 %v14886_v28  ;;  %v1647_v44 = vpop.f32.mrf.mxu2 }
 0x523   :  { %v1667_v8 = vadd.f32 %v1647_v44, %v15706_v9  ;;  %v10499_v9 = vor.u32 %v14057_v50, %v10496_v55  ;;  %v1993_v44 = vpop.f32.mrf.mxu0 }
 0x524   :  { %2838 = vmatpush.bf16.msrb.mxu2 %v14852_v56  ;;  %v15909_v51 = vpop.f32.mrf.mxu3 }
 0x525   :  { %v15892_v16 = vadd.f32 %v1868_v27, %v1667_v8 }
 0x526   :  { %3065 = vmatpush.bf16.msra.mxu3 %v14899_v35 }
 0x528   :  { %2839 = vmatpush.bf16.msrb.mxu2 %v14858_v63 }
 0x52a   :  { %v15902_v15 = vpop.f32.mrf.mxu2 }
 0x52c   :  { %2840 = vmatpush.bf16.msrb.mxu2 %v14866_v7 }
 0x52f   :  { %10517 = vmatmul.msk.bf16.gmra.mxu2 %vm410_vm6, %v10499_v9 }
 0x530   :  { %2841 = vmatpush.bf16.msrb.mxu2 %v14874_v14 }
 0x532   :  { %v1652_v11 = vpop.f32.mrf.mxu2 }
 0x533   :  { %v1669_v45 = vadd.f32 %v1652_v11, %v15719_v31  ;;  %v1878_v31 = vpop.f32.mrf.mxu3 }
 0x534   :  { %2842 = vmatpush.bf16.msrb.mxu2 %v14882_v24 }
 0x535   :  { %v15911_v20 = vadd.f32 %v1873_v30, %v1669_v45 }
 0x538   :  { %2843 = vmatpush.bf16.msrb.mxu2 %v14886_v28 }
 0x53a   :  { %v15920_v6 = vpop.f32.mrf.mxu2 }
 0x53b   :  { %v15927_v52 = vpop.f32.mrf.mxu3  ;;  %v1996_v50 = vpop.f32.mrf.mxu0 }
 0x53c   :  { %2844 = vmatpush.bf16.msrb.mxu2 %v14899_v35 }
 0x53f   :  { %10518 = vmatmul.msk.bf16.gmra.mxu2 %vm410_vm6, %v10507_v58 }
 0x542   :  { %v1657_v40 = vpop.f32.mrf.mxu2 }
 0x543   :  { %v1671_v62 = vadd.f32 %v1657_v40, %v15726_v17  ;;  %v1883_v27 = vpop.f32.mrf.mxu3  ;;  %v1998_v25 = vpop.f32.mrf.mxu0 }
 0x545   :  { %v15925_v60 = vadd.f32 %v1878_v31, %v1671_v62 }
 0x54a   :  { %v15935_v5 = vpop.f32.mrf.mxu2 }
 0x54b   :  { %v2001_v31 = vpop.f32.mrf.mxu0  ;;  %v15946_v2 = vpop.f32.mrf.mxu3 }
 0x54c   :  { %18424 = vst [vmem:[#allocation5_spill] sm:$0xff] %v15946_v2 }
 0x54f   :  { %10519 = vmatmul.msk.bf16.gmra.mxu2 %vm410_vm6, %v10515_v13 }
 0x552   :  { %v1662_v18 = vpop.f32.mrf.mxu2 }
 0x553   :  { %v1673_v17 = vadd.f32 %v1662_v18, %v15731_v23  ;;  %v2003_v47 = vpop.f32.mrf.mxu0 }
 0x555   :  { %v15939_v1 = vadd.f32 %v1883_v27, %v1673_v17 }
 0x55a   :  { %v15941_v39 = vpop.f32.mrf.mxu2 }
 0x55b   :  { %18423 = vst [vmem:[#allocation4_spill] sm:$0xff] %v15941_v39 }
 0x562   :  { %v1962_v8 = vpop.f32.mrf.mxu2 }
 0x563   :  { %v1992_v30 = vadd.f32 %v1991_v34, %v1962_v8  ;;  %v14073_v34 = vld [vmem:[%s18419_s0 + $0x254] sm:$0xf]  ;;  %v2006_v8 = vpop.f32.mrf.mxu0 }
 0x56a   :  { %v1964_v55 = vpop.f32.mrf.mxu2 }
 0x56b   :  { %v1994_v9 = vadd.f32 %v1993_v44, %v1964_v55  ;;  %v10588_v44 = vld [vmem:[%s18419_s0 + $0x258] sm:$0xf0] }
 0x56d   :  { %v2011_v11 = vpack.c.bf16 %v1994_v9, %v1992_v30  ;;  %v2183_v30 = vpop.f32.mrf.mxu3  ;;  %v2008_v9 = vpop.f32.mrf.mxu0 }
 0x56f   :  { %2088 = vmatmul.bf16.vlgmr.msra.gmra.mxu1 %v2011_v11 }
 0x570   :  { %2650 = vmatpush.bf16.msra.mxu1 %v14926_v59 }
 0x572   :  { %v1967_v45 = vpop.f32.mrf.mxu2 }
 0x573   :  { %v1997_v53 = vadd.f32 %v1996_v50, %v1967_v45  ;;  %v10591_v50 = vor.u32 %v14073_v34, %v10588_v44 }
 0x574   :  { %2651 = vmatpush.bf16.msra.mxu1 %v14939_v3 }
 0x575   :  { %10609 = vmatmul.msk.bf16.gmra.mxu3 %vm410_vm6, %v10591_v50  ;;  %v14077_v50 = vld [vmem:[%s18419_s0 + $0x274] sm:$0xf] }
 0x578   :  { %2652 = vmatpush.bf16.msra.mxu1 %v14958_v12 }
 0x57a   :  { %v1969_v23 = vpop.f32.mrf.mxu2 }
 0x57b   :  { %v1999_v58 = vadd.f32 %v1998_v25, %v1969_v23  ;;  %v2185_v23 = vpop.f32.mrf.mxu3 }
 0x57d   :  { %v2012_v40 = vpack.c.bf16 %v1999_v58, %v1997_v53  ;;  %v14075_v58 = vld [vmem:[%s18419_s0 + $0x264] sm:$0xf] }
 0x57f   :  { %2093 = vmatmul.bf16.gmra.mxu1 %v2012_v40 }
 0x582   :  { %v1972_v62 = vpop.f32.mrf.mxu2 }
 0x583   :  { %v2002_v18 = vadd.f32 %v2001_v31, %v1972_v62  ;;  %v10596_v31 = vld [vmem:[%s18419_s0 + $0x268] sm:$0xf0] }
 0x584   :  { %v10599_v40 = vor.u32 %v14075_v58, %v10596_v31  ;;  %v14116_v31 = vld [vmem:[%s18420_s1 + $0x2e8] sm:$0xff] }
 0x586   :  { %10610 = vmatmul.msk.bf16.gmra.mxu3 %vm410_vm6, %v10599_v40 }
 0x58a   :  { %v1974_v13 = vpop.f32.mrf.mxu2 }
 0x58b   :  { %v2004_v27 = vadd.f32 %v2003_v47, %v1974_v13  ;;  %v2188_v47 = vpop.f32.mrf.mxu3  ;;  %v10578_v13 = vld [vmem:[%s18419_s0 + $0x240] sm:$0xf] }
 0x58d   :  { %v2013_v17 = vpack.c.bf16 %v2004_v27, %v2002_v18  ;;  %v14072_v18 = vld [vmem:[%s18419_s0 + $0x244] sm:$0xf0] }
 0x58e   :  { %v10579_v44 = vor.u32 %v14072_v18, %v10578_v13 }
 0x58f   :  { %2098 = vmatmul.bf16.gmra.mxu1 %v2013_v17 }
 0x592   :  { %v1977_v55 = vpop.f32.mrf.mxu2 }
 0x593   :  { %v2007_v45 = vadd.f32 %v2006_v8, %v1977_v55  ;;  %v10604_v55 = vld [vmem:[%s18419_s0 + $0x278] sm:$0xf0] }
 0x59a   :  { %v1979_v11 = vpop.f32.mrf.mxu2 }
 0x59b   :  { %v2009_v25 = vadd.f32 %v2008_v9, %v1979_v11  ;;  %v2190_v9 = vpop.f32.mrf.mxu3  ;;  %v10607_v11 = vor.u32 %v14077_v50, %v10604_v55  ;;  %v10594_v50 = vld [vmem:[%s18419_s0 + $0x260] sm:$0xf]  ;;  %v14076_v55 = vld [vmem:[%s18419_s0 + $0x264] sm:$0xf0] }
 0x59d   :  { %v2014_v53 = vpack.c.bf16 %v2009_v25, %v2007_v45  ;;  %10611 = vmatmul.msk.bf16.gmra.mxu3 %vm410_vm6, %v10607_v11  ;;  %v14117_v25 = vld [vmem:[%s18420_s1 + $0x2f0] sm:$0xff] }
 0x59f   :  { %2103 = vmatmul.bf16.gmra.mxu1 %v2014_v53  ;;  %v14074_v53 = vld [vmem:[%s18419_s0 + $0x254] sm:$0xf0] }
 0x5a2   :  { %v2212_v62 = vpop.f32.mrf.mxu2 }
 0x5a3   :  { %v2213_v27 = vadd.f32 %v2212_v62, %v2183_v30  ;;  %v14118_v30 = vld [vmem:[%s18420_s1 + $0x2f8] sm:$0xff]  ;;  %v2193_v62 = vpop.f32.mrf.mxu3 }
 0x5aa   :  { %v2214_v17 = vpop.f32.mrf.mxu2 }
 0x5ab   :  { %v2215_v34 = vadd.f32 %v2214_v17, %v2185_v23  ;;  %v10586_v23 = vld [vmem:[%s18419_s0 + $0x250] sm:$0xf]  ;;  %v14115_v17 = vld [vmem:[%s18420_s1 + $0x2e0] sm:$0xff] }
 0x5ac   :  { %v10587_v18 = vor.u32 %v14074_v53, %v10586_v23  ;;  %v14111_v53 = vld [vmem:[%s18420_s1 + $0x2c0] sm:$0xff] }
 0x5ad   :  { %v2232_v8 = vpack.c.bf16 %v2215_v34, %v2213_v27 }
 0x5af   :  { %2309 = vmatmul.bf16.vlgmr.msrb.gmra.mxu0 %v2232_v8  ;;  %2403 = vmatmul.bf16.vlgmr.msrb.gmra.mxu1 %v10579_v44  ;;  %v2195_v44 = vpop.f32.mrf.mxu3  ;;  %v14113_v8 = vld [vmem:[%s18420_s1 + $0x2d0] sm:$0xff] }
 0x5b0   :  { %2871 = vmatpush.bf16.msrb.mxu0 %v14926_v59  ;;  %2964 = vmatpush.bf16.msrb.mxu1 %v14118_v30 }
 0x5b2   :  { %v2217_v45 = vpop.f32.mrf.mxu2 }
 0x5b3   :  { %v2218_v58 = vadd.f32 %v2217_v45, %v2188_v47  ;;  %v14114_v47 = vld [vmem:[%s18420_s1 + $0x2d8] sm:$0xff] }
 0x5b4   :  { %2872 = vmatpush.bf16.msrb.mxu0 %v14939_v3  ;;  %2965 = vmatpush.bf16.msrb.mxu1 %v14117_v25  ;;  %v10595_v25 = vor.u32 %v14076_v55, %v10594_v50  ;;  %v14087_v50 = vld [vmem:[%s18419_s0 + $0x284] sm:$0xf]  ;;  %v10672_v55 = vld [vmem:[%s18419_s0 + $0x288] sm:$0xf0] }
 0x5b8   :  { %2873 = vmatpush.bf16.msrb.mxu0 %v14958_v12  ;;  %2966 = vmatpush.bf16.msrb.mxu1 %v14116_v31 }
 0x5ba   :  { %v2219_v40 = vpop.f32.mrf.mxu2 }
 0x5bb   :  { %v2220_v13 = vadd.f32 %v2219_v40, %v2190_v9  ;;  %v14112_v9 = vld [vmem:[%s18420_s1 + $0x2c8] sm:$0xff] }
 0x5bc   :  { %2967 = vmatpush.bf16.msrb.mxu1 %v14115_v17 }
 0x5bd   :  { %v2233_v27 = vpack.c.bf16 %v2220_v13, %v2218_v58  ;;  %v2198_v58 = vpop.f32.mrf.mxu3  ;;  %v10602_v13 = vld [vmem:[%s18419_s0 + $0x270] sm:$0xf] }
 0x5bf   :  { %2314 = vmatmul.bf16.gmra.mxu0 %v2233_v27  ;;  %2408 = vmatmul.bf16.gmra.mxu1 %v10587_v18 }
 0x5c0   :  { %2968 = vmatpush.bf16.msrb.mxu1 %v14114_v47 }
 0x5c2   :  { %v2222_v34 = vpop.f32.mrf.mxu2 }
 0x5c3   :  { %v2223_v11 = vadd.f32 %v2222_v34, %v2193_v62  ;;  %v14078_v62 = vld [vmem:[%s18419_s0 + $0x274] sm:$0xf0] }
 0x5c4   :  { %2969 = vmatpush.bf16.msrb.mxu1 %v14113_v8  ;;  %v10603_v47 = vor.u32 %v14078_v62, %v10602_v13  ;;  %v14088_v8 = vld [vmem:[%s18419_s0 + $0x284] sm:$0xf0]  ;;  %v10680_v13 = vld [vmem:[%s18419_s0 + $0x298] sm:$0xf0] }
 0x5c5   :  { %v2200_v40 = vpop.f32.mrf.mxu3 }
 0x5c8   :  { %2970 = vmatpush.bf16.msrb.mxu1 %v14112_v9 }
 0x5ca   :  { %v2224_v30 = vpop.f32.mrf.mxu2 }
 0x5cb   :  { %v2225_v45 = vadd.f32 %v2224_v30, %v2195_v44  ;;  %v10670_v44 = vld [vmem:[%s18419_s0 + $0x280] sm:$0xf] }
 0x5cc   :  { %2971 = vmatpush.bf16.msrb.mxu1 %v14111_v53  ;;  %v10671_v9 = vor.u32 %v14088_v8, %v10670_v44  ;;  %v14133_v53 = vld [vmem:[%s18420_s1 + $0x330] sm:$0xff]  ;;  %v10686_v8 = vld [vmem:[%s18419_s0 + $0x2a0] sm:$0xf] }
 0x5cd   :  { %v2234_v23 = vpack.c.bf16 %v2225_v45, %v2223_v11  ;;  %v10675_v11 = vor.u32 %v14087_v50, %v10672_v55  ;;  %v14092_v50 = vld [vmem:[%s18419_s0 + $0x2a4] sm:$0xf0]  ;;  %v14091_v55 = vld [vmem:[%s18419_s0 + $0x2a4] sm:$0xf] }
 0x5cf   :  { %2319 = vmatmul.bf16.gmra.mxu0 %v2234_v23  ;;  %2413 = vmatmul.bf16.gmra.mxu1 %v10595_v25  ;;  %v14134_v25 = vld [vmem:[%s18420_s1 + $0x338] sm:$0xff] }
 0x5d2   :  { %v2227_v31 = vpop.f32.mrf.mxu2 }
 0x5d3   :  { %v2228_v18 = vadd.f32 %v2227_v31, %v2198_v58  ;;  %v14132_v58 = vld [vmem:[%s18420_s1 + $0x328] sm:$0xff]  ;;  %v14090_v31 = vld [vmem:[%s18419_s0 + $0x294] sm:$0xf0] }
 0x5da   :  { %v2229_v27 = vpop.f32.mrf.mxu2 }
 0x5db   :  { %v2230_v17 = vadd.f32 %v2229_v27, %v2200_v40  ;;  %v14089_v40 = vld [vmem:[%s18419_s0 + $0x294] sm:$0xf] }
 0x5dd   :  { %v2235_v34 = vpack.c.bf16 %v2230_v17, %v2228_v18  ;;  %v10683_v18 = vor.u32 %v14089_v40, %v10680_v13  ;;  %v10694_v40 = vld [vmem:[%s18419_s0 + $0x2b0] sm:$0xf]  ;;  %v14094_v13 = vld [vmem:[%s18419_s0 + $0x2b4] sm:$0xf0] }
 0x5df   :  { %2324 = vmatmul.bf16.gmra.mxu0 %v2235_v34  ;;  %2418 = vmatmul.bf16.gmra.mxu1 %v10603_v47  ;;  %v14131_v47 = vld [vmem:[%s18420_s1 + $0x320] sm:$0xff]  ;;  %v14130_v34 = vld [vmem:[%s18420_s1 + $0x318] sm:$0xff] }
 0x5ec   :  { %v2089_v30 = vpop.f32.mrf.mxu1 }
 0x5ed   :  { %v16033_v45 = vadd.f32 %v2089_v30, %v15892_v16  ;;  %v10678_v16 = vld [vmem:[%s18419_s0 + $0x290] sm:$0xf]  ;;  %v10687_v30 = vor.u32 %v14092_v50, %v10686_v8 }
 0x5ee   :  { %v10679_v62 = vor.u32 %v14090_v31, %v10678_v16 }
 0x5ef   :  { %2624 = vmatmul.bf16.vlgmr.msra.gmra.mxu0 %v10671_v9  ;;  %10700 = vmatmul.msk.bf16.vlgmr.msra.gmra.mxu1 %vm410_vm6, %v10675_v11  ;;  %v10688_v9 = vld [vmem:[%s18419_s0 + $0x2a8] sm:$0xf0] }
 0x5f0   :  { %3279 = vmatpush.bf16.msra.mxu1 %v14844_v48  ;;  %3185 = vmatpush.bf16.msra.mxu0 %v14134_v25  ;;  %v14128_v11 = vld [vmem:[%s18420_s1 + $0x308] sm:$0xff]  ;;  %v10691_v25 = vor.u32 %v14091_v55, %v10688_v9  ;;  %v14103_v55 = vld [vmem:[%s18419_s0 + $0x2c4] sm:$0xf] }
 0x5f1   :  { %v10764_v9 = vld [vmem:[%s18419_s0 + $0x2c8] sm:$0xf0] }
 0x5f4   :  { %3280 = vmatpush.bf16.msra.mxu1 %v14852_v56  ;;  %v16041_v23 = vpop.f32.mrf.mxu1  ;;  %3186 = vmatpush.bf16.msra.mxu0 %v14133_v53 }
 0x5f8   :  { %3281 = vmatpush.bf16.msra.mxu1 %v14858_v63  ;;  %3187 = vmatpush.bf16.msra.mxu0 %v14132_v58  ;;  %v14127_v58 = vld [vmem:[%s18420_s1 + $0x300] sm:$0xff] }
 0x5fc   :  { %3282 = vmatpush.bf16.msra.mxu1 %v14866_v7  ;;  %v2094_v27 = vpop.f32.mrf.mxu1  ;;  %3188 = vmatpush.bf16.msra.mxu0 %v14131_v47 }
 0x5fd   :  { %v16064_v17 = vadd.f32 %v2094_v27, %v15911_v20  ;;  %v14129_v20 = vld [vmem:[%s18420_s1 + $0x310] sm:$0xff] }
 0x5ff   :  { %2629 = vmatmul.bf16.gmra.mxu0 %v10679_v62  ;;  %10701 = vmatmul.msk.bf16.gmra.mxu1 %vm410_vm6, %v10683_v18  ;;  %v10696_v62 = vld [vmem:[%s18419_s0 + $0x2b8] sm:$0xf0]  ;;  %v10695_v18 = vor.u32 %v14094_v13, %v10694_v40 }
 0x600   :  { %3283 = vmatpush.bf16.msra.mxu1 %v14874_v14  ;;  %3189 = vmatpush.bf16.msra.mxu0 %v14130_v34 }
 0x604   :  { %3284 = vmatpush.bf16.msra.mxu1 %v14882_v24  ;;  %v16075_v44 = vpop.f32.mrf.mxu1  ;;  %3190 = vmatpush.bf16.msra.mxu0 %v14129_v20  ;;  %v2433_v20 = vpop.f32.mrf.mxu3 }
 0x608   :  { %3285 = vmatpush.bf16.msra.mxu1 %v14886_v28  ;;  %3191 = vmatpush.bf16.msra.mxu0 %v14128_v11  ;;  %v10767_v11 = vor.u32 %v14103_v55, %v10764_v9 }
 0x60c   :  { %3286 = vmatpush.bf16.msra.mxu1 %v14899_v35  ;;  %v2099_v53 = vpop.f32.mrf.mxu1  ;;  %3192 = vmatpush.bf16.msra.mxu0 %v14127_v58  ;;  %v2435_v50 = vpop.f32.mrf.mxu3 }
 0x60d   :  { %v2113_v16 = vadd.f32 %v2099_v53, %v15925_v60  ;;  %v14093_v60 = vld [vmem:[%s18419_s0 + $0x2b4] sm:$0xf] }
 0x60e   :  { %v10699_v27 = vor.u32 %v14093_v60, %v10696_v62 }
 0x60f   :  { %2634 = vmatmul.bf16.gmra.mxu0 %v10687_v30  ;;  %10702 = vmatmul.msk.bf16.gmra.mxu1 %vm410_vm6, %v10691_v25 }
 0x614   :  { %v16102_v31 = vpop.f32.mrf.mxu1  ;;  %v2438_v53 = vpop.f32.mrf.mxu3 }
 0x61c   :  { %v2104_v47 = vpop.f32.mrf.mxu1 }
 0x61d   :  { %v2115_v34 = vadd.f32 %v2104_v47, %v15939_v1 }
 0x61f   :  { %2639 = vmatmul.bf16.gmra.mxu0 %v10695_v18  ;;  %10703 = vmatmul.msk.bf16.gmra.mxu1 %vm410_vm6, %v10699_v27 }
 0x624   :  { %v16118_v8 = vpop.f32.mrf.mxu1 }
 0x625   :  { %18425 = vst [vmem:[#allocation6_spill] sm:$0xff] %v16118_v8 }
 0x62c   :  { %v2310_v30 = vpop.f32.mrf.mxu0  ;;  %v2404_v25 = vpop.f32.mrf.mxu1 }
 0x62d   :  { %v16127_v1 = vadd.f32 %v2310_v30, %v16033_v45  ;;  %v2434_v13 = vadd.f32 %v2433_v20, %v2404_v25  ;;  %v2440_v45 = vpop.f32.mrf.mxu3 }
 0x62f   :  { %10792 = vmatmul.msk.bf16.vlgmr.msrb.gmra.mxu0 %vm410_vm6, %v10767_v11 }
 0x630   :  { %3500 = vmatpush.bf16.msrb.mxu0 %v14844_v48 }
 0x634   :  { %3501 = vmatpush.bf16.msrb.mxu0 %v14852_v56  ;;  %v16132_v58 = vpop.f32.mrf.mxu0  ;;  %v2406_v40 = vpop.f32.mrf.mxu1 }
 0x635   :  { %v2436_v60 = vadd.f32 %v2435_v50, %v2406_v40  ;;  %v2443_v11 = vpop.f32.mrf.mxu3 }
 0x637   :  { %v2453_v62 = vpack.c.bf16 %v2436_v60, %v2434_v13 }
 0x638   :  { %3502 = vmatpush.bf16.msrb.mxu0 %v14858_v63 }
 0x639   :  { %2530 = vmatmul.bf16.vlgmr.msra.gmra.mxu2 %v2453_v62 }
 0x63a   :  { %3092 = vmatpush.bf16.msra.mxu2 %v14926_v59 }
 0x63c   :  { %3503 = vmatpush.bf16.msrb.mxu0 %v14866_v7  ;;  %v2315_v18 = vpop.f32.mrf.mxu0  ;;  %v2409_v27 = vpop.f32.mrf.mxu1 }
 0x63d   :  { %v16138_v47 = vadd.f32 %v2315_v18, %v16064_v17  ;;  %v2439_v55 = vadd.f32 %v2438_v53, %v2409_v27  ;;  %v2445_v13 = vpop.f32.mrf.mxu3 }
 0x63e   :  { %3093 = vmatpush.bf16.msra.mxu2 %v14939_v3 }
 0x640   :  { %3504 = vmatpush.bf16.msrb.mxu0 %v14874_v14 }
 0x642   :  { %3094 = vmatpush.bf16.msra.mxu2 %v14958_v12 }
 0x644   :  { %3505 = vmatpush.bf16.msrb.mxu0 %v14882_v24  ;;  %v16144_v20 = vpop.f32.mrf.mxu0  ;;  %v2411_v50 = vpop.f32.mrf.mxu1 }
 0x645   :  { %v2441_v9 = vadd.f32 %v2440_v45, %v2411_v50  ;;  %v2448_v53 = vpop.f32.mrf.mxu3 }
 0x647   :  { %v2454_v30 = vpack.c.bf16 %v2441_v9, %v2439_v55 }
 0x648   :  { %3506 = vmatpush.bf16.msrb.mxu0 %v14886_v28 }
 0x649   :  { %2535 = vmatmul.bf16.gmra.mxu2 %v2454_v30 }
 0x64c   :  { %3507 = vmatpush.bf16.msrb.mxu0 %v14899_v35  ;;  %v2320_v17 = vpop.f32.mrf.mxu0  ;;  %v2414_v25 = vpop.f32.mrf.mxu1 }
 0x64d   :  { %v16148_v40 = vadd.f32 %v2320_v17, %v2113_v16  ;;  %v2444_v18 = vadd.f32 %v2443_v11, %v2414_v25  ;;  %v2450_v55 = vpop.f32.mrf.mxu3  ;;  %v14105_v17 = vld [vmem:[%s18419_s0 + $0x2d4] sm:$0xf] }
 0x654   :  { %v16150_v60 = vpop.f32.mrf.mxu0  ;;  %v2416_v62 = vpop.f32.mrf.mxu1 }
 0x655   :  { %v2446_v8 = vadd.f32 %v2445_v13, %v2416_v62  ;;  %v10762_v13 = vld [vmem:[%s18419_s0 + $0x2c0] sm:$0xf]  ;;  %v14104_v62 = vld [vmem:[%s18419_s0 + $0x2c4] sm:$0xf0] }
 0x657   :  { %v2455_v2 = vpack.c.bf16 %v2446_v8, %v2444_v18  ;;  %v10772_v8 = vld [vmem:[%s18419_s0 + $0x2d8] sm:$0xf0] }
 0x658   :  { %v10775_v11 = vor.u32 %v14105_v17, %v10772_v8  ;;  %v14150_v8 = vld [vmem:[%s18420_s1 + $0x378] sm:$0xff] }
 0x659   :  { %2540 = vmatmul.bf16.gmra.mxu2 %v2455_v2 }
 0x65a   :  { %10793 = vmatmul.msk.bf16.gmra.mxu0 %vm410_vm6, %v10775_v11 }
 0x65c   :  { %v2325_v45 = vpop.f32.mrf.mxu0  ;;  %v2419_v27 = vpop.f32.mrf.mxu1 }
 0x65d   :  { %v16152_v50 = vadd.f32 %v2325_v45, %v2115_v34  ;;  %v2449_v39 = vadd.f32 %v2448_v53, %v2419_v27 }
 0x664   :  { %v16154_v9 = vpop.f32.mrf.mxu0  ;;  %v2421_v30 = vpop.f32.mrf.mxu1 }
 0x665   :  { %18426 = vst [vmem:[#allocation7_spill] sm:$0xff] %v16154_v9  ;;  %v2451_v16 = vadd.f32 %v2450_v55, %v2421_v30  ;;  %v10763_v55 = vor.u32 %v14104_v62, %v10762_v13  ;;  %v10780_v30 = vld [vmem:[%s18419_s0 + $0x2e8] sm:$0xf0]  ;;  %v14106_v13 = vld [vmem:[%s18419_s0 + $0x2d4] sm:$0xf0] }
 0x667   :  { %v2456_v2 = vpack.c.bf16 %v2451_v16, %v2449_v39  ;;  %v14107_v39 = vld [vmem:[%s18419_s0 + $0x2e4] sm:$0xf] }
 0x668   :  { %v10783_v16 = vor.u32 %v14107_v39, %v10780_v30  ;;  %v14109_v39 = vld [vmem:[%s18419_s0 + $0x2f4] sm:$0xf]  ;;  %v10788_v30 = vld [vmem:[%s18419_s0 + $0x2f8] sm:$0xf0] }
 0x669   :  { %2545 = vmatmul.bf16.gmra.mxu2 %v2456_v2 }
 0x66a   :  { %10794 = vmatmul.msk.bf16.gmra.mxu0 %vm410_vm6, %v10783_v16  ;;  %v10791_v16 = vor.u32 %v14109_v39, %v10788_v30  ;;  %v14143_v30 = vld [vmem:[%s18420_s1 + $0x340] sm:$0xff] }
 0x66c   :  { %v2625_v34 = vpop.f32.mrf.mxu0  ;;  %v2654_v25 = vpop.f32.mrf.mxu1 }
 0x66d   :  { %v2655_v18 = vadd.f32 %v2654_v25, %v2625_v34  ;;  %v14149_v34 = vld [vmem:[%s18420_s1 + $0x370] sm:$0xff] }
 0x66e   :  { %v10770_v25 = vld [vmem:[%s18419_s0 + $0x2d0] sm:$0xf] }
 0x674   :  { %v2627_v53 = vpop.f32.mrf.mxu0  ;;  %v2656_v45 = vpop.f32.mrf.mxu1 }
 0x675   :  { %v2657_v27 = vadd.f32 %v2656_v45, %v2627_v53 }
 0x677   :  { %v2674_v17 = vpack.c.bf16 %v2657_v27, %v2655_v18  ;;  %v14148_v18 = vld [vmem:[%s18420_s1 + $0x368] sm:$0xff] }
 0x679   :  { %2751 = vmatmul.bf16.vlgmr.msrb.gmra.mxu3 %v2674_v17  ;;  %2845 = vmatmul.bf16.vlgmr.msrb.gmra.mxu2 %v10763_v55  ;;  %v10771_v55 = vor.u32 %v14106_v13, %v10770_v25  ;;  %v14145_v25 = vld [vmem:[%s18420_s1 + $0x350] sm:$0xff]  ;;  %v10778_v13 = vld [vmem:[%s18419_s0 + $0x2e0] sm:$0xf] }
 0x67a   :  { %3313 = vmatpush.bf16.msrb.mxu3 %v14926_v59  ;;  %3406 = vmatpush.bf16.msrb.mxu2 %v14150_v8  ;;  %v14147_v8 = vld [vmem:[%s18420_s1 + $0x360] sm:$0xff] }
 0x67b   :  { %10795 = vmatmul.msk.bf16.gmra.mxu0 %vm410_vm6, %v10791_v16 }
 0x67c   :  { %v2630_v11 = vpop.f32.mrf.mxu0  ;;  %v2659_v2 = vpop.f32.mrf.mxu1 }
 0x67d   :  { %v2660_v62 = vadd.f32 %v2659_v2, %v2630_v11  ;;  %v14146_v11 = vld [vmem:[%s18420_s1 + $0x358] sm:$0xff] }
 0x67e   :  { %3314 = vmatpush.bf16.msrb.mxu3 %v14939_v3  ;;  %3407 = vmatpush.bf16.msrb.mxu2 %v14149_v34 }
 0x682   :  { %3315 = vmatpush.bf16.msrb.mxu3 %v14958_v12  ;;  %3408 = vmatpush.bf16.msrb.mxu2 %v14148_v18  ;;  %v14144_v18 = vld [vmem:[%s18420_s1 + $0x348] sm:$0xff] }
 0x684   :  { %v2632_v53 = vpop.f32.mrf.mxu0  ;;  %v2661_v45 = vpop.f32.mrf.mxu1 }
 0x685   :  { %v2662_v27 = vadd.f32 %v2661_v45, %v2632_v53 }
 0x686   :  { %3409 = vmatpush.bf16.msrb.mxu2 %v14147_v8 }
 0x687   :  { %v2675_v17 = vpack.c.bf16 %v2662_v27, %v2660_v62  ;;  %v14108_v62 = vld [vmem:[%s18419_s0 + $0x2e4] sm:$0xf0] }
 0x688   :  { %v10779_v39 = vor.u32 %v14108_v62, %v10778_v13 }
 0x689   :  { %2756 = vmatmul.bf16.gmra.mxu3 %v2675_v17  ;;  %2850 = vmatmul.bf16.gmra.mxu2 %v10771_v55 }
 0x68a   :  { %3410 = vmatpush.bf16.msrb.mxu2 %v14146_v11  ;;  %v10786_v11 = vld [vmem:[%s18419_s0 + $0x2f0] sm:$0xf] }
 0x68c   :  { %v2635_v2 = vpop.f32.mrf.mxu0  ;;  %v2664_v34 = vpop.f32.mrf.mxu1 }
 0x68d   :  { %v2665_v53 = vadd.f32 %v2664_v34, %v2635_v2  ;;  %v14110_v2 = vld [vmem:[%s18419_s0 + $0x2f4] sm:$0xf0] }
 0x68e   :  { %3411 = vmatpush.bf16.msrb.mxu2 %v14145_v25 }
 0x692   :  { %3412 = vmatpush.bf16.msrb.mxu2 %v14144_v18  ;;  %v10787_v18 = vor.u32 %v14110_v2, %v10786_v11  ;;  %v10862_v11 = vld [vmem:[%s18419_s0 + $0x310] sm:$0xf]  ;;  %v14122_v2 = vld [vmem:[%s18419_s0 + $0x314] sm:$0xf0] }
 0x694   :  { %v2637_v45 = vpop.f32.mrf.mxu0  ;;  %v2666_v27 = vpop.f32.mrf.mxu1 }
 0x695   :  { %v2667_v55 = vadd.f32 %v2666_v27, %v2637_v45  ;;  %v14120_v27 = vld [vmem:[%s18419_s0 + $0x304] sm:$0xf0] }
 0x696   :  { %3413 = vmatpush.bf16.msrb.mxu2 %v14143_v30 }
 0x697   :  { %v2676_v16 = vpack.c.bf16 %v2667_v55, %v2665_v53  ;;  %v10854_v53 = vld [vmem:[%s18419_s0 + $0x300] sm:$0xf]  ;;  %v14119_v55 = vld [vmem:[%s18419_s0 + $0x304] sm:$0xf] }
 0x698   :  { %v10855_v30 = vor.u32 %v14120_v27, %v10854_v53  ;;  %v10878_v27 = vld [vmem:[%s18419_s0 + $0x330] sm:$0xf] }
 0x699   :  { %2761 = vmatmul.bf16.gmra.mxu3 %v2676_v16  ;;  %2855 = vmatmul.bf16.gmra.mxu2 %v10779_v39  ;;  %v10856_v39 = vld [vmem:[%s18419_s0 + $0x308] sm:$0xf0] }
 0x69a   :  { %v10859_v16 = vor.u32 %v14119_v55, %v10856_v39  ;;  %v14126_v55 = vld [vmem:[%s18419_s0 + $0x334] sm:$0xf0]  ;;  %v14125_v39 = vld [vmem:[%s18419_s0 + $0x334] sm:$0xf] }
 0x69c   :  { %v2640_v17 = vpop.f32.mrf.mxu0  ;;  %v2669_v8 = vpop.f32.mrf.mxu1 }
 0x69d   :  { %v2670_v34 = vadd.f32 %v2669_v8, %v2640_v17 }
 0x6a4   :  { %v2642_v25 = vpop.f32.mrf.mxu0  ;;  %v2671_v13 = vpop.f32.mrf.mxu1 }
 0x6a5   :  { %v2672_v62 = vadd.f32 %v2671_v13, %v2642_v25 }
 0x6a7   :  { %v2677_v45 = vpack.c.bf16 %v2672_v62, %v2670_v34  ;;  %v14121_v34 = vld [vmem:[%s18419_s0 + $0x314] sm:$0xf]  ;;  %v10870_v62 = vld [vmem:[%s18419_s0 + $0x320] sm:$0xf] }
 0x6a9   :  { %2766 = vmatmul.bf16.gmra.mxu3 %v2677_v45  ;;  %2860 = vmatmul.bf16.gmra.mxu2 %v10787_v18  ;;  %v14123_v18 = vld [vmem:[%s18419_s0 + $0x324] sm:$0xf] }
 0x6b9   :  { %3066 = vmatmul.bf16.vlgmr.msra.gmra.mxu3 %v10855_v30  ;;  %10884 = vmatmul.msk.bf16.vlgmr.msra.gmra.mxu2 %vm410_vm6, %v10859_v16  ;;  %v10879_v16 = vor.u32 %v14126_v55, %v10878_v27 }
 0x6ba   :  { %3721 = vmatpush.bf16.msra.mxu2 %v14844_v48  ;;  %v10864_v48 = vld [vmem:[%s18419_s0 + $0x318] sm:$0xf0] }
 0x6bb   :  { %v10867_v25 = vor.u32 %v14121_v34, %v10864_v48 }
 0x6bc   :  { %v2531_v17 = vpop.f32.mrf.mxu2 }
 0x6bd   :  { %v2551_v8 = vadd.f32 %v2531_v17, %v16127_v1 }
 0x6be   :  { %3722 = vmatpush.bf16.msra.mxu2 %v14852_v56  ;;  %v10863_v56 = vor.u32 %v14122_v2, %v10862_v11  ;;  %v2875_v2 = vpop.f32.mrf.mxu0 }
 0x6c2   :  { %3723 = vmatpush.bf16.msra.mxu2 %v14858_v63 }
 0x6c4   :  { %v16257_v1 = vpop.f32.mrf.mxu2 }
 0x6c6   :  { %3724 = vmatpush.bf16.msra.mxu2 %v14866_v7  ;;  %v14124_v7 = vld [vmem:[%s18419_s0 + $0x324] sm:$0xf0]  ;;  %v2877_v48 = vpop.f32.mrf.mxu0 }
 0x6c9   :  { %3071 = vmatmul.bf16.gmra.mxu3 %v10863_v56  ;;  %10885 = vmatmul.msk.bf16.gmra.mxu2 %vm410_vm6, %v10867_v25 }
 0x6ca   :  { %3725 = vmatpush.bf16.msra.mxu2 %v14874_v14  ;;  %v10872_v14 = vld [vmem:[%s18419_s0 + $0x328] sm:$0xf0] }
 0x6cb   :  { %v10875_v45 = vor.u32 %v14123_v18, %v10872_v14 }
 0x6cc   :  { %v2536_v63 = vpop.f32.mrf.mxu2 }
 0x6cd   :  { %v2553_v13 = vadd.f32 %v2536_v63, %v16138_v47 }
 0x6ce   :  { %3726 = vmatpush.bf16.msra.mxu2 %v14882_v24  ;;  %v10871_v24 = vor.u32 %v14124_v7, %v10870_v62 }
 0x6d2   :  { %3727 = vmatpush.bf16.msra.mxu2 %v14886_v28 }
 0x6d4   :  { %v16277_v47 = vpop.f32.mrf.mxu2 }
 0x6d6   :  { %3728 = vmatpush.bf16.msra.mxu2 %v14899_v35  ;;  %v10880_v35 = vld [vmem:[%s18419_s0 + $0x338] sm:$0xf0] }
 0x6d7   :  { %v2880_v62 = vpop.f32.mrf.mxu0 }
 0x6d9   :  { %3076 = vmatmul.bf16.gmra.mxu3 %v10871_v24  ;;  %10886 = vmatmul.msk.bf16.gmra.mxu2 %vm410_vm6, %v10875_v45 }
 0x6dc   :  { %v2541_v28 = vpop.f32.mrf.mxu2 }
 0x6dd   :  { %v2555_v53 = vadd.f32 %v2541_v28, %v16148_v40  ;;  %v10883_v40 = vor.u32 %v14125_v39, %v10880_v35 }
 0x6df   :  { %v2882_v28 = vpop.f32.mrf.mxu0 }
 0x6e4   :  { %v16294_v30 = vpop.f32.mrf.mxu2 }
 0x6e5   :  { %18427 = vst [vmem:[#allocation8_spill] sm:$0xff] %v16294_v30 }
 0x6e9   :  { %3081 = vmatmul.bf16.gmra.mxu3 %v10879_v16  ;;  %10887 = vmatmul.msk.bf16.gmra.mxu2 %vm410_vm6, %v10883_v40  ;;  %v2885_v40 = vpop.f32.mrf.mxu0 }
 0x6ec   :  { %v2546_v17 = vpop.f32.mrf.mxu2 }
 0x6ed   :  { %v2557_v11 = vadd.f32 %v2546_v17, %v16152_v50 }
 0x6f4   :  { %v16298_v34 = vpop.f32.mrf.mxu2 }
 0x6f5   :  { %18428 = vst [vmem:[#allocation9_spill] sm:$0xff] %v16298_v34 }
 0x6fc   :  { %v2752_v56 = vpop.f32.mrf.mxu3  ;;  %v2846_v25 = vpop.f32.mrf.mxu2 }
 0x6fd   :  { %v16300_v63 = vadd.f32 %v2752_v56, %v2551_v8  ;;  %v2876_v14 = vadd.f32 %v2875_v2, %v2846_v25  ;;  %v14135_v2 = vld [vmem:[%s18419_s0 + $0x344] sm:$0xf] }
 0x704   :  { %v16302_v7 = vpop.f32.mrf.mxu3  ;;  %v2848_v18 = vpop.f32.mrf.mxu2 }
 0x705   :  { %v2878_v24 = vadd.f32 %v2877_v48, %v2848_v18 }
 0x707   :  { %v2895_v45 = vpack.c.bf16 %v2878_v24, %v2876_v14 }
 0x709   :  { %2972 = vmatmul.bf16.vlgmr.msrb.gmra.mxu1 %v2895_v45 }
 0x70a   :  { %3534 = vmatpush.bf16.msrb.mxu1 %v14926_v59 }
 0x70c   :  { %v2757_v50 = vpop.f32.mrf.mxu3  ;;  %v2851_v27 = vpop.f32.mrf.mxu2 }
 0x70d   :  { %v16305_v55 = vadd.f32 %v2757_v50, %v2553_v13  ;;  %v2881_v35 = vadd.f32 %v2880_v62, %v2851_v27  ;;  %v10948_v13 = vld [vmem:[%s18419_s0 + $0x348] sm:$0xf0]  ;;  %v2887_v62 = vpop.f32.mrf.mxu0 }
 0x70e   :  { %3535 = vmatpush.bf16.msrb.mxu1 %v14939_v3  ;;  %v10951_v48 = vor.u32 %v14135_v2, %v10948_v13 }
 0x710   :  { %10976 = vmatmul.msk.bf16.vlgmr.msrb.gmra.mxu3 %vm410_vm6, %v10951_v48 }
 0x712   :  { %3536 = vmatpush.bf16.msrb.mxu1 %v14958_v12 }
 0x714   :  { %v16309_v8 = vpop.f32.mrf.mxu3  ;;  %v2853_v39 = vpop.f32.mrf.mxu2 }
 0x715   :  { %v2883_v16 = vadd.f32 %v2882_v28, %v2853_v39  ;;  %v2890_v27 = vpop.f32.mrf.mxu0  ;;  %v14137_v39 = vld [vmem:[%s18419_s0 + $0x354] sm:$0xf] }
 0x717   :  { %v2896_v17 = vpack.c.bf16 %v2883_v16, %v2881_v35  ;;  %v10956_v35 = vld [vmem:[%s18419_s0 + $0x358] sm:$0xf0] }
 0x718   :  { %v10959_v16 = vor.u32 %v14137_v39, %v10956_v35  ;;  %v14136_v39 = vld [vmem:[%s18419_s0 + $0x344] sm:$0xf0] }
 0x719   :  { %2977 = vmatmul.bf16.gmra.mxu1 %v2896_v17 }
 0x71c   :  { %v2762_v56 = vpop.f32.mrf.mxu3  ;;  %v2856_v25 = vpop.f32.mrf.mxu2 }
 0x71d   :  { %v16318_v18 = vadd.f32 %v2762_v56, %v2555_v53  ;;  %v2886_v45 = vadd.f32 %v2885_v40, %v2856_v25  ;;  %v2892_v40 = vpop.f32.mrf.mxu0 }
 0x720   :  { %10977 = vmatmul.msk.bf16.gmra.mxu3 %vm410_vm6, %v10959_v16 }
 0x724   :  { %v16320_v14 = vpop.f32.mrf.mxu3  ;;  %v2858_v24 = vpop.f32.mrf.mxu2 }
 0x725   :  { %18429 = vst [vmem:[#allocation10_spill] sm:$0xff] %v16320_v14  ;;  %v2888_v28 = vadd.f32 %v2887_v62, %v2858_v24  ;;  %v14139_v24 = vld [vmem:[%s18419_s0 + $0x364] sm:$0xf] }
 0x727   :  { %v2897_v50 = vpack.c.bf16 %v2888_v28, %v2886_v45  ;;  %v10964_v45 = vld [vmem:[%s18419_s0 + $0x368] sm:$0xf0] }
 0x728   :  { %v10967_v28 = vor.u32 %v14139_v24, %v10964_v45 }
 0x729   :  { %2982 = vmatmul.bf16.gmra.mxu1 %v2897_v50 }
 0x72c   :  { %v2767_v53 = vpop.f32.mrf.mxu3  ;;  %v2861_v17 = vpop.f32.mrf.mxu2 }
 0x72d   :  { %v16329_v2 = vadd.f32 %v2767_v53, %v2557_v11  ;;  %v2891_v56 = vadd.f32 %v2890_v27, %v2861_v17  ;;  %v10946_v27 = vld [vmem:[%s18419_s0 + $0x340] sm:$0xf] }
 0x730   :  { %10978 = vmatmul.msk.bf16.gmra.mxu3 %vm410_vm6, %v10967_v28  ;;  %v10954_v28 = vld [vmem:[%s18419_s0 + $0x350] sm:$0xf] }
 0x734   :  { %v16331_v13 = vpop.f32.mrf.mxu3  ;;  %v2863_v48 = vpop.f32.mrf.mxu2 }
 0x735   :  { %18430 = vst [vmem:[#allocation11_spill] sm:$0xff] %v16331_v13  ;;  %v2893_v25 = vadd.f32 %v2892_v40, %v2863_v48  ;;  %v10947_v40 = vor.u32 %v14136_v39, %v10946_v27 }
 0x737   :  { %v2898_v62 = vpack.c.bf16 %v2893_v25, %v2891_v56  ;;  %v14141_v56 = vld [vmem:[%s18419_s0 + $0x374] sm:$0xf]  ;;  %v10972_v25 = vld [vmem:[%s18419_s0 + $0x378] sm:$0xf0] }
 0x739   :  { %2987 = vmatmul.bf16.gmra.mxu1 %v2898_v62  ;;  %v10975_v62 = vor.u32 %v14141_v56, %v10972_v25 }
 0x73c   :  { %v3067_v50 = vpop.f32.mrf.mxu3  ;;  %v3096_v11 = vpop.f32.mrf.mxu2 }
 0x73d   :  { %v3097_v35 = vadd.f32 %v3096_v11, %v3067_v50  ;;  %v14138_v50 = vld [vmem:[%s18419_s0 + $0x354] sm:$0xf0] }
 0x740   :  { %10979 = vmatmul.msk.bf16.gmra.mxu3 %vm410_vm6, %v10975_v62 }
 0x744   :  { %v3069_v16 = vpop.f32.mrf.mxu3  ;;  %v3098_v53 = vpop.f32.mrf.mxu2 }
 0x745   :  { %v3099_v17 = vadd.f32 %v3098_v53, %v3069_v16 }
 0x747   :  { %v3116_v48 = vpack.c.bf16 %v3099_v17, %v3097_v35  ;;  %v10955_v35 = vor.u32 %v14138_v50, %v10954_v28  ;;  %v14140_v17 = vld [vmem:[%s18419_s0 + $0x364] sm:$0xf0]  ;;  %v10970_v50 = vld [vmem:[%s18419_s0 + $0x370] sm:$0xf] }
 0x749   :  { %3193 = vmatmul.bf16.vlgmr.msra.gmra.mxu0 %v3116_v48  ;;  %3287 = vmatmul.bf16.vlgmr.msra.gmra.mxu1 %v10947_v40 }
 0x74a   :  { %3755 = vmatpush.bf16.msra.mxu0 %v14926_v59 }
 0x74c   :  { %v3072_v24 = vpop.f32.mrf.mxu3  ;;  %v3101_v45 = vpop.f32.mrf.mxu2 }
 0x74d   :  { %v3102_v11 = vadd.f32 %v3101_v45, %v3072_v24 }
 0x74e   :  { %3756 = vmatpush.bf16.msra.mxu0 %v14939_v3 }
 0x752   :  { %3757 = vmatpush.bf16.msra.mxu0 %v14958_v12  ;;  %v10962_v12 = vld [vmem:[%s18419_s0 + $0x360] sm:$0xf] }
 0x753   :  { %v10963_v62 = vor.u32 %v14140_v17, %v10962_v12  ;;  %v14152_v12 = vld [vmem:[%s18419_s0 + $0x384] sm:$0xf0]  ;;  %v14151_v17 = vld [vmem:[%s18419_s0 + $0x384] sm:$0xf] }
 0x754   :  { %v3074_v27 = vpop.f32.mrf.mxu3  ;;  %v3103_v59 = vpop.f32.mrf.mxu2 }
 0x755   :  { %v3104_v39 = vadd.f32 %v3103_v59, %v3074_v27 }
 0x757   :  { %v3117_v16 = vpack.c.bf16 %v3104_v39, %v3102_v11  ;;  %v14142_v11 = vld [vmem:[%s18419_s0 + $0x374] sm:$0xf0] }
 0x759   :  { %3198 = vmatmul.bf16.gmra.mxu0 %v3117_v16  ;;  %3292 = vmatmul.bf16.gmra.mxu1 %v10955_v35  ;;  %v10971_v16 = vor.u32 %v14142_v11, %v10970_v50  ;;  %v14153_v50 = vld [vmem:[%s18419_s0 + $0x394] sm:$0xf] }
 0x75c   :  { %v3077_v53 = vpop.f32.mrf.mxu3  ;;  %v3106_v3 = vpop.f32.mrf.mxu2 }
 0x75d   :  { %v3107_v40 = vadd.f32 %v3106_v3, %v3077_v53  ;;  %v11038_v3 = vld [vmem:[%s18419_s0 + $0x380] sm:$0xf] }
 0x764   :  { %v3079_v48 = vpop.f32.mrf.mxu3  ;;  %v3108_v56 = vpop.f32.mrf.mxu2 }
 0x765   :  { %v3109_v25 = vadd.f32 %v3108_v56, %v3079_v48  ;;  %v11039_v48 = vor.u32 %v14152_v12, %v11038_v3  ;;  %v14155_v3 = vld [vmem:[%s18419_s0 + $0x3a4] sm:$0xf] }
 0x767   :  { %v3118_v24 = vpack.c.bf16 %v3109_v25, %v3107_v40  ;;  %v11040_v40 = vld [vmem:[%s18419_s0 + $0x388] sm:$0xf0] }
 0x768   :  { %v11043_v56 = vor.u32 %v14151_v17, %v11040_v40 }
 0x769   :  { %3203 = vmatmul.bf16.gmra.mxu0 %v3118_v24  ;;  %3297 = vmatmul.bf16.gmra.mxu1 %v10963_v62 }
 0x76c   :  { %v3082_v45 = vpop.f32.mrf.mxu3  ;;  %v3111_v28 = vpop.f32.mrf.mxu2 }
 0x76d   :  { %v3112_v27 = vadd.f32 %v3111_v28, %v3082_v45  ;;  %v11046_v45 = vld [vmem:[%s18419_s0 + $0x390] sm:$0xf]  ;;  %v14154_v28 = vld [vmem:[%s18419_s0 + $0x394] sm:$0xf0] }
 0x76e   :  { %v11047_v11 = vor.u32 %v14154_v28, %v11046_v45  ;;  %v14158_v45 = vld [vmem:[%s18419_s0 + $0x3b4] sm:$0xf0]  ;;  %v14157_v28 = vld [vmem:[%s18419_s0 + $0x3b4] sm:$0xf] }
 0x774   :  { %v3084_v59 = vpop.f32.mrf.mxu3  ;;  %v3113_v39 = vpop.f32.mrf.mxu2 }
 0x775   :  { %v3114_v35 = vadd.f32 %v3113_v39, %v3084_v59 }
 0x777   :  { %v3119_v53 = vpack.c.bf16 %v3114_v35, %v3112_v27 }
 0x779   :  { %3208 = vmatmul.bf16.gmra.mxu0 %v3119_v53  ;;  %3302 = vmatmul.bf16.gmra.mxu1 %v10971_v16  ;;  %v11054_v16 = vld [vmem:[%s18419_s0 + $0x3a0] sm:$0xf]  ;;  %v14156_v53 = vld [vmem:[%s18419_s0 + $0x3a4] sm:$0xf0] }
 0x77a   :  { %v11055_v12 = vor.u32 %v14156_v53, %v11054_v16 }
 0x786   :  { %v2973_v25 = vpop.f32.mrf.mxu1 }
 0x787   :  { %v2993_v62 = vadd.f32 %v2973_v25, %v16300_v63  ;;  %v11048_v63 = vld [vmem:[%s18419_s0 + $0x398] sm:$0xf0]  ;;  %v11062_v25 = vld [vmem:[%s18419_s0 + $0x3b0] sm:$0xf] }
 0x788   :  { %v11051_v27 = vor.u32 %v14153_v50, %v11048_v63  ;;  %v11063_v50 = vor.u32 %v14158_v45, %v11062_v25 }
 0x789   :  { %3508 = vmatmul.bf16.vlgmr.msrb.gmra.mxu0 %v11039_v48  ;;  %11068 = vmatmul.msk.bf16.vlgmr.msrb.gmra.mxu1 %vm410_vm6, %v11043_v56 }
 0x78e   :  { %v16388_v24 = vpop.f32.mrf.mxu1 }
 0x796   :  { %v2978_v59 = vpop.f32.mrf.mxu1 }
 0x797   :  { %v2995_v39 = vadd.f32 %v2978_v59, %v16305_v55  ;;  %v11056_v55 = vld [vmem:[%s18419_s0 + $0x3a8] sm:$0xf0]  ;;  %v3317_v59 = vpop.f32.mrf.mxu3 }
 0x798   :  { %v11059_v17 = vor.u32 %v14155_v3, %v11056_v55 }
 0x799   :  { %3513 = vmatmul.bf16.gmra.mxu0 %v11047_v11  ;;  %11069 = vmatmul.msk.bf16.gmra.mxu1 %vm410_vm6, %v11051_v27 }
 0x79e   :  { %v16404_v35 = vpop.f32.mrf.mxu1 }
 0x79f   :  { %v3319_v53 = vpop.f32.mrf.mxu3 }
 0x7a6   :  { %v2983_v40 = vpop.f32.mrf.mxu1 }
 0x7a7   :  { %v2997_v48 = vadd.f32 %v2983_v40, %v16318_v18  ;;  %v11064_v18 = vld [vmem:[%s18419_s0 + $0x3b8] sm:$0xf0] }
 0x7a8   :  { %v11067_v63 = vor.u32 %v14157_v28, %v11064_v18 }
 0x7a9   :  { %3518 = vmatmul.bf16.gmra.mxu0 %v11055_v12  ;;  %11070 = vmatmul.msk.bf16.gmra.mxu1 %vm410_vm6, %v11059_v17  ;;  %v3322_v17 = vpop.f32.mrf.mxu3 }
 0x7ae   :  { %v16420_v56 = vpop.f32.mrf.mxu1 }
 0x7af   :  { %18431 = vst [vmem:[#allocation12_spill] sm:$0xff] %v16420_v56 }
 0x7b1   :  { %v3324_v18 = vpop.f32.mrf.mxu3 }
 0x7b6   :  { %v2988_v11 = vpop.f32.mrf.mxu1 }
 0x7b7   :  { %v2999_v27 = vadd.f32 %v2988_v11, %v16329_v2  ;;  %v14166_v2 = vld [vmem:[%s18420_s1 + $0x3b8] sm:$0xff] }
 0x7b8   :  { %3627 = vmatpush.bf16.msra.mxu3 %v14166_v2 }
 0x7b9   :  { %3523 = vmatmul.bf16.gmra.mxu0 %v11063_v50  ;;  %11071 = vmatmul.msk.bf16.gmra.mxu1 %vm410_vm6, %v11067_v63 }
 0x7be   :  { %v16436_v16 = vpop.f32.mrf.mxu1 }
 0x7bf   :  { %18432 = vst [vmem:[#allocation13_spill] sm:$0xff] %v16436_v16 }
 0x7c6   :  { %v3194_v3 = vpop.f32.mrf.mxu0  ;;  %v3288_v55 = vpop.f32.mrf.mxu1 }
 0x7c7   :  { %v16438_v12 = vadd.f32 %v3194_v3, %v2993_v62  ;;  %v3318_v25 = vadd.f32 %v3317_v59, %v3288_v55  ;;  %v14165_v62 = vld [vmem:[%s18420_s1 + $0x3b0] sm:$0xff] }
 0x7c8   :  { %3628 = vmatpush.bf16.msra.mxu3 %v14165_v62 }
 0x7ce   :  { %v16440_v40 = vpop.f32.mrf.mxu0  ;;  %v3290_v13 = vpop.f32.mrf.mxu1 }
 0x7cf   :  { %v3320_v45 = vadd.f32 %v3319_v53, %v3290_v13  ;;  %v14164_v13 = vld [vmem:[%s18420_s1 + $0x3a8] sm:$0xff] }
 0x7d0   :  { %3629 = vmatpush.bf16.msra.mxu3 %v14164_v13 }
 0x7d1   :  { %v3337_v28 = vpack.c.bf16 %v3320_v45, %v3318_v25  ;;  %v3327_v25 = vpop.f32.mrf.mxu3 }
 0x7d3   :  { %3414 = vmatmul.bf16.vlgmr.msrb.gmra.mxu2 %v3337_v28  ;;  %v14162_v28 = vld [vmem:[%s18420_s1 + $0x398] sm:$0xff] }
 0x7d6   :  { %v3199_v50 = vpop.f32.mrf.mxu0  ;;  %v3293_v63 = vpop.f32.mrf.mxu1 }
 0x7d7   :  { %v16445_v11 = vadd.f32 %v3199_v50, %v2995_v39  ;;  %v3323_v3 = vadd.f32 %v3322_v17, %v3293_v63  ;;  %v14163_v39 = vld [vmem:[%s18420_s1 + $0x3a0] sm:$0xff]  ;;  %v14161_v17 = vld [vmem:[%s18420_s1 + $0x390] sm:$0xff]  ;;  %v14160_v63 = vld [vmem:[%s18420_s1 + $0x388] sm:$0xff] }
 0x7d8   :  { %3630 = vmatpush.bf16.msra.mxu3 %v14163_v39  ;;  %v14167_v39 = vld [vmem:[%s18419_s0 + $0x3c4] sm:$0xf] }
 0x7dc   :  { %3631 = vmatpush.bf16.msra.mxu3 %v14162_v28 }
 0x7de   :  { %v16453_v59 = vpop.f32.mrf.mxu0  ;;  %v3295_v53 = vpop.f32.mrf.mxu1 }
 0x7df   :  { %v3325_v55 = vadd.f32 %v3324_v18, %v3295_v53  ;;  %v3329_v18 = vpop.f32.mrf.mxu3 }
 0x7e0   :  { %3632 = vmatpush.bf16.msra.mxu3 %v14161_v17 }
 0x7e1   :  { %v3338_v45 = vpack.c.bf16 %v3325_v55, %v3323_v3 }
 0x7e3   :  { %3419 = vmatmul.bf16.gmra.mxu2 %v3338_v45  ;;  %v11132_v45 = vld [vmem:[%s18419_s0 + $0x3c8] sm:$0xf0] }
 0x7e4   :  { %3633 = vmatpush.bf16.msra.mxu3 %v14160_v63  ;;  %v11135_v28 = vor.u32 %v14167_v39, %v11132_v45  ;;  %v14169_v39 = vld [vmem:[%s18419_s0 + $0x3d4] sm:$0xf] }
 0x7e6   :  { %v3204_v2 = vpop.f32.mrf.mxu0  ;;  %v3298_v50 = vpop.f32.mrf.mxu1  ;;  %11160 = vmatmul.msk.bf16.vlgmr.msra.gmra.mxu0 %vm410_vm6, %v11135_v28  ;;  %v11130_v28 = vld [vmem:[%s18419_s0 + $0x3c0] sm:$0xf] }
 0x7e7   :  { %v16461_v62 = vadd.f32 %v3204_v2, %v2997_v48  ;;  %v3328_v3 = vadd.f32 %v3327_v25, %v3298_v50  ;;  %v14159_v48 = vld [vmem:[%s18420_s1 + $0x380] sm:$0xff]  ;;  %v3332_v17 = vpop.f32.mrf.mxu3 }
 0x7e8   :  { %3634 = vmatpush.bf16.msra.mxu3 %v14159_v48 }
 0x7ee   :  { %v16469_v13 = vpop.f32.mrf.mxu0  ;;  %v3300_v53 = vpop.f32.mrf.mxu1 }
 0x7ef   :  { %18433 = vst [vmem:[#allocation14_spill] sm:$0xff] %v16469_v13  ;;  %v3330_v55 = vadd.f32 %v3329_v18, %v3300_v53  ;;  %v3334_v63 = vpop.f32.mrf.mxu3 }
 0x7f1   :  { %v3339_v2 = vpack.c.bf16 %v3330_v55, %v3328_v3  ;;  %v11140_v3 = vld [vmem:[%s18419_s0 + $0x3d8] sm:$0xf0] }
 0x7f2   :  { %v11143_v55 = vor.u32 %v14169_v39, %v11140_v3 }
 0x7f3   :  { %3424 = vmatmul.bf16.gmra.mxu2 %v3339_v2 }
 0x7f6   :  { %v3209_v25 = vpop.f32.mrf.mxu0  ;;  %v3303_v50 = vpop.f32.mrf.mxu1  ;;  %11161 = vmatmul.msk.bf16.gmra.mxu0 %vm410_vm6, %v11143_v55 }
 0x7f7   :  { %v16481_v18 = vadd.f32 %v3209_v25, %v2999_v27  ;;  %v3333_v34 = vadd.f32 %v3332_v17, %v3303_v50 }
 0x7fe   :  { %v16483_v53 = vpop.f32.mrf.mxu0  ;;  %v3305_v16 = vpop.f32.mrf.mxu1 }
 0x7ff   :  { %18434 = vst [vmem:[#allocation15_spill] sm:$0xff] %v16483_v53  ;;  %v3335_v9 = vadd.f32 %v3334_v63, %v3305_v16  ;;  %v14168_v16 = vld [vmem:[%s18419_s0 + $0x3c4] sm:$0xf0] }
 0x800   :  { %v11131_v63 = vor.u32 %v14168_v16, %v11130_v28 }
 0x801   :  { %v3340_v48 = vpack.c.bf16 %v3335_v9, %v3333_v34  ;;  %v14171_v9 = vld [vmem:[%s18419_s0 + $0x3e4] sm:$0xf]  ;;  %v11148_v34 = vld [vmem:[%s18419_s0 + $0x3e8] sm:$0xf0] }
 0x802   :  { %v11151_v39 = vor.u32 %v14171_v9, %v11148_v34 }
 0x803   :  { %3429 = vmatmul.bf16.gmra.mxu2 %v3340_v48 }
 0x806   :  { %v3509_v27 = vpop.f32.mrf.mxu0  ;;  %v3538_v45 = vpop.f32.mrf.mxu1  ;;  %11162 = vmatmul.msk.bf16.gmra.mxu0 %vm410_vm6, %v11151_v39 }
 0x807   :  { %v3539_v2 = vadd.f32 %v3538_v45, %v3509_v27  ;;  %v11138_v27 = vld [vmem:[%s18419_s0 + $0x3d0] sm:$0xf]  ;;  %v14170_v45 = vld [vmem:[%s18419_s0 + $0x3d4] sm:$0xf0] }
 0x808   :  { %v11139_v9 = vor.u32 %v14170_v45, %v11138_v27 }
 0x80e   :  { %v3511_v17 = vpop.f32.mrf.mxu0  ;;  %v3540_v25 = vpop.f32.mrf.mxu1 }
 0x80f   :  { %v3541_v50 = vadd.f32 %v3540_v25, %v3511_v17 }
 0x811   :  { %v3558_v3 = vpack.c.bf16 %v3541_v50, %v3539_v2  ;;  %v14173_v2 = vld [vmem:[%s18419_s0 + $0x3f4] sm:$0xf]  ;;  %v11156_v50 = vld [vmem:[%s18419_s0 + $0x3f8] sm:$0xf0] }
 0x813   :  { %3635 = vmatmul.bf16.vlgmr.msra.gmra.mxu3 %v3558_v3  ;;  %3729 = vmatmul.bf16.vlgmr.msra.gmra.mxu2 %v11131_v63  ;;  %v11159_v63 = vor.u32 %v14173_v2, %v11156_v50  ;;  %v11154_v50 = vld [vmem:[%s18419_s0 + $0x3f0] sm:$0xf] }
 0x816   :  { %v3514_v55 = vpop.f32.mrf.mxu0  ;;  %v3543_v48 = vpop.f32.mrf.mxu1  ;;  %11163 = vmatmul.msk.bf16.gmra.mxu0 %vm410_vm6, %v11159_v63  ;;  %v14174_v63 = vld [vmem:[%s18419_s0 + $0x3f4] sm:$0xf0] }
 0x817   :  { %v3544_v28 = vadd.f32 %v3543_v48, %v3514_v55  ;;  %v11146_v55 = vld [vmem:[%s18419_s0 + $0x3e0] sm:$0xf]  ;;  %v14172_v48 = vld [vmem:[%s18419_s0 + $0x3e4] sm:$0xf0]  ;;  %v11155_v13 = vor.u32 %v14174_v63, %v11154_v50  ;;  %v14177_v50 = vld [vmem:[%s18420_s1 + $0x3d0] sm:$0xff] }
 0x818   :  { %v11147_v2 = vor.u32 %v14172_v48, %v11146_v55  ;;  %v14176_v63 = vld [vmem:[%s18420_s1 + $0x3c8] sm:$0xff] }
 0x81e   :  { %v3516_v16 = vpop.f32.mrf.mxu0  ;;  %v3545_v17 = vpop.f32.mrf.mxu1 }
 0x81f   :  { %v3546_v25 = vadd.f32 %v3545_v17, %v3516_v16 }
 0x821   :  { %v3559_v34 = vpack.c.bf16 %v3546_v25, %v3544_v28 }
 0x823   :  { %3640 = vmatmul.bf16.gmra.mxu3 %v3559_v34  ;;  %3734 = vmatmul.bf16.gmra.mxu2 %v11139_v9 }
 0x826   :  { %v3519_v39 = vpop.f32.mrf.mxu0  ;;  %v3548_v3 = vpop.f32.mrf.mxu1 }
 0x827   :  { %v3549_v27 = vadd.f32 %v3548_v3, %v3519_v39 }
 0x82e   :  { %v3521_v45 = vpop.f32.mrf.mxu0  ;;  %v3550_v16 = vpop.f32.mrf.mxu1 }
 0x82f   :  { %v3551_v17 = vadd.f32 %v3550_v16, %v3521_v45  ;;  %v14182_v16 = vld [vmem:[%s18420_s1 + $0x3f8] sm:$0xff] }
 0x830   :  { %3848 = vmatpush.bf16.msra.mxu1 %v14182_v16 }
 0x831   :  { %v3560_v28 = vpack.c.bf16 %v3551_v17, %v3549_v27 }
 0x833   :  { %3645 = vmatmul.bf16.gmra.mxu3 %v3560_v28  ;;  %3739 = vmatmul.bf16.gmra.mxu2 %v11147_v2  ;;  %v14179_v28 = vld [vmem:[%s18420_s1 + $0x3e0] sm:$0xff] }
 0x836   :  { %v3524_v25 = vpop.f32.mrf.mxu0  ;;  %v3553_v9 = vpop.f32.mrf.mxu1 }
 0x837   :  { %v3554_v34 = vadd.f32 %v3553_v9, %v3524_v25 }
 0x83e   :  { %v3526_v53 = vpop.f32.mrf.mxu0  ;;  %v3555_v39 = vpop.f32.mrf.mxu1 }
 0x83f   :  { %v3556_v3 = vadd.f32 %v3555_v39, %v3526_v53  ;;  %v14181_v53 = vld [vmem:[%s18420_s1 + $0x3f0] sm:$0xff]  ;;  %v14175_v39 = vld [vmem:[%s18420_s1 + $0x3c0] sm:$0xff] }
 0x840   :  { %3849 = vmatpush.bf16.msra.mxu1 %v14181_v53 }
 0x841   :  { %v3561_v45 = vpack.c.bf16 %v3556_v3, %v3554_v34 }
 0x843   :  { %3650 = vmatmul.bf16.gmra.mxu3 %v3561_v45  ;;  %3744 = vmatmul.bf16.gmra.mxu2 %v11155_v13 }
 0x856   :  { %v3415_v55 = vpop.f32.mrf.mxu2 }
 0x857   :  { %v16531_v48 = vadd.f32 %v3415_v55, %v16438_v12  ;;  %v14180_v12 = vld [vmem:[%s18420_s1 + $0x3e8] sm:$0xff] }
 0x858   :  { %3850 = vmatpush.bf16.msra.mxu1 %v14180_v12 }
 0x85c   :  { %3851 = vmatpush.bf16.msra.mxu1 %v14179_v28 }
 0x85e   :  { %v16533_v27 = vpop.f32.mrf.mxu2 }
 0x863   :  { %v3759_v45 = vpop.f32.mrf.mxu0 }
 0x866   :  { %v3420_v17 = vpop.f32.mrf.mxu2 }
 0x867   :  { %v16539_v2 = vadd.f32 %v3420_v17, %v16445_v11  ;;  %v14178_v11 = vld [vmem:[%s18420_s1 + $0x3d8] sm:$0xff] }
 0x868   :  { %3852 = vmatpush.bf16.msra.mxu1 %v14178_v11 }
 0x86b   :  { %v3761_v16 = vpop.f32.mrf.mxu0 }
 0x86c   :  { %3853 = vmatpush.bf16.msra.mxu1 %v14177_v50 }
 0x86e   :  { %v16547_v13 = vpop.f32.mrf.mxu2 }
 0x870   :  { %3854 = vmatpush.bf16.msra.mxu1 %v14176_v63 }
 0x873   :  { %v3764_v53 = vpop.f32.mrf.mxu0 }
 0x874   :  { %3855 = vmatpush.bf16.msra.mxu1 %v14175_v39 }
 0x876   :  { %v3425_v25 = vpop.f32.mrf.mxu2 }
 0x877   :  { %v16556_v9 = vadd.f32 %v3425_v25, %v16461_v62 }
 0x879   :  { %18435 = vst [vmem:[#allocation16_spill] sm:$0xff] %v16556_v9 }
 0x87b   :  { %v3766_v63 = vpop.f32.mrf.mxu0 }
 0x87e   :  { %v16564_v34 = vpop.f32.mrf.mxu2 }
 0x87f   :  { %18436 = vst [vmem:[#allocation17_spill] sm:$0xff] %v16564_v34 }
 0x883   :  { %v3769_v54 = vpop.f32.mrf.mxu0 }
 0x886   :  { %v3430_v3 = vpop.f32.mrf.mxu2 }
 0x887   :  { %v16570_v62 = vadd.f32 %v3430_v3, %v16481_v18 }
 0x889   :  { %18437 = vst [vmem:[#allocation18_spill] sm:$0xff] %v16570_v62 }
 0x88b   :  { %v3771_v3 = vpop.f32.mrf.mxu0 }
 0x88e   :  { %v16572_v55 = vpop.f32.mrf.mxu2 }
 0x88f   :  { %18438 = vst [vmem:[#allocation19_spill] sm:$0xff] %v16572_v55 }
 0x893   :  { %v3774_v30 = vpop.f32.mrf.mxu0 }
 0x896   :  { %v3730_v17 = vpop.f32.mrf.mxu2 }
 0x897   :  { %v3760_v28 = vadd.f32 %v3759_v45, %v3730_v17 }
 0x89e   :  { %v3732_v12 = vpop.f32.mrf.mxu2 }
 0x89f   :  { %v3762_v11 = vadd.f32 %v3761_v16, %v3732_v12  ;;  %v3776_v16 = vpop.f32.mrf.mxu0 }
 0x8a1   :  { %v3779_v25 = vpack.c.bf16 %v3762_v11, %v3760_v28 }
 0x8a3   :  { %3856 = vmatmul.bf16.vlgmr.msra.gmra.mxu1 %v3779_v25 }
 0x8a6   :  { %v3735_v50 = vpop.f32.mrf.mxu2 }
 0x8a7   :  { %v3765_v56 = vadd.f32 %v3764_v53, %v3735_v50  ;;  %v3636_v53 = vpop.f32.mrf.mxu3 }
 0x8ae   :  { %v3737_v34 = vpop.f32.mrf.mxu2 }
 0x8af   :  { %v3767_v39 = vadd.f32 %v3766_v63, %v3737_v34  ;;  %v3638_v34 = vpop.f32.mrf.mxu3 }
 0x8b1   :  { %v3780_v9 = vpack.c.bf16 %v3767_v39, %v3765_v56  ;;  %v774_v56 = vadd.f32 %v15370_v36, %v15376_v46  ;;  %v784_v36 = vadd.f32 %v15387_v22, %v15389_v26 }
 0x8b3   :  { %3861 = vmatmul.bf16.gmra.mxu1 %v3780_v9  ;;  %v1005_v9 = vadd.f32 %v15529_v29, %v774_v56 }
 0x8b6   :  { %v3740_v18 = vpop.f32.mrf.mxu2 }
 0x8b7   :  { %v3770_v55 = vadd.f32 %v3769_v54, %v3740_v18  ;;  %v779_v54 = vadd.f32 %v15381_v57, %v15383_v61 }
 0x8be   :  { %v3742_v62 = vpop.f32.mrf.mxu2 }
 0x8bf   :  { %v3772_v14 = vadd.f32 %v3771_v3, %v3742_v62  ;;  %v1007_v62 = vadd.f32 %v15536_v37, %v779_v54  ;;  %v3656_v3 = vadd.f32 %v3636_v53, %v16531_v48 }
 0x8c1   :  { %v3781_v4 = vpack.c.bf16 %v3772_v14, %v3770_v55  ;;  %v3641_v55 = vpop.f32.mrf.mxu3  ;;  %v1228_v25 = vadd.f32 %v15532_v33, %v1007_v62 }
 0x8c3   :  { %3866 = vmatmul.bf16.gmra.mxu1 %v3781_v4  ;;  %v1226_v4 = vadd.f32 %v15524_v0, %v1005_v9  ;;  %v1449_v63 = vadd.f32 %v15723_v32, %v1228_v25  ;;  %v1009_v0 = vadd.f32 %v15543_v10, %v784_v36  ;;  %v18447_v25 = vld [vmem:[#allocation14_spill] sm:$0xff] }
 0x8c5   :  { %v1670_v61 = vadd.f32 %v15920_v6, %v1449_v63 }
 0x8c6   :  { %v3745_v45 = vpop.f32.mrf.mxu2 }
 0x8c7   :  { %v3775_v12 = vadd.f32 %v3774_v30, %v3745_v45  ;;  %v1447_v30 = vadd.f32 %v15712_v19, %v1226_v4  ;;  %v1891_v19 = vadd.f32 %v15909_v51, %v1670_v61  ;;  %v18439_v45 = vld [vmem:[#allocation8_spill] sm:$0xff] }
 0x8c9   :  { %v1668_v50 = vadd.f32 %v15902_v15, %v1447_v30  ;;  %v3643_v37 = vpop.f32.mrf.mxu3  ;;  %v1230_v15 = vadd.f32 %v15541_v42, %v1009_v0  ;;  %v2112_v32 = vadd.f32 %v16075_v44, %v1891_v19  ;;  %v18449_v19 = vld [vmem:[#allocation5_spill] sm:$0xff] }
 0x8cb   :  { %v1889_v57 = vadd.f32 %v15887_v43, %v1668_v50  ;;  %v1451_v26 = vadd.f32 %v15728_v38, %v1230_v15  ;;  %v2333_v6 = vadd.f32 %v16144_v20, %v2112_v32  ;;  %v789_v20 = vadd.f32 %v15522_v21, %v15393_v41 }
 0x8cd   :  { %v2110_v29 = vadd.f32 %v16041_v23, %v1889_v57  ;;  %v1672_v23 = vadd.f32 %v15935_v5, %v1451_v26  ;;  %v2554_v39 = vadd.f32 %v16277_v47, %v2333_v6 }
 0x8ce   :  { %v3747_v17 = vpop.f32.mrf.mxu2 }
 0x8cf   :  { %v3777_v28 = vadd.f32 %v3776_v16, %v3747_v17  ;;  %v2331_v33 = vadd.f32 %v16132_v58, %v2110_v29  ;;  %v2775_v58 = vadd.f32 %v16309_v8, %v2554_v39  ;;  %v1893_v44 = vadd.f32 %v15927_v52, %v1672_v23  ;;  %v18441_v17 = vld [vmem:[#allocation2_spill] sm:$0xff] }
 0x8d0   :  { %v1011_v8 = vadd.f32 %v15548_v49, %v789_v20 }
 0x8d1   :  { %v3782_v11 = vpack.c.bf16 %v3777_v28, %v3775_v12  ;;  %v2552_v22 = vadd.f32 %v16257_v1, %v2331_v33  ;;  %v3646_v1 = vpop.f32.mrf.mxu3  ;;  %v2996_v38 = vadd.f32 %v16404_v35, %v2775_v58  ;;  %v2114_v5 = vadd.f32 %v16102_v31, %v1893_v44  ;;  %v14640_v31 = vld [vmem:[%s18440_s28] ss:$0 sm:$0xff]  ;;  %v18443_v28 = vld [vmem:[#allocation16_spill] sm:$0xff]  ;;  %v18451_v44 = vld [vmem:[#allocation7_spill] sm:$0xff] }
 0x8d2   :  { %v3658_v35 = vadd.f32 %v3641_v55, %v16539_v2  ;;  %v1232_v49 = vadd.f32 %v18441_v17, %v1011_v8  ;;  %v18442_v12 = vld [vmem:[#allocation10_spill] sm:$0xff]  ;;  %v18444_v2 = vld [vmem:[#allocation3_spill] sm:$0xff]  ;;  %v18446_v55 = vld [vmem:[#allocation4_spill] sm:$0xff] }
 0x8d3   :  { %3871 = vmatmul.bf16.gmra.mxu1 %v3782_v11  ;;  %v2773_v10 = vadd.f32 %v16302_v7, %v2552_v22  ;;  %v3217_v47 = vadd.f32 %v16453_v59, %v2996_v38 }
 0x8d4   :  { %v1453_v53 = vadd.f32 %v18444_v2, %v1232_v49 }
 0x8d5   :  { %v2994_v51 = vadd.f32 %v16388_v24, %v2773_v10  ;;  %v3438_v52 = vadd.f32 %v16547_v13, %v3217_v47  ;;  %v3660_v13 = vadd.f32 %v3646_v1, %v18443_v28 }
 0x8d6   :  { %v1674_v30 = vadd.f32 %v18446_v55, %v1453_v53  ;;  %v14202_v55 = vld [vmem:[%s18389_s9 + $0x78] sm:$0xff] }
 0x8d7   :  { %v3215_v42 = vadd.f32 %v16440_v40, %v2994_v51  ;;  %v2335_v40 = vadd.f32 %v16150_v60, %v2114_v5  ;;  %v3659_v41 = vadd.f32 %v3643_v37, %v3438_v52  ;;  %v18452_v5 = vld [vmem:[#allocation9_spill] sm:$0xff]  ;;  %4171 = vmatpush.bf16.msrb.mxu2 %v14202_v55 }
 0x8d8   :  { %v1895_v33 = vadd.f32 %v18449_v19, %v1674_v30 }
 0x8d9   :  { %v3436_v18 = vadd.f32 %v16533_v27, %v3215_v42  ;;  %v2556_v16 = vadd.f32 %v18439_v45, %v2335_v40  ;;  %v3648_v9 = vpop.f32.mrf.mxu3  ;;  %v18453_v40 = vld [vmem:[#allocation11_spill] sm:$0xff] }
 0x8db   :  { %v3657_v24 = vadd.f32 %v3638_v34, %v3436_v18  ;;  %v2777_v60 = vadd.f32 %v18442_v12, %v2556_v16  ;;  %v18445_v34 = vld [vmem:[#allocation12_spill] sm:$0xff]  ;;  %v18455_v16 = vld [vmem:[#allocation13_spill] sm:$0xff] }
 0x8dd   :  { %v2998_v56 = vadd.f32 %v18445_v34, %v2777_v60  ;;  %v18457_v60 = vld [vmem:[#allocation19_spill] sm:$0xff] }
 0x8df   :  { %v3219_v50 = vadd.f32 %v18447_v25, %v2998_v56 }
 0x8e1   :  { %v3651_v42 = vpop.f32.mrf.mxu3 }
 0x8e9   :  { %v3653_v12 = vpop.f32.mrf.mxu3 }
 0x920   :  { %v3857_v14 = vpop.f32.mrf.mxu1 }
 0x921   :  { %v3877_v21 = vadd.f32 %v3857_v14, %v3656_v3  ;;  %v18454_v3 = vld [vmem:[#allocation18_spill] sm:$0xff] }
 0x923   :  { %v16627_v14 = vadd.f32 %v14640_v31, %v3877_v21 }
 0x925   :  { %v3910_v61 = vmul.f32 %v16627_v14, %v16627_v14 }
 0x928   :  { %v3859_v46 = vpop.f32.mrf.mxu1 }
 0x929   :  { %v3878_v27 = vadd.f32 %v3859_v46, %v3657_v24  ;;  %v18448_v46 = vld [vmem:[#allocation17_spill] sm:$0xff] }
 0x92a   :  { %v3440_v57 = vadd.f32 %v18448_v46, %v3219_v50  ;;  %v14201_v46 = vld [vmem:[%s18389_s9 + $0x70] sm:$0xff] }
 0x92b   :  { %v16623_v11 = vadd.f32 %v14640_v31, %v3878_v27  ;;  %4172 = vmatpush.bf16.msrb.mxu2 %v14201_v46 }
 0x92c   :  { %v3661_v15 = vadd.f32 %v3648_v9, %v3440_v57 }
 0x92d   :  { %v3911_v63 = vmul.f32 %v16623_v11, %v16623_v11  ;;  %v3897_v0 = vadd.f32 %v16623_v11, %v16627_v14 }
 0x92f   :  { %v3918_v32 = vadd.f32 %v3911_v63, %v3910_v61 }
 0x930   :  { %v3862_v43 = vpop.f32.mrf.mxu1 }
 0x931   :  { %v3879_v59 = vadd.f32 %v3862_v43, %v3658_v35  ;;  %v18450_v43 = vld [vmem:[#allocation6_spill] sm:$0xff]  ;;  %v3662_v35 = vadd.f32 %v3651_v42, %v18454_v3 }
 0x932   :  { %v2116_v6 = vadd.f32 %v18450_v43, %v1895_v33  ;;  %v14200_v33 = vld [vmem:[%s18389_s9 + $0x68] sm:$0xff] }
 0x933   :  { %v16629_v4 = vadd.f32 %v14640_v31, %v3879_v59  ;;  %v18456_v59 = vld [vmem:[#allocation15_spill] sm:$0xff]  ;;  %4173 = vmatpush.bf16.msrb.mxu2 %v14200_v33 }
 0x934   :  { %v2337_v1 = vadd.f32 %v18451_v44, %v2116_v6  ;;  %v14199_v6 = vld [vmem:[%s18389_s9 + $0x60] sm:$0xff] }
 0x935   :  { %v3912_v29 = vmul.f32 %v16629_v4, %v16629_v4  ;;  %v3898_v22 = vadd.f32 %v3897_v0, %v16629_v4 }
 0x937   :  { %v3919_v23 = vadd.f32 %v3918_v32, %v3912_v29  ;;  %4174 = vmatpush.bf16.msrb.mxu2 %v14199_v6  ;;  %v14183_v6 = vld [vmem:[%s18392_s8] sm:$0xff] }
 0x938   :  { %v3864_v7 = vpop.f32.mrf.mxu1 }
 0x939   :  { %v3880_v48 = vadd.f32 %v3864_v7, %v3659_v41  ;;  %v2558_v7 = vadd.f32 %v18452_v5, %v2337_v1 }
 0x93b   :  { %v16635_v36 = vadd.f32 %v14640_v31, %v3880_v48  ;;  %v2779_v52 = vadd.f32 %v18453_v40, %v2558_v7  ;;  %v14196_v7 = vld [vmem:[%s18389_s9 + $0x48] sm:$0xff] }
 0x93d   :  { %v3913_v26 = vmul.f32 %v16635_v36, %v16635_v36  ;;  %v3899_v39 = vadd.f32 %v3898_v22, %v16635_v36  ;;  %v3000_v41 = vadd.f32 %v18455_v16, %v2779_v52 }
 0x93f   :  { %v3920_v38 = vadd.f32 %v3919_v23, %v3913_v26  ;;  %v3221_v17 = vadd.f32 %v18456_v59, %v3000_v41  ;;  %v3953_v41 = vld [vmem:[%s18391_s7] sm:$0x1] }
 0x940   :  { %v3867_v54 = vpop.f32.mrf.mxu1 }
 0x941   :  { %v3881_v62 = vadd.f32 %v3867_v54, %v3660_v13  ;;  %v3442_v28 = vadd.f32 %v18457_v60, %v3221_v17 }
 0x943   :  { %v16644_v37 = vadd.f32 %v14640_v31, %v3881_v62  ;;  %v3663_v2 = vadd.f32 %v3653_v12, %v3442_v28 }
 0x945   :  { %v3914_v51 = vmul.f32 %v16644_v37, %v16644_v37  ;;  %v3900_v18 = vadd.f32 %v3899_v39, %v16644_v37 }
 0x947   :  { %v3921_v47 = vadd.f32 %v3920_v38, %v3914_v51  ;;  %v14197_v38 = vld [vmem:[%s18389_s9 + $0x50] sm:$0xff] }
 0x948   :  { %v3869_v10 = vpop.f32.mrf.mxu1 }
 0x949   :  { %v3882_v58 = vadd.f32 %v3869_v10, %v3661_v15 }
 0x94b   :  { %v16656_v20 = vadd.f32 %v14640_v31, %v3882_v58  ;;  %v14198_v58 = vld [vmem:[%s18389_s9 + $0x58] sm:$0xff] }
 0x94c   :  { %4175 = vmatpush.bf16.msrb.mxu2 %v14198_v58  ;;  %v14223_v58 = vld [vmem:[%s18392_s8 + $0x40] sm:$0xff] }
 0x94d   :  { %v3901_v24 = vadd.f32 %v3900_v18, %v16656_v20  ;;  %v3915_v8 = vmul.f32 %v16656_v20, %v16656_v20 }
 0x94f   :  { %v3922_v27 = vadd.f32 %v3921_v47, %v3915_v8  ;;  %v14195_v47 = vld [vmem:[%s18389_s9 + $0x40] sm:$0xff] }
 0x950   :  { %v3872_v45 = vpop.f32.mrf.mxu1  ;;  %4176 = vmatpush.bf16.msrb.mxu2 %v14197_v38  ;;  %v14244_v38 = vld [vmem:[%s18392_s8 + $0x68] sm:$0xff] }
 0x951   :  { %v3883_v21 = vadd.f32 %v3872_v45, %v3662_v35  ;;  %v3940_v35 = vld [vmem:[%s18390_s6] sm:$0x1] }
 0x953   :  { %v16666_v49 = vadd.f32 %v14640_v31, %v3883_v21 }
 0x954   :  { %4177 = vmatpush.bf16.msrb.mxu2 %v14196_v7  ;;  %v14190_v7 = vld [vmem:[%s18389_s9 + $0x28] sm:$0xff] }
 0x955   :  { %v3902_v13 = vadd.f32 %v3901_v24, %v16666_v49  ;;  %v3916_v48 = vmul.f32 %v16666_v49, %v16666_v49 }
 0x957   :  { %v3923_v53 = vadd.f32 %v3922_v27, %v3916_v48 }
 0x958   :  { %v3874_v34 = vpop.f32.mrf.mxu1  ;;  %4178 = vmatpush.bf16.msrb.mxu2 %v14195_v47  ;;  %v14189_v47 = vld [vmem:[%s18389_s9 + $0x20] sm:$0xff] }
 0x959   :  { %v3884_v56 = vadd.f32 %v3874_v34, %v3663_v2 }
 0x95b   :  { %v16672_v9 = vadd.f32 %v14640_v31, %v3884_v56  ;;  %v3885_v31 = vld [vmem:[%s18440_s28] sm:$0x1] }
 0x95c   :  { %v3931_v19 = vmul.f32 14.0, %v3885_v31 }
 0x95d   :  { %v3903_v54 = vadd.f32 %v3902_v13, %v16672_v9  ;;  %v3917_v62 = vmul.f32 %v16672_v9, %v16672_v9 }
 0x95e   :  { %v3933_v43 = vmul.f32 %v3931_v19, %v3885_v31 }
 0x95f   :  { %v3904_v30 = vrot.slane %v3903_v54, 4  ;;  %v3924_v25 = vadd.f32 %v3923_v53, %v3917_v62 }
 0x961   :  { %v3905_v50 = vadd.f32 %v3904_v30, %v3903_v54  ;;  %v3925_v63 = vrot.slane %v3924_v25, 4 }
 0x963   :  { %v3906_v57 = vrot.slane %v3905_v50, 2  ;;  %v3926_v61 = vadd.f32 %v3925_v63, %v3924_v25 }
 0x965   :  { %v3907_v0 = vadd.f32 %v3906_v57, %v3905_v50  ;;  %v3927_v29 = vrot.slane %v3926_v61, 2 }
 0x967   :  { %v3908_v15 = vrot.slane %v3907_v0, 1  ;;  %v3928_v32 = vadd.f32 %v3927_v29, %v3926_v61 }
 0x969   :  { %v3909_v22 = vadd.f32 %v3908_v15, %v3907_v0  ;;  %v3929_v26 = vrot.slane %v3928_v32, 1 }
 0x96b   :  { %v3930_v10 = vadd.f32 %v3929_v26, %v3928_v32  ;;  %v3932_v23 = vsub.f32 %v3909_v22, %v3931_v19 }
 0x96d   :  { %v3934_v39 = vsub.f32 %v3930_v10, %v3933_v43  ;;  %v3935_v51 = vmul.f32 0.02, %v3932_v23  ;;  %v14203_v10 = vld [vmem:[%s18392_s8 + $0x20] sm:$0xff]  ;;  %v14184_v23 = vld [vmem:[%s18392_s8 + $0x8] sm:$0xff] }
 0x96f   :  { %v3936_v42 = vmul.f32 0.02, %v3934_v39  ;;  %v3937_v44 = vmul.f32 %v3935_v51, %v3935_v51  ;;  %v14204_v39 = vld [vmem:[%s18392_s8 + $0x28] sm:$0xff] }
 0x971   :  { %v3938_v1 = vsub.f32 %v3936_v42, %v3937_v44  ;;  %v14194_v42 = vld [vmem:[%s18392_s8 + $0x18] sm:$0xff]  ;;  %v14224_v44 = vld [vmem:[%s18392_s8 + $0x48] sm:$0xff] }
 0x973   :  { %v3939_v18 = vmax.f32 %v3938_v1, 0.0  ;;  %v14243_v1 = vld [vmem:[%s18392_s8 + $0x60] sm:$0xff] }
 0x975   :  { %v3941_v5 = vadd.f32 1e-05, %v3939_v18  ;;  %v14192_v18 = vld [vmem:[%s18389_s9 + $0x38] sm:$0xff] }
 0x976   :  { %4238 = vmatpush.bf16.msrb.mxu0 %v14192_v18 }
 0x977   :  { %14644 = vrsqrt.f32 %v3941_v5  ;;  %vm3948_vm8 = vweird.f32 %v3941_v5 }
 0x97d   :  { %v14645_v24 = vpop.eup %14644 }
 0x97e   :  { %v3943_v8 = vmul.f32 %v14645_v24, %v3941_v5  ;;  %vm3949_vm7 = vweird.f32 %v14645_v24  ;;  %v14191_v5 = vld [vmem:[%s18389_s9 + $0x30] sm:$0xff] }
 0x97f   :  { %vm3950_vm9 = vmor %vm3948_vm8, %vm3949_vm7  ;;  %4239 = vmatpush.bf16.msrb.mxu0 %v14191_v5  ;;  %v14217_v5 = vld [vmem:[%s18389_s9 + $0xd0] sm:$0xff] }
 0x980   :  { %v3944_v40 = vmul.f32 %v14645_v24, %v3943_v8  ;;  %v14188_v8 = vld [vmem:[%s18389_s9 + $0x18] sm:$0xff] }
 0x982   :  { %v3945_v52 = vmul.f32 0.5, %v3944_v40  ;;  %v14187_v40 = vld [vmem:[%s18389_s9 + $0x10] sm:$0xff] }
 0x983   :  { %4240 = vmatpush.bf16.msrb.mxu0 %v14190_v7  ;;  %v14226_v7 = vld [vmem:[%s18389_s9 + $0x108] sm:$0xff] }
 0x984   :  { %v3946_v3 = vsub.f32 1.5, %v3945_v52  ;;  %v14186_v52 = vld [vmem:[%s18389_s9 + $0x8] sm:$0xff] }
 0x986   :  { %v3947_v27 = vmul.f32 %v14645_v24, %v3946_v3  ;;  %v14185_v3 = vld [vmem:[%s18389_s9] sm:$0xff] }
 0x987   :  { %4241 = vmatpush.bf16.msrb.mxu0 %v14189_v47 }
 0x988   :  { %v3951_v45 = vsel %vm3950_vm9, %v14645_v24, %v3947_v27  ;;  %v14263_v24 = vld [vmem:[%s18392_s8 + $0x80] sm:$0xff]  ;;  %v14212_v27 = vld [vmem:[%s18389_s9 + $0xb8] sm:$0xff] }
 0x989   :  { %v3952_v16 = vmul.f32 %v3951_v45, %v3940_v35  ;;  %v14264_v35 = vld [vmem:[%s18392_s8 + $0x88] sm:$0xff]  ;;  %v14211_v45 = vld [vmem:[%s18389_s9 + $0xb0] sm:$0xff] }
 0x98b   :  { %v3954_v21 = vmul.f32 %v3952_v16, %v3935_v51  ;;  %v3957_v59 = vperm.slane %v3952_v16, 0  ;;  %v14193_v51 = vld [vmem:[%s18392_s8 + $0x10] sm:$0xff]  ;;  %4242 = vmatpush.bf16.msrb.mxu0 %v14188_v8  ;;  %v14210_v16 = vld [vmem:[%s18389_s9 + $0xa8] sm:$0xff] }
 0x98d   :  { %v3955_v17 = vsub.f32 %v3953_v41, %v3954_v21  ;;  %v3959_v12 = vmul.f32 %v3957_v59, %v16627_v14  ;;  %v3960_v60 = vmul.f32 %v3957_v59, %v16623_v11  ;;  %v3963_v28 = vmul.f32 %v3957_v59, %v16644_v37  ;;  %v14209_v41 = vld [vmem:[%s18389_s9 + $0xa0] sm:$0xff] }
 0x98e   :  { %v3964_v13 = vmul.f32 %v3957_v59, %v16656_v20  ;;  %v3965_v48 = vmul.f32 %v3957_v59, %v16666_v49  ;;  %v3961_v2 = vmul.f32 %v3957_v59, %v16629_v4  ;;  %v3962_v53 = vmul.f32 %v3957_v59, %v16635_v36  ;;  %v14283_v21 = vld [vmem:[%s18392_s8 + $0xa0] sm:$0xff] }
 0x98f   :  { %v3966_v34 = vmul.f32 %v3957_v59, %v16672_v9  ;;  %v3968_v56 = vperm.slane %v3955_v17, 0  ;;  %4243 = vmatpush.bf16.msrb.mxu0 %v14187_v40  ;;  %v14208_v59 = vld [vmem:[%s18389_s9 + $0x98] sm:$0xff] }
 0x991   :  { %v3970_v54 = vadd.f32 %v3968_v56, %v3959_v12  ;;  %v3971_v62 = vadd.f32 %v3968_v56, %v3960_v60  ;;  %v3972_v55 = vadd.f32 %v3968_v56, %v3961_v2  ;;  %v3973_v30 = vadd.f32 %v3968_v56, %v3962_v53  ;;  %v14207_v60 = vld [vmem:[%s18389_s9 + $0x90] sm:$0xff]  ;;  %v14205_v53 = vld [vmem:[%s18389_s9 + $0x80] sm:$0xff] }
 0x992   :  { %v3974_v14 = vadd.f32 %v3968_v56, %v3963_v28  ;;  %v3975_v25 = vadd.f32 %v3968_v56, %v3964_v13  ;;  %v3976_v11 = vadd.f32 %v3968_v56, %v3965_v48  ;;  %v3977_v50 = vadd.f32 %v3968_v56, %v3966_v34  ;;  %v14206_v28 = vld [vmem:[%s18389_s9 + $0x88] sm:$0xff] }
 0x993   :  { %vm3978_vm10 = vcmp.gt.f32.partialorder %v3970_v54, 0.0  ;;  %vm3979_vm11 = vcmp.gt.f32.partialorder %v3971_v62, 0.0  ;;  %vm3980_vm12 = vcmp.gt.f32.partialorder %v3972_v55, 0.0  ;;  %vm3981_vm13 = vcmp.gt.f32.partialorder %v3973_v30, 0.0  ;;  %4244 = vmatpush.bf16.msrb.mxu0 %v14186_v52  ;;  %v14225_v52 = vld [vmem:[%s18389_s9 + $0x100] sm:$0xff] }
 0x994   :  { %vm3982_vm14 = vcmp.gt.f32.partialorder %v3974_v14, 0.0  ;;  %vm3983_vm15 = vcmp.gt.f32.partialorder %v3975_v25, 0.0  ;;  %vm3984_vm0 = vcmp.gt.f32.partialorder %v3976_v11, 0.0  ;;  %vm3985_vm1 = vcmp.gt.f32.partialorder %v3977_v50, 0.0 }
 0x995   :  { %v3986_v4 = vmul.f32 0.2, %v3970_v54  ;;  %v3987_v36 = vmul.f32 0.2, %v3971_v62  ;;  %v3988_v37 = vmul.f32 0.2, %v3972_v55 }
 0x996   :  { %v3989_v20 = vmul.f32 0.2, %v3973_v30  ;;  %v3990_v49 = vmul.f32 0.2, %v3974_v14  ;;  %v3991_v9 = vmul.f32 0.2, %v3975_v25 }
 0x997   :  { %v3992_v63 = vmul.f32 0.2, %v3976_v11  ;;  %v3993_v46 = vmul.f32 0.2, %v3977_v50  ;;  %v3994_v31 = vsel %vm3978_vm10, %v3970_v54, %v3986_v4  ;;  %v3995_v57 = vsel %vm3979_vm11, %v3971_v62, %v3987_v36  ;;  %4245 = vmatpush.bf16.msrb.mxu0 %v14185_v3 }
 0x998   :  { %v3996_v61 = vsel %vm3980_vm12, %v3972_v55, %v3988_v37  ;;  %v3997_v0 = vsel %vm3981_vm13, %v3973_v30, %v3989_v20  ;;  %v3998_v29 = vsel %vm3982_vm14, %v3974_v14, %v3990_v49  ;;  %v3999_v19 = vsel %vm3983_vm15, %v3975_v25, %v3991_v9  ;;  %v14213_v20 = vld [vmem:[%s18392_s8 + $0x30] sm:$0xff]  ;;  %v14214_v49 = vld [vmem:[%s18392_s8 + $0x38] sm:$0xff] }
 0x999   :  { %v4000_v33 = vsel %vm3984_vm0, %v3976_v11, %v3992_v63  ;;  %v4001_v15 = vsel %vm3985_vm1, %v3977_v50, %v3993_v46  ;;  %v16726_v32 = vpack.c.bf16 %v3995_v57, %v3994_v31  ;;  %v16728_v22 = vpack.c.bf16 %v3997_v0, %v3996_v61  ;;  %v14233_v9 = vld [vmem:[%s18392_s8 + $0x50] sm:$0xff]  ;;  %v14234_v63 = vld [vmem:[%s18392_s8 + $0x58] sm:$0xff] }
 0x99a   :  { %v16730_v26 = vpack.c.bf16 %v3999_v19, %v3998_v29  ;;  %v16732_v43 = vpack.c.bf16 %v4001_v15, %v4000_v33  ;;  %v14253_v46 = vld [vmem:[%s18392_s8 + $0x70] sm:$0xff]  ;;  %v14232_v31 = vld [vmem:[%s18389_s9 + $0x138] sm:$0xff]  ;;  %v14284_v29 = vld [vmem:[%s18392_s8 + $0xa8] sm:$0xff]  ;;  %vm6167_vm10 = vcmask 261120   ;;  %vm7938_vm0 = vcmask 130048  }
 0x99b   :  { %v14254_v57 = vld [vmem:[%s18392_s8 + $0x78] sm:$0xff]  ;;  %v14231_v0 = vld [vmem:[%s18389_s9 + $0x130] sm:$0xff]  ;;  %v14230_v33 = vld [vmem:[%s18389_s9 + $0x128] sm:$0xff] }
 0x99c   :  { %4031 = vmatpush.bf16.msrb.mxu3 %v16732_v43  ;;  %4282 = vmatpush.bf16.msrb.mxu1 %v16732_v43  ;;  %v14222_v61 = vld [vmem:[%s18389_s9 + $0xf8] sm:$0xff]  ;;  %v14221_v19 = vld [vmem:[%s18389_s9 + $0xf0] sm:$0xff]  ;;  %v14220_v15 = vld [vmem:[%s18389_s9 + $0xe8] sm:$0xff] }
 0x99d   :  { %4412 = vmatpush.bf16.msra.mxu2 %v16732_v43  ;;  %4494 = vmatpush.bf16.msra.mxu0 %v14222_v61 }
 0x9a0   :  { %4032 = vmatpush.bf16.msrb.mxu3 %v16730_v26  ;;  %4283 = vmatpush.bf16.msrb.mxu1 %v16730_v26 }
 0x9a1   :  { %4413 = vmatpush.bf16.msra.mxu2 %v16730_v26  ;;  %4495 = vmatpush.bf16.msra.mxu0 %v14221_v19  ;;  %v14294_v19 = vld [vmem:[%s18392_s8 + $0xb8] sm:$0xff] }
 0x9a4   :  { %4033 = vmatpush.bf16.msrb.mxu3 %v16728_v22  ;;  %4284 = vmatpush.bf16.msrb.mxu1 %v16728_v22 }
 0x9a5   :  { %4414 = vmatpush.bf16.msra.mxu2 %v16728_v22  ;;  %4496 = vmatpush.bf16.msra.mxu0 %v14220_v15  ;;  %v14271_v15 = vld [vmem:[%s18389_s9 + $0x230] sm:$0xff] }
 0x9a8   :  { %4034 = vmatpush.bf16.msrb.mxu3 %v16726_v32  ;;  %4285 = vmatpush.bf16.msrb.mxu1 %v16726_v32 }
 0x9a9   :  { %4415 = vmatpush.bf16.msra.mxu2 %v16726_v32 }
 0x9ab   :  { %11220 = vmatmul.msk.bf16.vlgmr.msrb.gmra.mxu3 %vm4020_vm2, %v14183_v6  ;;  %11328 = vmatmul.msk.bf16.vlgmr.msrb.gmra.mxu1 %vm4020_vm2, %v14203_v10  ;;  %v14229_v6 = vld [vmem:[%s18389_s9 + $0x120] sm:$0xff] }
 0x9ac   :  { %4089 = vmatpush.bf16.msra.mxu3 %v16732_v43  ;;  %4542 = vmatpush.bf16.msra.mxu1 %v16732_v43  ;;  %v14219_v10 = vld [vmem:[%s18389_s9 + $0xe0] sm:$0xff] }
 0x9ad   :  { %4497 = vmatpush.bf16.msra.mxu0 %v14219_v10  ;;  %v14261_v10 = vld [vmem:[%s18389_s9 + $0x1f0] sm:$0xff] }
 0x9b0   :  { %4090 = vmatpush.bf16.msra.mxu3 %v16730_v26  ;;  %4543 = vmatpush.bf16.msra.mxu1 %v16730_v26 }
 0x9b4   :  { %4091 = vmatpush.bf16.msra.mxu3 %v16728_v22  ;;  %4544 = vmatpush.bf16.msra.mxu1 %v16728_v22 }
 0x9b8   :  { %4092 = vmatpush.bf16.msra.mxu3 %v16726_v32  ;;  %4545 = vmatpush.bf16.msra.mxu1 %v16726_v32 }
 0x9bb   :  { %11221 = vmatmul.msk.bf16.gmra.mxu3 %vm4020_vm2, %v14184_v23  ;;  %11329 = vmatmul.msk.bf16.gmra.mxu1 %vm4020_vm2, %v14204_v39  ;;  %v14228_v23 = vld [vmem:[%s18389_s9 + $0x118] sm:$0xff]  ;;  %v14273_v39 = vld [vmem:[%s18392_s8 + $0x90] sm:$0xff] }
 0x9bc   :  { %4802 = vmatpush.bf16.msrb.mxu1 %v16732_v43  ;;  %4364 = vmatpush.bf16.msrb.mxu3 %v14212_v27 }
 0x9c0   :  { %4803 = vmatpush.bf16.msrb.mxu1 %v16730_v26  ;;  %4365 = vmatpush.bf16.msrb.mxu3 %v14211_v45 }
 0x9c4   :  { %4804 = vmatpush.bf16.msrb.mxu1 %v16728_v22  ;;  %4366 = vmatpush.bf16.msrb.mxu3 %v14210_v16  ;;  %v14215_v16 = vld [vmem:[%s18389_s9 + $0xc0] sm:$0xff] }
 0x9c8   :  { %4805 = vmatpush.bf16.msrb.mxu1 %v16726_v32  ;;  %4367 = vmatpush.bf16.msrb.mxu3 %v14209_v41  ;;  %v14252_v41 = vld [vmem:[%s18389_s9 + $0x1b8] sm:$0xff] }
 0x9cb   :  { %11234 = vmatmul.msk.bf16.vlgmr.msra.gmra.mxu3 %vm4020_vm2, %v14193_v51  ;;  %11452 = vmatmul.msk.bf16.vlgmr.msra.gmra.mxu1 %vm4020_vm2, %v14223_v58  ;;  %v14218_v58 = vld [vmem:[%s18389_s9 + $0xd8] sm:$0xff] }
 0x9cc   :  { %5062 = vmatpush.bf16.msra.mxu1 %v16732_v43  ;;  %4368 = vmatpush.bf16.msrb.mxu3 %v14208_v59 }
 0x9cd   :  { %4498 = vmatpush.bf16.msra.mxu0 %v14218_v58  ;;  %v14269_v58 = vld [vmem:[%s18389_s9 + $0x220] sm:$0xff] }
 0x9d0   :  { %5063 = vmatpush.bf16.msra.mxu1 %v16730_v26  ;;  %4369 = vmatpush.bf16.msrb.mxu3 %v14207_v60  ;;  %v14304_v60 = vld [vmem:[%s18392_s8 + $0xc8] sm:$0xff] }
 0x9d1   :  { %4499 = vmatpush.bf16.msra.mxu0 %v14217_v5  ;;  %v14313_v5 = vld [vmem:[%s18392_s8 + $0xd0] sm:$0xff] }
 0x9d4   :  { %5064 = vmatpush.bf16.msra.mxu1 %v16728_v22  ;;  %4370 = vmatpush.bf16.msrb.mxu3 %v14206_v28 }
 0x9d8   :  { %5065 = vmatpush.bf16.msra.mxu1 %v16726_v32  ;;  %4371 = vmatpush.bf16.msrb.mxu3 %v14205_v53  ;;  %v14250_v53 = vld [vmem:[%s18389_s9 + $0x1a8] sm:$0xff] }
 0x9db   :  { %11235 = vmatmul.msk.bf16.gmra.mxu3 %vm4020_vm2, %v14194_v42  ;;  %11453 = vmatmul.msk.bf16.gmra.mxu1 %vm4020_vm2, %v14224_v44  ;;  %v14227_v44 = vld [vmem:[%s18389_s9 + $0x110] sm:$0xff] }
 0x9dc   :  { %4624 = vmatpush.bf16.msra.mxu3 %v14232_v31  ;;  %v14245_v31 = vld [vmem:[%s18389_s9 + $0x180] sm:$0xff] }
 0x9e0   :  { %4625 = vmatpush.bf16.msra.mxu3 %v14231_v0  ;;  %v14272_v0 = vld [vmem:[%s18389_s9 + $0x238] sm:$0xff] }
 0x9e4   :  { %4626 = vmatpush.bf16.msra.mxu3 %v14230_v33  ;;  %v14262_v33 = vld [vmem:[%s18389_s9 + $0x1f8] sm:$0xff] }
 0x9e8   :  { %4627 = vmatpush.bf16.msra.mxu3 %v14229_v6 }
 0x9eb   :  { %11576 = vmatmul.msk.bf16.vlgmr.msrb.gmra.mxu1 %vm4020_vm2, %v14243_v1 }
 0x9ec   :  { %5322 = vmatpush.bf16.msrb.mxu1 %v16732_v43  ;;  %4628 = vmatpush.bf16.msra.mxu3 %v14228_v23  ;;  %v14270_v23 = vld [vmem:[%s18389_s9 + $0x228] sm:$0xff] }
 0x9f0   :  { %5323 = vmatpush.bf16.msrb.mxu1 %v16730_v26  ;;  %4629 = vmatpush.bf16.msra.mxu3 %v14227_v44 }
 0x9f4   :  { %5324 = vmatpush.bf16.msrb.mxu1 %v16728_v22  ;;  %4630 = vmatpush.bf16.msra.mxu3 %v14226_v7  ;;  %v14258_v7 = vld [vmem:[%s18389_s9 + $0x1d8] sm:$0xff] }
 0x9f8   :  { %5325 = vmatpush.bf16.msrb.mxu1 %v16726_v32  ;;  %4631 = vmatpush.bf16.msra.mxu3 %v14225_v52  ;;  %v14257_v52 = vld [vmem:[%s18389_s9 + $0x1d0] sm:$0xff] }
 0x9fb   :  { %11577 = vmatmul.msk.bf16.gmra.mxu1 %vm4020_vm2, %v14244_v38  ;;  %v14303_v38 = vld [vmem:[%s18392_s8 + $0xc0] sm:$0xff] }
 0xa0b   :  { %11700 = vmatmul.msk.bf16.vlgmr.msra.gmra.mxu1 %vm4020_vm2, %v14263_v24  ;;  %v14216_v24 = vld [vmem:[%s18389_s9 + $0xc8] sm:$0xff] }
 0xa0c   :  { %5582 = vmatpush.bf16.msra.mxu1 %v16732_v43  ;;  %4500 = vmatpush.bf16.msra.mxu0 %v14216_v24  ;;  %v14267_v24 = vld [vmem:[%s18389_s9 + $0x210] sm:$0xff] }
 0xa10   :  { %5583 = vmatpush.bf16.msra.mxu1 %v16730_v26  ;;  %4501 = vmatpush.bf16.msra.mxu0 %v14215_v16  ;;  %v14256_v16 = vld [vmem:[%s18389_s9 + $0x1c8] sm:$0xff] }
 0xa14   :  { %5584 = vmatpush.bf16.msra.mxu1 %v16728_v22 }
 0xa18   :  { %5585 = vmatpush.bf16.msra.mxu1 %v16726_v32 }
 0xa1b   :  { %11701 = vmatmul.msk.bf16.gmra.mxu1 %vm4020_vm2, %v14264_v35 }
 0xa28   :  { %v4287_v12 = vpop.f32.mrf.mxu1 }
 0xa2b   :  { %11824 = vmatmul.msk.bf16.vlgmr.msrb.gmra.mxu1 %vm4020_vm2, %v14283_v21  ;;  %v14274_v21 = vld [vmem:[%s18392_s8 + $0x98] sm:$0xff] }
 0xa2c   :  { %5842 = vmatpush.bf16.msrb.mxu1 %v16732_v43 }
 0xa2e   :  { %v4036_v17 = vpop.f32.mrf.mxu3 }
 0xa30   :  { %5843 = vmatpush.bf16.msrb.mxu1 %v16730_v26  ;;  %v4289_v2 = vpop.f32.mrf.mxu1 }
 0xa31   :  { %v4297_v34 = vpack.c.bf16 %v4289_v2, %v4287_v12  ;;  %v14251_v12 = vld [vmem:[%s18389_s9 + $0x1b0] sm:$0xff] }
 0xa32   :  { %v14241_v2 = vld [vmem:[%s18389_s9 + $0x170] sm:$0xff] }
 0xa33   :  { %4372 = vmatmul.bf16.vlgmr.msrb.gmra.mxu3 %v4297_v34 }
 0xa34   :  { %5844 = vmatpush.bf16.msrb.mxu1 %v16728_v22  ;;  %4884 = vmatpush.bf16.msrb.mxu3 %v14252_v41 }
 0xa36   :  { %v4038_v13 = vpop.f32.mrf.mxu3 }
 0xa37   :  { %v4046_v48 = vpack.c.bf16 %v4038_v13, %v4036_v17  ;;  %v14242_v17 = vld [vmem:[%s18389_s9 + $0x178] sm:$0xff] }
 0xa38   :  { %5845 = vmatpush.bf16.msrb.mxu1 %v16726_v32  ;;  %v4292_v54 = vpop.f32.mrf.mxu1  ;;  %4885 = vmatpush.bf16.msrb.mxu3 %v14251_v12  ;;  %v14255_v12 = vld [vmem:[%s18389_s9 + $0x1c0] sm:$0xff] }
 0xa39   :  { %4246 = vmatmul.bf16.vlgmr.msrb.gmra.mxu0 %v4046_v48 }
 0xa3a   :  { %4754 = vmatpush.bf16.msrb.mxu0 %v14242_v17 }
 0xa3b   :  { %11825 = vmatmul.msk.bf16.gmra.mxu1 %vm4020_vm2, %v14284_v29 }
 0xa3c   :  { %4886 = vmatpush.bf16.msrb.mxu3 %v14250_v53  ;;  %v14291_v53 = vld [vmem:[%s18389_s9 + $0x2b0] sm:$0xff] }
 0xa3e   :  { %v4041_v56 = vpop.f32.mrf.mxu3  ;;  %4755 = vmatpush.bf16.msrb.mxu0 %v14241_v2  ;;  %v14282_v2 = vld [vmem:[%s18389_s9 + $0x278] sm:$0xff] }
 0xa40   :  { %v4294_v30 = vpop.f32.mrf.mxu1 }
 0xa41   :  { %v4298_v14 = vpack.c.bf16 %v4294_v30, %v4292_v54 }
 0xa43   :  { %4377 = vmatmul.bf16.gmra.mxu3 %v4298_v14 }
 0xa46   :  { %v4043_v62 = vpop.f32.mrf.mxu3 }
 0xa47   :  { %v4047_v55 = vpack.c.bf16 %v4043_v62, %v4041_v56  ;;  %v14240_v56 = vld [vmem:[%s18389_s9 + $0x168] sm:$0xff] }
 0xa48   :  { %v4547_v42 = vpop.f32.mrf.mxu1  ;;  %4756 = vmatpush.bf16.msrb.mxu0 %v14240_v56  ;;  %v14281_v56 = vld [vmem:[%s18389_s9 + $0x270] sm:$0xff] }
 0xa49   :  { %4251 = vmatmul.bf16.gmra.mxu0 %v4047_v55  ;;  %v14249_v55 = vld [vmem:[%s18389_s9 + $0x1a0] sm:$0xff] }
 0xa4a   :  { %4887 = vmatpush.bf16.msrb.mxu3 %v14249_v55  ;;  %v14280_v55 = vld [vmem:[%s18389_s9 + $0x268] sm:$0xff] }
 0xa4b   :  { %11948 = vmatmul.msk.bf16.vlgmr.msra.gmra.mxu1 %vm4020_vm2, %v14303_v38  ;;  %v14268_v38 = vld [vmem:[%s18389_s9 + $0x218] sm:$0xff] }
 0xa4e   :  { %v4094_v25 = vpop.f32.mrf.mxu3 }
 0xa50   :  { %v4549_v40 = vpop.f32.mrf.mxu1 }
 0xa51   :  { %v4557_v27 = vpack.c.bf16 %v4549_v40, %v4547_v42 }
 0xa53   :  { %4632 = vmatmul.bf16.vlgmr.msra.gmra.mxu3 %v4557_v27  ;;  %v14266_v27 = vld [vmem:[%s18389_s9 + $0x208] sm:$0xff] }
 0xa56   :  { %v4096_v11 = vpop.f32.mrf.mxu3 }
 0xa57   :  { %v4104_v50 = vpack.c.bf16 %v4096_v11, %v4094_v25  ;;  %v14239_v25 = vld [vmem:[%s18389_s9 + $0x160] sm:$0xff]  ;;  %v14248_v11 = vld [vmem:[%s18389_s9 + $0x198] sm:$0xff] }
 0xa58   :  { %v4552_v59 = vpop.f32.mrf.mxu1  ;;  %4757 = vmatpush.bf16.msrb.mxu0 %v14239_v25  ;;  %4888 = vmatpush.bf16.msrb.mxu3 %v14248_v11  ;;  %v14289_v25 = vld [vmem:[%s18389_s9 + $0x2a0] sm:$0xff] }
 0xa59   :  { %4179 = vmatmul.bf16.vlgmr.msrb.gmra.mxu2 %v4104_v50  ;;  %v14293_v50 = vld [vmem:[%s18392_s8 + $0xb0] sm:$0xff] }
 0xa5a   :  { %4672 = vmatpush.bf16.msrb.mxu2 %v16732_v43 }
 0xa5b   :  { %11949 = vmatmul.msk.bf16.gmra.mxu1 %vm4020_vm2, %v14304_v60  ;;  %v14292_v60 = vld [vmem:[%s18389_s9 + $0x2b8] sm:$0xff] }
 0xa5e   :  { %4673 = vmatpush.bf16.msrb.mxu2 %v16730_v26  ;;  %v4099_v4 = vpop.f32.mrf.mxu3 }
 0xa60   :  { %v4554_v62 = vpop.f32.mrf.mxu1 }
 0xa61   :  { %v4558_v30 = vpack.c.bf16 %v4554_v62, %v4552_v59  ;;  %v14290_v62 = vld [vmem:[%s18389_s9 + $0x2a8] sm:$0xff] }
 0xa62   :  { %4674 = vmatpush.bf16.msrb.mxu2 %v16728_v22 }
 0xa63   :  { %4637 = vmatmul.bf16.gmra.mxu3 %v4558_v30 }
 0xa66   :  { %4675 = vmatpush.bf16.msrb.mxu2 %v16726_v32  ;;  %v4101_v36 = vpop.f32.mrf.mxu3 }
 0xa67   :  { %v4105_v37 = vpack.c.bf16 %v4101_v36, %v4099_v4  ;;  %v14238_v4 = vld [vmem:[%s18389_s9 + $0x158] sm:$0xff] }
 0xa68   :  { %v4807_v36 = vpop.f32.mrf.mxu1  ;;  %4758 = vmatpush.bf16.msrb.mxu0 %v14238_v4  ;;  %v14279_v4 = vld [vmem:[%s18389_s9 + $0x260] sm:$0xff] }
 0xa69   :  { %4184 = vmatmul.bf16.gmra.mxu2 %v4105_v37  ;;  %v14247_v37 = vld [vmem:[%s18389_s9 + $0x190] sm:$0xff] }
 0xa6a   :  { %4889 = vmatpush.bf16.msrb.mxu3 %v14247_v37 }
 0xa79   :  { %11390 = vmatmul.msk.bf16.vlgmr.msra.gmra.mxu2 %vm4020_vm2, %v14213_v20  ;;  %v14323_v20 = vld [vmem:[%s18392_s8 + $0xe0] sm:$0xff] }
 0xa7a   :  { %4932 = vmatpush.bf16.msra.mxu2 %v16732_v43  ;;  %12072 = vmatmul.msk.bf16.vlgmr.msrb.gmra.mxu1 %vm4020_vm2, %v14323_v20  ;;  %v14333_v20 = vld [vmem:[%s18392_s8 + $0xf0] sm:$0xff] }
 0xa7e   :  { %4933 = vmatpush.bf16.msra.mxu2 %v16730_v26 }
 0xa82   :  { %4934 = vmatpush.bf16.msra.mxu2 %v16728_v22 }
 0xa86   :  { %4935 = vmatpush.bf16.msra.mxu2 %v16726_v32 }
 0xa89   :  { %11391 = vmatmul.msk.bf16.gmra.mxu2 %vm4020_vm2, %v14214_v49 }
 0xa99   :  { %11514 = vmatmul.msk.bf16.vlgmr.msrb.gmra.mxu2 %vm4020_vm2, %v14233_v9  ;;  %v14237_v9 = vld [vmem:[%s18389_s9 + $0x150] sm:$0xff] }
 0xa9a   :  { %5192 = vmatpush.bf16.msrb.mxu2 %v16732_v43  ;;  %4759 = vmatpush.bf16.msrb.mxu0 %v14237_v9 }
 0xa9e   :  { %5193 = vmatpush.bf16.msrb.mxu2 %v16730_v26 }
 0xaa2   :  { %5194 = vmatpush.bf16.msrb.mxu2 %v16728_v22 }
 0xaa6   :  { %5195 = vmatpush.bf16.msrb.mxu2 %v16726_v32 }
 0xaa9   :  { %11515 = vmatmul.msk.bf16.gmra.mxu2 %vm4020_vm2, %v14234_v63  ;;  %v14246_v63 = vld [vmem:[%s18389_s9 + $0x188] sm:$0xff] }
 0xaaa   :  { %4890 = vmatpush.bf16.msrb.mxu3 %v14246_v63  ;;  %v14287_v63 = vld [vmem:[%s18389_s9 + $0x290] sm:$0xff] }
 0xaae   :  { %4891 = vmatpush.bf16.msrb.mxu3 %v14245_v31  ;;  %v14286_v31 = vld [vmem:[%s18389_s9 + $0x288] sm:$0xff] }
 0xab2   :  { %5144 = vmatpush.bf16.msra.mxu3 %v14272_v0 }
 0xab6   :  { %v4247_v51 = vpop.f32.mrf.mxu0  ;;  %v4373_v1 = vpop.f32.mrf.mxu3  ;;  %5145 = vmatpush.bf16.msra.mxu3 %v14271_v15  ;;  %v14334_v15 = vld [vmem:[%s18392_s8 + $0xf8] sm:$0xff] }
 0xab9   :  { %11638 = vmatmul.msk.bf16.vlgmr.msra.gmra.mxu2 %vm4020_vm2, %v14253_v46  ;;  %v4809_v46 = vpop.f32.mrf.mxu1 }
 0xaba   :  { %5452 = vmatpush.bf16.msra.mxu2 %v16732_v43  ;;  %5146 = vmatpush.bf16.msra.mxu3 %v14270_v23 }
 0xabe   :  { %5453 = vmatpush.bf16.msra.mxu2 %v16730_v26  ;;  %v16975_v3 = vpop.f32.mrf.mxu0  ;;  %v16978_v35 = vpop.f32.mrf.mxu3  ;;  %5147 = vmatpush.bf16.msra.mxu3 %v14269_v58  ;;  %v14300_v58 = vld [vmem:[%s18389_s9 + $0x2e8] sm:$0xff] }
 0xac2   :  { %5454 = vmatpush.bf16.msra.mxu2 %v16728_v22  ;;  %5148 = vmatpush.bf16.msra.mxu3 %v14268_v38 }
 0xac6   :  { %5455 = vmatpush.bf16.msra.mxu2 %v16726_v32  ;;  %v4252_v28 = vpop.f32.mrf.mxu0  ;;  %v4378_v48 = vpop.f32.mrf.mxu3  ;;  %5149 = vmatpush.bf16.msra.mxu3 %v14267_v24  ;;  %v14307_v24 = vld [vmem:[%s18389_s9 + $0x310] sm:$0xff] }
 0xac9   :  { %11639 = vmatmul.msk.bf16.gmra.mxu2 %vm4020_vm2, %v14254_v57  ;;  %v4817_v57 = vpack.c.bf16 %v4809_v46, %v4807_v36  ;;  %v14288_v36 = vld [vmem:[%s18389_s9 + $0x298] sm:$0xff]  ;;  %v14277_v46 = vld [vmem:[%s18389_s9 + $0x250] sm:$0xff] }
 0xaca   :  { %5150 = vmatpush.bf16.msra.mxu3 %v14266_v27  ;;  %v14297_v27 = vld [vmem:[%s18389_s9 + $0x2d0] sm:$0xff] }
 0xacb   :  { %4892 = vmatmul.bf16.vlgmr.msrb.gmra.mxu3 %v4817_v57  ;;  %v14276_v57 = vld [vmem:[%s18389_s9 + $0x248] sm:$0xff] }
 0xad9   :  { %11762 = vmatmul.msk.bf16.vlgmr.msrb.gmra.mxu2 %vm4020_vm2, %v14273_v39  ;;  %v14260_v39 = vld [vmem:[%s18389_s9 + $0x1e8] sm:$0xff] }
 0xada   :  { %5712 = vmatpush.bf16.msrb.mxu2 %v16732_v43 }
 0xadc   :  { %v4180_v18 = vpop.f32.mrf.mxu2 }
 0xadd   :  { %v4248_v47 = vadd.f32 %v4247_v51, %v4180_v18 }
 0xade   :  { %5713 = vmatpush.bf16.msrb.mxu2 %v16730_v26 }
 0xadf   :  { %v16970_v8 = vadd.f32 %v4373_v1, %v4248_v47  ;;  %v14259_v1 = vld [vmem:[%s18389_s9 + $0x1e0] sm:$0xff] }
 0xae2   :  { %5714 = vmatpush.bf16.msrb.mxu2 %v16728_v22 }
 0xae4   :  { %v16980_v45 = vpop.f32.mrf.mxu2 }
 0xae6   :  { %5715 = vmatpush.bf16.msrb.mxu2 %v16726_v32 }
 0xae9   :  { %11763 = vmatmul.msk.bf16.gmra.mxu2 %vm4020_vm2, %v14274_v21  ;;  %v14265_v21 = vld [vmem:[%s18389_s9 + $0x200] sm:$0xff] }
 0xaea   :  { %5151 = vmatpush.bf16.msra.mxu3 %v14265_v21  ;;  %v14305_v21 = vld [vmem:[%s18389_s9 + $0x300] sm:$0xff] }
 0xaec   :  { %v4185_v13 = vpop.f32.mrf.mxu2 }
 0xaed   :  { %v4253_v34 = vadd.f32 %v4252_v28, %v4185_v13  ;;  %v14314_v13 = vld [vmem:[%s18392_s8 + $0xd8] sm:$0xff] }
 0xaee   :  { %5404 = vmatpush.bf16.msrb.mxu3 %v14292_v60 }
 0xaef   :  { %v17012_v54 = vadd.f32 %v4378_v48, %v4253_v34 }
 0xaf2   :  { %5405 = vmatpush.bf16.msrb.mxu3 %v14291_v53  ;;  %v14331_v53 = vld [vmem:[%s18389_s9 + $0x3b0] sm:$0xff] }
 0xaf4   :  { %v17017_v14 = vpop.f32.mrf.mxu2 }
 0xaf6   :  { %5406 = vmatpush.bf16.msrb.mxu3 %v14290_v62 }
 0xaf9   :  { %11886 = vmatmul.msk.bf16.vlgmr.msra.gmra.mxu2 %vm4020_vm2, %v14293_v50 }
 0xafa   :  { %5972 = vmatpush.bf16.msra.mxu2 %v16732_v43  ;;  %v14236_v43 = vld [vmem:[%s18389_s9 + $0x148] sm:$0xff]  ;;  %5407 = vmatpush.bf16.msrb.mxu3 %v14289_v25 }
 0xafb   :  { %4760 = vmatpush.bf16.msrb.mxu0 %v14236_v43  ;;  %v14320_v25 = vld [vmem:[%s18389_s9 + $0x368] sm:$0xff] }
 0xafc   :  { %v4417_v49 = vpop.f32.mrf.mxu2 }
 0xafe   :  { %5973 = vmatpush.bf16.msra.mxu2 %v16730_v26  ;;  %v14235_v26 = vld [vmem:[%s18389_s9 + $0x140] sm:$0xff]  ;;  %5408 = vmatpush.bf16.msrb.mxu3 %v14288_v36 }
 0xaff   :  { %4761 = vmatpush.bf16.msrb.mxu0 %v14235_v26  ;;  %v14285_v26 = vld [vmem:[%s18389_s9 + $0x280] sm:$0xff] }
 0xb02   :  { %5974 = vmatpush.bf16.msra.mxu2 %v16728_v22  ;;  %v4812_v22 = vpop.f32.mrf.mxu1  ;;  %5409 = vmatpush.bf16.msrb.mxu3 %v14287_v63  ;;  %v14318_v63 = vld [vmem:[%s18389_s9 + $0x358] sm:$0xff] }
 0xb04   :  { %v4419_v61 = vpop.f32.mrf.mxu2 }
 0xb05   :  { %v4427_v29 = vpack.c.bf16 %v4419_v61, %v4417_v49  ;;  %v14278_v49 = vld [vmem:[%s18389_s9 + $0x258] sm:$0xff] }
 0xb06   :  { %5975 = vmatpush.bf16.msra.mxu2 %v16726_v32  ;;  %v14324_v32 = vld [vmem:[%s18392_s8 + $0xe8] sm:$0xff]  ;;  %5410 = vmatpush.bf16.msrb.mxu3 %v14286_v31  ;;  %v4254_v31 = vpop.f32.mrf.mxu0 }
 0xb07   :  { %4502 = vmatmul.bf16.vlgmr.msra.gmra.mxu0 %v4427_v29  ;;  %12073 = vmatmul.msk.bf16.gmra.mxu1 %vm4020_vm2, %v14324_v32  ;;  %v14302_v32 = vld [vmem:[%s18389_s9 + $0x2f8] sm:$0xff] }
 0xb08   :  { %5014 = vmatpush.bf16.msra.mxu0 %v14262_v33 }
 0xb09   :  { %11887 = vmatmul.msk.bf16.gmra.mxu2 %vm4020_vm2, %v14294_v19  ;;  %v14275_v19 = vld [vmem:[%s18389_s9 + $0x240] sm:$0xff] }
 0xb0a   :  { %v4814_v51 = vpop.f32.mrf.mxu1  ;;  %5411 = vmatpush.bf16.msrb.mxu3 %v14285_v26  ;;  %v14326_v26 = vld [vmem:[%s18389_s9 + $0x388] sm:$0xff] }
 0xb0b   :  { %v4818_v42 = vpack.c.bf16 %v4814_v51, %v4812_v22  ;;  %v14312_v22 = vld [vmem:[%s18389_s9 + $0x338] sm:$0xff]  ;;  %v14310_v51 = vld [vmem:[%s18389_s9 + $0x328] sm:$0xff] }
 0xb0c   :  { %v4422_v6 = vpop.f32.mrf.mxu2  ;;  %5015 = vmatpush.bf16.msra.mxu0 %v14261_v10 }
 0xb0d   :  { %4897 = vmatmul.bf16.gmra.mxu3 %v4818_v42  ;;  %v14309_v42 = vld [vmem:[%s18389_s9 + $0x320] sm:$0xff] }
 0xb10   :  { %5016 = vmatpush.bf16.msra.mxu0 %v14260_v39  ;;  %v14301_v39 = vld [vmem:[%s18389_s9 + $0x2f0] sm:$0xff] }
 0xb12   :  { %v5067_v47 = vpop.f32.mrf.mxu1 }
 0xb14   :  { %v4424_v44 = vpop.f32.mrf.mxu2  ;;  %5017 = vmatpush.bf16.msra.mxu0 %v14259_v1 }
 0xb15   :  { %v4428_v18 = vpack.c.bf16 %v4424_v44, %v4422_v6  ;;  %v14311_v6 = vld [vmem:[%s18389_s9 + $0x330] sm:$0xff] }
 0xb17   :  { %4507 = vmatmul.bf16.gmra.mxu0 %v4428_v18  ;;  %v14299_v18 = vld [vmem:[%s18389_s9 + $0x2e0] sm:$0xff] }
 0xb18   :  { %5018 = vmatpush.bf16.msra.mxu0 %v14258_v7 }
 0xb19   :  { %12010 = vmatmul.msk.bf16.vlgmr.msrb.gmra.mxu2 %vm4020_vm2, %v14313_v5  ;;  %v14308_v5 = vld [vmem:[%s18389_s9 + $0x318] sm:$0xff] }
 0xb1a   :  { %v5069_v41 = vpop.f32.mrf.mxu1 }
 0xb1b   :  { %v5077_v59 = vpack.c.bf16 %v5069_v41, %v5067_v47  ;;  %v14298_v47 = vld [vmem:[%s18389_s9 + $0x2d8] sm:$0xff]  ;;  %v14296_v41 = vld [vmem:[%s18389_s9 + $0x2c8] sm:$0xff] }
 0xb1c   :  { %v4677_v40 = vpop.f32.mrf.mxu2  ;;  %5019 = vmatpush.bf16.msra.mxu0 %v14257_v52 }
 0xb1d   :  { %5152 = vmatmul.bf16.vlgmr.msra.gmra.mxu3 %v5077_v59 }
 0xb1e   :  { %5664 = vmatpush.bf16.msra.mxu3 %v14312_v22 }
 0xb20   :  { %5020 = vmatpush.bf16.msra.mxu0 %v14256_v16  ;;  %v14306_v16 = vld [vmem:[%s18389_s9 + $0x308] sm:$0xff] }
 0xb22   :  { %v5072_v48 = vpop.f32.mrf.mxu1  ;;  %5665 = vmatpush.bf16.msra.mxu3 %v14311_v6  ;;  %v14315_v6 = vld [vmem:[%s18389_s9 + $0x340] sm:$0xff] }
 0xb24   :  { %v4679_v17 = vpop.f32.mrf.mxu2  ;;  %5021 = vmatpush.bf16.msra.mxu0 %v14255_v12  ;;  %v17223_v12 = vpop.f32.mrf.mxu3 }
 0xb25   :  { %v4687_v28 = vpack.c.bf16 %v4679_v17, %v4677_v40 }
 0xb26   :  { %5666 = vmatpush.bf16.msra.mxu3 %v14310_v51 }
 0xb27   :  { %4762 = vmatmul.bf16.vlgmr.msrb.gmra.mxu0 %v4687_v28  ;;  %v14295_v28 = vld [vmem:[%s18389_s9 + $0x2c0] sm:$0xff] }
 0xb28   :  { %5274 = vmatpush.bf16.msrb.mxu0 %v14282_v2  ;;  %v14322_v2 = vld [vmem:[%s18389_s9 + $0x378] sm:$0xff] }
 0xb29   :  { %12011 = vmatmul.msk.bf16.gmra.mxu2 %vm4020_vm2, %v14314_v13  ;;  %v14332_v13 = vld [vmem:[%s18389_s9 + $0x3b8] sm:$0xff] }
 0xb2a   :  { %v5074_v30 = vpop.f32.mrf.mxu1  ;;  %5667 = vmatpush.bf16.msra.mxu3 %v14309_v42 }
 0xb2b   :  { %v5078_v11 = vpack.c.bf16 %v5074_v30, %v5072_v48  ;;  %v14330_v30 = vld [vmem:[%s18389_s9 + $0x3a8] sm:$0xff] }
 0xb2c   :  { %v4682_v34 = vpop.f32.mrf.mxu2  ;;  %5275 = vmatpush.bf16.msrb.mxu0 %v14281_v56  ;;  %v4633_v56 = vpop.f32.mrf.mxu3 }
 0xb2d   :  { %5157 = vmatmul.bf16.gmra.mxu3 %v5078_v11  ;;  %v14329_v11 = vld [vmem:[%s18389_s9 + $0x3a0] sm:$0xff] }
 0xb2e   :  { %5668 = vmatpush.bf16.msra.mxu3 %v14308_v5 }
 0xb30   :  { %5276 = vmatpush.bf16.msrb.mxu0 %v14280_v55  ;;  %v14321_v55 = vld [vmem:[%s18389_s9 + $0x370] sm:$0xff] }
 0xb32   :  { %v5327_v9 = vpop.f32.mrf.mxu1  ;;  %5669 = vmatpush.bf16.msra.mxu3 %v14307_v24 }
 0xb34   :  { %v4684_v50 = vpop.f32.mrf.mxu2  ;;  %5277 = vmatpush.bf16.msrb.mxu0 %v14279_v4 }
 0xb35   :  { %v4688_v37 = vpack.c.bf16 %v4684_v50, %v4682_v34 }
 0xb36   :  { %5670 = vmatpush.bf16.msra.mxu3 %v14306_v16  ;;  %v4255_v16 = vadd.f32 %v4254_v31, %v17017_v14  ;;  %v14336_v14 = vld [vmem:[%s18389_s9 + $0x3c8] sm:$0xff] }
 0xb37   :  { %4767 = vmatmul.bf16.gmra.mxu0 %v4688_v37  ;;  %v14319_v37 = vld [vmem:[%s18389_s9 + $0x360] sm:$0xff] }
 0xb38   :  { %5278 = vmatpush.bf16.msrb.mxu0 %v14278_v49 }
 0xb39   :  { %12134 = vmatmul.msk.bf16.vlgmr.msra.gmra.mxu2 %vm4020_vm2, %v14333_v20  ;;  %v14328_v20 = vld [vmem:[%s18389_s9 + $0x398] sm:$0xff] }
 0xb3a   :  { %v5329_v61 = vpop.f32.mrf.mxu1  ;;  %5671 = vmatpush.bf16.msra.mxu3 %v14305_v21  ;;  %v14338_v21 = vld [vmem:[%s18389_s9 + $0x3d8] sm:$0xff] }
 0xb3b   :  { %v5337_v0 = vpack.c.bf16 %v5329_v61, %v5327_v9  ;;  %v17255_v9 = vpop.f32.mrf.mxu3  ;;  %v14317_v61 = vld [vmem:[%s18389_s9 + $0x350] sm:$0xff] }
 0xb3c   :  { %v4937_v43 = vpop.f32.mrf.mxu2  ;;  %5279 = vmatpush.bf16.msrb.mxu0 %v14277_v46 }
 0xb3d   :  { %5412 = vmatmul.bf16.vlgmr.msrb.gmra.mxu3 %v5337_v0 }
 0xb3e   :  { %5924 = vmatpush.bf16.msrb.mxu3 %v14332_v13 }
 0xb40   :  { %5280 = vmatpush.bf16.msrb.mxu0 %v14276_v57 }
 0xb42   :  { %v5332_v10 = vpop.f32.mrf.mxu1  ;;  %5925 = vmatpush.bf16.msrb.mxu3 %v14331_v53 }
 0xb43   :  { %v4638_v0 = vpop.f32.mrf.mxu3 }
 0xb44   :  { %v4939_v29 = vpop.f32.mrf.mxu2  ;;  %5281 = vmatpush.bf16.msrb.mxu0 %v14275_v19  ;;  %v14325_v19 = vld [vmem:[%s18389_s9 + $0x380] sm:$0xff] }
 0xb45   :  { %v4947_v33 = vpack.c.bf16 %v4939_v29, %v4937_v43  ;;  %v14327_v43 = vld [vmem:[%s18389_s9 + $0x390] sm:$0xff]  ;;  %v14316_v29 = vld [vmem:[%s18389_s9 + $0x348] sm:$0xff] }
 0xb46   :  { %5926 = vmatpush.bf16.msrb.mxu3 %v14330_v30 }
 0xb47   :  { %5022 = vmatmul.bf16.vlgmr.msra.gmra.mxu0 %v4947_v33 }
 0xb48   :  { %5534 = vmatpush.bf16.msra.mxu0 %v14302_v32 }
 0xb49   :  { %12135 = vmatmul.msk.bf16.gmra.mxu2 %vm4020_vm2, %v14334_v15 }
 0xb4a   :  { %v5334_v44 = vpop.f32.mrf.mxu1  ;;  %5927 = vmatpush.bf16.msrb.mxu3 %v14329_v11 }
 0xb4b   :  { %v5338_v1 = vpack.c.bf16 %v5334_v44, %v5332_v10  ;;  %v17284_v42 = vpop.f32.mrf.mxu3 }
 0xb4c   :  { %v4942_v23 = vpop.f32.mrf.mxu2  ;;  %5535 = vmatpush.bf16.msra.mxu0 %v14301_v39  ;;  %v4250_v39 = vadd.f32 %v16975_v3, %v16980_v45  ;;  %v14340_v3 = vld [vmem:[%s18389_s9 + $0x3e8] sm:$0xff] }
 0xb4d   :  { %5417 = vmatmul.bf16.gmra.mxu3 %v5338_v1 }
 0xb4e   :  { %5928 = vmatpush.bf16.msrb.mxu3 %v14328_v20  ;;  %v4384_v1 = vadd.f32 %v16978_v35, %v4250_v39  ;;  %v14339_v35 = vld [vmem:[%s18389_s9 + $0x3e0] sm:$0xff] }
 0xb50   :  { %5536 = vmatpush.bf16.msra.mxu0 %v14300_v58  ;;  %v14342_v58 = vld [vmem:[%s18389_s9 + $0x3f8] sm:$0xff] }
 0xb52   :  { %v5587_v40 = vpop.f32.mrf.mxu1  ;;  %5929 = vmatpush.bf16.msrb.mxu3 %v14327_v43 }
 0xb54   :  { %v4944_v38 = vpop.f32.mrf.mxu2  ;;  %5537 = vmatpush.bf16.msra.mxu0 %v14299_v18  ;;  %v14341_v18 = vld [vmem:[%s18389_s9 + $0x3f0] sm:$0xff] }
 0xb55   :  { %v4948_v7 = vpack.c.bf16 %v4944_v38, %v4942_v23 }
 0xb56   :  { %5930 = vmatpush.bf16.msrb.mxu3 %v14326_v26 }
 0xb57   :  { %5027 = vmatmul.bf16.gmra.mxu0 %v4948_v7 }
 0xb58   :  { %5538 = vmatpush.bf16.msra.mxu0 %v14298_v47  ;;  %v4893_v47 = vpop.f32.mrf.mxu3 }
 0xb5a   :  { %v5589_v59 = vpop.f32.mrf.mxu1  ;;  %5931 = vmatpush.bf16.msrb.mxu3 %v14325_v19 }
 0xb5b   :  { %v5597_v17 = vpack.c.bf16 %v5589_v59, %v5587_v40  ;;  %v4386_v59 = vadd.f32 %v17223_v12, %v4255_v16  ;;  %v14335_v12 = vld [vmem:[%s18389_s9 + $0x3c0] sm:$0xff] }
 0xb5c   :  { %v5197_v52 = vpop.f32.mrf.mxu2  ;;  %5539 = vmatpush.bf16.msra.mxu0 %v14297_v27 }
 0xb5d   :  { %5672 = vmatmul.bf16.vlgmr.msra.gmra.mxu3 %v5597_v17 }
 0xb60   :  { %5540 = vmatpush.bf16.msra.mxu0 %v14296_v41  ;;  %v17309_v13 = vpop.f32.mrf.mxu3 }
 0xb62   :  { %v5592_v34 = vpop.f32.mrf.mxu1 }
 0xb64   :  { %v5199_v60 = vpop.f32.mrf.mxu2  ;;  %5541 = vmatpush.bf16.msra.mxu0 %v14295_v28 }
 0xb65   :  { %v5207_v48 = vpack.c.bf16 %v5199_v60, %v5197_v52 }
 0xb67   :  { %5282 = vmatmul.bf16.vlgmr.msrb.gmra.mxu0 %v5207_v48 }
 0xb68   :  { %5794 = vmatpush.bf16.msrb.mxu0 %v14322_v2 }
 0xb6a   :  { %v5594_v50 = vpop.f32.mrf.mxu1 }
 0xb6b   :  { %v5598_v4 = vpack.c.bf16 %v5594_v50, %v5592_v34 }
 0xb6c   :  { %v5202_v62 = vpop.f32.mrf.mxu2  ;;  %5795 = vmatpush.bf16.msrb.mxu0 %v14321_v55 }
 0xb6d   :  { %5677 = vmatmul.bf16.gmra.mxu3 %v5598_v4 }
 0xb70   :  { %5796 = vmatpush.bf16.msrb.mxu0 %v14320_v25 }
 0xb72   :  { %v5847_v46 = vpop.f32.mrf.mxu1 }
 0xb74   :  { %v5204_v36 = vpop.f32.mrf.mxu2  ;;  %5797 = vmatpush.bf16.msrb.mxu0 %v14319_v37 }
 0xb75   :  { %v5208_v49 = vpack.c.bf16 %v5204_v36, %v5202_v62 }
 0xb77   :  { %5287 = vmatmul.bf16.gmra.mxu0 %v5208_v49 }
 0xb78   :  { %5798 = vmatpush.bf16.msrb.mxu0 %v14318_v63 }
 0xb7a   :  { %v5849_v22 = vpop.f32.mrf.mxu1 }
 0xb7b   :  { %v5857_v33 = vpack.c.bf16 %v5849_v22, %v5847_v46 }
 0xb7c   :  { %v5457_v57 = vpop.f32.mrf.mxu2  ;;  %5799 = vmatpush.bf16.msrb.mxu0 %v14317_v61 }
 0xb7d   :  { %5932 = vmatmul.bf16.vlgmr.msrb.gmra.mxu3 %v5857_v33 }
 0xb80   :  { %5800 = vmatpush.bf16.msrb.mxu0 %v14316_v29 }
 0xb84   :  { %v4503_v15 = vpop.f32.mrf.mxu0  ;;  %v5459_v32 = vpop.f32.mrf.mxu2  ;;  %5801 = vmatpush.bf16.msrb.mxu0 %v14315_v6 }
 0xb85   :  { %v4513_v10 = vadd.f32 %v4503_v15, %v16970_v8  ;;  %v5467_v23 = vpack.c.bf16 %v5459_v32, %v5457_v57  ;;  %v5852_v44 = vpop.f32.mrf.mxu1 }
 0xb87   :  { %v4643_v51 = vadd.f32 %v4633_v56, %v4513_v10  ;;  %5542 = vmatmul.bf16.vlgmr.msra.gmra.mxu0 %v5467_v23 }
 0xb88   :  { %6054 = vmatpush.bf16.msra.mxu0 %v14342_v58 }
 0xb8c   :  { %v4505_v38 = vpop.f32.mrf.mxu0  ;;  %v5462_v8 = vpop.f32.mrf.mxu2  ;;  %6055 = vmatpush.bf16.msra.mxu0 %v14341_v18 }
 0xb8d   :  { %v17290_v5 = vadd.f32 %v4505_v38, %v4384_v1  ;;  %v5854_v45 = vpop.f32.mrf.mxu1 }
 0xb8e   :  { %v5858_v7 = vpack.c.bf16 %v5854_v45, %v5852_v44 }
 0xb90   :  { %6056 = vmatpush.bf16.msra.mxu0 %v14340_v3  ;;  %5937 = vmatmul.bf16.gmra.mxu3 %v5858_v7  ;;  %v4898_v62 = vpop.f32.mrf.mxu3 }
 0xb94   :  { %v4508_v24 = vpop.f32.mrf.mxu0  ;;  %v5464_v40 = vpop.f32.mrf.mxu2  ;;  %6057 = vmatpush.bf16.msra.mxu0 %v14339_v35 }
 0xb95   :  { %v4515_v52 = vadd.f32 %v4508_v24, %v17012_v54  ;;  %v5468_v27 = vpack.c.bf16 %v5464_v40, %v5462_v8  ;;  %v14337_v54 = vld [vmem:[%s18389_s9 + $0x3d0] sm:$0xff] }
 0xb97   :  { %v4645_v41 = vadd.f32 %v4638_v0, %v4515_v52  ;;  %5547 = vmatmul.bf16.gmra.mxu0 %v5468_v27 }
 0xb98   :  { %6058 = vmatpush.bf16.msra.mxu0 %v14338_v21  ;;  %v17317_v25 = vpop.f32.mrf.mxu3 }
 0xb9c   :  { %v4510_v17 = vpop.f32.mrf.mxu0  ;;  %v5717_v60 = vpop.f32.mrf.mxu2  ;;  %6059 = vmatpush.bf16.msra.mxu0 %v14337_v54 }
 0xb9d   :  { %v17307_v28 = vadd.f32 %v4510_v17, %v4386_v59  ;;  %v4644_v17 = vadd.f32 %v17255_v9, %v17290_v5 }
 0xba0   :  { %6060 = vmatpush.bf16.msra.mxu0 %v14336_v14  ;;  %v5153_v20 = vpop.f32.mrf.mxu3 }
 0xba4   :  { %v4763_v48 = vpop.f32.mrf.mxu0  ;;  %v5719_v2 = vpop.f32.mrf.mxu2  ;;  %6061 = vmatpush.bf16.msra.mxu0 %v14335_v12 }
 0xba5   :  { %v4773_v53 = vadd.f32 %v4763_v48, %v4643_v51  ;;  %v5727_v34 = vpack.c.bf16 %v5719_v2, %v5717_v60 }
 0xba7   :  { %v4903_v56 = vadd.f32 %v4893_v47, %v4773_v53  ;;  %5802 = vmatmul.bf16.vlgmr.msrb.gmra.mxu0 %v5727_v34 }
 0xba8   :  { %v5155_v61 = vpop.f32.mrf.mxu3 }
 0xbac   :  { %v4765_v55 = vpop.f32.mrf.mxu0  ;;  %v5722_v30 = vpop.f32.mrf.mxu2 }
 0xbad   :  { %v4774_v60 = vadd.f32 %v4765_v55, %v4644_v17 }
 0xbaf   :  { %v4904_v14 = vadd.f32 %v17309_v13, %v4774_v60  ;;  %v6077_v60 = vld [vmem:[%s18393_s10] sm:$0x1] }
 0xbb0   :  { %v5158_v19 = vpop.f32.mrf.mxu3 }
 0xbb4   :  { %v4768_v11 = vpop.f32.mrf.mxu0  ;;  %v5724_v50 = vpop.f32.mrf.mxu2 }
 0xbb5   :  { %v4775_v4 = vadd.f32 %v4768_v11, %v4645_v41  ;;  %v5728_v36 = vpack.c.bf16 %v5724_v50, %v5722_v30 }
 0xbb7   :  { %v4905_v37 = vadd.f32 %v4898_v62, %v4775_v4  ;;  %5807 = vmatmul.bf16.gmra.mxu0 %v5728_v36  ;;  %v4646_v62 = vadd.f32 %v17284_v42, %v17307_v28  ;;  %v14641_v42 = vld [vmem:[%s18393_s10] ss:$0 sm:$0xff] }
 0xbb8   :  { %v5160_v10 = vpop.f32.mrf.mxu3 }
 0xbbc   :  { %v4770_v49 = vpop.f32.mrf.mxu0  ;;  %v5977_v63 = vpop.f32.mrf.mxu2 }
 0xbbd   :  { %v4776_v30 = vadd.f32 %v4770_v49, %v4646_v62  ;;  %v14357_v62 = vld [vmem:[%s18394_s14 + $0x60] sm:$0xff] }
 0xbbf   :  { %v4906_v36 = vadd.f32 %v17317_v25, %v4776_v30 }
 0xbc0   :  { %v5413_v51 = vpop.f32.mrf.mxu3 }
 0xbc4   :  { %v5023_v43 = vpop.f32.mrf.mxu0  ;;  %v5979_v46 = vpop.f32.mrf.mxu2 }
 0xbc5   :  { %v5033_v31 = vadd.f32 %v5023_v43, %v4903_v56  ;;  %v5987_v57 = vpack.c.bf16 %v5979_v46, %v5977_v63 }
 0xbc7   :  { %v5163_v26 = vadd.f32 %v5153_v20, %v5033_v31  ;;  %6062 = vmatmul.bf16.vlgmr.msra.gmra.mxu0 %v5987_v57 }
 0xbc8   :  { %v5415_v38 = vpop.f32.mrf.mxu3 }
 0xbcc   :  { %v5025_v0 = vpop.f32.mrf.mxu0  ;;  %v5982_v29 = vpop.f32.mrf.mxu2 }
 0xbcd   :  { %v5034_v2 = vadd.f32 %v5025_v0, %v4904_v14 }
 0xbcf   :  { %v5164_v12 = vadd.f32 %v5155_v61, %v5034_v2  ;;  %v6107_v2 = vmul.f32 14.0, %v6077_v60 }
 0xbd0   :  { %v5418_v45 = vpop.f32.mrf.mxu3 }
 0xbd1   :  { %v6109_v30 = vmul.f32 %v6107_v2, %v6077_v60  ;;  %v14351_v60 = vld [vmem:[%s18394_s14 + $0x38] sm:$0xff] }
 0xbd2   :  { %6355 = vmatpush.bf16.msrb.mxu0 %v14351_v60  ;;  %v14422_v60 = vld [vmem:[%s18394_s14 + $0x230] sm:$0xff] }
 0xbd4   :  { %v5028_v22 = vpop.f32.mrf.mxu0  ;;  %v5984_v33 = vpop.f32.mrf.mxu2 }
 0xbd5   :  { %v5035_v15 = vadd.f32 %v5028_v22, %v4905_v37  ;;  %v5988_v32 = vpack.c.bf16 %v5984_v33, %v5982_v29 }
 0xbd7   :  { %v5165_v6 = vadd.f32 %v5158_v19, %v5035_v15  ;;  %6067 = vmatmul.bf16.gmra.mxu0 %v5988_v32 }
 0xbd8   :  { %v5420_v24 = vpop.f32.mrf.mxu3 }
 0xbdc   :  { %v5030_v23 = vpop.f32.mrf.mxu0 }
 0xbdd   :  { %v5036_v37 = vadd.f32 %v5030_v23, %v4906_v36 }
 0xbdf   :  { %v5166_v46 = vadd.f32 %v5160_v10, %v5036_v37 }
 0xbe0   :  { %v5673_v35 = vpop.f32.mrf.mxu3 }
 0xbe4   :  { %v5283_v39 = vpop.f32.mrf.mxu0 }
 0xbe5   :  { %v5293_v58 = vadd.f32 %v5283_v39, %v5163_v26 }
 0xbe7   :  { %v5423_v44 = vadd.f32 %v5413_v51, %v5293_v58 }
 0xbe8   :  { %v5675_v27 = vpop.f32.mrf.mxu3 }
 0xbec   :  { %v5285_v1 = vpop.f32.mrf.mxu0 }
 0xbed   :  { %v5294_v34 = vadd.f32 %v5285_v1, %v5164_v12 }
 0xbef   :  { %v5424_v11 = vadd.f32 %v5415_v38, %v5294_v34 }
 0xbf0   :  { %v5678_v21 = vpop.f32.mrf.mxu3 }
 0xbf4   :  { %v5288_v8 = vpop.f32.mrf.mxu0 }
 0xbf5   :  { %v5295_v18 = vadd.f32 %v5288_v8, %v5165_v6 }
 0xbf7   :  { %v5425_v20 = vadd.f32 %v5418_v45, %v5295_v18 }
 0xbf8   :  { %v5680_v54 = vpop.f32.mrf.mxu3 }
 0xbfc   :  { %v5290_v3 = vpop.f32.mrf.mxu0 }
 0xbfd   :  { %v5296_v28 = vadd.f32 %v5290_v3, %v5166_v46  ;;  %v14354_v46 = vld [vmem:[%s18394_s14 + $0x48] sm:$0xff] }
 0xbff   :  { %v5426_v19 = vadd.f32 %v5420_v24, %v5296_v28 }
 0xc00   :  { %v5933_v53 = vpop.f32.mrf.mxu3 }
 0xc04   :  { %v5543_v7 = vpop.f32.mrf.mxu0 }
 0xc05   :  { %v5553_v47 = vadd.f32 %v5543_v7, %v5423_v44 }
 0xc07   :  { %v5683_v50 = vadd.f32 %v5673_v35, %v5553_v47  ;;  %v14360_v35 = vld [vmem:[%s18394_s14 + $0x78] sm:$0xff] }
 0xc08   :  { %v5935_v5 = vpop.f32.mrf.mxu3  ;;  %6293 = vmatpush.bf16.msrb.mxu2 %v14360_v35 }
 0xc0c   :  { %v5545_v40 = vpop.f32.mrf.mxu0 }
 0xc0d   :  { %v5554_v4 = vadd.f32 %v5545_v40, %v5424_v11 }
 0xc0f   :  { %v5684_v13 = vadd.f32 %v5675_v27, %v5554_v4 }
 0xc13   :  { %v5938_v29 = vpop.f32.mrf.mxu3 }
 0xc14   :  { %v5548_v52 = vpop.f32.mrf.mxu0 }
 0xc15   :  { %v5555_v31 = vadd.f32 %v5548_v52, %v5425_v20  ;;  %v14355_v20 = vld [vmem:[%s18394_s14 + $0x50] sm:$0xff] }
 0xc17   :  { %v5685_v26 = vadd.f32 %v5678_v21, %v5555_v31  ;;  %v14359_v21 = vld [vmem:[%s18394_s14 + $0x70] sm:$0xff] }
 0xc18   :  { %6294 = vmatpush.bf16.msrb.mxu2 %v14359_v21  ;;  %v14379_v21 = vld [vmem:[%s18397_s13 + $0x20] sm:$0xff] }
 0xc1b   :  { %v5940_v8 = vpop.f32.mrf.mxu3 }
 0xc1c   :  { %v5550_v16 = vpop.f32.mrf.mxu0 }
 0xc1d   :  { %v5556_v15 = vadd.f32 %v5550_v16, %v5426_v19 }
 0xc1f   :  { %v5686_v58 = vadd.f32 %v5680_v54, %v5556_v15  ;;  %v6129_v15 = vld [vmem:[%s18396_s12] sm:$0x1] }
 0xc24   :  { %v5803_v41 = vpop.f32.mrf.mxu0 }
 0xc25   :  { %v5813_v9 = vadd.f32 %v5803_v41, %v5683_v50 }
 0xc27   :  { %v5943_v63 = vadd.f32 %v5933_v53, %v5813_v9  ;;  %v14356_v9 = vld [vmem:[%s18394_s14 + $0x58] sm:$0xff] }
 0xc2c   :  { %v5805_v59 = vpop.f32.mrf.mxu0 }
 0xc2d   :  { %v5814_v43 = vadd.f32 %v5805_v59, %v5684_v13 }
 0xc2f   :  { %v5944_v49 = vadd.f32 %v5935_v5, %v5814_v43 }
 0xc34   :  { %v5808_v48 = vpop.f32.mrf.mxu0 }
 0xc35   :  { %v5815_v22 = vadd.f32 %v5808_v48, %v5685_v26  ;;  %v14358_v48 = vld [vmem:[%s18394_s14 + $0x68] sm:$0xff] }
 0xc36   :  { %6295 = vmatpush.bf16.msrb.mxu2 %v14358_v48  ;;  %v14403_v48 = vld [vmem:[%s18394_s14 + $0x1a8] sm:$0xff] }
 0xc37   :  { %v5945_v23 = vadd.f32 %v5938_v29, %v5815_v22 }
 0xc3a   :  { %6296 = vmatpush.bf16.msrb.mxu2 %v14357_v62  ;;  %v14348_v62 = vld [vmem:[%s18394_s14 + $0x20] sm:$0xff] }
 0xc3c   :  { %v5810_v56 = vpop.f32.mrf.mxu0 }
 0xc3d   :  { %v5816_v1 = vadd.f32 %v5810_v56, %v5686_v58 }
 0xc3e   :  { %6297 = vmatpush.bf16.msrb.mxu2 %v14356_v9  ;;  %v14346_v9 = vld [vmem:[%s18394_s14 + $0x10] sm:$0xff] }
 0xc3f   :  { %v5946_v45 = vadd.f32 %v5940_v8, %v5816_v1 }
 0xc42   :  { %6298 = vmatpush.bf16.msrb.mxu2 %v14355_v20  ;;  %v14363_v20 = vld [vmem:[%s18394_s14 + $0x88] sm:$0xff] }
 0xc44   :  { %v6063_v55 = vpop.f32.mrf.mxu0 }
 0xc45   :  { %v6073_v57 = vadd.f32 %v6063_v55, %v5943_v63 }
 0xc46   :  { %6299 = vmatpush.bf16.msrb.mxu2 %v14354_v46  ;;  %v14362_v46 = vld [vmem:[%s18394_s14 + $0x80] sm:$0xff] }
 0xc47   :  { %v17328_v25 = vadd.f32 %v14641_v42, %v6073_v57  ;;  %v14353_v57 = vld [vmem:[%s18394_s14 + $0x40] sm:$0xff] }
 0xc49   :  { %v6094_v32 = vmul.f32 %v17328_v25, %v17328_v25 }
 0xc4a   :  { %6300 = vmatpush.bf16.msrb.mxu2 %v14353_v57  ;;  %v14377_v57 = vld [vmem:[%s18394_s14 + $0xf0] sm:$0xff] }
 0xc4c   :  { %v6065_v61 = vpop.f32.mrf.mxu0 }
 0xc4d   :  { %v6074_v0 = vadd.f32 %v6065_v61, %v5944_v49 }
 0xc4f   :  { %v17330_v33 = vadd.f32 %v14641_v42, %v6074_v0  ;;  %v6116_v0 = vld [vmem:[%s18395_s11] sm:$0x1] }
 0xc51   :  { %v6085_v6 = vadd.f32 %v17330_v33, %v17328_v25  ;;  %v6095_v10 = vmul.f32 %v17330_v33, %v17330_v33 }
 0xc53   :  { %v6098_v39 = vadd.f32 %v6095_v10, %v6094_v32 }
 0xc54   :  { %v6068_v51 = vpop.f32.mrf.mxu0 }
 0xc55   :  { %v6075_v44 = vadd.f32 %v6068_v51, %v5945_v23 }
 0xc57   :  { %v17338_v38 = vadd.f32 %v14641_v42, %v6075_v44 }
 0xc59   :  { %v6086_v18 = vadd.f32 %v6085_v6, %v17338_v38  ;;  %v6096_v3 = vmul.f32 %v17338_v38, %v17338_v38 }
 0xc5b   :  { %v6099_v7 = vadd.f32 %v6098_v39, %v6096_v3 }
 0xc5c   :  { %v6070_v47 = vpop.f32.mrf.mxu0 }
 0xc5d   :  { %v6076_v24 = vadd.f32 %v6070_v47, %v5946_v45 }
 0xc5f   :  { %v17343_v40 = vadd.f32 %v14641_v42, %v6076_v24 }
 0xc61   :  { %v6087_v52 = vadd.f32 %v6086_v18, %v17343_v40  ;;  %v6097_v27 = vmul.f32 %v17343_v40, %v17343_v40 }
 0xc63   :  { %v6088_v16 = vrot.slane %v6087_v52, 4  ;;  %v6100_v41 = vadd.f32 %v6099_v7, %v6097_v27  ;;  %v14343_v27 = vld [vmem:[%s18397_s13] sm:$0xff] }
 0xc65   :  { %v6089_v59 = vadd.f32 %v6088_v16, %v6087_v52  ;;  %v6101_v17 = vrot.slane %v6100_v41, 4  ;;  %v14352_v16 = vld [vmem:[%s18397_s13 + $0x8] sm:$0xff] }
 0xc67   :  { %v6090_v54 = vrot.slane %v6089_v59, 2  ;;  %v6102_v14 = vadd.f32 %v6101_v17, %v6100_v41  ;;  %v14361_v41 = vld [vmem:[%s18397_s13 + $0x10] sm:$0xff] }
 0xc68   :  { %v14404_v17 = vld [vmem:[%s18394_s14 + $0x1b0] sm:$0xff] }
 0xc69   :  { %v6091_v12 = vadd.f32 %v6090_v54, %v6089_v59  ;;  %v6103_v53 = vrot.slane %v6102_v14, 2  ;;  %v14405_v59 = vld [vmem:[%s18394_s14 + $0x1b8] sm:$0xff] }
 0xc6a   :  { %v14369_v54 = vld [vmem:[%s18394_s14 + $0xb8] sm:$0xff] }
 0xc6b   :  { %v6092_v34 = vrot.slane %v6091_v12, 1  ;;  %v6104_v56 = vadd.f32 %v6103_v53, %v6102_v14  ;;  %v14350_v14 = vld [vmem:[%s18394_s14 + $0x30] sm:$0xff]  ;;  %v14402_v53 = vld [vmem:[%s18394_s14 + $0x1a0] sm:$0xff] }
 0xc6c   :  { %6356 = vmatpush.bf16.msrb.mxu0 %v14350_v14  ;;  %v14421_v14 = vld [vmem:[%s18394_s14 + $0x228] sm:$0xff] }
 0xc6d   :  { %v6093_v11 = vadd.f32 %v6092_v34, %v6091_v12  ;;  %v6105_v50 = vrot.slane %v6104_v56, 1  ;;  %v14349_v12 = vld [vmem:[%s18394_s14 + $0x28] sm:$0xff] }
 0xc6e   :  { %v14367_v34 = vld [vmem:[%s18394_s14 + $0xa8] sm:$0xff] }
 0xc6f   :  { %v6106_v4 = vadd.f32 %v6105_v50, %v6104_v56  ;;  %v6108_v36 = vsub.f32 %v6093_v11, %v6107_v2  ;;  %v14368_v2 = vld [vmem:[%s18394_s14 + $0xb0] sm:$0xff]  ;;  %v14388_v56 = vld [vmem:[%s18397_s13 + $0x28] sm:$0xff]  ;;  %v14366_v11 = vld [vmem:[%s18394_s14 + $0xa0] sm:$0xff] }
 0xc70   :  { %6357 = vmatpush.bf16.msrb.mxu0 %v14349_v12  ;;  %v14347_v50 = vld [vmem:[%s18394_s14 + $0x18] sm:$0xff]  ;;  %v14420_v12 = vld [vmem:[%s18394_s14 + $0x220] sm:$0xff] }
 0xc71   :  { %v6110_v5 = vsub.f32 %v6106_v4, %v6109_v30  ;;  %v6111_v55 = vmul.f32 0.055555556, %v6108_v36  ;;  %v14401_v30 = vld [vmem:[%s18394_s14 + $0x198] sm:$0xff]  ;;  %v14400_v4 = vld [vmem:[%s18394_s14 + $0x190] sm:$0xff] }
 0xc72   :  { %v14365_v36 = vld [vmem:[%s18394_s14 + $0x98] sm:$0xff] }
 0xc73   :  { %v6112_v37 = vmul.f32 0.055555556, %v6110_v5  ;;  %v6113_v13 = vmul.f32 %v6111_v55, %v6111_v55  ;;  %v14399_v5 = vld [vmem:[%s18394_s14 + $0x188] sm:$0xff] }
 0xc74   :  { %6358 = vmatpush.bf16.msrb.mxu0 %v14348_v62  ;;  %v14430_v62 = vld [vmem:[%s18394_s14 + $0x268] sm:$0xff] }
 0xc75   :  { %v6114_v63 = vsub.f32 %v6112_v37, %v6113_v13  ;;  %v14345_v37 = vld [vmem:[%s18394_s14 + $0x8] sm:$0xff]  ;;  %v14398_v13 = vld [vmem:[%s18394_s14 + $0x180] sm:$0xff] }
 0xc77   :  { %v6115_v43 = vmax.f32 %v6114_v63, 0.0  ;;  %v14344_v63 = vld [vmem:[%s18394_s14] sm:$0xff] }
 0xc78   :  { %6359 = vmatpush.bf16.msrb.mxu0 %v14347_v50  ;;  %v14415_v50 = vld [vmem:[%s18397_s13 + $0x40] sm:$0xff] }
 0xc79   :  { %v6117_v31 = vadd.f32 1e-05, %v6115_v43  ;;  %v14378_v43 = vld [vmem:[%s18394_s14 + $0xf8] sm:$0xff] }
 0xc7b   :  { %14646 = vrsqrt.f32 %v6117_v31  ;;  %vm6124_vm4 = vweird.f32 %v6117_v31 }
 0xc7c   :  { %6360 = vmatpush.bf16.msrb.mxu0 %v14346_v9  ;;  %v14416_v9 = vld [vmem:[%s18394_s14 + $0x200] sm:$0xff] }
 0xc80   :  { %6361 = vmatpush.bf16.msrb.mxu0 %v14345_v37  ;;  %v14425_v37 = vld [vmem:[%s18394_s14 + $0x240] sm:$0xff] }
 0xc81   :  { %v14647_v42 = vpop.eup %14646 }
 0xc82   :  { %v6119_v28 = vmul.f32 %v14647_v42, %v6117_v31  ;;  %vm6125_vm3 = vweird.f32 %v14647_v42  ;;  %v14396_v31 = vld [vmem:[%s18394_s14 + $0x178] sm:$0xff] }
 0xc83   :  { %vm6126_vm5 = vmor %vm6124_vm4, %vm6125_vm3 }
 0xc84   :  { %v6120_v49 = vmul.f32 %v14647_v42, %v6119_v28  ;;  %6362 = vmatpush.bf16.msrb.mxu0 %v14344_v63  ;;  %v14375_v28 = vld [vmem:[%s18394_s14 + $0xe0] sm:$0xff] }
 0xc86   :  { %v6121_v61 = vmul.f32 0.5, %v6120_v49  ;;  %v14374_v49 = vld [vmem:[%s18394_s14 + $0xd8] sm:$0xff] }
 0xc88   :  { %v6122_v26 = vsub.f32 1.5, %v6121_v61  ;;  %6567 = vmatpush.bf16.msra.mxu0 %v14378_v43  ;;  %v14373_v61 = vld [vmem:[%s18394_s14 + $0xd0] sm:$0xff] }
 0xc8a   :  { %v6123_v29 = vmul.f32 %v14647_v42, %v6122_v26  ;;  %v14395_v26 = vld [vmem:[%s18394_s14 + $0x170] sm:$0xff] }
 0xc8c   :  { %v6127_v19 = vsel %vm6126_vm5, %v14647_v42, %v6123_v29  ;;  %6568 = vmatpush.bf16.msra.mxu0 %v14377_v57  ;;  %v14376_v42 = vld [vmem:[%s18394_s14 + $0xe8] sm:$0xff] }
 0xc8d   :  { %v6128_v22 = vmul.f32 %v6127_v19, %v6116_v0  ;;  %v14372_v0 = vld [vmem:[%s18394_s14 + $0xc8] sm:$0xff]  ;;  %v14371_v19 = vld [vmem:[%s18394_s14 + $0xc0] sm:$0xff] }
 0xc8e   :  { %v14394_v29 = vld [vmem:[%s18394_s14 + $0x168] sm:$0xff] }
 0xc8f   :  { %v6130_v32 = vmul.f32 %v6128_v22, %v6111_v55  ;;  %v6133_v6 = vperm.slane %v6128_v22, 0  ;;  %v14364_v55 = vld [vmem:[%s18394_s14 + $0x90] sm:$0xff]  ;;  %v14393_v22 = vld [vmem:[%s18394_s14 + $0x160] sm:$0xff] }
 0xc90   :  { %6569 = vmatpush.bf16.msra.mxu0 %v14376_v42 }
 0xc91   :  { %v6131_v10 = vsub.f32 %v6129_v15, %v6130_v32  ;;  %v6135_v23 = vmul.f32 %v6133_v6, %v17328_v25  ;;  %v6136_v39 = vmul.f32 %v6133_v6, %v17330_v33  ;;  %v6137_v51 = vmul.f32 %v6133_v6, %v17338_v38  ;;  %v14392_v15 = vld [vmem:[%s18394_s14 + $0x158] sm:$0xff]  ;;  %v14391_v32 = vld [vmem:[%s18394_s14 + $0x150] sm:$0xff] }
 0xc92   :  { %v6138_v58 = vmul.f32 %v6133_v6, %v17343_v40  ;;  %v14390_v6 = vld [vmem:[%s18394_s14 + $0x148] sm:$0xff] }
 0xc93   :  { %v6140_v44 = vperm.slane %v6131_v10, 0  ;;  %v14389_v10 = vld [vmem:[%s18394_s14 + $0x140] sm:$0xff] }
 0xc94   :  { %6570 = vmatpush.bf16.msra.mxu0 %v14375_v28  ;;  %v14414_v28 = vld [vmem:[%s18394_s14 + $0x1f8] sm:$0xff] }
 0xc95   :  { %v6142_v1 = vadd.f32 %v6140_v44, %v6135_v23  ;;  %v6143_v8 = vadd.f32 %v6140_v44, %v6136_v39  ;;  %v6144_v18 = vadd.f32 %v6140_v44, %v6137_v51  ;;  %v6145_v3 = vadd.f32 %v6140_v44, %v6138_v58 }
 0xc97   :  { %vm6146_vm6 = vcmp.gt.f32.partialorder %v6142_v1, 0.0  ;;  %vm6147_vm7 = vcmp.gt.f32.partialorder %v6143_v8, 0.0  ;;  %vm6148_vm8 = vcmp.gt.f32.partialorder %v6144_v18, 0.0  ;;  %vm6149_vm9 = vcmp.gt.f32.partialorder %v6145_v3, 0.0 }
 0xc98   :  { %v6150_v45 = vmul.f32 0.2, %v6142_v1  ;;  %v6151_v7 = vmul.f32 0.2, %v6143_v8  ;;  %v6152_v47 = vmul.f32 0.2, %v6144_v18  ;;  %6571 = vmatpush.bf16.msra.mxu0 %v14374_v49 }
 0xc99   :  { %v6153_v24 = vmul.f32 0.2, %v6145_v3 }
 0xc9a   :  { %v6154_v25 = vsel %vm6146_vm6, %v6142_v1, %v6150_v45  ;;  %v6155_v35 = vsel %vm6147_vm7, %v6143_v8, %v6151_v7  ;;  %v6156_v33 = vsel %vm6148_vm8, %v6144_v18, %v6152_v47  ;;  %v14387_v1 = vld [vmem:[%s18394_s14 + $0x138] sm:$0xff]  ;;  %v14385_v45 = vld [vmem:[%s18394_s14 + $0x128] sm:$0xff] }
 0xc9b   :  { %v6157_v52 = vsel %vm6149_vm9, %v6145_v3, %v6153_v24  ;;  %v17385_v38 = vpack.c.bf16 %v6155_v35, %v6154_v25  ;;  %v14386_v3 = vld [vmem:[%s18394_s14 + $0x130] sm:$0xff]  ;;  %v14384_v24 = vld [vmem:[%s18394_s14 + $0x120] sm:$0xff]  ;;  %v14370_v25 = vld [vmem:[%s18397_s13 + $0x18] sm:$0xff] }
 0xc9c   :  { %v17387_v40 = vpack.c.bf16 %v6157_v52, %v6156_v33  ;;  %6572 = vmatpush.bf16.msra.mxu0 %v14373_v61  ;;  %v14383_v35 = vld [vmem:[%s18394_s14 + $0x118] sm:$0xff]  ;;  %v14382_v52 = vld [vmem:[%s18394_s14 + $0x110] sm:$0xff] }
 0xc9d   :  { %v14413_v61 = vld [vmem:[%s18394_s14 + $0x1f0] sm:$0xff] }
 0xc9e   :  { %6177 = vmatpush.bf16.msra.mxu1 %v17387_v40  ;;  %6219 = vmatpush.bf16.msra.mxu3 %v17387_v40 }
 0xc9f   :  { %6493 = vmatpush.bf16.msra.mxu2 %v17387_v40 }
 0xca0   :  { %6573 = vmatpush.bf16.msra.mxu0 %v14372_v0  ;;  %v14412_v0 = vld [vmem:[%s18394_s14 + $0x1e8] sm:$0xff] }
 0xca2   :  { %6178 = vmatpush.bf16.msra.mxu1 %v17385_v38  ;;  %6220 = vmatpush.bf16.msra.mxu3 %v17385_v38 }
 0xca3   :  { %6494 = vmatpush.bf16.msra.mxu2 %v17385_v38 }
 0xca4   :  { %6574 = vmatpush.bf16.msra.mxu0 %v14371_v19  ;;  %v14411_v19 = vld [vmem:[%s18394_s14 + $0x1e0] sm:$0xff] }
 0xca5   :  { %12188 = vmatmul.msk.bf16.vlgmr.msra.gmra.mxu1 %vm6167_vm10, %v14343_v27  ;;  %12195 = vmatmul.msk.bf16.vlgmr.msra.gmra.mxu3 %vm6167_vm10, %v14352_v16  ;;  %v14381_v27 = vld [vmem:[%s18394_s14 + $0x108] sm:$0xff] }
 0xca6   :  { %6386 = vmatpush.bf16.msrb.mxu1 %v17387_v40  ;;  %6460 = vmatpush.bf16.msrb.mxu3 %v14369_v54 }
 0xcaa   :  { %6387 = vmatpush.bf16.msrb.mxu1 %v17385_v38  ;;  %6461 = vmatpush.bf16.msrb.mxu3 %v14368_v2 }
 0xcae   :  { %6600 = vmatpush.bf16.msra.mxu1 %v17387_v40  ;;  %6462 = vmatpush.bf16.msrb.mxu3 %v14367_v34  ;;  %v14406_v34 = vld [vmem:[%s18397_s13 + $0x38] sm:$0xff] }
 0xcb2   :  { %6601 = vmatpush.bf16.msra.mxu1 %v17385_v38  ;;  %6463 = vmatpush.bf16.msrb.mxu3 %v14366_v11  ;;  %v14429_v11 = vld [vmem:[%s18394_s14 + $0x260] sm:$0xff] }
 0xcb5   :  { %12282 = vmatmul.msk.bf16.vlgmr.msrb.gmra.mxu1 %vm6167_vm10, %v14361_v41  ;;  %v14380_v41 = vld [vmem:[%s18394_s14 + $0x100] sm:$0xff] }
 0xcb6   :  { %6707 = vmatpush.bf16.msrb.mxu1 %v17387_v40  ;;  %6464 = vmatpush.bf16.msrb.mxu3 %v14365_v36  ;;  %v14428_v36 = vld [vmem:[%s18394_s14 + $0x258] sm:$0xff] }
 0xcba   :  { %6708 = vmatpush.bf16.msrb.mxu1 %v17385_v38  ;;  %6465 = vmatpush.bf16.msrb.mxu3 %v14364_v55  ;;  %v14426_v55 = vld [vmem:[%s18394_s14 + $0x248] sm:$0xff] }
 0xcbe   :  { %6466 = vmatpush.bf16.msrb.mxu3 %v14363_v20 }
 0xcc2   :  { %6467 = vmatpush.bf16.msrb.mxu3 %v14362_v46 }
 0xcc5   :  { %12392 = vmatmul.msk.bf16.vlgmr.msra.gmra.mxu1 %vm6167_vm10, %v14379_v21 }
 0xcc6   :  { %6888 = vmatpush.bf16.msra.mxu1 %v14405_v59  ;;  %6781 = vmatpush.bf16.msra.mxu3 %v14396_v31 }
 0xcca   :  { %6889 = vmatpush.bf16.msra.mxu1 %v14404_v17  ;;  %6782 = vmatpush.bf16.msra.mxu3 %v14395_v26  ;;  %v14423_v17 = vld [vmem:[%s18394_s14 + $0x238] sm:$0xff] }
 0xcce   :  { %6890 = vmatpush.bf16.msra.mxu1 %v14403_v48  ;;  %6783 = vmatpush.bf16.msra.mxu3 %v14394_v29  ;;  %v14432_v48 = vld [vmem:[%s18394_s14 + $0x278] sm:$0xff] }
 0xcd2   :  { %6891 = vmatpush.bf16.msra.mxu1 %v14402_v53  ;;  %6784 = vmatpush.bf16.msra.mxu3 %v14393_v22  ;;  %v14431_v53 = vld [vmem:[%s18394_s14 + $0x270] sm:$0xff] }
 0xcd3   :  { %v14397_v22 = vld [vmem:[%s18397_s13 + $0x30] sm:$0xff] }
 0xcd5   :  { %12447 = vmatmul.msk.bf16.vlgmr.msrb.gmra.mxu1 %vm6167_vm10, %v14388_v56  ;;  %v14419_v56 = vld [vmem:[%s18394_s14 + $0x218] sm:$0xff] }
 0xcd6   :  { %6892 = vmatpush.bf16.msra.mxu1 %v14401_v30  ;;  %6785 = vmatpush.bf16.msra.mxu3 %v14392_v15  ;;  %v14418_v30 = vld [vmem:[%s18394_s14 + $0x210] sm:$0xff] }
 0xcda   :  { %6893 = vmatpush.bf16.msra.mxu1 %v14400_v4  ;;  %6786 = vmatpush.bf16.msra.mxu3 %v14391_v32  ;;  %v14417_v4 = vld [vmem:[%s18394_s14 + $0x208] sm:$0xff]  ;;  %v14410_v32 = vld [vmem:[%s18394_s14 + $0x1d8] sm:$0xff] }
 0xcde   :  { %6894 = vmatpush.bf16.msra.mxu1 %v14399_v5  ;;  %6787 = vmatpush.bf16.msra.mxu3 %v14390_v6  ;;  %v14427_v5 = vld [vmem:[%s18394_s14 + $0x250] sm:$0xff] }
 0xce2   :  { %6895 = vmatpush.bf16.msra.mxu1 %v14398_v13  ;;  %6788 = vmatpush.bf16.msra.mxu3 %v14389_v10  ;;  %v14409_v10 = vld [vmem:[%s18394_s14 + $0x1d0] sm:$0xff] }
 0xce6   :  { %7135 = vmatpush.bf16.msrb.mxu1 %v17387_v40 }
 0xcea   :  { %7136 = vmatpush.bf16.msrb.mxu1 %v17385_v38 }
 0xd22   :  { %v6180_v23 = vpop.f32.mrf.mxu1 }
 0xd28   :  { %v6222_v39 = vpop.f32.mrf.mxu3 }
 0xd2a   :  { %v6182_v51 = vpop.f32.mrf.mxu1 }
 0xd2b   :  { %v6185_v58 = vpack.c.bf16 %v6182_v51, %v6180_v23 }
 0xd2d   :  { %6363 = vmatmul.bf16.vlgmr.msrb.gmra.mxu0 %v6185_v58  ;;  %v14407_v58 = vld [vmem:[%s18394_s14 + $0x1c0] sm:$0xff] }
 0xd2e   :  { %6814 = vmatpush.bf16.msrb.mxu0 %v17387_v40 }
 0xd30   :  { %v6224_v44 = vpop.f32.mrf.mxu3 }
 0xd31   :  { %v6227_v8 = vpack.c.bf16 %v6224_v44, %v6222_v39  ;;  %v14408_v39 = vld [vmem:[%s18394_s14 + $0x1c8] sm:$0xff] }
 0xd32   :  { %6815 = vmatpush.bf16.msrb.mxu0 %v17385_v38  ;;  %v6389_v18 = vpop.f32.mrf.mxu1 }
 0xd33   :  { %6301 = vmatmul.bf16.vlgmr.msrb.gmra.mxu2 %v6227_v8 }
 0xd34   :  { %6674 = vmatpush.bf16.msrb.mxu2 %v14387_v1 }
 0xd38   :  { %6675 = vmatpush.bf16.msrb.mxu2 %v14386_v3  ;;  %v14449_v3 = vld [vmem:[%s18394_s14 + $0x2f0] sm:$0xff] }
 0xd3a   :  { %v6391_v7 = vpop.f32.mrf.mxu1 }
 0xd3b   :  { %v6394_v47 = vpack.c.bf16 %v6391_v7, %v6389_v18  ;;  %v14450_v18 = vld [vmem:[%s18394_s14 + $0x2f8] sm:$0xff]  ;;  %v14448_v7 = vld [vmem:[%s18394_s14 + $0x2e8] sm:$0xff] }
 0xd3c   :  { %6676 = vmatpush.bf16.msrb.mxu2 %v14385_v45 }
 0xd3d   :  { %6468 = vmatmul.bf16.vlgmr.msrb.gmra.mxu3 %v6394_v47  ;;  %v14459_v47 = vld [vmem:[%s18394_s14 + $0x338] sm:$0xff] }
 0xd3e   :  { %7028 = vmatpush.bf16.msrb.mxu3 %v17387_v40 }
 0xd40   :  { %6677 = vmatpush.bf16.msrb.mxu2 %v14384_v24 }
 0xd42   :  { %7029 = vmatpush.bf16.msrb.mxu3 %v17385_v38  ;;  %v6603_v33 = vpop.f32.mrf.mxu1 }
 0xd43   :  { %12337 = vmatmul.msk.bf16.vlgmr.msra.gmra.mxu2 %vm6167_vm10, %v14370_v25  ;;  %v14447_v25 = vld [vmem:[%s18394_s14 + $0x2e0] sm:$0xff] }
 0xd44   :  { %6678 = vmatpush.bf16.msrb.mxu2 %v14383_v35  ;;  %v14458_v35 = vld [vmem:[%s18394_s14 + $0x330] sm:$0xff] }
 0xd48   :  { %6679 = vmatpush.bf16.msrb.mxu2 %v14382_v52  ;;  %v14446_v52 = vld [vmem:[%s18394_s14 + $0x2d8] sm:$0xff] }
 0xd4a   :  { %v6605_v16 = vpop.f32.mrf.mxu1 }
 0xd4b   :  { %v6608_v21 = vpack.c.bf16 %v6605_v16, %v6603_v33  ;;  %v14433_v33 = vld [vmem:[%s18397_s13 + $0x50] sm:$0xff] }
 0xd4c   :  { %6680 = vmatpush.bf16.msrb.mxu2 %v14381_v27  ;;  %v14457_v27 = vld [vmem:[%s18394_s14 + $0x328] sm:$0xff]  ;;  %v14445_v16 = vld [vmem:[%s18394_s14 + $0x2d0] sm:$0xff] }
 0xd50   :  { %6681 = vmatpush.bf16.msrb.mxu2 %v14380_v41  ;;  %v14456_v41 = vld [vmem:[%s18394_s14 + $0x320] sm:$0xff] }
 0xd52   :  { %v6710_v59 = vpop.f32.mrf.mxu1 }
 0xd53   :  { %6682 = vmatmul.bf16.vlgmr.msrb.gmra.mxu2 %v6608_v21  ;;  %v14442_v21 = vld [vmem:[%s18397_s13 + $0x58] sm:$0xff] }
 0xd54   :  { %6921 = vmatpush.bf16.msra.mxu2 %v17387_v40 }
 0xd58   :  { %6922 = vmatpush.bf16.msra.mxu2 %v17385_v38 }
 0xd5a   :  { %v6712_v54 = vpop.f32.mrf.mxu1 }
 0xd5b   :  { %v6715_v2 = vpack.c.bf16 %v6712_v54, %v6710_v59  ;;  %v14444_v59 = vld [vmem:[%s18394_s14 + $0x2c8] sm:$0xff]  ;;  %v14454_v54 = vld [vmem:[%s18394_s14 + $0x310] sm:$0xff] }
 0xd5c   :  { %7102 = vmatpush.bf16.msrb.mxu2 %v14423_v17  ;;  %v14455_v17 = vld [vmem:[%s18394_s14 + $0x318] sm:$0xff] }
 0xd5d   :  { %6789 = vmatmul.bf16.vlgmr.msra.gmra.mxu3 %v6715_v2 }
 0xd5e   :  { %7209 = vmatpush.bf16.msra.mxu3 %v14432_v48  ;;  %v14452_v48 = vld [vmem:[%s18394_s14 + $0x300] sm:$0xff] }
 0xd60   :  { %7103 = vmatpush.bf16.msrb.mxu2 %v14422_v60  ;;  %v14443_v60 = vld [vmem:[%s18394_s14 + $0x2c0] sm:$0xff] }
 0xd62   :  { %7210 = vmatpush.bf16.msra.mxu3 %v14431_v53 }
 0xd63   :  { %12557 = vmatmul.msk.bf16.vlgmr.msra.gmra.mxu2 %vm6167_vm10, %v14406_v34 }
 0xd64   :  { %7104 = vmatpush.bf16.msrb.mxu2 %v14421_v14  ;;  %v14453_v14 = vld [vmem:[%s18394_s14 + $0x308] sm:$0xff] }
 0xd66   :  { %7211 = vmatpush.bf16.msra.mxu3 %v14430_v62 }
 0xd68   :  { %7105 = vmatpush.bf16.msrb.mxu2 %v14420_v12 }
 0xd6a   :  { %7212 = vmatpush.bf16.msra.mxu3 %v14429_v11 }
 0xd6c   :  { %7106 = vmatpush.bf16.msrb.mxu2 %v14419_v56 }
 0xd6d   :  { %12612 = vmatmul.msk.bf16.vlgmr.msrb.gmra.mxu3 %vm6167_vm10, %v14415_v50  ;;  %v14440_v50 = vld [vmem:[%s18394_s14 + $0x2b0] sm:$0xff] }
 0xd6e   :  { %7213 = vmatpush.bf16.msra.mxu3 %v14428_v36  ;;  %v14438_v36 = vld [vmem:[%s18394_s14 + $0x2a0] sm:$0xff] }
 0xd70   :  { %7107 = vmatpush.bf16.msrb.mxu2 %v14418_v30  ;;  %v14441_v30 = vld [vmem:[%s18394_s14 + $0x2b8] sm:$0xff] }
 0xd72   :  { %7214 = vmatpush.bf16.msra.mxu3 %v14427_v5  ;;  %v14437_v5 = vld [vmem:[%s18394_s14 + $0x298] sm:$0xff] }
 0xd74   :  { %7108 = vmatpush.bf16.msrb.mxu2 %v14417_v4  ;;  %v14439_v4 = vld [vmem:[%s18394_s14 + $0x2a8] sm:$0xff] }
 0xd76   :  { %7215 = vmatpush.bf16.msra.mxu3 %v14426_v55  ;;  %v14436_v55 = vld [vmem:[%s18394_s14 + $0x290] sm:$0xff] }
 0xd78   :  { %7109 = vmatpush.bf16.msrb.mxu2 %v14416_v9  ;;  %v14424_v9 = vld [vmem:[%s18397_s13 + $0x48] sm:$0xff] }
 0xd7a   :  { %7216 = vmatpush.bf16.msra.mxu3 %v14425_v37  ;;  %v14435_v37 = vld [vmem:[%s18394_s14 + $0x288] sm:$0xff] }
 0xd7c   :  { %7349 = vmatpush.bf16.msra.mxu2 %v17387_v40 }
 0xd7e   :  { %7456 = vmatpush.bf16.msrb.mxu3 %v17387_v40 }
 0xd80   :  { %7350 = vmatpush.bf16.msra.mxu2 %v17385_v38 }
 0xd82   :  { %7457 = vmatpush.bf16.msrb.mxu3 %v17385_v38 }
 0xdaa   :  { %v6364_v13 = vpop.f32.mrf.mxu0 }
 0xdb2   :  { %v17741_v2 = vpop.f32.mrf.mxu0 }
 0xdb6   :  { %v6302_v20 = vpop.f32.mrf.mxu2 }
 0xdb7   :  { %v6365_v63 = vadd.f32 %v6364_v13, %v6302_v20  ;;  %v14434_v13 = vld [vmem:[%s18394_s14 + $0x280] sm:$0xff] }
 0xdbe   :  { %v17637_v43 = vpop.f32.mrf.mxu2 }
 0xdc0   :  { %v6469_v46 = vpop.f32.mrf.mxu3 }
 0xdc1   :  { %v17639_v31 = vadd.f32 %v6469_v46, %v6365_v63 }
 0xdc6   :  { %v6496_v57 = vpop.f32.mrf.mxu2 }
 0xdc8   :  { %v17652_v29 = vpop.f32.mrf.mxu3 }
 0xdce   :  { %v6498_v42 = vpop.f32.mrf.mxu2 }
 0xdcf   :  { %v6501_v49 = vpack.c.bf16 %v6498_v42, %v6496_v57 }
 0xdd1   :  { %6575 = vmatmul.bf16.vlgmr.msra.gmra.mxu0 %v6501_v49 }
 0xdd2   :  { %6995 = vmatpush.bf16.msra.mxu0 %v14414_v28 }
 0xdd6   :  { %6996 = vmatpush.bf16.msra.mxu0 %v14413_v61  ;;  %v17647_v26 = vpop.f32.mrf.mxu2 }
 0xdda   :  { %6997 = vmatpush.bf16.msra.mxu0 %v14412_v0 }
 0xdde   :  { %6998 = vmatpush.bf16.msra.mxu0 %v14411_v19  ;;  %v17660_v15 = vpop.f32.mrf.mxu2 }
 0xde0   :  { %v17665_v6 = vpop.f32.mrf.mxu3 }
 0xde1   :  { %12502 = vmatmul.msk.bf16.vlgmr.msrb.gmra.mxu0 %vm6167_vm10, %v14397_v22 }
 0xde2   :  { %6999 = vmatpush.bf16.msra.mxu0 %v14410_v32 }
 0xde6   :  { %7000 = vmatpush.bf16.msra.mxu0 %v14409_v10  ;;  %v6924_v23 = vpop.f32.mrf.mxu2 }
 0xde8   :  { %v17674_v51 = vpop.f32.mrf.mxu3 }
 0xdea   :  { %7001 = vmatpush.bf16.msra.mxu0 %v14408_v39 }
 0xdee   :  { %7002 = vmatpush.bf16.msra.mxu0 %v14407_v58  ;;  %v6926_v44 = vpop.f32.mrf.mxu2  ;;  %v14460_v58 = vld [vmem:[%s18397_s13 + $0x68] sm:$0xff] }
 0xdef   :  { %v6929_v1 = vpack.c.bf16 %v6926_v44, %v6924_v23  ;;  %v14468_v44 = vld [vmem:[%s18394_s14 + $0x378] sm:$0xff] }
 0xdf0   :  { %v7031_v8 = vpop.f32.mrf.mxu3 }
 0xdf1   :  { %7003 = vmatmul.bf16.vlgmr.msra.gmra.mxu0 %v6929_v1 }
 0xdf2   :  { %7242 = vmatpush.bf16.msrb.mxu0 %v17387_v40 }
 0xdf6   :  { %7243 = vmatpush.bf16.msrb.mxu0 %v17385_v38 }
 0xdf8   :  { %v7033_v45 = vpop.f32.mrf.mxu3 }
 0xdf9   :  { %v7036_v24 = vpack.c.bf16 %v7033_v45, %v7031_v8  ;;  %v14451_v8 = vld [vmem:[%s18397_s13 + $0x60] sm:$0xff]  ;;  %v14466_v45 = vld [vmem:[%s18394_s14 + $0x368] sm:$0xff] }
 0xdfa   :  { %7423 = vmatpush.bf16.msra.mxu0 %v14450_v18  ;;  %v14467_v18 = vld [vmem:[%s18394_s14 + $0x370] sm:$0xff] }
 0xdfb   :  { %7110 = vmatmul.bf16.vlgmr.msrb.gmra.mxu2 %v7036_v24  ;;  %v14465_v24 = vld [vmem:[%s18394_s14 + $0x360] sm:$0xff] }
 0xdfc   :  { %7530 = vmatpush.bf16.msrb.mxu2 %v14459_v47 }
 0xdfe   :  { %7424 = vmatpush.bf16.msra.mxu0 %v14449_v3 }
 0xe00   :  { %7531 = vmatpush.bf16.msrb.mxu2 %v14458_v35 }
 0xe01   :  { %12722 = vmatmul.msk.bf16.vlgmr.msrb.gmra.mxu0 %vm6167_vm10, %v14433_v33  ;;  %v14464_v33 = vld [vmem:[%s18394_s14 + $0x358] sm:$0xff] }
 0xe02   :  { %7425 = vmatpush.bf16.msra.mxu0 %v14448_v7  ;;  %v14477_v7 = vld [vmem:[%s18394_s14 + $0x3b8] sm:$0xff] }
 0xe04   :  { %7532 = vmatpush.bf16.msrb.mxu2 %v14457_v27  ;;  %v14463_v27 = vld [vmem:[%s18394_s14 + $0x350] sm:$0xff] }
 0xe06   :  { %7426 = vmatpush.bf16.msra.mxu0 %v14447_v25  ;;  %v14476_v25 = vld [vmem:[%s18394_s14 + $0x3b0] sm:$0xff] }
 0xe08   :  { %7533 = vmatpush.bf16.msrb.mxu2 %v14456_v41  ;;  %v6367_v41 = vadd.f32 %v17741_v2, %v17637_v43  ;;  %v14472_v2 = vld [vmem:[%s18394_s14 + $0x390] sm:$0xff] }
 0xe0a   :  { %7427 = vmatpush.bf16.msra.mxu0 %v14446_v52  ;;  %v14475_v52 = vld [vmem:[%s18394_s14 + $0x3a8] sm:$0xff] }
 0xe0b   :  { %12777 = vmatmul.msk.bf16.vlgmr.msra.gmra.mxu2 %vm6167_vm10, %v14442_v21 }
 0xe0c   :  { %7534 = vmatpush.bf16.msrb.mxu2 %v14455_v17 }
 0xe0e   :  { %7428 = vmatpush.bf16.msra.mxu0 %v14445_v16  ;;  %v14474_v16 = vld [vmem:[%s18394_s14 + $0x3a0] sm:$0xff] }
 0xe10   :  { %7535 = vmatpush.bf16.msrb.mxu2 %v14454_v54  ;;  %v14473_v54 = vld [vmem:[%s18394_s14 + $0x398] sm:$0xff] }
 0xe12   :  { %7429 = vmatpush.bf16.msra.mxu0 %v14444_v59  ;;  %v6475_v59 = vadd.f32 %v17652_v29, %v6367_v41  ;;  %v14461_v29 = vld [vmem:[%s18394_s14 + $0x340] sm:$0xff] }
 0xe14   :  { %7536 = vmatpush.bf16.msrb.mxu2 %v14453_v14 }
 0xe16   :  { %7430 = vmatpush.bf16.msra.mxu0 %v14443_v60  ;;  %v14462_v60 = vld [vmem:[%s18394_s14 + $0x348] sm:$0xff] }
 0xe18   :  { %7537 = vmatpush.bf16.msrb.mxu2 %v14452_v48 }
 0xe1a   :  { %7670 = vmatpush.bf16.msrb.mxu0 %v17387_v40 }
 0xe1c   :  { %7777 = vmatpush.bf16.msra.mxu2 %v17387_v40 }
 0xe1e   :  { %7671 = vmatpush.bf16.msrb.mxu0 %v17385_v38 }
 0xe20   :  { %7778 = vmatpush.bf16.msra.mxu2 %v17385_v38 }
 0xe4e   :  { %v6576_v12 = vpop.f32.mrf.mxu0 }
 0xe4f   :  { %v6581_v53 = vadd.f32 %v6576_v12, %v17639_v31 }
 0xe51   :  { %v6688_v28 = vadd.f32 %v17647_v26, %v6581_v53  ;;  %v14469_v26 = vld [vmem:[%s18397_s13 + $0x70] sm:$0xff]  ;;  %v14471_v53 = vld [vmem:[%s18394_s14 + $0x388] sm:$0xff] }
 0xe53   :  { %v6795_v49 = vadd.f32 %v17665_v6, %v6688_v28 }
 0xe56   :  { %v17744_v34 = vpop.f32.mrf.mxu0 }
 0xe57   :  { %v6582_v14 = vadd.f32 %v17744_v34, %v6475_v59 }
 0xe59   :  { %v6689_v43 = vadd.f32 %v17660_v15, %v6582_v14 }
 0xe5e   :  { %v6817_v56 = vpop.f32.mrf.mxu0 }
 0xe66   :  { %v6819_v62 = vpop.f32.mrf.mxu0 }
 0xe67   :  { %v6822_v11 = vpack.c.bf16 %v6819_v62, %v6817_v56  ;;  %v6796_v56 = vadd.f32 %v17674_v51, %v6689_v43  ;;  %v14470_v62 = vld [vmem:[%s18394_s14 + $0x380] sm:$0xff] }
 0xe69   :  { %6896 = vmatmul.bf16.vlgmr.msra.gmra.mxu1 %v6822_v11 }
 0xe6a   :  { %7316 = vmatpush.bf16.msra.mxu1 %v14441_v30 }
 0xe6e   :  { %7317 = vmatpush.bf16.msra.mxu1 %v14440_v50  ;;  %v7004_v20 = vpop.f32.mrf.mxu0 }
 0xe72   :  { %7318 = vmatpush.bf16.msra.mxu1 %v14439_v4 }
 0xe76   :  { %7319 = vmatpush.bf16.msra.mxu1 %v14438_v36  ;;  %v17776_v46 = vpop.f32.mrf.mxu0 }
 0xe79   :  { %12667 = vmatmul.msk.bf16.vlgmr.msrb.gmra.mxu1 %vm6167_vm10, %v14424_v9 }
 0xe7a   :  { %7320 = vmatpush.bf16.msra.mxu1 %v14437_v5 }
 0xe7e   :  { %7321 = vmatpush.bf16.msra.mxu1 %v14436_v55  ;;  %v7111_v63 = vpop.f32.mrf.mxu2  ;;  %v7245_v57 = vpop.f32.mrf.mxu0 }
 0xe82   :  { %7322 = vmatpush.bf16.msra.mxu1 %v14435_v37 }
 0xe86   :  { %7323 = vmatpush.bf16.msra.mxu1 %v14434_v13  ;;  %v17778_v31 = vpop.f32.mrf.mxu2  ;;  %v7247_v19 = vpop.f32.mrf.mxu0 }
 0xe87   :  { %v7250_v32 = vpack.c.bf16 %v7247_v19, %v7245_v57  ;;  %v14481_v19 = vld [vmem:[%s18394_s14 + $0x3d0] sm:$0xff] }
 0xe89   :  { %7324 = vmatmul.bf16.vlgmr.msra.gmra.mxu1 %v7250_v32  ;;  %v14479_v32 = vld [vmem:[%s18394_s14 + $0x3c0] sm:$0xff] }
 0xe8a   :  { %7563 = vmatpush.bf16.msrb.mxu1 %v17387_v40 }
 0xe8e   :  { %7564 = vmatpush.bf16.msrb.mxu1 %v17385_v38  ;;  %v7352_v42 = vpop.f32.mrf.mxu2 }
 0xe92   :  { %7744 = vmatpush.bf16.msra.mxu1 %v14477_v7 }
 0xe96   :  { %v7354_v22 = vpop.f32.mrf.mxu2  ;;  %7745 = vmatpush.bf16.msra.mxu1 %v14476_v25 }
 0xe97   :  { %v7357_v40 = vpack.c.bf16 %v7354_v22, %v7352_v42  ;;  %v14480_v22 = vld [vmem:[%s18394_s14 + $0x3c8] sm:$0xff] }
 0xe99   :  { %7431 = vmatmul.bf16.vlgmr.msra.gmra.mxu0 %v7357_v40  ;;  %12887 = vmatmul.msk.bf16.vlgmr.msrb.gmra.mxu1 %vm6167_vm10, %v14460_v58 }
 0xe9a   :  { %7746 = vmatpush.bf16.msra.mxu1 %v14475_v52 }
 0xe9e   :  { %7747 = vmatpush.bf16.msra.mxu1 %v14474_v16 }
 0xea2   :  { %7748 = vmatpush.bf16.msra.mxu1 %v14473_v54 }
 0xea6   :  { %7749 = vmatpush.bf16.msra.mxu1 %v14472_v2 }
 0xea9   :  { %12942 = vmatmul.msk.bf16.vlgmr.msrb.gmra.mxu0 %vm6167_vm10, %v14469_v26 }
 0xeaa   :  { %7750 = vmatpush.bf16.msra.mxu1 %v14471_v53 }
 0xeae   :  { %7751 = vmatpush.bf16.msra.mxu1 %v14470_v62 }
 0xee6   :  { %v6897_v61 = vpop.f32.mrf.mxu1 }
 0xee7   :  { %v6902_v0 = vadd.f32 %v6897_v61, %v6795_v49  ;;  %v14484_v49 = vld [vmem:[%s18394_s14 + $0x3e8] sm:$0xff]  ;;  %v14483_v61 = vld [vmem:[%s18394_s14 + $0x3e0] sm:$0xff] }
 0xee9   :  { %v7009_v10 = vadd.f32 %v7004_v20, %v6902_v0  ;;  %v14486_v20 = vld [vmem:[%s18394_s14 + $0x3f8] sm:$0xff] }
 0xeea   :  { %7851 = vmatpush.bf16.msra.mxu0 %v14486_v20  ;;  %v14482_v0 = vld [vmem:[%s18394_s14 + $0x3d8] sm:$0xff] }
 0xeeb   :  { %v7116_v38 = vadd.f32 %v7111_v63, %v7009_v10 }
 0xeee   :  { %v6899_v23 = vpop.f32.mrf.mxu1 }
 0xeef   :  { %v6903_v15 = vadd.f32 %v6899_v23, %v6796_v56 }
 0xef1   :  { %v7010_v36 = vadd.f32 %v17776_v46, %v6903_v15  ;;  %v14478_v46 = vld [vmem:[%s18397_s13 + $0x78] sm:$0xff]  ;;  %v14510_v15 = vld [vmem:[%s18399_s19 + $0xa0] sm:$0xff] }
 0xef3   :  { %v7117_v55 = vadd.f32 %v17778_v31, %v7010_v36  ;;  %v14485_v31 = vld [vmem:[%s18394_s14 + $0x3f0] sm:$0xff]  ;;  %v14509_v36 = vld [vmem:[%s18399_s19 + $0x98] sm:$0xff] }
 0xef4   :  { %7852 = vmatpush.bf16.msra.mxu0 %v14485_v31 }
 0xef6   :  { %v7138_v39 = vpop.f32.mrf.mxu1 }
 0xef8   :  { %7853 = vmatpush.bf16.msra.mxu0 %v14484_v49 }
 0xefc   :  { %7854 = vmatpush.bf16.msra.mxu0 %v14483_v61 }
 0xefe   :  { %v7140_v6 = vpop.f32.mrf.mxu1 }
 0xeff   :  { %v7143_v1 = vpack.c.bf16 %v7140_v6, %v7138_v39 }
 0xf00   :  { %7855 = vmatpush.bf16.msra.mxu0 %v14482_v0 }
 0xf01   :  { %7217 = vmatmul.bf16.vlgmr.msra.gmra.mxu3 %v7143_v1 }
 0xf02   :  { %7637 = vmatpush.bf16.msra.mxu3 %v14468_v44 }
 0xf04   :  { %7856 = vmatpush.bf16.msra.mxu0 %v14481_v19 }
 0xf06   :  { %v7325_v3 = vpop.f32.mrf.mxu1  ;;  %7638 = vmatpush.bf16.msra.mxu3 %v14467_v18 }
 0xf08   :  { %7857 = vmatpush.bf16.msra.mxu0 %v14480_v22  ;;  %v7898_v22 = vld [vmem:[%s18400_s16] sm:$0x1] }
 0xf0a   :  { %7639 = vmatpush.bf16.msra.mxu3 %v14466_v45 }
 0xf0c   :  { %7858 = vmatpush.bf16.msra.mxu0 %v14479_v32 }
 0xf0e   :  { %v7327_v35 = vpop.f32.mrf.mxu1  ;;  %7640 = vmatpush.bf16.msra.mxu3 %v14465_v24  ;;  %v14642_v24 = vld [vmem:[%s18398_s15] ss:$0 sm:$0xff] }
 0xf11   :  { %12832 = vmatmul.msk.bf16.vlgmr.msrb.gmra.mxu3 %vm6167_vm10, %v14451_v8 }
 0xf12   :  { %7641 = vmatpush.bf16.msra.mxu3 %v14464_v33 }
 0xf16   :  { %v7432_v47 = vpop.f32.mrf.mxu0  ;;  %v7566_v17 = vpop.f32.mrf.mxu1  ;;  %7642 = vmatpush.bf16.msra.mxu3 %v14463_v27  ;;  %v14513_v27 = vld [vmem:[%s18399_s19 + $0xb8] sm:$0xff] }
 0xf17   :  { %8231 = vmatpush.bf16.msrb.mxu0 %v14513_v27  ;;  %v14492_v27 = vld [vmem:[%s18399_s19 + $0x20] sm:$0xff] }
 0xf1a   :  { %7643 = vmatpush.bf16.msra.mxu3 %v14462_v60 }
 0xf1e   :  { %v7434_v21 = vpop.f32.mrf.mxu0  ;;  %v7568_v12 = vpop.f32.mrf.mxu1  ;;  %7644 = vmatpush.bf16.msra.mxu3 %v14461_v29  ;;  %v7867_v29 = vld [vmem:[%s18398_s15] sm:$0x1] }
 0xf1f   :  { %v7571_v34 = vpack.c.bf16 %v7568_v12, %v7566_v17  ;;  %v14512_v17 = vld [vmem:[%s18399_s19 + $0xb0] sm:$0xff]  ;;  %v7889_v53 = vmul.f32 8.0, %v7867_v29 }
 0xf20   :  { %8232 = vmatpush.bf16.msrb.mxu0 %v14512_v17  ;;  %v14504_v17 = vld [vmem:[%s18399_s19 + $0x78] sm:$0xff] }
 0xf21   :  { %7645 = vmatmul.bf16.vlgmr.msra.gmra.mxu3 %v7571_v34  ;;  %8064 = vmatpush.bf16.msrb.mxu1 %v14504_v17  ;;  %v14552_v17 = vld [vmem:[%s18399_s19 + $0x1c8] sm:$0xff] }
 0xf26   :  { %v7673_v48 = vpop.f32.mrf.mxu0 }
 0xf2e   :  { %v7675_v50 = vpop.f32.mrf.mxu0 }
 0xf2f   :  { %v7678_v4 = vpack.c.bf16 %v7675_v50, %v7673_v48  ;;  %v14511_v48 = vld [vmem:[%s18399_s19 + $0xa8] sm:$0xff] }
 0xf30   :  { %8233 = vmatpush.bf16.msrb.mxu0 %v14511_v48  ;;  %v14488_v48 = vld [vmem:[%s18399_s19] sm:$0xff] }
 0xf31   :  { %7752 = vmatmul.bf16.vlgmr.msra.gmra.mxu1 %v7678_v4 }
 0xf34   :  { %8234 = vmatpush.bf16.msrb.mxu0 %v14510_v15  ;;  %v14499_v15 = vld [vmem:[%s18399_s19 + $0x50] sm:$0xff] }
 0xf38   :  { %8235 = vmatpush.bf16.msrb.mxu0 %v14509_v36  ;;  %v14522_v36 = vld [vmem:[%s18399_s19 + $0xf8] sm:$0xff] }
 0xf84   :  { %v7218_v30 = vpop.f32.mrf.mxu3 }
 0xf85   :  { %v7223_v11 = vadd.f32 %v7218_v30, %v7116_v38 }
 0xf87   :  { %v7330_v9 = vadd.f32 %v7325_v3, %v7223_v11  ;;  %v7891_v11 = vmul.f32 %v7889_v53, %v7867_v29  ;;  %v14529_v29 = vld [vmem:[%s18399_s19 + $0x128] sm:$0xff] }
 0xf89   :  { %v7437_v5 = vadd.f32 %v7432_v47, %v7330_v9 }
 0xf8c   :  { %v7220_v51 = vpop.f32.mrf.mxu3 }
 0xf8d   :  { %v7224_v37 = vadd.f32 %v7220_v51, %v7117_v55 }
 0xf8f   :  { %v7331_v13 = vadd.f32 %v7327_v35, %v7224_v37  ;;  %v14508_v37 = vld [vmem:[%s18399_s19 + $0x90] sm:$0xff] }
 0xf90   :  { %8236 = vmatpush.bf16.msrb.mxu0 %v14508_v37  ;;  %v14517_v37 = vld [vmem:[%s18399_s19 + $0xd0] sm:$0xff] }
 0xf91   :  { %v7438_v63 = vadd.f32 %v7434_v21, %v7331_v13 }
 0xf94   :  { %v7459_v57 = vpop.f32.mrf.mxu3 }
 0xf9c   :  { %v7461_v42 = vpop.f32.mrf.mxu3 }
 0xf9d   :  { %v7464_v28 = vpack.c.bf16 %v7461_v42, %v7459_v57  ;;  %v14507_v57 = vld [vmem:[%s18399_s19 + $0x88] sm:$0xff] }
 0xf9e   :  { %8237 = vmatpush.bf16.msrb.mxu0 %v14507_v57 }
 0xf9f   :  { %7538 = vmatmul.bf16.vlgmr.msrb.gmra.mxu2 %v7464_v28 }
 0xfa4   :  { %v7646_v6 = vpop.f32.mrf.mxu3 }
 0xfac   :  { %v7648_v8 = vpop.f32.mrf.mxu3 }
 0xfae   :  { %v7753_v44 = vpop.f32.mrf.mxu1 }
 0xfaf   :  { %12997 = vmatmul.msk.bf16.vlgmr.msra.gmra.mxu2 %vm6167_vm10, %v14478_v46  ;;  %v14506_v46 = vld [vmem:[%s18399_s19 + $0x80] sm:$0xff] }
 0xfb0   :  { %8238 = vmatpush.bf16.msrb.mxu0 %v14506_v46  ;;  %v14540_v46 = vld [vmem:[%s18399_s19 + $0x178] sm:$0xff] }
 0xfb6   :  { %v7755_v7 = vpop.f32.mrf.mxu1 }
0x1022   :  { %v7539_v40 = vpop.f32.mrf.mxu2 }
0x1023   :  { %v7544_v10 = vadd.f32 %v7539_v40, %v7437_v5 }
0x1025   :  { %v7651_v1 = vadd.f32 %v7646_v6, %v7544_v10 }
0x1027   :  { %v7758_v3 = vadd.f32 %v7753_v44, %v7651_v1 }
0x102a   :  { %v7541_v38 = vpop.f32.mrf.mxu2 }
0x102b   :  { %v7545_v23 = vadd.f32 %v7541_v38, %v7438_v63  ;;  %v7911_v38 = vld [vmem:[%s18401_s17] sm:$0x1] }
0x102d   :  { %v7652_v45 = vadd.f32 %v7648_v8, %v7545_v23 }
0x102f   :  { %v7759_v25 = vadd.f32 %v7755_v7, %v7652_v45 }
0x1032   :  { %v7780_v39 = vpop.f32.mrf.mxu2 }
0x103a   :  { %v7782_v58 = vpop.f32.mrf.mxu2 }
0x103b   :  { %v7785_v26 = vpack.c.bf16 %v7782_v58, %v7780_v39 }
0x103d   :  { %7859 = vmatmul.bf16.vlgmr.msra.gmra.mxu0 %v7785_v26 }
0x10ba   :  { %v7860_v18 = vpop.f32.mrf.mxu0 }
0x10bb   :  { %v7865_v47 = vadd.f32 %v7860_v18, %v7758_v3 }
0x10bd   :  { %v17881_v33 = vadd.f32 %v14642_v24, %v7865_v47  ;;  %v14495_v47 = vld [vmem:[%s18399_s19 + $0x38] sm:$0xff] }
0x10bf   :  { %v7880_v41 = vmul.f32 %v17881_v33, %v17881_v33 }
0x10c2   :  { %v7862_v35 = vpop.f32.mrf.mxu0 }
0x10c3   :  { %v7866_v52 = vadd.f32 %v7862_v35, %v7759_v25  ;;  %v14487_v25 = vld [vmem:[%s18402_s18] sm:$0xff]  ;;  %v14496_v35 = vld [vmem:[%s18402_s18 + $0x8] sm:$0xff] }
0x10c5   :  { %v17886_v16 = vadd.f32 %v14642_v24, %v7866_v52  ;;  %v14493_v52 = vld [vmem:[%s18399_s19 + $0x28] sm:$0xff] }
0x10c7   :  { %v7873_v21 = vadd.f32 %v17886_v16, %v17881_v33  ;;  %v7881_v59 = vmul.f32 %v17886_v16, %v17886_v16 }
0x10c9   :  { %v7874_v60 = vrot.slane %v7873_v21, 4  ;;  %v7882_v54 = vadd.f32 %v7881_v59, %v7880_v41  ;;  %v14505_v41 = vld [vmem:[%s18402_s18 + $0x10] sm:$0xff] }
0x10ca   :  { %v14490_v59 = vld [vmem:[%s18399_s19 + $0x10] sm:$0xff] }
0x10cb   :  { %v7875_v14 = vadd.f32 %v7874_v60, %v7873_v21  ;;  %v7883_v43 = vrot.slane %v7882_v54, 4  ;;  %v14531_v21 = vld [vmem:[%s18399_s19 + $0x138] sm:$0xff]  ;;  %v14503_v60 = vld [vmem:[%s18399_s19 + $0x70] sm:$0xff] }
0x10cc   :  { %8065 = vmatpush.bf16.msrb.mxu1 %v14503_v60  ;;  %v14551_v60 = vld [vmem:[%s18399_s19 + $0x1c0] sm:$0xff] }
0x10cd   :  { %v7876_v2 = vrot.slane %v7875_v14, 2  ;;  %v7884_v12 = vadd.f32 %v7883_v43, %v7882_v54  ;;  %v14530_v54 = vld [vmem:[%s18399_s19 + $0x130] sm:$0xff]  ;;  %v14502_v43 = vld [vmem:[%s18399_s19 + $0x68] sm:$0xff] }
0x10cf   :  { %v7877_v34 = vadd.f32 %v7876_v2, %v7875_v14  ;;  %v7885_v56 = vrot.slane %v7884_v12, 2  ;;  %v14489_v14 = vld [vmem:[%s18399_s19 + $0x8] sm:$0xff]  ;;  %v14501_v2 = vld [vmem:[%s18399_s19 + $0x60] sm:$0xff] }
0x10d0   :  { %8066 = vmatpush.bf16.msrb.mxu1 %v14502_v43 }
0x10d1   :  { %v7878_v62 = vrot.slane %v7877_v34, 1  ;;  %v7886_v30 = vadd.f32 %v7885_v56, %v7884_v12  ;;  %v14528_v12 = vld [vmem:[%s18399_s19 + $0x120] sm:$0xff]  ;;  %v14527_v56 = vld [vmem:[%s18399_s19 + $0x118] sm:$0xff] }
0x10d3   :  { %v7879_v50 = vadd.f32 %v7878_v62, %v7877_v34  ;;  %v7887_v4 = vrot.slane %v7886_v30, 1  ;;  %v14500_v34 = vld [vmem:[%s18399_s19 + $0x58] sm:$0xff]  ;;  %v14526_v62 = vld [vmem:[%s18399_s19 + $0x110] sm:$0xff] }
0x10d4   :  { %8067 = vmatpush.bf16.msrb.mxu1 %v14501_v2 }
0x10d5   :  { %v7888_v9 = vadd.f32 %v7887_v4, %v7886_v30  ;;  %v7890_v5 = vsub.f32 %v7879_v50, %v7889_v53  ;;  %v14514_v53 = vld [vmem:[%s18402_s18 + $0x18] sm:$0xff]  ;;  %v14498_v30 = vld [vmem:[%s18399_s19 + $0x48] sm:$0xff]  ;;  %v14497_v50 = vld [vmem:[%s18399_s19 + $0x40] sm:$0xff] }
0x10d6   :  { %v14524_v4 = vld [vmem:[%s18399_s19 + $0x100] sm:$0xff] }
0x10d7   :  { %v7892_v55 = vsub.f32 %v7888_v9, %v7891_v11  ;;  %v7893_v51 = vmul.f32 0.125, %v7890_v5  ;;  %v14525_v11 = vld [vmem:[%s18399_s19 + $0x108] sm:$0xff]  ;;  %v14521_v9 = vld [vmem:[%s18399_s19 + $0xf0] sm:$0xff] }
0x10d8   :  { %8068 = vmatpush.bf16.msrb.mxu1 %v14500_v34  ;;  %v14520_v5 = vld [vmem:[%s18399_s19 + $0xe8] sm:$0xff] }
0x10d9   :  { %v7894_v13 = vmul.f32 0.125, %v7892_v55  ;;  %v7895_v20 = vmul.f32 %v7893_v51, %v7893_v51  ;;  %v14519_v55 = vld [vmem:[%s18399_s19 + $0xe0] sm:$0xff] }
0x10db   :  { %v7896_v63 = vsub.f32 %v7894_v13, %v7895_v20  ;;  %v14516_v13 = vld [vmem:[%s18399_s19 + $0xc8] sm:$0xff]  ;;  %v14515_v20 = vld [vmem:[%s18399_s19 + $0xc0] sm:$0xff] }
0x10dc   :  { %8069 = vmatpush.bf16.msrb.mxu1 %v14499_v15 }
0x10dd   :  { %v7897_v42 = vmax.f32 %v7896_v63, 0.0 }
0x10df   :  { %v7899_v28 = vadd.f32 1e-05, %v7897_v42 }
0x10e0   :  { %8070 = vmatpush.bf16.msrb.mxu1 %v14498_v30  ;;  %v14567_v30 = vld [vmem:[%s18399_s19 + $0x238] sm:$0xff] }
0x10e1   :  { %14648 = vrsqrt.f32 %v7899_v28  ;;  %vm7906_vm12 = vweird.f32 %v7899_v28 }
0x10e4   :  { %8071 = vmatpush.bf16.msrb.mxu1 %v14497_v50 }
0x10e7   :  { %v14649_v31 = vpop.eup %14648 }
0x10e8   :  { %v7901_v49 = vmul.f32 %v14649_v31, %v7899_v28  ;;  %vm7907_vm11 = vweird.f32 %v14649_v31  ;;  %8338 = vmatpush.bf16.msra.mxu1 %v14522_v36 }
0x10e9   :  { %vm7908_vm13 = vmor %vm7906_vm12, %vm7907_vm11 }
0x10ea   :  { %v7902_v61 = vmul.f32 %v14649_v31, %v7901_v49 }
0x10ec   :  { %v7903_v0 = vmul.f32 0.5, %v7902_v61  ;;  %8339 = vmatpush.bf16.msra.mxu1 %v14521_v9  ;;  %v14566_v9 = vld [vmem:[%s18399_s19 + $0x230] sm:$0xff] }
0x10ee   :  { %v7904_v19 = vsub.f32 1.5, %v7903_v0  ;;  %v14539_v0 = vld [vmem:[%s18399_s19 + $0x170] sm:$0xff] }
0x10f0   :  { %v7905_v32 = vmul.f32 %v14649_v31, %v7904_v19  ;;  %8340 = vmatpush.bf16.msra.mxu1 %v14520_v5  ;;  %v14548_v19 = vld [vmem:[%s18399_s19 + $0x1b0] sm:$0xff]  ;;  %v14565_v5 = vld [vmem:[%s18399_s19 + $0x228] sm:$0xff] }
0x10f2   :  { %v7909_v40 = vsel %vm7908_vm13, %v14649_v31, %v7905_v32  ;;  %v14549_v31 = vld [vmem:[%s18399_s19 + $0x1b8] sm:$0xff]  ;;  %v14538_v32 = vld [vmem:[%s18399_s19 + $0x168] sm:$0xff] }
0x10f3   :  { %v7910_v10 = vmul.f32 %v7909_v40, %v7898_v22  ;;  %v14547_v40 = vld [vmem:[%s18399_s19 + $0x1a8] sm:$0xff] }
0x10f4   :  { %8341 = vmatpush.bf16.msra.mxu1 %v14519_v55 }
0x10f5   :  { %v7912_v23 = vmul.f32 %v7910_v10, %v7893_v51  ;;  %v7915_v39 = vperm.slane %v7910_v10, 0  ;;  %v14518_v51 = vld [vmem:[%s18399_s19 + $0xd8] sm:$0xff]  ;;  %v14537_v10 = vld [vmem:[%s18399_s19 + $0x160] sm:$0xff] }
0x10f7   :  { %v7913_v58 = vsub.f32 %v7911_v38, %v7912_v23  ;;  %v7917_v26 = vmul.f32 %v7915_v39, %v17881_v33  ;;  %v7918_v6 = vmul.f32 %v7915_v39, %v17886_v16  ;;  %v14494_v33 = vld [vmem:[%s18399_s19 + $0x30] sm:$0xff]  ;;  %v14491_v16 = vld [vmem:[%s18399_s19 + $0x18] sm:$0xff]  ;;  %v14546_v38 = vld [vmem:[%s18399_s19 + $0x1a0] sm:$0xff] }
0x10f8   :  { %8342 = vmatpush.bf16.msra.mxu1 %v14518_v51  ;;  %v14523_v23 = vld [vmem:[%s18402_s18 + $0x20] sm:$0xff]  ;;  %v14576_v51 = vld [vmem:[%s18399_s19 + $0x278] sm:$0xff] }
0x10f9   :  { %v7920_v44 = vperm.slane %v7913_v58, 0  ;;  %v14536_v58 = vld [vmem:[%s18399_s19 + $0x158] sm:$0xff] }
0x10fb   :  { %v7922_v1 = vadd.f32 %v7920_v44, %v7917_v26  ;;  %v7923_v8 = vadd.f32 %v7920_v44, %v7918_v6  ;;  %v14545_v6 = vld [vmem:[%s18399_s19 + $0x198] sm:$0xff]  ;;  %v14535_v44 = vld [vmem:[%s18399_s19 + $0x150] sm:$0xff] }
0x10fc   :  { %8343 = vmatpush.bf16.msra.mxu1 %v14517_v37 }
0x10fd   :  { %vm7924_vm14 = vcmp.gt.f32.partialorder %v7922_v1, 0.0  ;;  %vm7925_vm15 = vcmp.gt.f32.partialorder %v7923_v8, 0.0  ;;  %v7926_v18 = vmul.f32 0.2, %v7922_v1  ;;  %v7927_v3 = vmul.f32 0.2, %v7923_v8 }
0x10ff   :  { %v7928_v45 = vsel %vm7924_vm14, %v7922_v1, %v7926_v18  ;;  %v7929_v7 = vsel %vm7925_vm15, %v7923_v8, %v7927_v3  ;;  %v14544_v1 = vld [vmem:[%s18399_s19 + $0x190] sm:$0xff]  ;;  %v14534_v18 = vld [vmem:[%s18399_s19 + $0x148] sm:$0xff] }
0x1100   :  { %v17929_v24 = vpack.c.bf16 %v7929_v7, %v7928_v45  ;;  %8344 = vmatpush.bf16.msra.mxu1 %v14516_v13  ;;  %v14543_v3 = vld [vmem:[%s18399_s19 + $0x188] sm:$0xff]  ;;  %v14533_v45 = vld [vmem:[%s18399_s19 + $0x140] sm:$0xff] }
0x1101   :  { %v14542_v7 = vld [vmem:[%s18399_s19 + $0x180] sm:$0xff] }
0x1102   :  { %7949 = vmatpush.bf16.msrb.mxu3 %v17929_v24  ;;  %7991 = vmatpush.bf16.msrb.mxu2 %v17929_v24  ;;  %v14564_v13 = vld [vmem:[%s18399_s19 + $0x220] sm:$0xff] }
0x1103   :  { %8479 = vmatpush.bf16.msra.mxu0 %v17929_v24 }
0x1104   :  { %8345 = vmatpush.bf16.msra.mxu1 %v14515_v20  ;;  %v14575_v20 = vld [vmem:[%s18399_s19 + $0x270] sm:$0xff] }
0x1105   :  { %13050 = vmatmul.msk.bf16.vlgmr.msrb.gmra.mxu3 %vm7938_vm0, %v14487_v25  ;;  %13057 = vmatmul.msk.bf16.vlgmr.msrb.gmra.mxu2 %vm7938_vm0, %v14496_v35  ;;  %v14558_v35 = vld [vmem:[%s18399_s19 + $0x1f8] sm:$0xff] }
0x1106   :  { %8126 = vmatpush.bf16.msra.mxu3 %v14495_v47  ;;  %8158 = vmatpush.bf16.msra.mxu2 %v17929_v24  ;;  %v14532_v47 = vld [vmem:[%s18402_s18 + $0x28] sm:$0xff] }
0x110a   :  { %8265 = vmatpush.bf16.msrb.mxu2 %v17929_v24  ;;  %8127 = vmatpush.bf16.msra.mxu3 %v14494_v33 }
0x110e   :  { %8128 = vmatpush.bf16.msra.mxu3 %v14493_v52  ;;  %v14557_v52 = vld [vmem:[%s18399_s19 + $0x1f0] sm:$0xff] }
0x1112   :  { %8129 = vmatpush.bf16.msra.mxu3 %v14492_v27  ;;  %v14556_v27 = vld [vmem:[%s18399_s19 + $0x1e8] sm:$0xff] }
0x1115   :  { %13144 = vmatmul.msk.bf16.vlgmr.msra.gmra.mxu2 %vm7938_vm0, %v14505_v41  ;;  %v14541_v41 = vld [vmem:[%s18402_s18 + $0x30] sm:$0xff] }
0x1116   :  { %8130 = vmatpush.bf16.msra.mxu3 %v14491_v16  ;;  %8445 = vmatpush.bf16.msra.mxu2 %v14531_v21  ;;  %v14555_v16 = vld [vmem:[%s18399_s19 + $0x1e0] sm:$0xff]  ;;  %v14554_v21 = vld [vmem:[%s18399_s19 + $0x1d8] sm:$0xff] }
0x111a   :  { %8131 = vmatpush.bf16.msra.mxu3 %v14490_v59  ;;  %8446 = vmatpush.bf16.msra.mxu2 %v14530_v54  ;;  %v14553_v59 = vld [vmem:[%s18399_s19 + $0x1d0] sm:$0xff] }
0x111e   :  { %8132 = vmatpush.bf16.msra.mxu3 %v14489_v14  ;;  %8447 = vmatpush.bf16.msra.mxu2 %v14529_v29 }
0x1122   :  { %8133 = vmatpush.bf16.msra.mxu3 %v14488_v48  ;;  %8448 = vmatpush.bf16.msra.mxu2 %v14528_v12 }
0x1125   :  { %13199 = vmatmul.msk.bf16.vlgmr.msrb.gmra.mxu2 %vm7938_vm0, %v14514_v53 }
0x1126   :  { %8372 = vmatpush.bf16.msrb.mxu3 %v17929_v24  ;;  %8449 = vmatpush.bf16.msra.mxu2 %v14527_v56 }
0x112a   :  { %8450 = vmatpush.bf16.msra.mxu2 %v14526_v62 }
0x112e   :  { %8451 = vmatpush.bf16.msra.mxu2 %v14525_v11 }
0x1132   :  { %8452 = vmatpush.bf16.msra.mxu2 %v14524_v4 }
0x1136   :  { %8693 = vmatpush.bf16.msrb.mxu2 %v17929_v24 }
0x1188   :  { %v7951_v63 = vpop.f32.mrf.mxu3  ;;  %v7993_v57 = vpop.f32.mrf.mxu2 }
0x1190   :  { %v7953_v42 = vpop.f32.mrf.mxu3  ;;  %v7995_v28 = vpop.f32.mrf.mxu2 }
0x1191   :  { %v7956_v49 = vpack.c.bf16 %v7953_v42, %v7951_v63  ;;  %v7998_v61 = vpack.c.bf16 %v7995_v28, %v7993_v57  ;;  %v14550_v63 = vld [vmem:[%s18402_s18 + $0x38] sm:$0xff]  ;;  %v14574_v28 = vld [vmem:[%s18399_s19 + $0x268] sm:$0xff] }
0x1192   :  { %v14563_v57 = vld [vmem:[%s18399_s19 + $0x218] sm:$0xff] }
0x1193   :  { %8134 = vmatmul.bf16.vlgmr.msra.gmra.mxu3 %v7956_v49  ;;  %8072 = vmatmul.bf16.vlgmr.msrb.gmra.mxu1 %v7998_v61  ;;  %v14561_v49 = vld [vmem:[%s18399_s19 + $0x208] sm:$0xff]  ;;  %v14559_v61 = vld [vmem:[%s18402_s18 + $0x40] sm:$0xff] }
0x1194   :  { %8552 = vmatpush.bf16.msra.mxu3 %v14540_v46  ;;  %8659 = vmatpush.bf16.msrb.mxu1 %v14549_v31  ;;  %v14562_v46 = vld [vmem:[%s18399_s19 + $0x210] sm:$0xff]  ;;  %v14573_v31 = vld [vmem:[%s18399_s19 + $0x260] sm:$0xff] }
0x1198   :  { %8553 = vmatpush.bf16.msra.mxu3 %v14539_v0  ;;  %v8160_v22 = vpop.f32.mrf.mxu2  ;;  %8660 = vmatpush.bf16.msrb.mxu1 %v14548_v19  ;;  %v14572_v19 = vld [vmem:[%s18399_s19 + $0x258] sm:$0xff] }
0x119c   :  { %8554 = vmatpush.bf16.msra.mxu3 %v14538_v32  ;;  %8661 = vmatpush.bf16.msrb.mxu1 %v14547_v40  ;;  %v14560_v40 = vld [vmem:[%s18399_s19 + $0x200] sm:$0xff] }
0x11a0   :  { %8555 = vmatpush.bf16.msra.mxu3 %v14537_v10  ;;  %v8162_v39 = vpop.f32.mrf.mxu2  ;;  %8662 = vmatpush.bf16.msrb.mxu1 %v14546_v38  ;;  %v14571_v10 = vld [vmem:[%s18399_s19 + $0x250] sm:$0xff] }
0x11a1   :  { %v8165_v26 = vpack.c.bf16 %v8162_v39, %v8160_v22  ;;  %v14585_v22 = vld [vmem:[%s18399_s19 + $0x2b8] sm:$0xff]  ;;  %v14584_v38 = vld [vmem:[%s18399_s19 + $0x2b0] sm:$0xff]  ;;  %v14583_v39 = vld [vmem:[%s18399_s19 + $0x2a8] sm:$0xff] }
0x11a3   :  { %8239 = vmatmul.bf16.vlgmr.msrb.gmra.mxu0 %v8165_v26  ;;  %13254 = vmatmul.msk.bf16.vlgmr.msrb.gmra.mxu3 %vm7938_vm0, %v14523_v23  ;;  %v14570_v23 = vld [vmem:[%s18399_s19 + $0x248] sm:$0xff]  ;;  %v14582_v26 = vld [vmem:[%s18399_s19 + $0x2a0] sm:$0xff] }
0x11a4   :  { %8556 = vmatpush.bf16.msra.mxu3 %v14536_v58  ;;  %8586 = vmatpush.bf16.msrb.mxu0 %v17929_v24  ;;  %v14569_v58 = vld [vmem:[%s18399_s19 + $0x240] sm:$0xff] }
0x11a5   :  { %8663 = vmatpush.bf16.msrb.mxu1 %v14545_v6  ;;  %v14568_v6 = vld [vmem:[%s18402_s18 + $0x48] sm:$0xff] }
0x11a8   :  { %8557 = vmatpush.bf16.msra.mxu3 %v14535_v44  ;;  %v8267_v8 = vpop.f32.mrf.mxu2  ;;  %v14581_v44 = vld [vmem:[%s18399_s19 + $0x298] sm:$0xff] }
0x11a9   :  { %8664 = vmatpush.bf16.msrb.mxu1 %v14544_v1  ;;  %v14580_v1 = vld [vmem:[%s18399_s19 + $0x290] sm:$0xff] }
0x11ac   :  { %8558 = vmatpush.bf16.msra.mxu3 %v14534_v18  ;;  %v14578_v18 = vld [vmem:[%s18399_s19 + $0x280] sm:$0xff] }
0x11ad   :  { %8665 = vmatpush.bf16.msrb.mxu1 %v14543_v3 }
0x11b0   :  { %8559 = vmatpush.bf16.msra.mxu3 %v14533_v45  ;;  %v8269_v25 = vpop.f32.mrf.mxu2 }
0x11b1   :  { %v8272_v33 = vpack.c.bf16 %v8269_v25, %v8267_v8  ;;  %8666 = vmatpush.bf16.msrb.mxu1 %v14542_v7  ;;  %v14579_v8 = vld [vmem:[%s18399_s19 + $0x288] sm:$0xff] }
0x11b3   :  { %8346 = vmatmul.bf16.vlgmr.msra.gmra.mxu1 %v8272_v33  ;;  %13309 = vmatmul.msk.bf16.vlgmr.msra.gmra.mxu0 %vm7938_vm0, %v14532_v47 }
0x11b4   :  { %8800 = vmatpush.bf16.msrb.mxu3 %v17929_v24  ;;  %8766 = vmatpush.bf16.msra.mxu0 %v14558_v35 }
0x11b5   :  { %8907 = vmatpush.bf16.msra.mxu1 %v17929_v24 }
0x11b8   :  { %8767 = vmatpush.bf16.msra.mxu0 %v14557_v52 }
0x11bc   :  { %8768 = vmatpush.bf16.msra.mxu0 %v14556_v27 }
0x11c0   :  { %8769 = vmatpush.bf16.msra.mxu0 %v14555_v16 }
0x11c3   :  { %13364 = vmatmul.msk.bf16.vlgmr.msrb.gmra.mxu0 %vm7938_vm0, %v14541_v41 }
0x11c4   :  { %8770 = vmatpush.bf16.msra.mxu0 %v14554_v21 }
0x11c8   :  { %8771 = vmatpush.bf16.msra.mxu0 %v14553_v59 }
0x11cc   :  { %8772 = vmatpush.bf16.msra.mxu0 %v14552_v17 }
0x11d0   :  { %8773 = vmatpush.bf16.msra.mxu0 %v14551_v60  ;;  %v14594_v60 = vld [vmem:[%s18399_s19 + $0x2f8] sm:$0xff] }
0x11d4   :  { %9014 = vmatpush.bf16.msrb.mxu0 %v17929_v24 }
0x1210   :  { %v8073_v54 = vpop.f32.mrf.mxu1 }
0x1216   :  { %v8135_v14 = vpop.f32.mrf.mxu3 }
0x1217   :  { %v8136_v43 = vadd.f32 %v8135_v14, %v8073_v54 }
0x1218   :  { %v8075_v48 = vpop.f32.mrf.mxu1 }
0x121e   :  { %v8137_v29 = vpop.f32.mrf.mxu3 }
0x121f   :  { %v8138_v2 = vadd.f32 %v8137_v29, %v8075_v48  ;;  %v14593_v29 = vld [vmem:[%s18399_s19 + $0x2f0] sm:$0xff] }
0x1220   :  { %v8240_v12 = vpop.f32.mrf.mxu0 }
0x1221   :  { %v8245_v53 = vadd.f32 %v8240_v12, %v8136_v43 }
0x1226   :  { %v8374_v34 = vpop.f32.mrf.mxu3 }
0x1228   :  { %v8242_v56 = vpop.f32.mrf.mxu0 }
0x1229   :  { %v18135_v15 = vadd.f32 %v8242_v56, %v8138_v2  ;;  %v14592_v2 = vld [vmem:[%s18399_s19 + $0x2e8] sm:$0xff] }
0x122e   :  { %v8376_v62 = vpop.f32.mrf.mxu3 }
0x122f   :  { %v8379_v11 = vpack.c.bf16 %v8376_v62, %v8374_v34  ;;  %v14602_v62 = vld [vmem:[%s18399_s19 + $0x330] sm:$0xff] }
0x1230   :  { %v8481_v50 = vpop.f32.mrf.mxu0  ;;  %v8347_v4 = vpop.f32.mrf.mxu1 }
0x1231   :  { %8453 = vmatmul.bf16.vlgmr.msra.gmra.mxu2 %v8379_v11  ;;  %v18140_v36 = vadd.f32 %v8347_v4, %v8245_v53  ;;  %v14603_v53 = vld [vmem:[%s18399_s19 + $0x338] sm:$0xff] }
0x1232   :  { %8873 = vmatpush.bf16.msra.mxu2 %v14567_v30  ;;  %v14577_v30 = vld [vmem:[%s18402_s18 + $0x50] sm:$0xff]  ;;  %v14590_v11 = vld [vmem:[%s18399_s19 + $0x2d8] sm:$0xff] }
0x1236   :  { %8874 = vmatpush.bf16.msra.mxu2 %v14566_v9 }
0x1238   :  { %v8483_v55 = vpop.f32.mrf.mxu0  ;;  %v8349_v7 = vpop.f32.mrf.mxu1 }
0x1239   :  { %v8486_v37 = vpack.c.bf16 %v8483_v55, %v8481_v50  ;;  %v8353_v47 = vadd.f32 %v8349_v7, %v18135_v15  ;;  %v14591_v15 = vld [vmem:[%s18399_s19 + $0x2e0] sm:$0xff]  ;;  %v14601_v50 = vld [vmem:[%s18399_s19 + $0x328] sm:$0xff]  ;;  %v14622_v7 = vld [vmem:[%s18402_s18 + $0x78] sm:$0xff] }
0x123a   :  { %8875 = vmatpush.bf16.msra.mxu2 %v14565_v5  ;;  %v14600_v5 = vld [vmem:[%s18399_s19 + $0x320] sm:$0xff]  ;;  %v14588_v55 = vld [vmem:[%s18399_s19 + $0x2c8] sm:$0xff] }
0x123b   :  { %8560 = vmatmul.bf16.vlgmr.msra.gmra.mxu3 %v8486_v37  ;;  %v14599_v37 = vld [vmem:[%s18399_s19 + $0x318] sm:$0xff] }
0x123c   :  { %8980 = vmatpush.bf16.msra.mxu3 %v14576_v51  ;;  %v14586_v51 = vld [vmem:[%s18402_s18 + $0x58] sm:$0xff] }
0x123e   :  { %8876 = vmatpush.bf16.msra.mxu2 %v14564_v13  ;;  %v14587_v13 = vld [vmem:[%s18399_s19 + $0x2c0] sm:$0xff] }
0x1240   :  { %8981 = vmatpush.bf16.msra.mxu3 %v14575_v20  ;;  %v8588_v42 = vpop.f32.mrf.mxu0  ;;  %v14598_v20 = vld [vmem:[%s18399_s19 + $0x310] sm:$0xff] }
0x1241   :  { %13419 = vmatmul.msk.bf16.vlgmr.msrb.gmra.mxu2 %vm7938_vm0, %v14550_v63  ;;  %v14597_v63 = vld [vmem:[%s18399_s19 + $0x308] sm:$0xff] }
0x1242   :  { %8877 = vmatpush.bf16.msra.mxu2 %v14563_v57  ;;  %v14595_v57 = vld [vmem:[%s18402_s18 + $0x60] sm:$0xff] }
0x1244   :  { %8982 = vmatpush.bf16.msra.mxu3 %v14574_v28 }
0x1246   :  { %8878 = vmatpush.bf16.msra.mxu2 %v14562_v46 }
0x1248   :  { %8983 = vmatpush.bf16.msra.mxu3 %v14573_v31  ;;  %v8590_v0 = vpop.f32.mrf.mxu0 }
0x1249   :  { %v8593_v32 = vpack.c.bf16 %v8590_v0, %v8588_v42  ;;  %v14596_v42 = vld [vmem:[%s18399_s19 + $0x300] sm:$0xff] }
0x124a   :  { %8879 = vmatpush.bf16.msra.mxu2 %v14561_v49 }
0x124b   :  { %8667 = vmatmul.bf16.vlgmr.msrb.gmra.mxu1 %v8593_v32  ;;  %13474 = vmatmul.msk.bf16.vlgmr.msrb.gmra.mxu3 %vm7938_vm0, %v14559_v61 }
0x124c   :  { %8984 = vmatpush.bf16.msra.mxu3 %v14572_v19  ;;  %9087 = vmatpush.bf16.msrb.mxu1 %v14585_v22 }
0x124e   :  { %8880 = vmatpush.bf16.msra.mxu2 %v14560_v40 }
0x1250   :  { %8985 = vmatpush.bf16.msra.mxu3 %v14571_v10  ;;  %9088 = vmatpush.bf16.msrb.mxu1 %v14584_v38 }
0x1252   :  { %9121 = vmatpush.bf16.msrb.mxu2 %v17929_v24 }
0x1254   :  { %8986 = vmatpush.bf16.msra.mxu3 %v14570_v23  ;;  %9089 = vmatpush.bf16.msrb.mxu1 %v14583_v39 }
0x1258   :  { %8987 = vmatpush.bf16.msra.mxu3 %v14569_v58  ;;  %9090 = vmatpush.bf16.msrb.mxu1 %v14582_v26 }
0x125b   :  { %13529 = vmatmul.msk.bf16.vlgmr.msra.gmra.mxu1 %vm7938_vm0, %v14568_v6  ;;  %v14604_v6 = vld [vmem:[%s18402_s18 + $0x68] sm:$0xff] }
0x125c   :  { %9228 = vmatpush.bf16.msrb.mxu3 %v17929_v24  ;;  %9091 = vmatpush.bf16.msrb.mxu1 %v14581_v44 }
0x1260   :  { %9092 = vmatpush.bf16.msrb.mxu1 %v14580_v1 }
0x1264   :  { %9093 = vmatpush.bf16.msrb.mxu1 %v14579_v8 }
0x1268   :  { %9094 = vmatpush.bf16.msrb.mxu1 %v14578_v18 }
0x126c   :  { %9335 = vmatpush.bf16.msra.mxu1 %v17929_v24 }
0x12b4   :  { %v8454_v3 = vpop.f32.mrf.mxu2 }
0x12b5   :  { %v8459_v45 = vadd.f32 %v8454_v3, %v18140_v36  ;;  %v14589_v36 = vld [vmem:[%s18399_s19 + $0x2d0] sm:$0xff] }
0x12bc   :  { %v8456_v25 = vpop.f32.mrf.mxu2 }
0x12bd   :  { %v8460_v35 = vadd.f32 %v8456_v25, %v8353_v47  ;;  %v14611_v47 = vld [vmem:[%s18399_s19 + $0x370] sm:$0xff]  ;;  %v14610_v25 = vld [vmem:[%s18399_s19 + $0x368] sm:$0xff] }
0x12be   :  { %v8561_v33 = vpop.f32.mrf.mxu3 }
0x12bf   :  { %v8566_v52 = vadd.f32 %v8561_v33, %v8459_v45  ;;  %v14613_v45 = vld [vmem:[%s18402_s18 + $0x70] sm:$0xff]  ;;  %v14608_v33 = vld [vmem:[%s18399_s19 + $0x358] sm:$0xff] }
0x12c4   :  { %v8695_v27 = vpop.f32.mrf.mxu2 }
0x12c6   :  { %v8563_v16 = vpop.f32.mrf.mxu3 }
0x12c7   :  { %v8567_v41 = vadd.f32 %v8563_v16, %v8460_v35  ;;  %v14609_v35 = vld [vmem:[%s18399_s19 + $0x360] sm:$0xff]  ;;  %v14620_v16 = vld [vmem:[%s18399_s19 + $0x3b0] sm:$0xff] }
0x12c8   :  { %v8668_v21 = vpop.f32.mrf.mxu1 }
0x12c9   :  { %v8673_v59 = vadd.f32 %v8668_v21, %v8566_v52  ;;  %v14621_v52 = vld [vmem:[%s18399_s19 + $0x3b8] sm:$0xff]  ;;  %v14619_v21 = vld [vmem:[%s18399_s19 + $0x3a8] sm:$0xff] }
0x12cc   :  { %v8697_v17 = vpop.f32.mrf.mxu2 }
0x12cd   :  { %v8700_v54 = vpack.c.bf16 %v8697_v17, %v8695_v27  ;;  %v14607_v27 = vld [vmem:[%s18399_s19 + $0x350] sm:$0xff]  ;;  %v14618_v17 = vld [vmem:[%s18399_s19 + $0x3a0] sm:$0xff] }
0x12ce   :  { %v8802_v14 = vpop.f32.mrf.mxu3 }
0x12cf   :  { %8774 = vmatmul.bf16.vlgmr.msra.gmra.mxu0 %v8700_v54  ;;  %v14630_v54 = vld [vmem:[%s18399_s19 + $0x3f8] sm:$0xff] }
0x12d0   :  { %9194 = vmatpush.bf16.msra.mxu0 %v14594_v60  ;;  %v8670_v43 = vpop.f32.mrf.mxu1  ;;  %v14617_v60 = vld [vmem:[%s18399_s19 + $0x398] sm:$0xff] }
0x12d1   :  { %v8674_v48 = vadd.f32 %v8670_v43, %v8567_v41  ;;  %v14606_v41 = vld [vmem:[%s18399_s19 + $0x348] sm:$0xff]  ;;  %v14629_v43 = vld [vmem:[%s18399_s19 + $0x3f0] sm:$0xff] }
0x12d4   :  { %9195 = vmatpush.bf16.msra.mxu0 %v14593_v29 }
0x12d6   :  { %v8804_v12 = vpop.f32.mrf.mxu3 }
0x12d7   :  { %v8807_v34 = vpack.c.bf16 %v8804_v12, %v8802_v14  ;;  %v14616_v14 = vld [vmem:[%s18399_s19 + $0x390] sm:$0xff]  ;;  %v14628_v12 = vld [vmem:[%s18399_s19 + $0x3e8] sm:$0xff] }
0x12d8   :  { %9196 = vmatpush.bf16.msra.mxu0 %v14592_v2  ;;  %v8909_v56 = vpop.f32.mrf.mxu1  ;;  %v14615_v2 = vld [vmem:[%s18399_s19 + $0x388] sm:$0xff] }
0x12d9   :  { %8881 = vmatmul.bf16.vlgmr.msra.gmra.mxu2 %v8807_v34  ;;  %v14627_v34 = vld [vmem:[%s18399_s19 + $0x3e0] sm:$0xff] }
0x12da   :  { %9301 = vmatpush.bf16.msra.mxu2 %v14603_v53  ;;  %v14614_v53 = vld [vmem:[%s18399_s19 + $0x380] sm:$0xff] }
0x12dc   :  { %9197 = vmatpush.bf16.msra.mxu0 %v14591_v15 }
0x12de   :  { %9302 = vmatpush.bf16.msra.mxu2 %v14602_v62  ;;  %v14626_v62 = vld [vmem:[%s18399_s19 + $0x3d8] sm:$0xff] }
0x12df   :  { %13584 = vmatmul.msk.bf16.vlgmr.msrb.gmra.mxu0 %vm7938_vm0, %v14577_v30  ;;  %v14625_v30 = vld [vmem:[%s18399_s19 + $0x3d0] sm:$0xff] }
0x12e0   :  { %9198 = vmatpush.bf16.msra.mxu0 %v14590_v11  ;;  %v8911_v4 = vpop.f32.mrf.mxu1 }
0x12e1   :  { %v8914_v9 = vpack.c.bf16 %v8911_v4, %v8909_v56 }
0x12e2   :  { %9303 = vmatpush.bf16.msra.mxu2 %v14601_v50 }
0x12e3   :  { %8988 = vmatmul.bf16.vlgmr.msra.gmra.mxu3 %v8914_v9  ;;  %v14623_v9 = vld [vmem:[%s18399_s19 + $0x3c0] sm:$0xff] }
0x12e4   :  { %9199 = vmatpush.bf16.msra.mxu0 %v14589_v36  ;;  %v14624_v36 = vld [vmem:[%s18399_s19 + $0x3c8] sm:$0xff] }
0x12e6   :  { %9304 = vmatpush.bf16.msra.mxu2 %v14600_v5 }
0x12e8   :  { %9200 = vmatpush.bf16.msra.mxu0 %v14588_v55 }
0x12e9   :  { %13639 = vmatmul.msk.bf16.vlgmr.msrb.gmra.mxu2 %vm7938_vm0, %v14586_v51 }
0x12ea   :  { %9305 = vmatpush.bf16.msra.mxu2 %v14599_v37 }
0x12ec   :  { %9201 = vmatpush.bf16.msra.mxu0 %v14587_v13 }
0x12ee   :  { %9306 = vmatpush.bf16.msra.mxu2 %v14598_v20 }
0x12f0   :  { %9442 = vmatpush.bf16.msrb.mxu0 %v17929_v24 }
0x12f2   :  { %9307 = vmatpush.bf16.msra.mxu2 %v14597_v63 }
0x12f3   :  { %13694 = vmatmul.msk.bf16.vlgmr.msrb.gmra.mxu3 %vm7938_vm0, %v14595_v57 }
0x12f6   :  { %9308 = vmatpush.bf16.msra.mxu2 %v14596_v42 }
0x12fa   :  { %9549 = vmatpush.bf16.msrb.mxu2 %v17929_v24  ;;  %v14612_v24 = vld [vmem:[%s18399_s19 + $0x378] sm:$0xff] }
0x12fb   :  { %9408 = vmatpush.bf16.msra.mxu3 %v14612_v24 }
0x12ff   :  { %9409 = vmatpush.bf16.msra.mxu3 %v14611_v47 }
0x1303   :  { %9410 = vmatpush.bf16.msra.mxu3 %v14610_v25 }
0x1307   :  { %9411 = vmatpush.bf16.msra.mxu3 %v14609_v35 }
0x130b   :  { %9412 = vmatpush.bf16.msra.mxu3 %v14608_v33 }
0x130f   :  { %9413 = vmatpush.bf16.msra.mxu3 %v14607_v27 }
0x1313   :  { %9414 = vmatpush.bf16.msra.mxu3 %v14606_v41 }
0x134c   :  { %v8775_v28 = vpop.f32.mrf.mxu0 }
0x134d   :  { %v8780_v46 = vadd.f32 %v8775_v28, %v8673_v59  ;;  %v14605_v59 = vld [vmem:[%s18399_s19 + $0x340] sm:$0xff] }
0x134e   :  { %9415 = vmatpush.bf16.msra.mxu3 %v14605_v59 }
0x1354   :  { %v8777_v31 = vpop.f32.mrf.mxu0 }
0x1355   :  { %v8781_v49 = vadd.f32 %v8777_v31, %v8674_v48 }
0x135c   :  { %v8882_v61 = vpop.f32.mrf.mxu2  ;;  %v9016_v0 = vpop.f32.mrf.mxu0 }
0x135d   :  { %v8887_v19 = vadd.f32 %v8882_v61, %v8780_v46 }
0x1364   :  { %v8884_v22 = vpop.f32.mrf.mxu2  ;;  %v9018_v32 = vpop.f32.mrf.mxu0 }
0x1365   :  { %v8888_v40 = vadd.f32 %v8884_v22, %v8781_v49  ;;  %v9021_v10 = vpack.c.bf16 %v9018_v32, %v9016_v0 }
0x1366   :  { %v8989_v38 = vpop.f32.mrf.mxu3 }
0x1367   :  { %v8994_v23 = vadd.f32 %v8989_v38, %v8887_v19  ;;  %9095 = vmatmul.bf16.vlgmr.msrb.gmra.mxu1 %v9021_v10 }
0x1368   :  { %9515 = vmatpush.bf16.msrb.mxu1 %v14621_v52 }
0x136c   :  { %v9123_v39 = vpop.f32.mrf.mxu2  ;;  %9516 = vmatpush.bf16.msrb.mxu1 %v14620_v16 }
0x136e   :  { %v8991_v58 = vpop.f32.mrf.mxu3 }
0x136f   :  { %v8995_v26 = vadd.f32 %v8991_v58, %v8888_v40  ;;  %v14643_v40 = vld [vmem:[%s18403_s20] ss:$0 sm:$0xff] }
0x1370   :  { %9517 = vmatpush.bf16.msrb.mxu1 %v14619_v21 }
0x1374   :  { %v9125_v44 = vpop.f32.mrf.mxu2  ;;  %9518 = vmatpush.bf16.msrb.mxu1 %v14618_v17 }
0x1375   :  { %v9128_v1 = vpack.c.bf16 %v9125_v44, %v9123_v39 }
0x1376   :  { %v9230_v8 = vpop.f32.mrf.mxu3 }
0x1377   :  { %9202 = vmatmul.bf16.vlgmr.msra.gmra.mxu0 %v9128_v1  ;;  %13749 = vmatmul.msk.bf16.vlgmr.msra.gmra.mxu1 %vm7938_vm0, %v14604_v6 }
0x1378   :  { %9519 = vmatpush.bf16.msrb.mxu1 %v14617_v60  ;;  %9622 = vmatpush.bf16.msra.mxu0 %v14630_v54 }
0x137c   :  { %9520 = vmatpush.bf16.msrb.mxu1 %v14616_v14  ;;  %9623 = vmatpush.bf16.msra.mxu0 %v14629_v43 }
0x137e   :  { %v9232_v18 = vpop.f32.mrf.mxu3 }
0x137f   :  { %v9235_v3 = vpack.c.bf16 %v9232_v18, %v9230_v8 }
0x1380   :  { %9521 = vmatpush.bf16.msrb.mxu1 %v14615_v2  ;;  %9624 = vmatpush.bf16.msra.mxu0 %v14628_v12 }
0x1381   :  { %9309 = vmatmul.bf16.vlgmr.msra.gmra.mxu2 %v9235_v3 }
0x1384   :  { %9522 = vmatpush.bf16.msrb.mxu1 %v14614_v53  ;;  %9625 = vmatpush.bf16.msra.mxu0 %v14627_v34 }
0x1387   :  { %13804 = vmatmul.msk.bf16.vlgmr.msrb.gmra.mxu0 %vm7938_vm0, %v14613_v45 }
0x1388   :  { %9626 = vmatpush.bf16.msra.mxu0 %v14626_v62 }
0x138c   :  { %9627 = vmatpush.bf16.msra.mxu0 %v14625_v30 }
0x1390   :  { %9628 = vmatpush.bf16.msra.mxu0 %v14624_v36 }
0x1391   :  { %13859 = vmatmul.msk.bf16.vlgmr.msrb.gmra.mxu2 %vm7938_vm0, %v14622_v7 }
0x1394   :  { %9629 = vmatpush.bf16.msra.mxu0 %v14623_v9 }
0x13e4   :  { %v9096_v29 = vpop.f32.mrf.mxu1 }
0x13e5   :  { %v9101_v48 = vadd.f32 %v9096_v29, %v8994_v23 }
0x13ec   :  { %v9098_v56 = vpop.f32.mrf.mxu1 }
0x13ed   :  { %v9102_v15 = vadd.f32 %v9098_v56, %v8995_v26 }
0x13f4   :  { %v9203_v11 = vpop.f32.mrf.mxu0  ;;  %v9337_v50 = vpop.f32.mrf.mxu1 }
0x13f5   :  { %v9208_v4 = vadd.f32 %v9203_v11, %v9101_v48 }
0x13fc   :  { %v9205_v5 = vpop.f32.mrf.mxu0  ;;  %v9339_v55 = vpop.f32.mrf.mxu1 }
0x13fd   :  { %v9209_v51 = vadd.f32 %v9205_v5, %v9102_v15  ;;  %v9342_v37 = vpack.c.bf16 %v9339_v55, %v9337_v50 }
0x13ff   :  { %9416 = vmatmul.bf16.vlgmr.msra.gmra.mxu3 %v9342_v37 }
0x1404   :  { %v9310_v13 = vpop.f32.mrf.mxu2  ;;  %v9444_v20 = vpop.f32.mrf.mxu0 }
0x1405   :  { %v9315_v63 = vadd.f32 %v9310_v13, %v9208_v4 }
0x140c   :  { %v9312_v57 = vpop.f32.mrf.mxu2  ;;  %v9446_v42 = vpop.f32.mrf.mxu0 }
0x140d   :  { %v9316_v28 = vadd.f32 %v9312_v57, %v9209_v51  ;;  %v9449_v46 = vpack.c.bf16 %v9446_v42, %v9444_v20 }
0x140f   :  { %9523 = vmatmul.bf16.vlgmr.msrb.gmra.mxu1 %v9449_v46 }
0x1414   :  { %v9551_v31 = vpop.f32.mrf.mxu2 }
0x141c   :  { %v9553_v49 = vpop.f32.mrf.mxu2 }
0x141d   :  { %v9556_v61 = vpack.c.bf16 %v9553_v49, %v9551_v31 }
0x141f   :  { %9630 = vmatmul.bf16.vlgmr.msra.gmra.mxu0 %v9556_v61 }
0x1482   :  { %v9417_v0 = vpop.f32.mrf.mxu3 }
0x1483   :  { %v9422_v22 = vadd.f32 %v9417_v0, %v9315_v63 }
0x148a   :  { %v9419_v23 = vpop.f32.mrf.mxu3 }
0x148b   :  { %v9423_v26 = vadd.f32 %v9419_v23, %v9316_v28 }
0x148c   :  { %v9524_v19 = vpop.f32.mrf.mxu1 }
0x148d   :  { %v9529_v32 = vadd.f32 %v9524_v19, %v9422_v22 }
0x1494   :  { %v9526_v58 = vpop.f32.mrf.mxu1 }
0x1495   :  { %v9530_v6 = vadd.f32 %v9526_v58, %v9423_v26 }
0x149c   :  { %v9631_v10 = vpop.f32.mrf.mxu0 }
0x149d   :  { %v9636_v38 = vadd.f32 %v9631_v10, %v9529_v32 }
0x149f   :  { %v9642_v39 = vadd.f32 %v14643_v40, %v9636_v38 }
0x14a1   :  { %v9644_v24 = vsub.f32 0.0, %v9642_v39 }
0x14a3   :  { %v9646_v44 = vmul.f32 1.442695, %v9644_v24 }
0x14a4   :  { %v9633_v1 = vpop.f32.mrf.mxu0 }
0x14a5   :  { %14650 = vpow2.f32 %v9646_v44  ;;  %v9637_v8 = vadd.f32 %v9633_v1, %v9530_v6 }
0x14a7   :  { %v9643_v18 = vadd.f32 %v14643_v40, %v9637_v8 }
0x14a9   :  { %v9645_v3 = vsub.f32 0.0, %v9643_v18 }
0x14ab   :  { %v14651_v45 = vpop.eup %14650  ;;  %v9648_v7 = vmul.f32 1.442695, %v9645_v3 }
0x14ac   :  { %v9650_v47 = vadd.f32 1.0, %v14651_v45 }
0x14ad   :  { %14652 = vpow2.f32 %v9648_v7 }
0x14ae   :  { %14654 = vrcp.f32 %v9650_v47  ;;  %v9663_v16 = vand.u32 2147483648, %v9650_v47  ;;  %v9661_v21 = vand.u32 2147483647, %v9650_v47  ;;  %vm9657_vm2 = vweird.f32 %v9650_v47 }
0x14b0   :  { %v9664_v60 = vor.u32 1.1754944e-38, %v9663_v16  ;;  %vm9662_vm4 = vcmp.eq.f32.partialorder %v9661_v21, 8.507059e+37 }
0x14b3   :  { %v14653_v25 = vpop.eup %14652 }
0x14b4   :  { %v14655_v35 = vpop.eup %14654  ;;  %v9651_v33 = vadd.f32 1.0, %v14653_v25 }
0x14b5   :  { %v9653_v52 = vmul.f32 %v14655_v35, %v9650_v47  ;;  %vm9658_vm1 = vweird.f32 %v14655_v35 }
0x14b6   :  { %14656 = vrcp.f32 %v9651_v33  ;;  %vm9659_vm3 = vmor %vm9657_vm2, %vm9658_vm1  ;;  %v9678_v48 = vand.u32 2147483648, %v9651_v33  ;;  %v9676_v12 = vand.u32 2147483647, %v9651_v33  ;;  %vm9672_vm6 = vweird.f32 %v9651_v33 }
0x14b7   :  { %v9654_v27 = vsub.f32 1.0, %v9653_v52 }
0x14b8   :  { %v9679_v34 = vor.u32 1.1754944e-38, %v9678_v48  ;;  %vm9677_vm8 = vcmp.eq.f32.partialorder %v9676_v12, 8.507059e+37 }
0x14b9   :  { %v9655_v41 = vmul.f32 %v14655_v35, %v9654_v27 }
0x14bb   :  { %v9656_v59 = vadd.f32 %v14655_v35, %v9655_v41 }
0x14bc   :  { %v14657_v17 = vpop.eup %14656 }
0x14bd   :  { %v9660_v54 = vsel %vm9659_vm3, %v14655_v35, %v9656_v59  ;;  %v9668_v14 = vmul.f32 %v14657_v17, %v9651_v33  ;;  %vm9673_vm5 = vweird.f32 %v14657_v17 }
0x14be   :  { %v9665_v43 = vsel %vm9662_vm4, %v9664_v60, %v9660_v54  ;;  %vm9674_vm7 = vmor %vm9672_vm6, %vm9673_vm5 }
0x14bf   :  { %9682 = vst [vmem:[%s18404_s21] sm:$0xff] %v9665_v43  ;;  %v9669_v29 = vsub.f32 1.0, %v9668_v14 }
0x14c1   :  { %v9670_v2 = vmul.f32 %v14657_v17, %v9669_v29 }
0x14c3   :  { %v9671_v53 = vadd.f32 %v14657_v17, %v9670_v2 }
0x14c5   :  { %v9675_v56 = vsel %vm9674_vm7, %v14657_v17, %v9671_v53 }
0x14c6   :  { %v9680_v15 = vsel %vm9677_vm8, %v9679_v34, %v9675_v56 }
0x14c7   :  { %9683 = vst [vmem:[%s18404_s21 + $0x8] sm:$0xff] %v9680_v15 }

</bundles_post_ra>
